<compile_context>
chip_gen: v6e
topology: v6e:2x2x1
jax: 0.10.0
libtpu: 0.0.40
codegen_flags: <defaults>
</compile_context>

<pallas_src>
import jax
import jax.numpy as jnp
from jax.experimental import pallas as pl
from jax.experimental.pallas import tpu as pltpu

HIDDEN = 128
H2 = 2 * HIDDEN
H3 = 3 * HIDDEN
NUM_LAYERS = 2                      # nn.GRU(num_layers=2)
KAN_NUM = 5                         # pykan default num=5 (grid intervals)
KAN_K = 3                           # pykan default k=3 (spline order)
KAN_KB = KAN_NUM + KAN_K            # 8 spline coefficients per (in, out) edge
N_KNOTS = KAN_NUM + 2 * KAN_K + 1   # 12 knots
N0 = KAN_NUM + 2 * KAN_K            # 11 degree-0 basis functions
LMAX = N0 - 1                       # 10 (max recursion slab length)
LANE = 128
SUBLANE = 8

# TODO(synk): layer_nums_nobi comes from KAN.train_kan and is not provided; assume
# (128, 64, 1): first must equal the GRU hidden size, last must be 1 for .squeeze(1).
LAYER_NUMS_NOBI = (128, 64, 1)


def _round_up(n, m):
    return ((n + m - 1) // m) * m


# ----------------------------------------------------------------------------
# In-kernel KAN layer (padded, reciprocal-based, accumulating MXU spline dots).
# ----------------------------------------------------------------------------
def _kan_apply(x, knots, w):
    """x: (Bp, din_p) f32; knots: (12 + 2*K*LMAX, din_p) f32 packed as
    [grid ; inv1 slabs ; inv2 slabs]; w: ((1+KB)*din_p, dout_p) bf16 packed as
    [scale_base*mask ; KB blocks of spline coefficients]."""
    din_p = x.shape[1]

    def knot(j):                                       # (1, din_p)
        return knots[j:j + 1]

    def inv1(kk, j):                                   # 1 / (g[j+kk] - g[j])
        r = N_KNOTS + (kk - 1) * LMAX + j
        return knots[r:r + 1]

    def inv2(kk, j):                                   # 1 / (g[j+kk+1] - g[j+1])
        r = N_KNOTS + KAN_K * LMAX + (kk - 1) * LMAX + j
        return knots[r:r + 1]

    base = x * jax.nn.sigmoid(x)                       # SiLU base branch
    # degree-0 B-spline basis: one (Bp, din_p) slab per knot interval
    b = [jnp.where((x >= knot(j)) & (x < knot(j + 1)),
                   jnp.float32(1.0), jnp.float32(0.0)) for j in range(N0)]
    # Cox-de Boor recursion with precomputed reciprocal knot spans (no divides)
    for kk in range(1, KAN_K + 1):
        b = [(x - knot(j)) * inv1(kk, j) * b[j]
             + (knot(j + kk + 1) - x) * inv2(kk, j) * b[j + 1]
             for j in range(N0 - kk)]
    # base term + spline term: 1 + KB accumulating (Bp, din_p) x (din_p, dout_p) dots
    y = jnp.dot(base.astype(jnp.bfloat16), w[0:din_p],
                preferred_element_type=jnp.float32)
    for j in range(KAN_KB):
        cj = w[(1 + j) * din_p:(2 + j) * din_p]
        y = y + jnp.dot(b[j].astype(jnp.bfloat16), cj,
                        preferred_element_type=jnp.float32)
    return y


# ----------------------------------------------------------------------------
# Fused kernel: GRU over a chunk of timesteps + (on last step) KAN head + sigmoid.
# ----------------------------------------------------------------------------
def _gru_kan_kernel(x_ref, w0_ref, w1_ref, b_ref, kg_ref, kw_ref, out_ref, h_scr):
    c = pl.program_id(0)
    nc = pl.num_programs(0)
    t_chunk, bp, fp = x_ref.shape

    @pl.when(c == 0)
    def _():
        h_scr[...] = jnp.zeros_like(h_scr)             # h0 = zeros(2, B, 128)

    # ---- unpack packed constant blobs (static, tile-aligned slices) ----
    whh0 = w0_ref[0:HIDDEN, :]                         # (H, 3H)  bf16
    wih0 = w0_ref[HIDDEN:, :]                          # (Fp, 3H) bf16
    w1rz = w1_ref[:, 0:H2]                             # (2H, 2H) bf16  [wih1_rz ; whh1_rz]
    w1ni = w1_ref[0:HIDDEN, H2:]                       # (H, H)   bf16  wih1_n
    w1nh = w1_ref[HIDDEN:, H2:]                        # (H, H)   bf16  whh1_n
    bias = b_ref[...]                                  # (4, 3H)  f32
    bih0, bhh0 = bias[0:1, :], bias[1:2, :]
    b1rz = bias[2:3, 0:H2]                             # bih1_rz + bhh1_rz (precombined on host)
    b1ni = bias[2:3, H2:]
    b1nh = bias[3:4, H2:]

    # ---- hoisted layer-0 input projection for the whole chunk (one MXU pass, M = t*Bp) ----
    x_all = x_ref[...].reshape(t_chunk * bp, fp).astype(jnp.bfloat16)
    gi0_all = jnp.dot(x_all, wih0, preferred_element_type=jnp.float32) + bih0   # (t*Bp, 3H)

    h0 = h_scr[0]
    h1 = h_scr[1]
    # serial recurrence, fully unrolled with static indices (t_chunk is small)
    for i in range(t_chunk):
        gi0 = gi0_all[i * bp:(i + 1) * bp]             # (Bp, 3H) static slice
        gh0 = jnp.dot(h0.astype(jnp.bfloat16), whh0,
                      preferred_element_type=jnp.float32) + bhh0
        r0 = jax.nn.sigmoid(gi0[:, 0:HIDDEN] + gh0[:, 0:HIDDEN])
        z0 = jax.nn.sigmoid(gi0[:, HIDDEN:H2] + gh0[:, HIDDEN:H2])
        n0 = jnp.tanh(gi0[:, H2:] + r0 * gh0[:, H2:])
        h0 = (1.0 - z0) * n0 + z0 * h0

        h0b = h0.astype(jnp.bfloat16)
        h1b = h1.astype(jnp.bfloat16)
        hcat = jnp.concatenate([h0b, h1b], axis=1)     # (Bp, 2H)
        grz = jnp.dot(hcat, w1rz, preferred_element_type=jnp.float32) + b1rz
        r1 = jax.nn.sigmoid(grz[:, 0:HIDDEN])
        z1 = jax.nn.sigmoid(grz[:, HIDDEN:])
        gin = jnp.dot(h0b, w1ni, preferred_element_type=jnp.float32) + b1ni
        ghn = jnp.dot(h1b, w1nh, preferred_element_type=jnp.float32) + b1nh
        n1 = jnp.tanh(gin + r1 * ghn)
        h1 = (1.0 - z1) * n1 + z1 * h1

    @pl.when(c < nc - 1)                               # skip the writeback on the final chunk
    def _():
        h_scr[0] = h0
        h_scr[1] = h1

    @pl.when(c == nc - 1)                              # KAN head + sigmoid, runs once
    def _():
        y = h1
        for l in range(len(LAYER_NUMS_NOBI) - 1):
            y = _kan_apply(y, kg_ref[l], kw_ref[l])
        out_ref[...] = jax.nn.sigmoid(y)               # lane-dense (Bp, 128); real value in col 0


def _const_spec(arr):
    zeros = (0,) * arr.ndim
    return pl.BlockSpec(arr.shape, lambda c: zeros)


def gru_kan_forward(params, x, t_chunk=None):
    """x: (B, T, F) batch-first, like the PyTorch module. Returns (B,) sigmoid outputs."""
    B, T, F = x.shape
    fp = params["fp"]
    bp = _round_up(B, SUBLANE)                         # pad batch to full sublanes
    if t_chunk is None:
        t_chunk = T
    assert T % t_chunk == 0, "T must be divisible by t_chunk"
    n_chunks = T // t_chunk

    x_tm = jnp.zeros((T, bp, fp), jnp.float32)
    x_tm = x_tm.at[:, :B, :F].set(jnp.transpose(x, (1, 0, 2)).astype(jnp.float32))

    consts = (params["w0"], params["w1"], params["b"],
              params["kan_knots"], params["kan_w"])
    out_pad = params["kan_w"].shape[-1]

    out = pl.pallas_call(
        _gru_kan_kernel,
        out_shape=jax.ShapeDtypeStruct((bp, out_pad), jnp.float32),
        grid_spec=pltpu.PrefetchScalarGridSpec(
            num_scalar_prefetch=0,
            grid=(n_chunks,),
            in_specs=[pl.BlockSpec((t_chunk, bp, fp), lambda c: (c, 0, 0))]
                     + [_const_spec(a) for a in consts],
            out_specs=pl.BlockSpec((bp, out_pad), lambda c: (0, 0)),
            scratch_shapes=[pltpu.VMEM((NUM_LAYERS, bp, HIDDEN), jnp.float32)],
        ),
        compiler_params=pltpu.CompilerParams(dimension_semantics=("arbitrary",)),
    )(x_tm, *consts)
    return out[:B, 0]                                  # torch .squeeze(1)


# ----------------------------------------------------------------------------
# Deterministic synthetic parameters + host-side packing.
# ----------------------------------------------------------------------------
def _make_kan_layer(key, din, dout):
    k_coef, k_base = jax.random.split(key)
    h_step = 2.0 / KAN_NUM
    grid_1d = jnp.linspace(-1.0 - KAN_K * h_step, 1.0 + KAN_K * h_step,
                           N_KNOTS, dtype=jnp.float32)
    grid = jnp.broadcast_to(grid_1d, (din, N_KNOTS))                   # (din, 12)
    coef = 0.1 * jax.random.normal(k_coef, (din, dout, KAN_KB), jnp.float32)
    scale_base = (1.0 / jnp.sqrt(jnp.float32(din))
                  + 0.1 * jax.random.normal(k_base, (din, dout), jnp.float32))
    scale_sp = jnp.ones((din, dout), jnp.float32)
    mask = jnp.ones((din, dout), jnp.float32)
    a_mat = mask * scale_base                                          # (din, dout)
    c_eff = coef * (mask * scale_sp)[:, :, None]                       # (din, dout, KB)
    c_ref = jnp.transpose(c_eff, (0, 2, 1))                            # (din, KB, dout)

    # padded kernel-side layout (lane-aligned, knot-transposed, precomputed reciprocals)
    din_p = _round_up(din, LANE)
    dout_p = _round_up(dout, LANE)
    grid_t = jnp.broadcast_to(grid_1d[:, None], (N_KNOTS, din_p))      # (12, din_p)
    inv1 = jnp.zeros((KAN_K * LMAX, din_p), jnp.float32)
    inv2 = jnp.zeros((KAN_K * LMAX, din_p), jnp.float32)
    for kk in range(1, KAN_K + 1):
        L = N0 - kk
        d1 = grid_t[kk:kk + L] - grid_t[:L]
        d2 = grid_t[kk + 1:kk + 1 + L] - grid_t[1:1 + L]
        inv1 = inv1.at[(kk - 1) * LMAX:(kk - 1) * LMAX + L].set(1.0 / d1)
        inv2 = inv2.at[(kk - 1) * LMAX:(kk - 1) * LMAX + L].set(1.0 / d2)
    knots = jnp.concatenate([grid_t, inv1, inv2], axis=0)              # (72, din_p)

    a_p = jnp.zeros((din_p, dout_p), jnp.float32).at[:din, :dout].set(a_mat)
    c_p = jnp.zeros((KAN_KB, din_p, dout_p), jnp.float32).at[:, :din, :dout].set(
        jnp.transpose(c_eff, (2, 0, 1)))
    w = jnp.concatenate([a_p, c_p.reshape(KAN_KB * din_p, dout_p)], axis=0)  # ((1+KB)*din_p, dout_p)
    return (knots, w), (grid, a_mat, c_ref)


def init_params(key, feature_number):
    keys = iter(jax.random.split(key, 16))
    s = 0.1
    wih, whh, bih, bhh = [], [], [], []
    for l in range(NUM_LAYERS):
        in_dim = feature_number if l == 0 else HIDDEN
        wih.append(s * jax.random.normal(next(keys), (H3, in_dim), jnp.float32))
        whh.append(s * jax.random.normal(next(keys), (H3, HIDDEN), jnp.float32))
        bih.append(s * jax.random.normal(next(keys), (H3,), jnp.float32))
        bhh.append(s * jax.random.normal(next(keys), (H3,), jnp.float32))
    wih0_t, wih1_t = wih[0].T, wih[1].T                                # (F, 3H), (H, 3H)
    whh0_t, whh1_t = whh[0].T, whh[1].T                                # (H, 3H)

    fp = _round_up(feature_number, 16)                                 # bf16 sublane tile
    # blob 1: layer-0 weights  [whh0_t ; wih0_t (zero-padded rows)]
    w0 = jnp.zeros((HIDDEN + fp, H3), jnp.float32)
    w0 = w0.at[:HIDDEN].set(whh0_t)
    w0 = w0.at[HIDDEN:HIDDEN + feature_number].set(wih0_t)
    # blob 2: layer-1 weights, r/z merged (K=256), n-gate kept separate
    w1 = jnp.zeros((H2, H3), jnp.float32)
    w1 = w1.at[:HIDDEN, :H2].set(wih1_t[:, :H2])
    w1 = w1.at[HIDDEN:, :H2].set(whh1_t[:, :H2])
    w1 = w1.at[:HIDDEN, H2:].set(wih1_t[:, H2:])
    w1 = w1.at[HIDDEN:, H2:].set(whh1_t[:, H2:])
    # blob 3: all biases
    b_all = jnp.zeros((4, H3), jnp.float32)
    b_all = b_all.at[0].set(bih[0]).at[1].set(bhh[0])
    b_all = b_all.at[2, :H2].set(bih[1][:H2] + bhh[1][:H2])
    b_all = b_all.at[2, H2:].set(bih[1][H2:])
    b_all = b_all.at[3, H2:].set(bhh[1][H2:])

    kan_knots, kan_w, kan_ref = [], [], []
    for din, dout in zip(LAYER_NUMS_NOBI[:-1], LAYER_NUMS_NOBI[1:]):
        (kn, kw), rp = _make_kan_layer(next(keys), din, dout)
        kan_knots.append(kn)
        kan_w.append(kw)
        kan_ref.append(rp)
    assert all(k.shape == kan_knots[0].shape for k in kan_knots)
    assert all(w.shape == kan_w[0].shape for w in kan_w)

    return {
        "fp": fp,
        "w0": w0.astype(jnp.bfloat16),
        "w1": w1.astype(jnp.bfloat16),
        "b": b_all,
        "kan_knots": jnp.stack(kan_knots),                             # (n_layers, 72, din_p) f32
        "kan_w": jnp.stack(kan_w).astype(jnp.bfloat16),                # (n_layers, 9*din_p, dout_p)
        "gru_raw": dict(wih_t=[wih0_t, wih1_t], whh_t=[whh0_t, whh1_t],
                        bih=bih, bhh=bhh),
        "kan_ref": kan_ref,
    }


# ----------------------------------------------------------------------------
# Independent pure-JAX reference (unpadded, division-based spline recursion).
# mm_dtype=jnp.bfloat16 mirrors the kernel's MXU operand precision policy.
# ----------------------------------------------------------------------------
def _kan_layer_ref(x, grid, a_mat, c_mat, mm_dtype):
    base = x * jax.nn.sigmoid(x)
    xg = x[:, :, None]
    g = grid[None, :, :]
    basis = ((xg >= g[:, :, :-1]) & (xg < g[:, :, 1:])).astype(jnp.float32)
    for kk in range(1, KAN_K + 1):
        basis = ((xg - g[:, :, :-(kk + 1)]) / (g[:, :, kk:-1] - g[:, :, :-(kk + 1)]) * basis[:, :, :-1]
                 + (g[:, :, kk + 1:] - xg) / (g[:, :, kk + 1:] - g[:, :, 1:-kk]) * basis[:, :, 1:])
    y = jnp.dot(base.astype(mm_dtype), a_mat.astype(mm_dtype),
                preferred_element_type=jnp.float32)
    y = y + jnp.einsum("bik,iko->bo", basis.astype(mm_dtype), c_mat.astype(mm_dtype),
                       preferred_element_type=jnp.float32)
    return y


def reference_forward(params, x, mm_dtype=jnp.float32):
    B, T, F = x.shape
    x = x.astype(jnp.float32)
    raw = params["gru_raw"]

    def mm(a, w):
        return jnp.dot(a.astype(mm_dtype), w.astype(mm_dtype),
                       preferred_element_type=jnp.float32)

    h = [jnp.zeros((B, HIDDEN), jnp.float32) for _ in range(NUM_LAYERS)]
    for t in range(T):
        inp = x[:, t, :]
        for l in range(NUM_LAYERS):
            gi = mm(inp, raw["wih_t"][l]) + raw["bih"][l]
            gh = mm(h[l], raw["whh_t"][l]) + raw["bhh"][l]
            r = jax.nn.sigmoid(gi[:, :HIDDEN] + gh[:, :HIDDEN])
            z = jax.nn.sigmoid(gi[:, HIDDEN:H2] + gh[:, HIDDEN:H2])
            n = jnp.tanh(gi[:, H2:] + r * gh[:, H2:])
            h[l] = (1.0 - z) * n + z * h[l]
            inp = h[l]
    out = h[-1]
    for grid, a_mat, c_mat in params["kan_ref"]:
        out = _kan_layer_ref(out, grid, a_mat, c_mat, mm_dtype)
    return jax.nn.sigmoid(out)[:, 0]


if __name__ == "__main__":
    B, T, F = 2, 8, 16          # batch=2, seq_len=8, Feature_number=16
    key = jax.random.PRNGKey(0)
    k_x, k_p = jax.random.split(key)
    x = jax.random.normal(k_x, (B, T, F), jnp.float32)
    params = init_params(k_p, F)

    out = jax.block_until_ready(gru_kan_forward(params, x))
    assert out.shape == (B,)

    # kernel vs a reference using the same bf16-operand / f32-accumulate matmul policy
    ref_matched = reference_forward(params, x, mm_dtype=jnp.bfloat16)
    err_matched = float(jnp.max(jnp.abs(out - ref_matched)))
    assert err_matched < 3e-3, f"kernel vs precision-matched reference mismatch: {err_matched}"

    # sanity: bf16 MXU operands stay close to the full-f32 module output
    ref_f32 = reference_forward(params, x, mm_dtype=jnp.float32)
    err_f32 = float(jnp.max(jnp.abs(out - ref_f32)))
    assert err_f32 < 1e-1, f"kernel vs f32 reference drift too large: {err_f32}"

    print("KERNEL_OK")
</pallas_src>

<mosaic_0001>
module attributes {stable_mosaic.version = 11 : i64} {
  func.func @_gru_kan_kernel(%arg0: i32, %arg1: memref<8x8x16xf32, #tpu.memory_space<vmem>>, %arg2: memref<144x384xbf16, #tpu.memory_space<vmem>>, %arg3: memref<256x384xbf16, #tpu.memory_space<vmem>>, %arg4: memref<4x384xf32, #tpu.memory_space<vmem>>, %arg5: memref<2x72x128xf32, #tpu.memory_space<vmem>>, %arg6: memref<2x1152x128xbf16, #tpu.memory_space<vmem>>, %arg7: memref<8x128xf32, #tpu.memory_space<vmem>>, %arg8: memref<2x8x128xf32, #tpu.memory_space<vmem>>) attributes {dimension_semantics = [#tpu.dimension_semantics<arbitrary>], iteration_bounds = array<i64: 1>, scalar_prefetch = 0 : i64, scratch_operands = 1 : i64, tpu.core_type = #tpu.core_type<tc>, window_params = [{transform_indices = @transform_0, window_bounds = array<i64: 8, 8, 16>}, {pipeline_mode = #tpu.pipeline_mode<synchronous>, transform_indices = @transform_1, window_bounds = array<i64: 144, 384>}, {pipeline_mode = #tpu.pipeline_mode<synchronous>, transform_indices = @transform_2, window_bounds = array<i64: 256, 384>}, {pipeline_mode = #tpu.pipeline_mode<synchronous>, transform_indices = @transform_3, window_bounds = array<i64: 4, 384>}, {pipeline_mode = #tpu.pipeline_mode<synchronous>, transform_indices = @transform_4, window_bounds = array<i64: 2, 72, 128>}, {pipeline_mode = #tpu.pipeline_mode<synchronous>, transform_indices = @transform_5, window_bounds = array<i64: 2, 1152, 128>}, {pipeline_mode = #tpu.pipeline_mode<synchronous>, transform_indices = @transform_6, window_bounds = array<i64: 8, 128>}]} {
    %c0_i32 = arith.constant 0 : i32
    %0 = arith.cmpi eq, %arg0, %c0_i32 : i32
    %1 = arith.extui %0 : i1 to i32
    %c0_i32_0 = arith.constant 0 : i32
    %2 = arith.cmpi ne, %1, %c0_i32_0 : i32
    scf.if %2 {
      %cst_102 = arith.constant 0.000000e+00 : f32
      %534 = vector.broadcast %cst_102 : f32 to vector<2x8x128xf32>
      %c0_103 = arith.constant 0 : index
      %c0_104 = arith.constant 0 : index
      %c0_105 = arith.constant 0 : index
      %535 = vector.load %arg8[%c0_103, %c0_104, %c0_105] : memref<2x8x128xf32, #tpu.memory_space<vmem>>, vector<2x8x128xf32>
      tpu.vector_store %arg8[%c0_103, %c0_104, %c0_105], %534 {strides = array<i32>} : memref<2x8x128xf32, #tpu.memory_space<vmem>>, vector<2x8x128xf32>,
    } else {
    }
    %c0 = arith.constant 0 : index
    %c0_1 = arith.constant 0 : index
    %3 = vector.load %arg2[%c0, %c0_1] : memref<144x384xbf16, #tpu.memory_space<vmem>>, vector<128x384xbf16>
    %c128 = arith.constant 128 : index
    %c0_2 = arith.constant 0 : index
    %4 = vector.load %arg2[%c128, %c0_2] : memref<144x384xbf16, #tpu.memory_space<vmem>>, vector<16x384xbf16>
    %c0_3 = arith.constant 0 : index
    %c0_4 = arith.constant 0 : index
    %5 = vector.load %arg3[%c0_3, %c0_4] : memref<256x384xbf16, #tpu.memory_space<vmem>>, vector<256x256xbf16>
    %c0_5 = arith.constant 0 : index
    %c256 = arith.constant 256 : index
    %6 = vector.load %arg3[%c0_5, %c256] : memref<256x384xbf16, #tpu.memory_space<vmem>>, vector<128x128xbf16>
    %c128_6 = arith.constant 128 : index
    %c256_7 = arith.constant 256 : index
    %7 = vector.load %arg3[%c128_6, %c256_7] : memref<256x384xbf16, #tpu.memory_space<vmem>>, vector<128x128xbf16>
    %c0_8 = arith.constant 0 : index
    %c0_9 = arith.constant 0 : index
    %8 = vector.load %arg4[%c0_8, %c0_9] : memref<4x384xf32, #tpu.memory_space<vmem>>, vector<4x384xf32>
    %9 = vector.extract_strided_slice %8 {offsets = [0, 0], sizes = [1, 384], strides = [1, 1]} : vector<4x384xf32> to vector<1x384xf32>
    %10 = vector.extract_strided_slice %8 {offsets = [1, 0], sizes = [1, 384], strides = [1, 1]} : vector<4x384xf32> to vector<1x384xf32>
    %11 = vector.extract_strided_slice %8 {offsets = [2, 0], sizes = [1, 256], strides = [1, 1]} : vector<4x384xf32> to vector<1x256xf32>
    %12 = vector.extract_strided_slice %8 {offsets = [2, 256], sizes = [1, 128], strides = [1, 1]} : vector<4x384xf32> to vector<1x128xf32>
    %13 = vector.extract_strided_slice %8 {offsets = [3, 256], sizes = [1, 128], strides = [1, 1]} : vector<4x384xf32> to vector<1x128xf32>
    %c0_10 = arith.constant 0 : index
    %c0_11 = arith.constant 0 : index
    %c0_12 = arith.constant 0 : index
    %14 = vector.load %arg1[%c0_10, %c0_11, %c0_12] : memref<8x8x16xf32, #tpu.memory_space<vmem>>, vector<8x8x16xf32>
    %15 = vector.shape_cast %14 : vector<8x8x16xf32> to vector<64x16xf32>
    %16 = arith.truncf %15 : vector<64x16xf32> to vector<64x16xbf16>
    %cst = arith.constant dense<0.000000e+00> : vector<64x384xf32>
    %17 = tpu.matmul %16, %4, %cst {dimension_numbers = #tpu.dot_dimension_numbers<[1], [0], [0], [1], [0, 0, 1, 1], [], []>} : vector<64x16xbf16>, vector<16x384xbf16>, vector<64x384xf32> -> vector<64x384xf32>
    %18 = vector.broadcast %9 : vector<1x384xf32> to vector<64x384xf32>
    %19 = arith.addf %17, %18 : vector<64x384xf32>
    %c0_13 = arith.constant 0 : index
    %c0_14 = arith.constant 0 : index
    %c0_15 = arith.constant 0 : index
    %20 = vector.load %arg8[%c0_13, %c0_14, %c0_15] : memref<2x8x128xf32, #tpu.memory_space<vmem>>, vector<1x8x128xf32>
    %21 = vector.shape_cast %20 : vector<1x8x128xf32> to vector<8x128xf32>
    %c1 = arith.constant 1 : index
    %c0_16 = arith.constant 0 : index
    %c0_17 = arith.constant 0 : index
    %22 = vector.load %arg8[%c1, %c0_16, %c0_17] : memref<2x8x128xf32, #tpu.memory_space<vmem>>, vector<1x8x128xf32>
    %23 = vector.shape_cast %22 : vector<1x8x128xf32> to vector<8x128xf32>
    %24 = vector.extract_strided_slice %19 {offsets = [0, 0], sizes = [8, 384], strides = [1, 1]} : vector<64x384xf32> to vector<8x384xf32>
    %25 = arith.truncf %21 : vector<8x128xf32> to vector<8x128xbf16>
    %cst_18 = arith.constant dense<0.000000e+00> : vector<8x384xf32>
    %26 = tpu.matmul %25, %3, %cst_18 {dimension_numbers = #tpu.dot_dimension_numbers<[1], [0], [0], [1], [0, 0, 1, 1], [], []>} : vector<8x128xbf16>, vector<128x384xbf16>, vector<8x384xf32> -> vector<8x384xf32>
    %27 = vector.broadcast %10 : vector<1x384xf32> to vector<8x384xf32>
    %28 = arith.addf %26, %27 : vector<8x384xf32>
    %29 = vector.extract_strided_slice %24 {offsets = [0, 0], sizes = [8, 128], strides = [1, 1]} : vector<8x384xf32> to vector<8x128xf32>
    %30 = vector.extract_strided_slice %28 {offsets = [0, 0], sizes = [8, 128], strides = [1, 1]} : vector<8x384xf32> to vector<8x128xf32>
    %31 = arith.addf %29, %30 : vector<8x128xf32>
    %32 = arith.negf %31 : vector<8x128xf32>
    %33 = math.exp %32 : vector<8x128xf32>
    %cst_19 = arith.constant 1.000000e+00 : f32
    %34 = vector.broadcast %cst_19 : f32 to vector<8x128xf32>
    %35 = arith.addf %34, %33 : vector<8x128xf32>
    %36 = arith.divf %34, %35 : vector<8x128xf32>
    %37 = vector.extract_strided_slice %24 {offsets = [0, 128], sizes = [8, 128], strides = [1, 1]} : vector<8x384xf32> to vector<8x128xf32>
    %38 = vector.extract_strided_slice %28 {offsets = [0, 128], sizes = [8, 128], strides = [1, 1]} : vector<8x384xf32> to vector<8x128xf32>
    %39 = arith.addf %37, %38 : vector<8x128xf32>
    %40 = arith.negf %39 : vector<8x128xf32>
    %41 = math.exp %40 : vector<8x128xf32>
    %cst_20 = arith.constant 1.000000e+00 : f32
    %42 = vector.broadcast %cst_20 : f32 to vector<8x128xf32>
    %43 = arith.addf %42, %41 : vector<8x128xf32>
    %44 = arith.divf %42, %43 : vector<8x128xf32>
    %45 = vector.extract_strided_slice %24 {offsets = [0, 256], sizes = [8, 128], strides = [1, 1]} : vector<8x384xf32> to vector<8x128xf32>
    %46 = vector.extract_strided_slice %28 {offsets = [0, 256], sizes = [8, 128], strides = [1, 1]} : vector<8x384xf32> to vector<8x128xf32>
    %47 = arith.mulf %36, %46 : vector<8x128xf32>
    %48 = arith.addf %45, %47 : vector<8x128xf32>
    %49 = math.tanh %48 : vector<8x128xf32>
    %cst_21 = arith.constant 1.000000e+00 : f32
    %50 = vector.broadcast %cst_21 : f32 to vector<8x128xf32>
    %51 = arith.subf %50, %44 : vector<8x128xf32>
    %52 = arith.mulf %51, %49 : vector<8x128xf32>
    %53 = arith.mulf %44, %21 : vector<8x128xf32>
    %54 = arith.addf %52, %53 : vector<8x128xf32>
    %55 = arith.truncf %54 : vector<8x128xf32> to vector<8x128xbf16>
    %56 = arith.truncf %23 : vector<8x128xf32> to vector<8x128xbf16>
    %57 = tpu.concatenate %55, %56 in 1 : vector<8x128xbf16>, vector<8x128xbf16> -> vector<8x256xbf16>
    %cst_22 = arith.constant dense<0.000000e+00> : vector<8x256xf32>
    %58 = tpu.matmul %57, %5, %cst_22 {dimension_numbers = #tpu.dot_dimension_numbers<[1], [0], [0], [1], [0, 0, 1, 1], [], []>} : vector<8x256xbf16>, vector<256x256xbf16>, vector<8x256xf32> -> vector<8x256xf32>
    %59 = vector.broadcast %11 : vector<1x256xf32> to vector<8x256xf32>
    %60 = arith.addf %58, %59 : vector<8x256xf32>
    %61 = vector.extract_strided_slice %60 {offsets = [0, 0], sizes = [8, 128], strides = [1, 1]} : vector<8x256xf32> to vector<8x128xf32>
    %62 = arith.negf %61 : vector<8x128xf32>
    %63 = math.exp %62 : vector<8x128xf32>
    %cst_23 = arith.constant 1.000000e+00 : f32
    %64 = vector.broadcast %cst_23 : f32 to vector<8x128xf32>
    %65 = arith.addf %64, %63 : vector<8x128xf32>
    %66 = arith.divf %64, %65 : vector<8x128xf32>
    %67 = vector.extract_strided_slice %60 {offsets = [0, 128], sizes = [8, 128], strides = [1, 1]} : vector<8x256xf32> to vector<8x128xf32>
    %68 = arith.negf %67 : vector<8x128xf32>
    %69 = math.exp %68 : vector<8x128xf32>
    %cst_24 = arith.constant 1.000000e+00 : f32
    %70 = vector.broadcast %cst_24 : f32 to vector<8x128xf32>
    %71 = arith.addf %70, %69 : vector<8x128xf32>
    %72 = arith.divf %70, %71 : vector<8x128xf32>
    %cst_25 = arith.constant dense<0.000000e+00> : vector<8x128xf32>
    %73 = tpu.matmul %55, %6, %cst_25 {dimension_numbers = #tpu.dot_dimension_numbers<[1], [0], [0], [1], [0, 0, 1, 1], [], []>} : vector<8x128xbf16>, vector<128x128xbf16>, vector<8x128xf32> -> vector<8x128xf32>
    %74 = vector.broadcast %12 : vector<1x128xf32> to vector<8x128xf32>
    %75 = arith.addf %73, %74 : vector<8x128xf32>
    %cst_26 = arith.constant dense<0.000000e+00> : vector<8x128xf32>
    %76 = tpu.matmul %56, %7, %cst_26 {dimension_numbers = #tpu.dot_dimension_numbers<[1], [0], [0], [1], [0, 0, 1, 1], [], []>} : vector<8x128xbf16>, vector<128x128xbf16>, vector<8x128xf32> -> vector<8x128xf32>
    %77 = vector.broadcast %13 : vector<1x128xf32> to vector<8x128xf32>
    %78 = arith.addf %76, %77 : vector<8x128xf32>
    %79 = arith.mulf %66, %78 : vector<8x128xf32>
    %80 = arith.addf %75, %79 : vector<8x128xf32>
    %81 = math.tanh %80 : vector<8x128xf32>
    %cst_27 = arith.constant 1.000000e+00 : f32
    %82 = vector.broadcast %cst_27 : f32 to vector<8x128xf32>
    %83 = arith.subf %82, %72 : vector<8x128xf32>
    %84 = arith.mulf %83, %81 : vector<8x128xf32>
    %85 = arith.mulf %72, %23 : vector<8x128xf32>
    %86 = arith.addf %84, %85 : vector<8x128xf32>
    %87 = vector.extract_strided_slice %19 {offsets = [8, 0], sizes = [8, 384], strides = [1, 1]} : vector<64x384xf32> to vector<8x384xf32>
    %88 = arith.truncf %54 : vector<8x128xf32> to vector<8x128xbf16>
    %cst_28 = arith.constant dense<0.000000e+00> : vector<8x384xf32>
    %89 = tpu.matmul %88, %3, %cst_28 {dimension_numbers = #tpu.dot_dimension_numbers<[1], [0], [0], [1], [0, 0, 1, 1], [], []>} : vector<8x128xbf16>, vector<128x384xbf16>, vector<8x384xf32> -> vector<8x384xf32>
    %90 = vector.broadcast %10 : vector<1x384xf32> to vector<8x384xf32>
    %91 = arith.addf %89, %90 : vector<8x384xf32>
    %92 = vector.extract_strided_slice %87 {offsets = [0, 0], sizes = [8, 128], strides = [1, 1]} : vector<8x384xf32> to vector<8x128xf32>
    %93 = vector.extract_strided_slice %91 {offsets = [0, 0], sizes = [8, 128], strides = [1, 1]} : vector<8x384xf32> to vector<8x128xf32>
    %94 = arith.addf %92, %93 : vector<8x128xf32>
    %95 = arith.negf %94 : vector<8x128xf32>
    %96 = math.exp %95 : vector<8x128xf32>
    %cst_29 = arith.constant 1.000000e+00 : f32
    %97 = vector.broadcast %cst_29 : f32 to vector<8x128xf32>
    %98 = arith.addf %97, %96 : vector<8x128xf32>
    %99 = arith.divf %97, %98 : vector<8x128xf32>
    %100 = vector.extract_strided_slice %87 {offsets = [0, 128], sizes = [8, 128], strides = [1, 1]} : vector<8x384xf32> to vector<8x128xf32>
    %101 = vector.extract_strided_slice %91 {offsets = [0, 128], sizes = [8, 128], strides = [1, 1]} : vector<8x384xf32> to vector<8x128xf32>
    %102 = arith.addf %100, %101 : vector<8x128xf32>
    %103 = arith.negf %102 : vector<8x128xf32>
    %104 = math.exp %103 : vector<8x128xf32>
    %cst_30 = arith.constant 1.000000e+00 : f32
    %105 = vector.broadcast %cst_30 : f32 to vector<8x128xf32>
    %106 = arith.addf %105, %104 : vector<8x128xf32>
    %107 = arith.divf %105, %106 : vector<8x128xf32>
    %108 = vector.extract_strided_slice %87 {offsets = [0, 256], sizes = [8, 128], strides = [1, 1]} : vector<8x384xf32> to vector<8x128xf32>
    %109 = vector.extract_strided_slice %91 {offsets = [0, 256], sizes = [8, 128], strides = [1, 1]} : vector<8x384xf32> to vector<8x128xf32>
    %110 = arith.mulf %99, %109 : vector<8x128xf32>
    %111 = arith.addf %108, %110 : vector<8x128xf32>
    %112 = math.tanh %111 : vector<8x128xf32>
    %cst_31 = arith.constant 1.000000e+00 : f32
    %113 = vector.broadcast %cst_31 : f32 to vector<8x128xf32>
    %114 = arith.subf %113, %107 : vector<8x128xf32>
    %115 = arith.mulf %114, %112 : vector<8x128xf32>
    %116 = arith.mulf %107, %54 : vector<8x128xf32>
    %117 = arith.addf %115, %116 : vector<8x128xf32>
    %118 = arith.truncf %117 : vector<8x128xf32> to vector<8x128xbf16>
    %119 = arith.truncf %86 : vector<8x128xf32> to vector<8x128xbf16>
    %120 = tpu.concatenate %118, %119 in 1 : vector<8x128xbf16>, vector<8x128xbf16> -> vector<8x256xbf16>
    %cst_32 = arith.constant dense<0.000000e+00> : vector<8x256xf32>
    %121 = tpu.matmul %120, %5, %cst_32 {dimension_numbers = #tpu.dot_dimension_numbers<[1], [0], [0], [1], [0, 0, 1, 1], [], []>} : vector<8x256xbf16>, vector<256x256xbf16>, vector<8x256xf32> -> vector<8x256xf32>
    %122 = vector.broadcast %11 : vector<1x256xf32> to vector<8x256xf32>
    %123 = arith.addf %121, %122 : vector<8x256xf32>
    %124 = vector.extract_strided_slice %123 {offsets = [0, 0], sizes = [8, 128], strides = [1, 1]} : vector<8x256xf32> to vector<8x128xf32>
    %125 = arith.negf %124 : vector<8x128xf32>
    %126 = math.exp %125 : vector<8x128xf32>
    %cst_33 = arith.constant 1.000000e+00 : f32
    %127 = vector.broadcast %cst_33 : f32 to vector<8x128xf32>
    %128 = arith.addf %127, %126 : vector<8x128xf32>
    %129 = arith.divf %127, %128 : vector<8x128xf32>
    %130 = vector.extract_strided_slice %123 {offsets = [0, 128], sizes = [8, 128], strides = [1, 1]} : vector<8x256xf32> to vector<8x128xf32>
    %131 = arith.negf %130 : vector<8x128xf32>
    %132 = math.exp %131 : vector<8x128xf32>
    %cst_34 = arith.constant 1.000000e+00 : f32
    %133 = vector.broadcast %cst_34 : f32 to vector<8x128xf32>
    %134 = arith.addf %133, %132 : vector<8x128xf32>
    %135 = arith.divf %133, %134 : vector<8x128xf32>
    %cst_35 = arith.constant dense<0.000000e+00> : vector<8x128xf32>
    %136 = tpu.matmul %118, %6, %cst_35 {dimension_numbers = #tpu.dot_dimension_numbers<[1], [0], [0], [1], [0, 0, 1, 1], [], []>} : vector<8x128xbf16>, vector<128x128xbf16>, vector<8x128xf32> -> vector<8x128xf32>
    %137 = vector.broadcast %12 : vector<1x128xf32> to vector<8x128xf32>
    %138 = arith.addf %136, %137 : vector<8x128xf32>
    %cst_36 = arith.constant dense<0.000000e+00> : vector<8x128xf32>
    %139 = tpu.matmul %119, %7, %cst_36 {dimension_numbers = #tpu.dot_dimension_numbers<[1], [0], [0], [1], [0, 0, 1, 1], [], []>} : vector<8x128xbf16>, vector<128x128xbf16>, vector<8x128xf32> -> vector<8x128xf32>
    %140 = vector.broadcast %13 : vector<1x128xf32> to vector<8x128xf32>
    %141 = arith.addf %139, %140 : vector<8x128xf32>
    %142 = arith.mulf %129, %141 : vector<8x128xf32>
    %143 = arith.addf %138, %142 : vector<8x128xf32>
    %144 = math.tanh %143 : vector<8x128xf32>
    %cst_37 = arith.constant 1.000000e+00 : f32
    %145 = vector.broadcast %cst_37 : f32 to vector<8x128xf32>
    %146 = arith.subf %145, %135 : vector<8x128xf32>
    %147 = arith.mulf %146, %144 : vector<8x128xf32>
    %148 = arith.mulf %135, %86 : vector<8x128xf32>
    %149 = arith.addf %147, %148 : vector<8x128xf32>
    %150 = vector.extract_strided_slice %19 {offsets = [16, 0], sizes = [8, 384], strides = [1, 1]} : vector<64x384xf32> to vector<8x384xf32>
    %151 = arith.truncf %117 : vector<8x128xf32> to vector<8x128xbf16>
    %cst_38 = arith.constant dense<0.000000e+00> : vector<8x384xf32>
    %152 = tpu.matmul %151, %3, %cst_38 {dimension_numbers = #tpu.dot_dimension_numbers<[1], [0], [0], [1], [0, 0, 1, 1], [], []>} : vector<8x128xbf16>, vector<128x384xbf16>, vector<8x384xf32> -> vector<8x384xf32>
    %153 = vector.broadcast %10 : vector<1x384xf32> to vector<8x384xf32>
    %154 = arith.addf %152, %153 : vector<8x384xf32>
    %155 = vector.extract_strided_slice %150 {offsets = [0, 0], sizes = [8, 128], strides = [1, 1]} : vector<8x384xf32> to vector<8x128xf32>
    %156 = vector.extract_strided_slice %154 {offsets = [0, 0], sizes = [8, 128], strides = [1, 1]} : vector<8x384xf32> to vector<8x128xf32>
    %157 = arith.addf %155, %156 : vector<8x128xf32>
    %158 = arith.negf %157 : vector<8x128xf32>
    %159 = math.exp %158 : vector<8x128xf32>
    %cst_39 = arith.constant 1.000000e+00 : f32
    %160 = vector.broadcast %cst_39 : f32 to vector<8x128xf32>
    %161 = arith.addf %160, %159 : vector<8x128xf32>
    %162 = arith.divf %160, %161 : vector<8x128xf32>
    %163 = vector.extract_strided_slice %150 {offsets = [0, 128], sizes = [8, 128], strides = [1, 1]} : vector<8x384xf32> to vector<8x128xf32>
    %164 = vector.extract_strided_slice %154 {offsets = [0, 128], sizes = [8, 128], strides = [1, 1]} : vector<8x384xf32> to vector<8x128xf32>
    %165 = arith.addf %163, %164 : vector<8x128xf32>
    %166 = arith.negf %165 : vector<8x128xf32>
    %167 = math.exp %166 : vector<8x128xf32>
    %cst_40 = arith.constant 1.000000e+00 : f32
    %168 = vector.broadcast %cst_40 : f32 to vector<8x128xf32>
    %169 = arith.addf %168, %167 : vector<8x128xf32>
    %170 = arith.divf %168, %169 : vector<8x128xf32>
    %171 = vector.extract_strided_slice %150 {offsets = [0, 256], sizes = [8, 128], strides = [1, 1]} : vector<8x384xf32> to vector<8x128xf32>
    %172 = vector.extract_strided_slice %154 {offsets = [0, 256], sizes = [8, 128], strides = [1, 1]} : vector<8x384xf32> to vector<8x128xf32>
    %173 = arith.mulf %162, %172 : vector<8x128xf32>
    %174 = arith.addf %171, %173 : vector<8x128xf32>
    %175 = math.tanh %174 : vector<8x128xf32>
    %cst_41 = arith.constant 1.000000e+00 : f32
    %176 = vector.broadcast %cst_41 : f32 to vector<8x128xf32>
    %177 = arith.subf %176, %170 : vector<8x128xf32>
    %178 = arith.mulf %177, %175 : vector<8x128xf32>
    %179 = arith.mulf %170, %117 : vector<8x128xf32>
    %180 = arith.addf %178, %179 : vector<8x128xf32>
    %181 = arith.truncf %180 : vector<8x128xf32> to vector<8x128xbf16>
    %182 = arith.truncf %149 : vector<8x128xf32> to vector<8x128xbf16>
    %183 = tpu.concatenate %181, %182 in 1 : vector<8x128xbf16>, vector<8x128xbf16> -> vector<8x256xbf16>
    %cst_42 = arith.constant dense<0.000000e+00> : vector<8x256xf32>
    %184 = tpu.matmul %183, %5, %cst_42 {dimension_numbers = #tpu.dot_dimension_numbers<[1], [0], [0], [1], [0, 0, 1, 1], [], []>} : vector<8x256xbf16>, vector<256x256xbf16>, vector<8x256xf32> -> vector<8x256xf32>
    %185 = vector.broadcast %11 : vector<1x256xf32> to vector<8x256xf32>
    %186 = arith.addf %184, %185 : vector<8x256xf32>
    %187 = vector.extract_strided_slice %186 {offsets = [0, 0], sizes = [8, 128], strides = [1, 1]} : vector<8x256xf32> to vector<8x128xf32>
    %188 = arith.negf %187 : vector<8x128xf32>
    %189 = math.exp %188 : vector<8x128xf32>
    %cst_43 = arith.constant 1.000000e+00 : f32
    %190 = vector.broadcast %cst_43 : f32 to vector<8x128xf32>
    %191 = arith.addf %190, %189 : vector<8x128xf32>
    %192 = arith.divf %190, %191 : vector<8x128xf32>
    %193 = vector.extract_strided_slice %186 {offsets = [0, 128], sizes = [8, 128], strides = [1, 1]} : vector<8x256xf32> to vector<8x128xf32>
    %194 = arith.negf %193 : vector<8x128xf32>
    %195 = math.exp %194 : vector<8x128xf32>
    %cst_44 = arith.constant 1.000000e+00 : f32
    %196 = vector.broadcast %cst_44 : f32 to vector<8x128xf32>
    %197 = arith.addf %196, %195 : vector<8x128xf32>
    %198 = arith.divf %196, %197 : vector<8x128xf32>
    %cst_45 = arith.constant dense<0.000000e+00> : vector<8x128xf32>
    %199 = tpu.matmul %181, %6, %cst_45 {dimension_numbers = #tpu.dot_dimension_numbers<[1], [0], [0], [1], [0, 0, 1, 1], [], []>} : vector<8x128xbf16>, vector<128x128xbf16>, vector<8x128xf32> -> vector<8x128xf32>
    %200 = vector.broadcast %12 : vector<1x128xf32> to vector<8x128xf32>
    %201 = arith.addf %199, %200 : vector<8x128xf32>
    %cst_46 = arith.constant dense<0.000000e+00> : vector<8x128xf32>
    %202 = tpu.matmul %182, %7, %cst_46 {dimension_numbers = #tpu.dot_dimension_numbers<[1], [0], [0], [1], [0, 0, 1, 1], [], []>} : vector<8x128xbf16>, vector<128x128xbf16>, vector<8x128xf32> -> vector<8x128xf32>
    %203 = vector.broadcast %13 : vector<1x128xf32> to vector<8x128xf32>
    %204 = arith.addf %202, %203 : vector<8x128xf32>
    %205 = arith.mulf %192, %204 : vector<8x128xf32>
    %206 = arith.addf %201, %205 : vector<8x128xf32>
    %207 = math.tanh %206 : vector<8x128xf32>
    %cst_47 = arith.constant 1.000000e+00 : f32
    %208 = vector.broadcast %cst_47 : f32 to vector<8x128xf32>
    %209 = arith.subf %208, %198 : vector<8x128xf32>
    %210 = arith.mulf %209, %207 : vector<8x128xf32>
    %211 = arith.mulf %198, %149 : vector<8x128xf32>
    %212 = arith.addf %210, %211 : vector<8x128xf32>
    %213 = vector.extract_strided_slice %19 {offsets = [24, 0], sizes = [8, 384], strides = [1, 1]} : vector<64x384xf32> to vector<8x384xf32>
    %214 = arith.truncf %180 : vector<8x128xf32> to vector<8x128xbf16>
    %cst_48 = arith.constant dense<0.000000e+00> : vector<8x384xf32>
    %215 = tpu.matmul %214, %3, %cst_48 {dimension_numbers = #tpu.dot_dimension_numbers<[1], [0], [0], [1], [0, 0, 1, 1], [], []>} : vector<8x128xbf16>, vector<128x384xbf16>, vector<8x384xf32> -> vector<8x384xf32>
    %216 = vector.broadcast %10 : vector<1x384xf32> to vector<8x384xf32>
    %217 = arith.addf %215, %216 : vector<8x384xf32>
    %218 = vector.extract_strided_slice %213 {offsets = [0, 0], sizes = [8, 128], strides = [1, 1]} : vector<8x384xf32> to vector<8x128xf32>
    %219 = vector.extract_strided_slice %217 {offsets = [0, 0], sizes = [8, 128], strides = [1, 1]} : vector<8x384xf32> to vector<8x128xf32>
    %220 = arith.addf %218, %219 : vector<8x128xf32>
    %221 = arith.negf %220 : vector<8x128xf32>
    %222 = math.exp %221 : vector<8x128xf32>
    %cst_49 = arith.constant 1.000000e+00 : f32
    %223 = vector.broadcast %cst_49 : f32 to vector<8x128xf32>
    %224 = arith.addf %223, %222 : vector<8x128xf32>
    %225 = arith.divf %223, %224 : vector<8x128xf32>
    %226 = vector.extract_strided_slice %213 {offsets = [0, 128], sizes = [8, 128], strides = [1, 1]} : vector<8x384xf32> to vector<8x128xf32>
    %227 = vector.extract_strided_slice %217 {offsets = [0, 128], sizes = [8, 128], strides = [1, 1]} : vector<8x384xf32> to vector<8x128xf32>
    %228 = arith.addf %226, %227 : vector<8x128xf32>
    %229 = arith.negf %228 : vector<8x128xf32>
    %230 = math.exp %229 : vector<8x128xf32>
    %cst_50 = arith.constant 1.000000e+00 : f32
    %231 = vector.broadcast %cst_50 : f32 to vector<8x128xf32>
    %232 = arith.addf %231, %230 : vector<8x128xf32>
    %233 = arith.divf %231, %232 : vector<8x128xf32>
    %234 = vector.extract_strided_slice %213 {offsets = [0, 256], sizes = [8, 128], strides = [1, 1]} : vector<8x384xf32> to vector<8x128xf32>
    %235 = vector.extract_strided_slice %217 {offsets = [0, 256], sizes = [8, 128], strides = [1, 1]} : vector<8x384xf32> to vector<8x128xf32>
    %236 = arith.mulf %225, %235 : vector<8x128xf32>
    %237 = arith.addf %234, %236 : vector<8x128xf32>
    %238 = math.tanh %237 : vector<8x128xf32>
    %cst_51 = arith.constant 1.000000e+00 : f32
    %239 = vector.broadcast %cst_51 : f32 to vector<8x128xf32>
    %240 = arith.subf %239, %233 : vector<8x128xf32>
    %241 = arith.mulf %240, %238 : vector<8x128xf32>
    %242 = arith.mulf %233, %180 : vector<8x128xf32>
    %243 = arith.addf %241, %242 : vector<8x128xf32>
    %244 = arith.truncf %243 : vector<8x128xf32> to vector<8x128xbf16>
    %245 = arith.truncf %212 : vector<8x128xf32> to vector<8x128xbf16>
    %246 = tpu.concatenate %244, %245 in 1 : vector<8x128xbf16>, vector<8x128xbf16> -> vector<8x256xbf16>
    %cst_52 = arith.constant dense<0.000000e+00> : vector<8x256xf32>
    %247 = tpu.matmul %246, %5, %cst_52 {dimension_numbers = #tpu.dot_dimension_numbers<[1], [0], [0], [1], [0, 0, 1, 1], [], []>} : vector<8x256xbf16>, vector<256x256xbf16>, vector<8x256xf32> -> vector<8x256xf32>
    %248 = vector.broadcast %11 : vector<1x256xf32> to vector<8x256xf32>
    %249 = arith.addf %247, %248 : vector<8x256xf32>
    %250 = vector.extract_strided_slice %249 {offsets = [0, 0], sizes = [8, 128], strides = [1, 1]} : vector<8x256xf32> to vector<8x128xf32>
    %251 = arith.negf %250 : vector<8x128xf32>
    %252 = math.exp %251 : vector<8x128xf32>
    %cst_53 = arith.constant 1.000000e+00 : f32
    %253 = vector.broadcast %cst_53 : f32 to vector<8x128xf32>
    %254 = arith.addf %253, %252 : vector<8x128xf32>
    %255 = arith.divf %253, %254 : vector<8x128xf32>
    %256 = vector.extract_strided_slice %249 {offsets = [0, 128], sizes = [8, 128], strides = [1, 1]} : vector<8x256xf32> to vector<8x128xf32>
    %257 = arith.negf %256 : vector<8x128xf32>
    %258 = math.exp %257 : vector<8x128xf32>
    %cst_54 = arith.constant 1.000000e+00 : f32
    %259 = vector.broadcast %cst_54 : f32 to vector<8x128xf32>
    %260 = arith.addf %259, %258 : vector<8x128xf32>
    %261 = arith.divf %259, %260 : vector<8x128xf32>
    %cst_55 = arith.constant dense<0.000000e+00> : vector<8x128xf32>
    %262 = tpu.matmul %244, %6, %cst_55 {dimension_numbers = #tpu.dot_dimension_numbers<[1], [0], [0], [1], [0, 0, 1, 1], [], []>} : vector<8x128xbf16>, vector<128x128xbf16>, vector<8x128xf32> -> vector<8x128xf32>
    %263 = vector.broadcast %12 : vector<1x128xf32> to vector<8x128xf32>
    %264 = arith.addf %262, %263 : vector<8x128xf32>
    %cst_56 = arith.constant dense<0.000000e+00> : vector<8x128xf32>
    %265 = tpu.matmul %245, %7, %cst_56 {dimension_numbers = #tpu.dot_dimension_numbers<[1], [0], [0], [1], [0, 0, 1, 1], [], []>} : vector<8x128xbf16>, vector<128x128xbf16>, vector<8x128xf32> -> vector<8x128xf32>
    %266 = vector.broadcast %13 : vector<1x128xf32> to vector<8x128xf32>
    %267 = arith.addf %265, %266 : vector<8x128xf32>
    %268 = arith.mulf %255, %267 : vector<8x128xf32>
    %269 = arith.addf %264, %268 : vector<8x128xf32>
    %270 = math.tanh %269 : vector<8x128xf32>
    %cst_57 = arith.constant 1.000000e+00 : f32
    %271 = vector.broadcast %cst_57 : f32 to vector<8x128xf32>
    %272 = arith.subf %271, %261 : vector<8x128xf32>
    %273 = arith.mulf %272, %270 : vector<8x128xf32>
    %274 = arith.mulf %261, %212 : vector<8x128xf32>
    %275 = arith.addf %273, %274 : vector<8x128xf32>
    %276 = vector.extract_strided_slice %19 {offsets = [32, 0], sizes = [8, 384], strides = [1, 1]} : vector<64x384xf32> to vector<8x384xf32>
    %277 = arith.truncf %243 : vector<8x128xf32> to vector<8x128xbf16>
    %cst_58 = arith.constant dense<0.000000e+00> : vector<8x384xf32>
    %278 = tpu.matmul %277, %3, %cst_58 {dimension_numbers = #tpu.dot_dimension_numbers<[1], [0], [0], [1], [0, 0, 1, 1], [], []>} : vector<8x128xbf16>, vector<128x384xbf16>, vector<8x384xf32> -> vector<8x384xf32>
    %279 = vector.broadcast %10 : vector<1x384xf32> to vector<8x384xf32>
    %280 = arith.addf %278, %279 : vector<8x384xf32>
    %281 = vector.extract_strided_slice %276 {offsets = [0, 0], sizes = [8, 128], strides = [1, 1]} : vector<8x384xf32> to vector<8x128xf32>
    %282 = vector.extract_strided_slice %280 {offsets = [0, 0], sizes = [8, 128], strides = [1, 1]} : vector<8x384xf32> to vector<8x128xf32>
    %283 = arith.addf %281, %282 : vector<8x128xf32>
    %284 = arith.negf %283 : vector<8x128xf32>
    %285 = math.exp %284 : vector<8x128xf32>
    %cst_59 = arith.constant 1.000000e+00 : f32
    %286 = vector.broadcast %cst_59 : f32 to vector<8x128xf32>
    %287 = arith.addf %286, %285 : vector<8x128xf32>
    %288 = arith.divf %286, %287 : vector<8x128xf32>
    %289 = vector.extract_strided_slice %276 {offsets = [0, 128], sizes = [8, 128], strides = [1, 1]} : vector<8x384xf32> to vector<8x128xf32>
    %290 = vector.extract_strided_slice %280 {offsets = [0, 128], sizes = [8, 128], strides = [1, 1]} : vector<8x384xf32> to vector<8x128xf32>
    %291 = arith.addf %289, %290 : vector<8x128xf32>
    %292 = arith.negf %291 : vector<8x128xf32>
    %293 = math.exp %292 : vector<8x128xf32>
    %cst_60 = arith.constant 1.000000e+00 : f32
    %294 = vector.broadcast %cst_60 : f32 to vector<8x128xf32>
    %295 = arith.addf %294, %293 : vector<8x128xf32>
    %296 = arith.divf %294, %295 : vector<8x128xf32>
    %297 = vector.extract_strided_slice %276 {offsets = [0, 256], sizes = [8, 128], strides = [1, 1]} : vector<8x384xf32> to vector<8x128xf32>
    %298 = vector.extract_strided_slice %280 {offsets = [0, 256], sizes = [8, 128], strides = [1, 1]} : vector<8x384xf32> to vector<8x128xf32>
    %299 = arith.mulf %288, %298 : vector<8x128xf32>
    %300 = arith.addf %297, %299 : vector<8x128xf32>
    %301 = math.tanh %300 : vector<8x128xf32>
    %cst_61 = arith.constant 1.000000e+00 : f32
    %302 = vector.broadcast %cst_61 : f32 to vector<8x128xf32>
    %303 = arith.subf %302, %296 : vector<8x128xf32>
    %304 = arith.mulf %303, %301 : vector<8x128xf32>
    %305 = arith.mulf %296, %243 : vector<8x128xf32>
    %306 = arith.addf %304, %305 : vector<8x128xf32>
    %307 = arith.truncf %306 : vector<8x128xf32> to vector<8x128xbf16>
    %308 = arith.truncf %275 : vector<8x128xf32> to vector<8x128xbf16>
    %309 = tpu.concatenate %307, %308 in 1 : vector<8x128xbf16>, vector<8x128xbf16> -> vector<8x256xbf16>
    %cst_62 = arith.constant dense<0.000000e+00> : vector<8x256xf32>
    %310 = tpu.matmul %309, %5, %cst_62 {dimension_numbers = #tpu.dot_dimension_numbers<[1], [0], [0], [1], [0, 0, 1, 1], [], []>} : vector<8x256xbf16>, vector<256x256xbf16>, vector<8x256xf32> -> vector<8x256xf32>
    %311 = vector.broadcast %11 : vector<1x256xf32> to vector<8x256xf32>
    %312 = arith.addf %310, %311 : vector<8x256xf32>
    %313 = vector.extract_strided_slice %312 {offsets = [0, 0], sizes = [8, 128], strides = [1, 1]} : vector<8x256xf32> to vector<8x128xf32>
    %314 = arith.negf %313 : vector<8x128xf32>
    %315 = math.exp %314 : vector<8x128xf32>
    %cst_63 = arith.constant 1.000000e+00 : f32
    %316 = vector.broadcast %cst_63 : f32 to vector<8x128xf32>
    %317 = arith.addf %316, %315 : vector<8x128xf32>
    %318 = arith.divf %316, %317 : vector<8x128xf32>
    %319 = vector.extract_strided_slice %312 {offsets = [0, 128], sizes = [8, 128], strides = [1, 1]} : vector<8x256xf32> to vector<8x128xf32>
    %320 = arith.negf %319 : vector<8x128xf32>
    %321 = math.exp %320 : vector<8x128xf32>
    %cst_64 = arith.constant 1.000000e+00 : f32
    %322 = vector.broadcast %cst_64 : f32 to vector<8x128xf32>
    %323 = arith.addf %322, %321 : vector<8x128xf32>
    %324 = arith.divf %322, %323 : vector<8x128xf32>
    %cst_65 = arith.constant dense<0.000000e+00> : vector<8x128xf32>
    %325 = tpu.matmul %307, %6, %cst_65 {dimension_numbers = #tpu.dot_dimension_numbers<[1], [0], [0], [1], [0, 0, 1, 1], [], []>} : vector<8x128xbf16>, vector<128x128xbf16>, vector<8x128xf32> -> vector<8x128xf32>
    %326 = vector.broadcast %12 : vector<1x128xf32> to vector<8x128xf32>
    %327 = arith.addf %325, %326 : vector<8x128xf32>
    %cst_66 = arith.constant dense<0.000000e+00> : vector<8x128xf32>
    %328 = tpu.matmul %308, %7, %cst_66 {dimension_numbers = #tpu.dot_dimension_numbers<[1], [0], [0], [1], [0, 0, 1, 1], [], []>} : vector<8x128xbf16>, vector<128x128xbf16>, vector<8x128xf32> -> vector<8x128xf32>
    %329 = vector.broadcast %13 : vector<1x128xf32> to vector<8x128xf32>
    %330 = arith.addf %328, %329 : vector<8x128xf32>
    %331 = arith.mulf %318, %330 : vector<8x128xf32>
    %332 = arith.addf %327, %331 : vector<8x128xf32>
    %333 = math.tanh %332 : vector<8x128xf32>
    %cst_67 = arith.constant 1.000000e+00 : f32
    %334 = vector.broadcast %cst_67 : f32 to vector<8x128xf32>
    %335 = arith.subf %334, %324 : vector<8x128xf32>
    %336 = arith.mulf %335, %333 : vector<8x128xf32>
    %337 = arith.mulf %324, %275 : vector<8x128xf32>
    %338 = arith.addf %336, %337 : vector<8x128xf32>
    %339 = vector.extract_strided_slice %19 {offsets = [40, 0], sizes = [8, 384], strides = [1, 1]} : vector<64x384xf32> to vector<8x384xf32>
    %340 = arith.truncf %306 : vector<8x128xf32> to vector<8x128xbf16>
    %cst_68 = arith.constant dense<0.000000e+00> : vector<8x384xf32>
    %341 = tpu.matmul %340, %3, %cst_68 {dimension_numbers = #tpu.dot_dimension_numbers<[1], [0], [0], [1], [0, 0, 1, 1], [], []>} : vector<8x128xbf16>, vector<128x384xbf16>, vector<8x384xf32> -> vector<8x384xf32>
    %342 = vector.broadcast %10 : vector<1x384xf32> to vector<8x384xf32>
    %343 = arith.addf %341, %342 : vector<8x384xf32>
    %344 = vector.extract_strided_slice %339 {offsets = [0, 0], sizes = [8, 128], strides = [1, 1]} : vector<8x384xf32> to vector<8x128xf32>
    %345 = vector.extract_strided_slice %343 {offsets = [0, 0], sizes = [8, 128], strides = [1, 1]} : vector<8x384xf32> to vector<8x128xf32>
    %346 = arith.addf %344, %345 : vector<8x128xf32>
    %347 = arith.negf %346 : vector<8x128xf32>
    %348 = math.exp %347 : vector<8x128xf32>
    %cst_69 = arith.constant 1.000000e+00 : f32
    %349 = vector.broadcast %cst_69 : f32 to vector<8x128xf32>
    %350 = arith.addf %349, %348 : vector<8x128xf32>
    %351 = arith.divf %349, %350 : vector<8x128xf32>
    %352 = vector.extract_strided_slice %339 {offsets = [0, 128], sizes = [8, 128], strides = [1, 1]} : vector<8x384xf32> to vector<8x128xf32>
    %353 = vector.extract_strided_slice %343 {offsets = [0, 128], sizes = [8, 128], strides = [1, 1]} : vector<8x384xf32> to vector<8x128xf32>
    %354 = arith.addf %352, %353 : vector<8x128xf32>
    %355 = arith.negf %354 : vector<8x128xf32>
    %356 = math.exp %355 : vector<8x128xf32>
    %cst_70 = arith.constant 1.000000e+00 : f32
    %357 = vector.broadcast %cst_70 : f32 to vector<8x128xf32>
    %358 = arith.addf %357, %356 : vector<8x128xf32>
    %359 = arith.divf %357, %358 : vector<8x128xf32>
    %360 = vector.extract_strided_slice %339 {offsets = [0, 256], sizes = [8, 128], strides = [1, 1]} : vector<8x384xf32> to vector<8x128xf32>
    %361 = vector.extract_strided_slice %343 {offsets = [0, 256], sizes = [8, 128], strides = [1, 1]} : vector<8x384xf32> to vector<8x128xf32>
    %362 = arith.mulf %351, %361 : vector<8x128xf32>
    %363 = arith.addf %360, %362 : vector<8x128xf32>
    %364 = math.tanh %363 : vector<8x128xf32>
    %cst_71 = arith.constant 1.000000e+00 : f32
    %365 = vector.broadcast %cst_71 : f32 to vector<8x128xf32>
    %366 = arith.subf %365, %359 : vector<8x128xf32>
    %367 = arith.mulf %366, %364 : vector<8x128xf32>
    %368 = arith.mulf %359, %306 : vector<8x128xf32>
    %369 = arith.addf %367, %368 : vector<8x128xf32>
    %370 = arith.truncf %369 : vector<8x128xf32> to vector<8x128xbf16>
    %371 = arith.truncf %338 : vector<8x128xf32> to vector<8x128xbf16>
    %372 = tpu.concatenate %370, %371 in 1 : vector<8x128xbf16>, vector<8x128xbf16> -> vector<8x256xbf16>
    %cst_72 = arith.constant dense<0.000000e+00> : vector<8x256xf32>
    %373 = tpu.matmul %372, %5, %cst_72 {dimension_numbers = #tpu.dot_dimension_numbers<[1], [0], [0], [1], [0, 0, 1, 1], [], []>} : vector<8x256xbf16>, vector<256x256xbf16>, vector<8x256xf32> -> vector<8x256xf32>
    %374 = vector.broadcast %11 : vector<1x256xf32> to vector<8x256xf32>
    %375 = arith.addf %373, %374 : vector<8x256xf32>
    %376 = vector.extract_strided_slice %375 {offsets = [0, 0], sizes = [8, 128], strides = [1, 1]} : vector<8x256xf32> to vector<8x128xf32>
    %377 = arith.negf %376 : vector<8x128xf32>
    %378 = math.exp %377 : vector<8x128xf32>
    %cst_73 = arith.constant 1.000000e+00 : f32
    %379 = vector.broadcast %cst_73 : f32 to vector<8x128xf32>
    %380 = arith.addf %379, %378 : vector<8x128xf32>
    %381 = arith.divf %379, %380 : vector<8x128xf32>
    %382 = vector.extract_strided_slice %375 {offsets = [0, 128], sizes = [8, 128], strides = [1, 1]} : vector<8x256xf32> to vector<8x128xf32>
    %383 = arith.negf %382 : vector<8x128xf32>
    %384 = math.exp %383 : vector<8x128xf32>
    %cst_74 = arith.constant 1.000000e+00 : f32
    %385 = vector.broadcast %cst_74 : f32 to vector<8x128xf32>
    %386 = arith.addf %385, %384 : vector<8x128xf32>
    %387 = arith.divf %385, %386 : vector<8x128xf32>
    %cst_75 = arith.constant dense<0.000000e+00> : vector<8x128xf32>
    %388 = tpu.matmul %370, %6, %cst_75 {dimension_numbers = #tpu.dot_dimension_numbers<[1], [0], [0], [1], [0, 0, 1, 1], [], []>} : vector<8x128xbf16>, vector<128x128xbf16>, vector<8x128xf32> -> vector<8x128xf32>
    %389 = vector.broadcast %12 : vector<1x128xf32> to vector<8x128xf32>
    %390 = arith.addf %388, %389 : vector<8x128xf32>
    %cst_76 = arith.constant dense<0.000000e+00> : vector<8x128xf32>
    %391 = tpu.matmul %371, %7, %cst_76 {dimension_numbers = #tpu.dot_dimension_numbers<[1], [0], [0], [1], [0, 0, 1, 1], [], []>} : vector<8x128xbf16>, vector<128x128xbf16>, vector<8x128xf32> -> vector<8x128xf32>
    %392 = vector.broadcast %13 : vector<1x128xf32> to vector<8x128xf32>
    %393 = arith.addf %391, %392 : vector<8x128xf32>
    %394 = arith.mulf %381, %393 : vector<8x128xf32>
    %395 = arith.addf %390, %394 : vector<8x128xf32>
    %396 = math.tanh %395 : vector<8x128xf32>
    %cst_77 = arith.constant 1.000000e+00 : f32
    %397 = vector.broadcast %cst_77 : f32 to vector<8x128xf32>
    %398 = arith.subf %397, %387 : vector<8x128xf32>
    %399 = arith.mulf %398, %396 : vector<8x128xf32>
    %400 = arith.mulf %387, %338 : vector<8x128xf32>
    %401 = arith.addf %399, %400 : vector<8x128xf32>
    %402 = vector.extract_strided_slice %19 {offsets = [48, 0], sizes = [8, 384], strides = [1, 1]} : vector<64x384xf32> to vector<8x384xf32>
    %403 = arith.truncf %369 : vector<8x128xf32> to vector<8x128xbf16>
    %cst_78 = arith.constant dense<0.000000e+00> : vector<8x384xf32>
    %404 = tpu.matmul %403, %3, %cst_78 {dimension_numbers = #tpu.dot_dimension_numbers<[1], [0], [0], [1], [0, 0, 1, 1], [], []>} : vector<8x128xbf16>, vector<128x384xbf16>, vector<8x384xf32> -> vector<8x384xf32>
    %405 = vector.broadcast %10 : vector<1x384xf32> to vector<8x384xf32>
    %406 = arith.addf %404, %405 : vector<8x384xf32>
    %407 = vector.extract_strided_slice %402 {offsets = [0, 0], sizes = [8, 128], strides = [1, 1]} : vector<8x384xf32> to vector<8x128xf32>
    %408 = vector.extract_strided_slice %406 {offsets = [0, 0], sizes = [8, 128], strides = [1, 1]} : vector<8x384xf32> to vector<8x128xf32>
    %409 = arith.addf %407, %408 : vector<8x128xf32>
    %410 = arith.negf %409 : vector<8x128xf32>
    %411 = math.exp %410 : vector<8x128xf32>
    %cst_79 = arith.constant 1.000000e+00 : f32
    %412 = vector.broadcast %cst_79 : f32 to vector<8x128xf32>
    %413 = arith.addf %412, %411 : vector<8x128xf32>
    %414 = arith.divf %412, %413 : vector<8x128xf32>
    %415 = vector.extract_strided_slice %402 {offsets = [0, 128], sizes = [8, 128], strides = [1, 1]} : vector<8x384xf32> to vector<8x128xf32>
    %416 = vector.extract_strided_slice %406 {offsets = [0, 128], sizes = [8, 128], strides = [1, 1]} : vector<8x384xf32> to vector<8x128xf32>
    %417 = arith.addf %415, %416 : vector<8x128xf32>
    %418 = arith.negf %417 : vector<8x128xf32>
    %419 = math.exp %418 : vector<8x128xf32>
    %cst_80 = arith.constant 1.000000e+00 : f32
    %420 = vector.broadcast %cst_80 : f32 to vector<8x128xf32>
    %421 = arith.addf %420, %419 : vector<8x128xf32>
    %422 = arith.divf %420, %421 : vector<8x128xf32>
    %423 = vector.extract_strided_slice %402 {offsets = [0, 256], sizes = [8, 128], strides = [1, 1]} : vector<8x384xf32> to vector<8x128xf32>
    %424 = vector.extract_strided_slice %406 {offsets = [0, 256], sizes = [8, 128], strides = [1, 1]} : vector<8x384xf32> to vector<8x128xf32>
    %425 = arith.mulf %414, %424 : vector<8x128xf32>
    %426 = arith.addf %423, %425 : vector<8x128xf32>
    %427 = math.tanh %426 : vector<8x128xf32>
    %cst_81 = arith.constant 1.000000e+00 : f32
    %428 = vector.broadcast %cst_81 : f32 to vector<8x128xf32>
    %429 = arith.subf %428, %422 : vector<8x128xf32>
    %430 = arith.mulf %429, %427 : vector<8x128xf32>
    %431 = arith.mulf %422, %369 : vector<8x128xf32>
    %432 = arith.addf %430, %431 : vector<8x128xf32>
    %433 = arith.truncf %432 : vector<8x128xf32> to vector<8x128xbf16>
    %434 = arith.truncf %401 : vector<8x128xf32> to vector<8x128xbf16>
    %435 = tpu.concatenate %433, %434 in 1 : vector<8x128xbf16>, vector<8x128xbf16> -> vector<8x256xbf16>
    %cst_82 = arith.constant dense<0.000000e+00> : vector<8x256xf32>
    %436 = tpu.matmul %435, %5, %cst_82 {dimension_numbers = #tpu.dot_dimension_numbers<[1], [0], [0], [1], [0, 0, 1, 1], [], []>} : vector<8x256xbf16>, vector<256x256xbf16>, vector<8x256xf32> -> vector<8x256xf32>
    %437 = vector.broadcast %11 : vector<1x256xf32> to vector<8x256xf32>
    %438 = arith.addf %436, %437 : vector<8x256xf32>
    %439 = vector.extract_strided_slice %438 {offsets = [0, 0], sizes = [8, 128], strides = [1, 1]} : vector<8x256xf32> to vector<8x128xf32>
    %440 = arith.negf %439 : vector<8x128xf32>
    %441 = math.exp %440 : vector<8x128xf32>
    %cst_83 = arith.constant 1.000000e+00 : f32
    %442 = vector.broadcast %cst_83 : f32 to vector<8x128xf32>
    %443 = arith.addf %442, %441 : vector<8x128xf32>
    %444 = arith.divf %442, %443 : vector<8x128xf32>
    %445 = vector.extract_strided_slice %438 {offsets = [0, 128], sizes = [8, 128], strides = [1, 1]} : vector<8x256xf32> to vector<8x128xf32>
    %446 = arith.negf %445 : vector<8x128xf32>
    %447 = math.exp %446 : vector<8x128xf32>
    %cst_84 = arith.constant 1.000000e+00 : f32
    %448 = vector.broadcast %cst_84 : f32 to vector<8x128xf32>
    %449 = arith.addf %448, %447 : vector<8x128xf32>
    %450 = arith.divf %448, %449 : vector<8x128xf32>
    %cst_85 = arith.constant dense<0.000000e+00> : vector<8x128xf32>
    %451 = tpu.matmul %433, %6, %cst_85 {dimension_numbers = #tpu.dot_dimension_numbers<[1], [0], [0], [1], [0, 0, 1, 1], [], []>} : vector<8x128xbf16>, vector<128x128xbf16>, vector<8x128xf32> -> vector<8x128xf32>
    %452 = vector.broadcast %12 : vector<1x128xf32> to vector<8x128xf32>
    %453 = arith.addf %451, %452 : vector<8x128xf32>
    %cst_86 = arith.constant dense<0.000000e+00> : vector<8x128xf32>
    %454 = tpu.matmul %434, %7, %cst_86 {dimension_numbers = #tpu.dot_dimension_numbers<[1], [0], [0], [1], [0, 0, 1, 1], [], []>} : vector<8x128xbf16>, vector<128x128xbf16>, vector<8x128xf32> -> vector<8x128xf32>
    %455 = vector.broadcast %13 : vector<1x128xf32> to vector<8x128xf32>
    %456 = arith.addf %454, %455 : vector<8x128xf32>
    %457 = arith.mulf %444, %456 : vector<8x128xf32>
    %458 = arith.addf %453, %457 : vector<8x128xf32>
    %459 = math.tanh %458 : vector<8x128xf32>
    %cst_87 = arith.constant 1.000000e+00 : f32
    %460 = vector.broadcast %cst_87 : f32 to vector<8x128xf32>
    %461 = arith.subf %460, %450 : vector<8x128xf32>
    %462 = arith.mulf %461, %459 : vector<8x128xf32>
    %463 = arith.mulf %450, %401 : vector<8x128xf32>
    %464 = arith.addf %462, %463 : vector<8x128xf32>
    %465 = vector.extract_strided_slice %19 {offsets = [56, 0], sizes = [8, 384], strides = [1, 1]} : vector<64x384xf32> to vector<8x384xf32>
    %466 = arith.truncf %432 : vector<8x128xf32> to vector<8x128xbf16>
    %cst_88 = arith.constant dense<0.000000e+00> : vector<8x384xf32>
    %467 = tpu.matmul %466, %3, %cst_88 {dimension_numbers = #tpu.dot_dimension_numbers<[1], [0], [0], [1], [0, 0, 1, 1], [], []>} : vector<8x128xbf16>, vector<128x384xbf16>, vector<8x384xf32> -> vector<8x384xf32>
    %468 = vector.broadcast %10 : vector<1x384xf32> to vector<8x384xf32>
    %469 = arith.addf %467, %468 : vector<8x384xf32>
    %470 = vector.extract_strided_slice %465 {offsets = [0, 0], sizes = [8, 128], strides = [1, 1]} : vector<8x384xf32> to vector<8x128xf32>
    %471 = vector.extract_strided_slice %469 {offsets = [0, 0], sizes = [8, 128], strides = [1, 1]} : vector<8x384xf32> to vector<8x128xf32>
    %472 = arith.addf %470, %471 : vector<8x128xf32>
    %473 = arith.negf %472 : vector<8x128xf32>
    %474 = math.exp %473 : vector<8x128xf32>
    %cst_89 = arith.constant 1.000000e+00 : f32
    %475 = vector.broadcast %cst_89 : f32 to vector<8x128xf32>
    %476 = arith.addf %475, %474 : vector<8x128xf32>
    %477 = arith.divf %475, %476 : vector<8x128xf32>
    %478 = vector.extract_strided_slice %465 {offsets = [0, 128], sizes = [8, 128], strides = [1, 1]} : vector<8x384xf32> to vector<8x128xf32>
    %479 = vector.extract_strided_slice %469 {offsets = [0, 128], sizes = [8, 128], strides = [1, 1]} : vector<8x384xf32> to vector<8x128xf32>
    %480 = arith.addf %478, %479 : vector<8x128xf32>
    %481 = arith.negf %480 : vector<8x128xf32>
    %482 = math.exp %481 : vector<8x128xf32>
    %cst_90 = arith.constant 1.000000e+00 : f32
    %483 = vector.broadcast %cst_90 : f32 to vector<8x128xf32>
    %484 = arith.addf %483, %482 : vector<8x128xf32>
    %485 = arith.divf %483, %484 : vector<8x128xf32>
    %486 = vector.extract_strided_slice %465 {offsets = [0, 256], sizes = [8, 128], strides = [1, 1]} : vector<8x384xf32> to vector<8x128xf32>
    %487 = vector.extract_strided_slice %469 {offsets = [0, 256], sizes = [8, 128], strides = [1, 1]} : vector<8x384xf32> to vector<8x128xf32>
    %488 = arith.mulf %477, %487 : vector<8x128xf32>
    %489 = arith.addf %486, %488 : vector<8x128xf32>
    %490 = math.tanh %489 : vector<8x128xf32>
    %cst_91 = arith.constant 1.000000e+00 : f32
    %491 = vector.broadcast %cst_91 : f32 to vector<8x128xf32>
    %492 = arith.subf %491, %485 : vector<8x128xf32>
    %493 = arith.mulf %492, %490 : vector<8x128xf32>
    %494 = arith.mulf %485, %432 : vector<8x128xf32>
    %495 = arith.addf %493, %494 : vector<8x128xf32>
    %496 = arith.truncf %495 : vector<8x128xf32> to vector<8x128xbf16>
    %497 = arith.truncf %464 : vector<8x128xf32> to vector<8x128xbf16>
    %498 = tpu.concatenate %496, %497 in 1 : vector<8x128xbf16>, vector<8x128xbf16> -> vector<8x256xbf16>
    %cst_92 = arith.constant dense<0.000000e+00> : vector<8x256xf32>
    %499 = tpu.matmul %498, %5, %cst_92 {dimension_numbers = #tpu.dot_dimension_numbers<[1], [0], [0], [1], [0, 0, 1, 1], [], []>} : vector<8x256xbf16>, vector<256x256xbf16>, vector<8x256xf32> -> vector<8x256xf32>
    %500 = vector.broadcast %11 : vector<1x256xf32> to vector<8x256xf32>
    %501 = arith.addf %499, %500 : vector<8x256xf32>
    %502 = vector.extract_strided_slice %501 {offsets = [0, 0], sizes = [8, 128], strides = [1, 1]} : vector<8x256xf32> to vector<8x128xf32>
    %503 = arith.negf %502 : vector<8x128xf32>
    %504 = math.exp %503 : vector<8x128xf32>
    %cst_93 = arith.constant 1.000000e+00 : f32
    %505 = vector.broadcast %cst_93 : f32 to vector<8x128xf32>
    %506 = arith.addf %505, %504 : vector<8x128xf32>
    %507 = arith.divf %505, %506 : vector<8x128xf32>
    %508 = vector.extract_strided_slice %501 {offsets = [0, 128], sizes = [8, 128], strides = [1, 1]} : vector<8x256xf32> to vector<8x128xf32>
    %509 = arith.negf %508 : vector<8x128xf32>
    %510 = math.exp %509 : vector<8x128xf32>
    %cst_94 = arith.constant 1.000000e+00 : f32
    %511 = vector.broadcast %cst_94 : f32 to vector<8x128xf32>
    %512 = arith.addf %511, %510 : vector<8x128xf32>
    %513 = arith.divf %511, %512 : vector<8x128xf32>
    %cst_95 = arith.constant dense<0.000000e+00> : vector<8x128xf32>
    %514 = tpu.matmul %496, %6, %cst_95 {dimension_numbers = #tpu.dot_dimension_numbers<[1], [0], [0], [1], [0, 0, 1, 1], [], []>} : vector<8x128xbf16>, vector<128x128xbf16>, vector<8x128xf32> -> vector<8x128xf32>
    %515 = vector.broadcast %12 : vector<1x128xf32> to vector<8x128xf32>
    %516 = arith.addf %514, %515 : vector<8x128xf32>
    %cst_96 = arith.constant dense<0.000000e+00> : vector<8x128xf32>
    %517 = tpu.matmul %497, %7, %cst_96 {dimension_numbers = #tpu.dot_dimension_numbers<[1], [0], [0], [1], [0, 0, 1, 1], [], []>} : vector<8x128xbf16>, vector<128x128xbf16>, vector<8x128xf32> -> vector<8x128xf32>
    %518 = vector.broadcast %13 : vector<1x128xf32> to vector<8x128xf32>
    %519 = arith.addf %517, %518 : vector<8x128xf32>
    %520 = arith.mulf %507, %519 : vector<8x128xf32>
    %521 = arith.addf %516, %520 : vector<8x128xf32>
    %522 = math.tanh %521 : vector<8x128xf32>
    %cst_97 = arith.constant 1.000000e+00 : f32
    %523 = vector.broadcast %cst_97 : f32 to vector<8x128xf32>
    %524 = arith.subf %523, %513 : vector<8x128xf32>
    %525 = arith.mulf %524, %522 : vector<8x128xf32>
    %526 = arith.mulf %513, %464 : vector<8x128xf32>
    %527 = arith.addf %525, %526 : vector<8x128xf32>
    %c0_i32_98 = arith.constant 0 : i32
    %528 = arith.cmpi slt, %arg0, %c0_i32_98 : i32
    %529 = arith.extui %528 : i1 to i32
    %c0_i32_99 = arith.constant 0 : i32
    %530 = arith.cmpi ne, %529, %c0_i32_99 : i32
    scf.if %530 {
      %c0_102 = arith.constant 0 : index
      %c0_103 = arith.constant 0 : index
      %c0_104 = arith.constant 0 : index
      %534 = vector.load %arg8[%c0_102, %c0_103, %c0_104] : memref<2x8x128xf32, #tpu.memory_space<vmem>>, vector<1x8x128xf32>
      %535 = vector.shape_cast %534 : vector<1x8x128xf32> to vector<8x128xf32>
      %536 = vector.shape_cast %495 : vector<8x128xf32> to vector<1x8x128xf32>
      tpu.vector_store %arg8[%c0_102, %c0_103, %c0_104], %536 {strides = array<i32>} : memref<2x8x128xf32, #tpu.memory_space<vmem>>, vector<1x8x128xf32>,
      %c1_105 = arith.constant 1 : index
      %c0_106 = arith.constant 0 : index
      %c0_107 = arith.constant 0 : index
      %537 = vector.load %arg8[%c1_105, %c0_106, %c0_107] : memref<2x8x128xf32, #tpu.memory_space<vmem>>, vector<1x8x128xf32>
      %538 = vector.shape_cast %537 : vector<1x8x128xf32> to vector<8x128xf32>
      %539 = vector.shape_cast %527 : vector<8x128xf32> to vector<1x8x128xf32>
      tpu.vector_store %arg8[%c1_105, %c0_106, %c0_107], %539 {strides = array<i32>} : memref<2x8x128xf32, #tpu.memory_space<vmem>>, vector<1x8x128xf32>,
    } else {
    }
    %c0_i32_100 = arith.constant 0 : i32
    %531 = arith.cmpi eq, %arg0, %c0_i32_100 : i32
    %532 = arith.extui %531 : i1 to i32
    %c0_i32_101 = arith.constant 0 : i32
    %533 = arith.cmpi ne, %532, %c0_i32_101 : i32
    scf.if %533 {
      %c0_102 = arith.constant 0 : index
      %c0_103 = arith.constant 0 : index
      %c0_104 = arith.constant 0 : index
      %534 = vector.load %arg5[%c0_102, %c0_103, %c0_104] : memref<2x72x128xf32, #tpu.memory_space<vmem>>, vector<1x72x128xf32>
      %535 = vector.shape_cast %534 : vector<1x72x128xf32> to vector<72x128xf32>
      %c0_105 = arith.constant 0 : index
      %c0_106 = arith.constant 0 : index
      %c0_107 = arith.constant 0 : index
      %536 = vector.load %arg6[%c0_105, %c0_106, %c0_107] : memref<2x1152x128xbf16, #tpu.memory_space<vmem>>, vector<1x1152x128xbf16>
      %537 = vector.shape_cast %536 : vector<1x1152x128xbf16> to vector<1152x128xbf16>
      %538 = arith.negf %527 : vector<8x128xf32>
      %539 = math.exp %538 : vector<8x128xf32>
      %cst_108 = arith.constant 1.000000e+00 : f32
      %540 = vector.broadcast %cst_108 : f32 to vector<8x128xf32>
      %541 = arith.addf %540, %539 : vector<8x128xf32>
      %542 = arith.divf %540, %541 : vector<8x128xf32>
      %543 = arith.mulf %527, %542 : vector<8x128xf32>
      %544 = vector.extract_strided_slice %535 {offsets = [0, 0], sizes = [1, 128], strides = [1, 1]} : vector<72x128xf32> to vector<1x128xf32>
      %545 = vector.broadcast %544 : vector<1x128xf32> to vector<8x128xf32>
      %546 = arith.cmpf oge, %527, %545 : vector<8x128xf32>
      %547 = vector.extract_strided_slice %535 {offsets = [1, 0], sizes = [1, 128], strides = [1, 1]} : vector<72x128xf32> to vector<1x128xf32>
      %548 = vector.broadcast %547 : vector<1x128xf32> to vector<8x128xf32>
      %549 = arith.cmpf olt, %527, %548 : vector<8x128xf32>
      %550 = arith.andi %546, %549 : vector<8x128xi1>
      %cst_109 = arith.constant 1.000000e+00 : f32
      %cst_110 = arith.constant 0.000000e+00 : f32
      %551 = vector.broadcast %cst_109 : f32 to vector<8x128xf32>
      %552 = vector.broadcast %cst_110 : f32 to vector<8x128xf32>
      %553 = arith.select %550, %551, %552 : vector<8x128xi1>, vector<8x128xf32>
      %554 = vector.extract_strided_slice %535 {offsets = [1, 0], sizes = [1, 128], strides = [1, 1]} : vector<72x128xf32> to vector<1x128xf32>
      %555 = vector.broadcast %554 : vector<1x128xf32> to vector<8x128xf32>
      %556 = arith.cmpf oge, %527, %555 : vector<8x128xf32>
      %557 = vector.extract_strided_slice %535 {offsets = [2, 0], sizes = [1, 128], strides = [1, 1]} : vector<72x128xf32> to vector<1x128xf32>
      %558 = vector.broadcast %557 : vector<1x128xf32> to vector<8x128xf32>
      %559 = arith.cmpf olt, %527, %558 : vector<8x128xf32>
      %560 = arith.andi %556, %559 : vector<8x128xi1>
      %cst_111 = arith.constant 1.000000e+00 : f32
      %cst_112 = arith.constant 0.000000e+00 : f32
      %561 = vector.broadcast %cst_111 : f32 to vector<8x128xf32>
      %562 = vector.broadcast %cst_112 : f32 to vector<8x128xf32>
      %563 = arith.select %560, %561, %562 : vector<8x128xi1>, vector<8x128xf32>
      %564 = vector.extract_strided_slice %535 {offsets = [2, 0], sizes = [1, 128], strides = [1, 1]} : vector<72x128xf32> to vector<1x128xf32>
      %565 = vector.broadcast %564 : vector<1x128xf32> to vector<8x128xf32>
      %566 = arith.cmpf oge, %527, %565 : vector<8x128xf32>
      %567 = vector.extract_strided_slice %535 {offsets = [3, 0], sizes = [1, 128], strides = [1, 1]} : vector<72x128xf32> to vector<1x128xf32>
      %568 = vector.broadcast %567 : vector<1x128xf32> to vector<8x128xf32>
      %569 = arith.cmpf olt, %527, %568 : vector<8x128xf32>
      %570 = arith.andi %566, %569 : vector<8x128xi1>
      %cst_113 = arith.constant 1.000000e+00 : f32
      %cst_114 = arith.constant 0.000000e+00 : f32
      %571 = vector.broadcast %cst_113 : f32 to vector<8x128xf32>
      %572 = vector.broadcast %cst_114 : f32 to vector<8x128xf32>
      %573 = arith.select %570, %571, %572 : vector<8x128xi1>, vector<8x128xf32>
      %574 = vector.extract_strided_slice %535 {offsets = [3, 0], sizes = [1, 128], strides = [1, 1]} : vector<72x128xf32> to vector<1x128xf32>
      %575 = vector.broadcast %574 : vector<1x128xf32> to vector<8x128xf32>
      %576 = arith.cmpf oge, %527, %575 : vector<8x128xf32>
      %577 = vector.extract_strided_slice %535 {offsets = [4, 0], sizes = [1, 128], strides = [1, 1]} : vector<72x128xf32> to vector<1x128xf32>
      %578 = vector.broadcast %577 : vector<1x128xf32> to vector<8x128xf32>
      %579 = arith.cmpf olt, %527, %578 : vector<8x128xf32>
      %580 = arith.andi %576, %579 : vector<8x128xi1>
      %cst_115 = arith.constant 1.000000e+00 : f32
      %cst_116 = arith.constant 0.000000e+00 : f32
      %581 = vector.broadcast %cst_115 : f32 to vector<8x128xf32>
      %582 = vector.broadcast %cst_116 : f32 to vector<8x128xf32>
      %583 = arith.select %580, %581, %582 : vector<8x128xi1>, vector<8x128xf32>
      %584 = vector.extract_strided_slice %535 {offsets = [4, 0], sizes = [1, 128], strides = [1, 1]} : vector<72x128xf32> to vector<1x128xf32>
      %585 = vector.broadcast %584 : vector<1x128xf32> to vector<8x128xf32>
      %586 = arith.cmpf oge, %527, %585 : vector<8x128xf32>
      %587 = vector.extract_strided_slice %535 {offsets = [5, 0], sizes = [1, 128], strides = [1, 1]} : vector<72x128xf32> to vector<1x128xf32>
      %588 = vector.broadcast %587 : vector<1x128xf32> to vector<8x128xf32>
      %589 = arith.cmpf olt, %527, %588 : vector<8x128xf32>
      %590 = arith.andi %586, %589 : vector<8x128xi1>
      %cst_117 = arith.constant 1.000000e+00 : f32
      %cst_118 = arith.constant 0.000000e+00 : f32
      %591 = vector.broadcast %cst_117 : f32 to vector<8x128xf32>
      %592 = vector.broadcast %cst_118 : f32 to vector<8x128xf32>
      %593 = arith.select %590, %591, %592 : vector<8x128xi1>, vector<8x128xf32>
      %594 = vector.extract_strided_slice %535 {offsets = [5, 0], sizes = [1, 128], strides = [1, 1]} : vector<72x128xf32> to vector<1x128xf32>
      %595 = vector.broadcast %594 : vector<1x128xf32> to vector<8x128xf32>
      %596 = arith.cmpf oge, %527, %595 : vector<8x128xf32>
      %597 = vector.extract_strided_slice %535 {offsets = [6, 0], sizes = [1, 128], strides = [1, 1]} : vector<72x128xf32> to vector<1x128xf32>
      %598 = vector.broadcast %597 : vector<1x128xf32> to vector<8x128xf32>
      %599 = arith.cmpf olt, %527, %598 : vector<8x128xf32>
      %600 = arith.andi %596, %599 : vector<8x128xi1>
      %cst_119 = arith.constant 1.000000e+00 : f32
      %cst_120 = arith.constant 0.000000e+00 : f32
      %601 = vector.broadcast %cst_119 : f32 to vector<8x128xf32>
      %602 = vector.broadcast %cst_120 : f32 to vector<8x128xf32>
      %603 = arith.select %600, %601, %602 : vector<8x128xi1>, vector<8x128xf32>
      %604 = vector.extract_strided_slice %535 {offsets = [6, 0], sizes = [1, 128], strides = [1, 1]} : vector<72x128xf32> to vector<1x128xf32>
      %605 = vector.broadcast %604 : vector<1x128xf32> to vector<8x128xf32>
      %606 = arith.cmpf oge, %527, %605 : vector<8x128xf32>
      %607 = vector.extract_strided_slice %535 {offsets = [7, 0], sizes = [1, 128], strides = [1, 1]} : vector<72x128xf32> to vector<1x128xf32>
      %608 = vector.broadcast %607 : vector<1x128xf32> to vector<8x128xf32>
      %609 = arith.cmpf olt, %527, %608 : vector<8x128xf32>
      %610 = arith.andi %606, %609 : vector<8x128xi1>
      %cst_121 = arith.constant 1.000000e+00 : f32
      %cst_122 = arith.constant 0.000000e+00 : f32
      %611 = vector.broadcast %cst_121 : f32 to vector<8x128xf32>
      %612 = vector.broadcast %cst_122 : f32 to vector<8x128xf32>
      %613 = arith.select %610, %611, %612 : vector<8x128xi1>, vector<8x128xf32>
      %614 = vector.extract_strided_slice %535 {offsets = [7, 0], sizes = [1, 128], strides = [1, 1]} : vector<72x128xf32> to vector<1x128xf32>
      %615 = vector.broadcast %614 : vector<1x128xf32> to vector<8x128xf32>
      %616 = arith.cmpf oge, %527, %615 : vector<8x128xf32>
      %617 = vector.extract_strided_slice %535 {offsets = [8, 0], sizes = [1, 128], strides = [1, 1]} : vector<72x128xf32> to vector<1x128xf32>
      %618 = vector.broadcast %617 : vector<1x128xf32> to vector<8x128xf32>
      %619 = arith.cmpf olt, %527, %618 : vector<8x128xf32>
      %620 = arith.andi %616, %619 : vector<8x128xi1>
      %cst_123 = arith.constant 1.000000e+00 : f32
      %cst_124 = arith.constant 0.000000e+00 : f32
      %621 = vector.broadcast %cst_123 : f32 to vector<8x128xf32>
      %622 = vector.broadcast %cst_124 : f32 to vector<8x128xf32>
      %623 = arith.select %620, %621, %622 : vector<8x128xi1>, vector<8x128xf32>
      %624 = vector.extract_strided_slice %535 {offsets = [8, 0], sizes = [1, 128], strides = [1, 1]} : vector<72x128xf32> to vector<1x128xf32>
      %625 = vector.broadcast %624 : vector<1x128xf32> to vector<8x128xf32>
      %626 = arith.cmpf oge, %527, %625 : vector<8x128xf32>
      %627 = vector.extract_strided_slice %535 {offsets = [9, 0], sizes = [1, 128], strides = [1, 1]} : vector<72x128xf32> to vector<1x128xf32>
      %628 = vector.broadcast %627 : vector<1x128xf32> to vector<8x128xf32>
      %629 = arith.cmpf olt, %527, %628 : vector<8x128xf32>
      %630 = arith.andi %626, %629 : vector<8x128xi1>
      %cst_125 = arith.constant 1.000000e+00 : f32
      %cst_126 = arith.constant 0.000000e+00 : f32
      %631 = vector.broadcast %cst_125 : f32 to vector<8x128xf32>
      %632 = vector.broadcast %cst_126 : f32 to vector<8x128xf32>
      %633 = arith.select %630, %631, %632 : vector<8x128xi1>, vector<8x128xf32>
      %634 = vector.extract_strided_slice %535 {offsets = [9, 0], sizes = [1, 128], strides = [1, 1]} : vector<72x128xf32> to vector<1x128xf32>
      %635 = vector.broadcast %634 : vector<1x128xf32> to vector<8x128xf32>
      %636 = arith.cmpf oge, %527, %635 : vector<8x128xf32>
      %637 = vector.extract_strided_slice %535 {offsets = [10, 0], sizes = [1, 128], strides = [1, 1]} : vector<72x128xf32> to vector<1x128xf32>
      %638 = vector.broadcast %637 : vector<1x128xf32> to vector<8x128xf32>
      %639 = arith.cmpf olt, %527, %638 : vector<8x128xf32>
      %640 = arith.andi %636, %639 : vector<8x128xi1>
      %cst_127 = arith.constant 1.000000e+00 : f32
      %cst_128 = arith.constant 0.000000e+00 : f32
      %641 = vector.broadcast %cst_127 : f32 to vector<8x128xf32>
      %642 = vector.broadcast %cst_128 : f32 to vector<8x128xf32>
      %643 = arith.select %640, %641, %642 : vector<8x128xi1>, vector<8x128xf32>
      %644 = vector.extract_strided_slice %535 {offsets = [10, 0], sizes = [1, 128], strides = [1, 1]} : vector<72x128xf32> to vector<1x128xf32>
      %645 = vector.broadcast %644 : vector<1x128xf32> to vector<8x128xf32>
      %646 = arith.cmpf oge, %527, %645 : vector<8x128xf32>
      %647 = vector.extract_strided_slice %535 {offsets = [11, 0], sizes = [1, 128], strides = [1, 1]} : vector<72x128xf32> to vector<1x128xf32>
      %648 = vector.broadcast %647 : vector<1x128xf32> to vector<8x128xf32>
      %649 = arith.cmpf olt, %527, %648 : vector<8x128xf32>
      %650 = arith.andi %646, %649 : vector<8x128xi1>
      %cst_129 = arith.constant 1.000000e+00 : f32
      %cst_130 = arith.constant 0.000000e+00 : f32
      %651 = vector.broadcast %cst_129 : f32 to vector<8x128xf32>
      %652 = vector.broadcast %cst_130 : f32 to vector<8x128xf32>
      %653 = arith.select %650, %651, %652 : vector<8x128xi1>, vector<8x128xf32>
      %654 = vector.extract_strided_slice %535 {offsets = [0, 0], sizes = [1, 128], strides = [1, 1]} : vector<72x128xf32> to vector<1x128xf32>
      %655 = vector.broadcast %654 : vector<1x128xf32> to vector<8x128xf32>
      %656 = arith.subf %527, %655 : vector<8x128xf32>
      %657 = vector.extract_strided_slice %535 {offsets = [12, 0], sizes = [1, 128], strides = [1, 1]} : vector<72x128xf32> to vector<1x128xf32>
      %658 = vector.broadcast %657 : vector<1x128xf32> to vector<8x128xf32>
      %659 = arith.mulf %656, %658 : vector<8x128xf32>
      %660 = arith.mulf %659, %553 : vector<8x128xf32>
      %661 = vector.extract_strided_slice %535 {offsets = [2, 0], sizes = [1, 128], strides = [1, 1]} : vector<72x128xf32> to vector<1x128xf32>
      %662 = vector.broadcast %661 : vector<1x128xf32> to vector<8x128xf32>
      %663 = arith.subf %662, %527 : vector<8x128xf32>
      %664 = vector.extract_strided_slice %535 {offsets = [42, 0], sizes = [1, 128], strides = [1, 1]} : vector<72x128xf32> to vector<1x128xf32>
      %665 = vector.broadcast %664 : vector<1x128xf32> to vector<8x128xf32>
      %666 = arith.mulf %663, %665 : vector<8x128xf32>
      %667 = arith.mulf %666, %563 : vector<8x128xf32>
      %668 = arith.addf %660, %667 : vector<8x128xf32>
      %669 = vector.extract_strided_slice %535 {offsets = [1, 0], sizes = [1, 128], strides = [1, 1]} : vector<72x128xf32> to vector<1x128xf32>
      %670 = vector.broadcast %669 : vector<1x128xf32> to vector<8x128xf32>
      %671 = arith.subf %527, %670 : vector<8x128xf32>
      %672 = vector.extract_strided_slice %535 {offsets = [13, 0], sizes = [1, 128], strides = [1, 1]} : vector<72x128xf32> to vector<1x128xf32>
      %673 = vector.broadcast %672 : vector<1x128xf32> to vector<8x128xf32>
      %674 = arith.mulf %671, %673 : vector<8x128xf32>
      %675 = arith.mulf %674, %563 : vector<8x128xf32>
      %676 = vector.extract_strided_slice %535 {offsets = [3, 0], sizes = [1, 128], strides = [1, 1]} : vector<72x128xf32> to vector<1x128xf32>
      %677 = vector.broadcast %676 : vector<1x128xf32> to vector<8x128xf32>
      %678 = arith.subf %677, %527 : vector<8x128xf32>
      %679 = vector.extract_strided_slice %535 {offsets = [43, 0], sizes = [1, 128], strides = [1, 1]} : vector<72x128xf32> to vector<1x128xf32>
      %680 = vector.broadcast %679 : vector<1x128xf32> to vector<8x128xf32>
      %681 = arith.mulf %678, %680 : vector<8x128xf32>
      %682 = arith.mulf %681, %573 : vector<8x128xf32>
      %683 = arith.addf %675, %682 : vector<8x128xf32>
      %684 = vector.extract_strided_slice %535 {offsets = [2, 0], sizes = [1, 128], strides = [1, 1]} : vector<72x128xf32> to vector<1x128xf32>
      %685 = vector.broadcast %684 : vector<1x128xf32> to vector<8x128xf32>
      %686 = arith.subf %527, %685 : vector<8x128xf32>
      %687 = vector.extract_strided_slice %535 {offsets = [14, 0], sizes = [1, 128], strides = [1, 1]} : vector<72x128xf32> to vector<1x128xf32>
      %688 = vector.broadcast %687 : vector<1x128xf32> to vector<8x128xf32>
      %689 = arith.mulf %686, %688 : vector<8x128xf32>
      %690 = arith.mulf %689, %573 : vector<8x128xf32>
      %691 = vector.extract_strided_slice %535 {offsets = [4, 0], sizes = [1, 128], strides = [1, 1]} : vector<72x128xf32> to vector<1x128xf32>
      %692 = vector.broadcast %691 : vector<1x128xf32> to vector<8x128xf32>
      %693 = arith.subf %692, %527 : vector<8x128xf32>
      %694 = vector.extract_strided_slice %535 {offsets = [44, 0], sizes = [1, 128], strides = [1, 1]} : vector<72x128xf32> to vector<1x128xf32>
      %695 = vector.broadcast %694 : vector<1x128xf32> to vector<8x128xf32>
      %696 = arith.mulf %693, %695 : vector<8x128xf32>
      %697 = arith.mulf %696, %583 : vector<8x128xf32>
      %698 = arith.addf %690, %697 : vector<8x128xf32>
      %699 = vector.extract_strided_slice %535 {offsets = [3, 0], sizes = [1, 128], strides = [1, 1]} : vector<72x128xf32> to vector<1x128xf32>
      %700 = vector.broadcast %699 : vector<1x128xf32> to vector<8x128xf32>
      %701 = arith.subf %527, %700 : vector<8x128xf32>
      %702 = vector.extract_strided_slice %535 {offsets = [15, 0], sizes = [1, 128], strides = [1, 1]} : vector<72x128xf32> to vector<1x128xf32>
      %703 = vector.broadcast %702 : vector<1x128xf32> to vector<8x128xf32>
      %704 = arith.mulf %701, %703 : vector<8x128xf32>
      %705 = arith.mulf %704, %583 : vector<8x128xf32>
      %706 = vector.extract_strided_slice %535 {offsets = [5, 0], sizes = [1, 128], strides = [1, 1]} : vector<72x128xf32> to vector<1x128xf32>
      %707 = vector.broadcast %706 : vector<1x128xf32> to vector<8x128xf32>
      %708 = arith.subf %707, %527 : vector<8x128xf32>
      %709 = vector.extract_strided_slice %535 {offsets = [45, 0], sizes = [1, 128], strides = [1, 1]} : vector<72x128xf32> to vector<1x128xf32>
      %710 = vector.broadcast %709 : vector<1x128xf32> to vector<8x128xf32>
      %711 = arith.mulf %708, %710 : vector<8x128xf32>
      %712 = arith.mulf %711, %593 : vector<8x128xf32>
      %713 = arith.addf %705, %712 : vector<8x128xf32>
      %714 = vector.extract_strided_slice %535 {offsets = [4, 0], sizes = [1, 128], strides = [1, 1]} : vector<72x128xf32> to vector<1x128xf32>
      %715 = vector.broadcast %714 : vector<1x128xf32> to vector<8x128xf32>
      %716 = arith.subf %527, %715 : vector<8x128xf32>
      %717 = vector.extract_strided_slice %535 {offsets = [16, 0], sizes = [1, 128], strides = [1, 1]} : vector<72x128xf32> to vector<1x128xf32>
      %718 = vector.broadcast %717 : vector<1x128xf32> to vector<8x128xf32>
      %719 = arith.mulf %716, %718 : vector<8x128xf32>
      %720 = arith.mulf %719, %593 : vector<8x128xf32>
      %721 = vector.extract_strided_slice %535 {offsets = [6, 0], sizes = [1, 128], strides = [1, 1]} : vector<72x128xf32> to vector<1x128xf32>
      %722 = vector.broadcast %721 : vector<1x128xf32> to vector<8x128xf32>
      %723 = arith.subf %722, %527 : vector<8x128xf32>
      %724 = vector.extract_strided_slice %535 {offsets = [46, 0], sizes = [1, 128], strides = [1, 1]} : vector<72x128xf32> to vector<1x128xf32>
      %725 = vector.broadcast %724 : vector<1x128xf32> to vector<8x128xf32>
      %726 = arith.mulf %723, %725 : vector<8x128xf32>
      %727 = arith.mulf %726, %603 : vector<8x128xf32>
      %728 = arith.addf %720, %727 : vector<8x128xf32>
      %729 = vector.extract_strided_slice %535 {offsets = [5, 0], sizes = [1, 128], strides = [1, 1]} : vector<72x128xf32> to vector<1x128xf32>
      %730 = vector.broadcast %729 : vector<1x128xf32> to vector<8x128xf32>
      %731 = arith.subf %527, %730 : vector<8x128xf32>
      %732 = vector.extract_strided_slice %535 {offsets = [17, 0], sizes = [1, 128], strides = [1, 1]} : vector<72x128xf32> to vector<1x128xf32>
      %733 = vector.broadcast %732 : vector<1x128xf32> to vector<8x128xf32>
      %734 = arith.mulf %731, %733 : vector<8x128xf32>
      %735 = arith.mulf %734, %603 : vector<8x128xf32>
      %736 = vector.extract_strided_slice %535 {offsets = [7, 0], sizes = [1, 128], strides = [1, 1]} : vector<72x128xf32> to vector<1x128xf32>
      %737 = vector.broadcast %736 : vector<1x128xf32> to vector<8x128xf32>
      %738 = arith.subf %737, %527 : vector<8x128xf32>
      %739 = vector.extract_strided_slice %535 {offsets = [47, 0], sizes = [1, 128], strides = [1, 1]} : vector<72x128xf32> to vector<1x128xf32>
      %740 = vector.broadcast %739 : vector<1x128xf32> to vector<8x128xf32>
      %741 = arith.mulf %738, %740 : vector<8x128xf32>
      %742 = arith.mulf %741, %613 : vector<8x128xf32>
      %743 = arith.addf %735, %742 : vector<8x128xf32>
      %744 = vector.extract_strided_slice %535 {offsets = [6, 0], sizes = [1, 128], strides = [1, 1]} : vector<72x128xf32> to vector<1x128xf32>
      %745 = vector.broadcast %744 : vector<1x128xf32> to vector<8x128xf32>
      %746 = arith.subf %527, %745 : vector<8x128xf32>
      %747 = vector.extract_strided_slice %535 {offsets = [18, 0], sizes = [1, 128], strides = [1, 1]} : vector<72x128xf32> to vector<1x128xf32>
      %748 = vector.broadcast %747 : vector<1x128xf32> to vector<8x128xf32>
      %749 = arith.mulf %746, %748 : vector<8x128xf32>
      %750 = arith.mulf %749, %613 : vector<8x128xf32>
      %751 = vector.extract_strided_slice %535 {offsets = [8, 0], sizes = [1, 128], strides = [1, 1]} : vector<72x128xf32> to vector<1x128xf32>
      %752 = vector.broadcast %751 : vector<1x128xf32> to vector<8x128xf32>
      %753 = arith.subf %752, %527 : vector<8x128xf32>
      %754 = vector.extract_strided_slice %535 {offsets = [48, 0], sizes = [1, 128], strides = [1, 1]} : vector<72x128xf32> to vector<1x128xf32>
      %755 = vector.broadcast %754 : vector<1x128xf32> to vector<8x128xf32>
      %756 = arith.mulf %753, %755 : vector<8x128xf32>
      %757 = arith.mulf %756, %623 : vector<8x128xf32>
      %758 = arith.addf %750, %757 : vector<8x128xf32>
      %759 = vector.extract_strided_slice %535 {offsets = [7, 0], sizes = [1, 128], strides = [1, 1]} : vector<72x128xf32> to vector<1x128xf32>
      %760 = vector.broadcast %759 : vector<1x128xf32> to vector<8x128xf32>
      %761 = arith.subf %527, %760 : vector<8x128xf32>
      %762 = vector.extract_strided_slice %535 {offsets = [19, 0], sizes = [1, 128], strides = [1, 1]} : vector<72x128xf32> to vector<1x128xf32>
      %763 = vector.broadcast %762 : vector<1x128xf32> to vector<8x128xf32>
      %764 = arith.mulf %761, %763 : vector<8x128xf32>
      %765 = arith.mulf %764, %623 : vector<8x128xf32>
      %766 = vector.extract_strided_slice %535 {offsets = [9, 0], sizes = [1, 128], strides = [1, 1]} : vector<72x128xf32> to vector<1x128xf32>
      %767 = vector.broadcast %766 : vector<1x128xf32> to vector<8x128xf32>
      %768 = arith.subf %767, %527 : vector<8x128xf32>
      %769 = vector.extract_strided_slice %535 {offsets = [49, 0], sizes = [1, 128], strides = [1, 1]} : vector<72x128xf32> to vector<1x128xf32>
      %770 = vector.broadcast %769 : vector<1x128xf32> to vector<8x128xf32>
      %771 = arith.mulf %768, %770 : vector<8x128xf32>
      %772 = arith.mulf %771, %633 : vector<8x128xf32>
      %773 = arith.addf %765, %772 : vector<8x128xf32>
      %774 = vector.extract_strided_slice %535 {offsets = [8, 0], sizes = [1, 128], strides = [1, 1]} : vector<72x128xf32> to vector<1x128xf32>
      %775 = vector.broadcast %774 : vector<1x128xf32> to vector<8x128xf32>
      %776 = arith.subf %527, %775 : vector<8x128xf32>
      %777 = vector.extract_strided_slice %535 {offsets = [20, 0], sizes = [1, 128], strides = [1, 1]} : vector<72x128xf32> to vector<1x128xf32>
      %778 = vector.broadcast %777 : vector<1x128xf32> to vector<8x128xf32>
      %779 = arith.mulf %776, %778 : vector<8x128xf32>
      %780 = arith.mulf %779, %633 : vector<8x128xf32>
      %781 = vector.extract_strided_slice %535 {offsets = [10, 0], sizes = [1, 128], strides = [1, 1]} : vector<72x128xf32> to vector<1x128xf32>
      %782 = vector.broadcast %781 : vector<1x128xf32> to vector<8x128xf32>
      %783 = arith.subf %782, %527 : vector<8x128xf32>
      %784 = vector.extract_strided_slice %535 {offsets = [50, 0], sizes = [1, 128], strides = [1, 1]} : vector<72x128xf32> to vector<1x128xf32>
      %785 = vector.broadcast %784 : vector<1x128xf32> to vector<8x128xf32>
      %786 = arith.mulf %783, %785 : vector<8x128xf32>
      %787 = arith.mulf %786, %643 : vector<8x128xf32>
      %788 = arith.addf %780, %787 : vector<8x128xf32>
      %789 = vector.extract_strided_slice %535 {offsets = [9, 0], sizes = [1, 128], strides = [1, 1]} : vector<72x128xf32> to vector<1x128xf32>
      %790 = vector.broadcast %789 : vector<1x128xf32> to vector<8x128xf32>
      %791 = arith.subf %527, %790 : vector<8x128xf32>
      %792 = vector.extract_strided_slice %535 {offsets = [21, 0], sizes = [1, 128], strides = [1, 1]} : vector<72x128xf32> to vector<1x128xf32>
      %793 = vector.broadcast %792 : vector<1x128xf32> to vector<8x128xf32>
      %794 = arith.mulf %791, %793 : vector<8x128xf32>
      %795 = arith.mulf %794, %643 : vector<8x128xf32>
      %796 = vector.extract_strided_slice %535 {offsets = [11, 0], sizes = [1, 128], strides = [1, 1]} : vector<72x128xf32> to vector<1x128xf32>
      %797 = vector.broadcast %796 : vector<1x128xf32> to vector<8x128xf32>
      %798 = arith.subf %797, %527 : vector<8x128xf32>
      %799 = vector.extract_strided_slice %535 {offsets = [51, 0], sizes = [1, 128], strides = [1, 1]} : vector<72x128xf32> to vector<1x128xf32>
      %800 = vector.broadcast %799 : vector<1x128xf32> to vector<8x128xf32>
      %801 = arith.mulf %798, %800 : vector<8x128xf32>
      %802 = arith.mulf %801, %653 : vector<8x128xf32>
      %803 = arith.addf %795, %802 : vector<8x128xf32>
      %804 = vector.extract_strided_slice %535 {offsets = [0, 0], sizes = [1, 128], strides = [1, 1]} : vector<72x128xf32> to vector<1x128xf32>
      %805 = vector.broadcast %804 : vector<1x128xf32> to vector<8x128xf32>
      %806 = arith.subf %527, %805 : vector<8x128xf32>
      %807 = vector.extract_strided_slice %535 {offsets = [22, 0], sizes = [1, 128], strides = [1, 1]} : vector<72x128xf32> to vector<1x128xf32>
      %808 = vector.broadcast %807 : vector<1x128xf32> to vector<8x128xf32>
      %809 = arith.mulf %806, %808 : vector<8x128xf32>
      %810 = arith.mulf %809, %668 : vector<8x128xf32>
      %811 = vector.extract_strided_slice %535 {offsets = [3, 0], sizes = [1, 128], strides = [1, 1]} : vector<72x128xf32> to vector<1x128xf32>
      %812 = vector.broadcast %811 : vector<1x128xf32> to vector<8x128xf32>
      %813 = arith.subf %812, %527 : vector<8x128xf32>
      %814 = vector.extract_strided_slice %535 {offsets = [52, 0], sizes = [1, 128], strides = [1, 1]} : vector<72x128xf32> to vector<1x128xf32>
      %815 = vector.broadcast %814 : vector<1x128xf32> to vector<8x128xf32>
      %816 = arith.mulf %813, %815 : vector<8x128xf32>
      %817 = arith.mulf %816, %683 : vector<8x128xf32>
      %818 = arith.addf %810, %817 : vector<8x128xf32>
      %819 = vector.extract_strided_slice %535 {offsets = [1, 0], sizes = [1, 128], strides = [1, 1]} : vector<72x128xf32> to vector<1x128xf32>
      %820 = vector.broadcast %819 : vector<1x128xf32> to vector<8x128xf32>
      %821 = arith.subf %527, %820 : vector<8x128xf32>
      %822 = vector.extract_strided_slice %535 {offsets = [23, 0], sizes = [1, 128], strides = [1, 1]} : vector<72x128xf32> to vector<1x128xf32>
      %823 = vector.broadcast %822 : vector<1x128xf32> to vector<8x128xf32>
      %824 = arith.mulf %821, %823 : vector<8x128xf32>
      %825 = arith.mulf %824, %683 : vector<8x128xf32>
      %826 = vector.extract_strided_slice %535 {offsets = [4, 0], sizes = [1, 128], strides = [1, 1]} : vector<72x128xf32> to vector<1x128xf32>
      %827 = vector.broadcast %826 : vector<1x128xf32> to vector<8x128xf32>
      %828 = arith.subf %827, %527 : vector<8x128xf32>
      %829 = vector.extract_strided_slice %535 {offsets = [53, 0], sizes = [1, 128], strides = [1, 1]} : vector<72x128xf32> to vector<1x128xf32>
      %830 = vector.broadcast %829 : vector<1x128xf32> to vector<8x128xf32>
      %831 = arith.mulf %828, %830 : vector<8x128xf32>
      %832 = arith.mulf %831, %698 : vector<8x128xf32>
      %833 = arith.addf %825, %832 : vector<8x128xf32>
      %834 = vector.extract_strided_slice %535 {offsets = [2, 0], sizes = [1, 128], strides = [1, 1]} : vector<72x128xf32> to vector<1x128xf32>
      %835 = vector.broadcast %834 : vector<1x128xf32> to vector<8x128xf32>
      %836 = arith.subf %527, %835 : vector<8x128xf32>
      %837 = vector.extract_strided_slice %535 {offsets = [24, 0], sizes = [1, 128], strides = [1, 1]} : vector<72x128xf32> to vector<1x128xf32>
      %838 = vector.broadcast %837 : vector<1x128xf32> to vector<8x128xf32>
      %839 = arith.mulf %836, %838 : vector<8x128xf32>
      %840 = arith.mulf %839, %698 : vector<8x128xf32>
      %841 = vector.extract_strided_slice %535 {offsets = [5, 0], sizes = [1, 128], strides = [1, 1]} : vector<72x128xf32> to vector<1x128xf32>
      %842 = vector.broadcast %841 : vector<1x128xf32> to vector<8x128xf32>
      %843 = arith.subf %842, %527 : vector<8x128xf32>
      %844 = vector.extract_strided_slice %535 {offsets = [54, 0], sizes = [1, 128], strides = [1, 1]} : vector<72x128xf32> to vector<1x128xf32>
      %845 = vector.broadcast %844 : vector<1x128xf32> to vector<8x128xf32>
      %846 = arith.mulf %843, %845 : vector<8x128xf32>
      %847 = arith.mulf %846, %713 : vector<8x128xf32>
      %848 = arith.addf %840, %847 : vector<8x128xf32>
      %849 = vector.extract_strided_slice %535 {offsets = [3, 0], sizes = [1, 128], strides = [1, 1]} : vector<72x128xf32> to vector<1x128xf32>
      %850 = vector.broadcast %849 : vector<1x128xf32> to vector<8x128xf32>
      %851 = arith.subf %527, %850 : vector<8x128xf32>
      %852 = vector.extract_strided_slice %535 {offsets = [25, 0], sizes = [1, 128], strides = [1, 1]} : vector<72x128xf32> to vector<1x128xf32>
      %853 = vector.broadcast %852 : vector<1x128xf32> to vector<8x128xf32>
      %854 = arith.mulf %851, %853 : vector<8x128xf32>
      %855 = arith.mulf %854, %713 : vector<8x128xf32>
      %856 = vector.extract_strided_slice %535 {offsets = [6, 0], sizes = [1, 128], strides = [1, 1]} : vector<72x128xf32> to vector<1x128xf32>
      %857 = vector.broadcast %856 : vector<1x128xf32> to vector<8x128xf32>
      %858 = arith.subf %857, %527 : vector<8x128xf32>
      %859 = vector.extract_strided_slice %535 {offsets = [55, 0], sizes = [1, 128], strides = [1, 1]} : vector<72x128xf32> to vector<1x128xf32>
      %860 = vector.broadcast %859 : vector<1x128xf32> to vector<8x128xf32>
      %861 = arith.mulf %858, %860 : vector<8x128xf32>
      %862 = arith.mulf %861, %728 : vector<8x128xf32>
      %863 = arith.addf %855, %862 : vector<8x128xf32>
      %864 = vector.extract_strided_slice %535 {offsets = [4, 0], sizes = [1, 128], strides = [1, 1]} : vector<72x128xf32> to vector<1x128xf32>
      %865 = vector.broadcast %864 : vector<1x128xf32> to vector<8x128xf32>
      %866 = arith.subf %527, %865 : vector<8x128xf32>
      %867 = vector.extract_strided_slice %535 {offsets = [26, 0], sizes = [1, 128], strides = [1, 1]} : vector<72x128xf32> to vector<1x128xf32>
      %868 = vector.broadcast %867 : vector<1x128xf32> to vector<8x128xf32>
      %869 = arith.mulf %866, %868 : vector<8x128xf32>
      %870 = arith.mulf %869, %728 : vector<8x128xf32>
      %871 = vector.extract_strided_slice %535 {offsets = [7, 0], sizes = [1, 128], strides = [1, 1]} : vector<72x128xf32> to vector<1x128xf32>
      %872 = vector.broadcast %871 : vector<1x128xf32> to vector<8x128xf32>
      %873 = arith.subf %872, %527 : vector<8x128xf32>
      %874 = vector.extract_strided_slice %535 {offsets = [56, 0], sizes = [1, 128], strides = [1, 1]} : vector<72x128xf32> to vector<1x128xf32>
      %875 = vector.broadcast %874 : vector<1x128xf32> to vector<8x128xf32>
      %876 = arith.mulf %873, %875 : vector<8x128xf32>
      %877 = arith.mulf %876, %743 : vector<8x128xf32>
      %878 = arith.addf %870, %877 : vector<8x128xf32>
      %879 = vector.extract_strided_slice %535 {offsets = [5, 0], sizes = [1, 128], strides = [1, 1]} : vector<72x128xf32> to vector<1x128xf32>
      %880 = vector.broadcast %879 : vector<1x128xf32> to vector<8x128xf32>
      %881 = arith.subf %527, %880 : vector<8x128xf32>
      %882 = vector.extract_strided_slice %535 {offsets = [27, 0], sizes = [1, 128], strides = [1, 1]} : vector<72x128xf32> to vector<1x128xf32>
      %883 = vector.broadcast %882 : vector<1x128xf32> to vector<8x128xf32>
      %884 = arith.mulf %881, %883 : vector<8x128xf32>
      %885 = arith.mulf %884, %743 : vector<8x128xf32>
      %886 = vector.extract_strided_slice %535 {offsets = [8, 0], sizes = [1, 128], strides = [1, 1]} : vector<72x128xf32> to vector<1x128xf32>
      %887 = vector.broadcast %886 : vector<1x128xf32> to vector<8x128xf32>
      %888 = arith.subf %887, %527 : vector<8x128xf32>
      %889 = vector.extract_strided_slice %535 {offsets = [57, 0], sizes = [1, 128], strides = [1, 1]} : vector<72x128xf32> to vector<1x128xf32>
      %890 = vector.broadcast %889 : vector<1x128xf32> to vector<8x128xf32>
      %891 = arith.mulf %888, %890 : vector<8x128xf32>
      %892 = arith.mulf %891, %758 : vector<8x128xf32>
      %893 = arith.addf %885, %892 : vector<8x128xf32>
      %894 = vector.extract_strided_slice %535 {offsets = [6, 0], sizes = [1, 128], strides = [1, 1]} : vector<72x128xf32> to vector<1x128xf32>
      %895 = vector.broadcast %894 : vector<1x128xf32> to vector<8x128xf32>
      %896 = arith.subf %527, %895 : vector<8x128xf32>
      %897 = vector.extract_strided_slice %535 {offsets = [28, 0], sizes = [1, 128], strides = [1, 1]} : vector<72x128xf32> to vector<1x128xf32>
      %898 = vector.broadcast %897 : vector<1x128xf32> to vector<8x128xf32>
      %899 = arith.mulf %896, %898 : vector<8x128xf32>
      %900 = arith.mulf %899, %758 : vector<8x128xf32>
      %901 = vector.extract_strided_slice %535 {offsets = [9, 0], sizes = [1, 128], strides = [1, 1]} : vector<72x128xf32> to vector<1x128xf32>
      %902 = vector.broadcast %901 : vector<1x128xf32> to vector<8x128xf32>
      %903 = arith.subf %902, %527 : vector<8x128xf32>
      %904 = vector.extract_strided_slice %535 {offsets = [58, 0], sizes = [1, 128], strides = [1, 1]} : vector<72x128xf32> to vector<1x128xf32>
      %905 = vector.broadcast %904 : vector<1x128xf32> to vector<8x128xf32>
      %906 = arith.mulf %903, %905 : vector<8x128xf32>
      %907 = arith.mulf %906, %773 : vector<8x128xf32>
      %908 = arith.addf %900, %907 : vector<8x128xf32>
      %909 = vector.extract_strided_slice %535 {offsets = [7, 0], sizes = [1, 128], strides = [1, 1]} : vector<72x128xf32> to vector<1x128xf32>
      %910 = vector.broadcast %909 : vector<1x128xf32> to vector<8x128xf32>
      %911 = arith.subf %527, %910 : vector<8x128xf32>
      %912 = vector.extract_strided_slice %535 {offsets = [29, 0], sizes = [1, 128], strides = [1, 1]} : vector<72x128xf32> to vector<1x128xf32>
      %913 = vector.broadcast %912 : vector<1x128xf32> to vector<8x128xf32>
      %914 = arith.mulf %911, %913 : vector<8x128xf32>
      %915 = arith.mulf %914, %773 : vector<8x128xf32>
      %916 = vector.extract_strided_slice %535 {offsets = [10, 0], sizes = [1, 128], strides = [1, 1]} : vector<72x128xf32> to vector<1x128xf32>
      %917 = vector.broadcast %916 : vector<1x128xf32> to vector<8x128xf32>
      %918 = arith.subf %917, %527 : vector<8x128xf32>
      %919 = vector.extract_strided_slice %535 {offsets = [59, 0], sizes = [1, 128], strides = [1, 1]} : vector<72x128xf32> to vector<1x128xf32>
      %920 = vector.broadcast %919 : vector<1x128xf32> to vector<8x128xf32>
      %921 = arith.mulf %918, %920 : vector<8x128xf32>
      %922 = arith.mulf %921, %788 : vector<8x128xf32>
      %923 = arith.addf %915, %922 : vector<8x128xf32>
      %924 = vector.extract_strided_slice %535 {offsets = [8, 0], sizes = [1, 128], strides = [1, 1]} : vector<72x128xf32> to vector<1x128xf32>
      %925 = vector.broadcast %924 : vector<1x128xf32> to vector<8x128xf32>
      %926 = arith.subf %527, %925 : vector<8x128xf32>
      %927 = vector.extract_strided_slice %535 {offsets = [30, 0], sizes = [1, 128], strides = [1, 1]} : vector<72x128xf32> to vector<1x128xf32>
      %928 = vector.broadcast %927 : vector<1x128xf32> to vector<8x128xf32>
      %929 = arith.mulf %926, %928 : vector<8x128xf32>
      %930 = arith.mulf %929, %788 : vector<8x128xf32>
      %931 = vector.extract_strided_slice %535 {offsets = [11, 0], sizes = [1, 128], strides = [1, 1]} : vector<72x128xf32> to vector<1x128xf32>
      %932 = vector.broadcast %931 : vector<1x128xf32> to vector<8x128xf32>
      %933 = arith.subf %932, %527 : vector<8x128xf32>
      %934 = vector.extract_strided_slice %535 {offsets = [60, 0], sizes = [1, 128], strides = [1, 1]} : vector<72x128xf32> to vector<1x128xf32>
      %935 = vector.broadcast %934 : vector<1x128xf32> to vector<8x128xf32>
      %936 = arith.mulf %933, %935 : vector<8x128xf32>
      %937 = arith.mulf %936, %803 : vector<8x128xf32>
      %938 = arith.addf %930, %937 : vector<8x128xf32>
      %939 = vector.extract_strided_slice %535 {offsets = [0, 0], sizes = [1, 128], strides = [1, 1]} : vector<72x128xf32> to vector<1x128xf32>
      %940 = vector.broadcast %939 : vector<1x128xf32> to vector<8x128xf32>
      %941 = arith.subf %527, %940 : vector<8x128xf32>
      %942 = vector.extract_strided_slice %535 {offsets = [32, 0], sizes = [1, 128], strides = [1, 1]} : vector<72x128xf32> to vector<1x128xf32>
      %943 = vector.broadcast %942 : vector<1x128xf32> to vector<8x128xf32>
      %944 = arith.mulf %941, %943 : vector<8x128xf32>
      %945 = arith.mulf %944, %818 : vector<8x128xf32>
      %946 = vector.extract_strided_slice %535 {offsets = [4, 0], sizes = [1, 128], strides = [1, 1]} : vector<72x128xf32> to vector<1x128xf32>
      %947 = vector.broadcast %946 : vector<1x128xf32> to vector<8x128xf32>
      %948 = arith.subf %947, %527 : vector<8x128xf32>
      %949 = vector.extract_strided_slice %535 {offsets = [62, 0], sizes = [1, 128], strides = [1, 1]} : vector<72x128xf32> to vector<1x128xf32>
      %950 = vector.broadcast %949 : vector<1x128xf32> to vector<8x128xf32>
      %951 = arith.mulf %948, %950 : vector<8x128xf32>
      %952 = arith.mulf %951, %833 : vector<8x128xf32>
      %953 = arith.addf %945, %952 : vector<8x128xf32>
      %954 = vector.extract_strided_slice %535 {offsets = [1, 0], sizes = [1, 128], strides = [1, 1]} : vector<72x128xf32> to vector<1x128xf32>
      %955 = vector.broadcast %954 : vector<1x128xf32> to vector<8x128xf32>
      %956 = arith.subf %527, %955 : vector<8x128xf32>
      %957 = vector.extract_strided_slice %535 {offsets = [33, 0], sizes = [1, 128], strides = [1, 1]} : vector<72x128xf32> to vector<1x128xf32>
      %958 = vector.broadcast %957 : vector<1x128xf32> to vector<8x128xf32>
      %959 = arith.mulf %956, %958 : vector<8x128xf32>
      %960 = arith.mulf %959, %833 : vector<8x128xf32>
      %961 = vector.extract_strided_slice %535 {offsets = [5, 0], sizes = [1, 128], strides = [1, 1]} : vector<72x128xf32> to vector<1x128xf32>
      %962 = vector.broadcast %961 : vector<1x128xf32> to vector<8x128xf32>
      %963 = arith.subf %962, %527 : vector<8x128xf32>
      %964 = vector.extract_strided_slice %535 {offsets = [63, 0], sizes = [1, 128], strides = [1, 1]} : vector<72x128xf32> to vector<1x128xf32>
      %965 = vector.broadcast %964 : vector<1x128xf32> to vector<8x128xf32>
      %966 = arith.mulf %963, %965 : vector<8x128xf32>
      %967 = arith.mulf %966, %848 : vector<8x128xf32>
      %968 = arith.addf %960, %967 : vector<8x128xf32>
      %969 = vector.extract_strided_slice %535 {offsets = [2, 0], sizes = [1, 128], strides = [1, 1]} : vector<72x128xf32> to vector<1x128xf32>
      %970 = vector.broadcast %969 : vector<1x128xf32> to vector<8x128xf32>
      %971 = arith.subf %527, %970 : vector<8x128xf32>
      %972 = vector.extract_strided_slice %535 {offsets = [34, 0], sizes = [1, 128], strides = [1, 1]} : vector<72x128xf32> to vector<1x128xf32>
      %973 = vector.broadcast %972 : vector<1x128xf32> to vector<8x128xf32>
      %974 = arith.mulf %971, %973 : vector<8x128xf32>
      %975 = arith.mulf %974, %848 : vector<8x128xf32>
      %976 = vector.extract_strided_slice %535 {offsets = [6, 0], sizes = [1, 128], strides = [1, 1]} : vector<72x128xf32> to vector<1x128xf32>
      %977 = vector.broadcast %976 : vector<1x128xf32> to vector<8x128xf32>
      %978 = arith.subf %977, %527 : vector<8x128xf32>
      %979 = vector.extract_strided_slice %535 {offsets = [64, 0], sizes = [1, 128], strides = [1, 1]} : vector<72x128xf32> to vector<1x128xf32>
      %980 = vector.broadcast %979 : vector<1x128xf32> to vector<8x128xf32>
      %981 = arith.mulf %978, %980 : vector<8x128xf32>
      %982 = arith.mulf %981, %863 : vector<8x128xf32>
      %983 = arith.addf %975, %982 : vector<8x128xf32>
      %984 = vector.extract_strided_slice %535 {offsets = [3, 0], sizes = [1, 128], strides = [1, 1]} : vector<72x128xf32> to vector<1x128xf32>
      %985 = vector.broadcast %984 : vector<1x128xf32> to vector<8x128xf32>
      %986 = arith.subf %527, %985 : vector<8x128xf32>
      %987 = vector.extract_strided_slice %535 {offsets = [35, 0], sizes = [1, 128], strides = [1, 1]} : vector<72x128xf32> to vector<1x128xf32>
      %988 = vector.broadcast %987 : vector<1x128xf32> to vector<8x128xf32>
      %989 = arith.mulf %986, %988 : vector<8x128xf32>
      %990 = arith.mulf %989, %863 : vector<8x128xf32>
      %991 = vector.extract_strided_slice %535 {offsets = [7, 0], sizes = [1, 128], strides = [1, 1]} : vector<72x128xf32> to vector<1x128xf32>
      %992 = vector.broadcast %991 : vector<1x128xf32> to vector<8x128xf32>
      %993 = arith.subf %992, %527 : vector<8x128xf32>
      %994 = vector.extract_strided_slice %535 {offsets = [65, 0], sizes = [1, 128], strides = [1, 1]} : vector<72x128xf32> to vector<1x128xf32>
      %995 = vector.broadcast %994 : vector<1x128xf32> to vector<8x128xf32>
      %996 = arith.mulf %993, %995 : vector<8x128xf32>
      %997 = arith.mulf %996, %878 : vector<8x128xf32>
      %998 = arith.addf %990, %997 : vector<8x128xf32>
      %999 = vector.extract_strided_slice %535 {offsets = [4, 0], sizes = [1, 128], strides = [1, 1]} : vector<72x128xf32> to vector<1x128xf32>
      %1000 = vector.broadcast %999 : vector<1x128xf32> to vector<8x128xf32>
      %1001 = arith.subf %527, %1000 : vector<8x128xf32>
      %1002 = vector.extract_strided_slice %535 {offsets = [36, 0], sizes = [1, 128], strides = [1, 1]} : vector<72x128xf32> to vector<1x128xf32>
      %1003 = vector.broadcast %1002 : vector<1x128xf32> to vector<8x128xf32>
      %1004 = arith.mulf %1001, %1003 : vector<8x128xf32>
      %1005 = arith.mulf %1004, %878 : vector<8x128xf32>
      %1006 = vector.extract_strided_slice %535 {offsets = [8, 0], sizes = [1, 128], strides = [1, 1]} : vector<72x128xf32> to vector<1x128xf32>
      %1007 = vector.broadcast %1006 : vector<1x128xf32> to vector<8x128xf32>
      %1008 = arith.subf %1007, %527 : vector<8x128xf32>
      %1009 = vector.extract_strided_slice %535 {offsets = [66, 0], sizes = [1, 128], strides = [1, 1]} : vector<72x128xf32> to vector<1x128xf32>
      %1010 = vector.broadcast %1009 : vector<1x128xf32> to vector<8x128xf32>
      %1011 = arith.mulf %1008, %1010 : vector<8x128xf32>
      %1012 = arith.mulf %1011, %893 : vector<8x128xf32>
      %1013 = arith.addf %1005, %1012 : vector<8x128xf32>
      %1014 = vector.extract_strided_slice %535 {offsets = [5, 0], sizes = [1, 128], strides = [1, 1]} : vector<72x128xf32> to vector<1x128xf32>
      %1015 = vector.broadcast %1014 : vector<1x128xf32> to vector<8x128xf32>
      %1016 = arith.subf %527, %1015 : vector<8x128xf32>
      %1017 = vector.extract_strided_slice %535 {offsets = [37, 0], sizes = [1, 128], strides = [1, 1]} : vector<72x128xf32> to vector<1x128xf32>
      %1018 = vector.broadcast %1017 : vector<1x128xf32> to vector<8x128xf32>
      %1019 = arith.mulf %1016, %1018 : vector<8x128xf32>
      %1020 = arith.mulf %1019, %893 : vector<8x128xf32>
      %1021 = vector.extract_strided_slice %535 {offsets = [9, 0], sizes = [1, 128], strides = [1, 1]} : vector<72x128xf32> to vector<1x128xf32>
      %1022 = vector.broadcast %1021 : vector<1x128xf32> to vector<8x128xf32>
      %1023 = arith.subf %1022, %527 : vector<8x128xf32>
      %1024 = vector.extract_strided_slice %535 {offsets = [67, 0], sizes = [1, 128], strides = [1, 1]} : vector<72x128xf32> to vector<1x128xf32>
      %1025 = vector.broadcast %1024 : vector<1x128xf32> to vector<8x128xf32>
      %1026 = arith.mulf %1023, %1025 : vector<8x128xf32>
      %1027 = arith.mulf %1026, %908 : vector<8x128xf32>
      %1028 = arith.addf %1020, %1027 : vector<8x128xf32>
      %1029 = vector.extract_strided_slice %535 {offsets = [6, 0], sizes = [1, 128], strides = [1, 1]} : vector<72x128xf32> to vector<1x128xf32>
      %1030 = vector.broadcast %1029 : vector<1x128xf32> to vector<8x128xf32>
      %1031 = arith.subf %527, %1030 : vector<8x128xf32>
      %1032 = vector.extract_strided_slice %535 {offsets = [38, 0], sizes = [1, 128], strides = [1, 1]} : vector<72x128xf32> to vector<1x128xf32>
      %1033 = vector.broadcast %1032 : vector<1x128xf32> to vector<8x128xf32>
      %1034 = arith.mulf %1031, %1033 : vector<8x128xf32>
      %1035 = arith.mulf %1034, %908 : vector<8x128xf32>
      %1036 = vector.extract_strided_slice %535 {offsets = [10, 0], sizes = [1, 128], strides = [1, 1]} : vector<72x128xf32> to vector<1x128xf32>
      %1037 = vector.broadcast %1036 : vector<1x128xf32> to vector<8x128xf32>
      %1038 = arith.subf %1037, %527 : vector<8x128xf32>
      %1039 = vector.extract_strided_slice %535 {offsets = [68, 0], sizes = [1, 128], strides = [1, 1]} : vector<72x128xf32> to vector<1x128xf32>
      %1040 = vector.broadcast %1039 : vector<1x128xf32> to vector<8x128xf32>
      %1041 = arith.mulf %1038, %1040 : vector<8x128xf32>
      %1042 = arith.mulf %1041, %923 : vector<8x128xf32>
      %1043 = arith.addf %1035, %1042 : vector<8x128xf32>
      %1044 = vector.extract_strided_slice %535 {offsets = [7, 0], sizes = [1, 128], strides = [1, 1]} : vector<72x128xf32> to vector<1x128xf32>
      %1045 = vector.broadcast %1044 : vector<1x128xf32> to vector<8x128xf32>
      %1046 = arith.subf %527, %1045 : vector<8x128xf32>
      %1047 = vector.extract_strided_slice %535 {offsets = [39, 0], sizes = [1, 128], strides = [1, 1]} : vector<72x128xf32> to vector<1x128xf32>
      %1048 = vector.broadcast %1047 : vector<1x128xf32> to vector<8x128xf32>
      %1049 = arith.mulf %1046, %1048 : vector<8x128xf32>
      %1050 = arith.mulf %1049, %923 : vector<8x128xf32>
      %1051 = vector.extract_strided_slice %535 {offsets = [11, 0], sizes = [1, 128], strides = [1, 1]} : vector<72x128xf32> to vector<1x128xf32>
      %1052 = vector.broadcast %1051 : vector<1x128xf32> to vector<8x128xf32>
      %1053 = arith.subf %1052, %527 : vector<8x128xf32>
      %1054 = vector.extract_strided_slice %535 {offsets = [69, 0], sizes = [1, 128], strides = [1, 1]} : vector<72x128xf32> to vector<1x128xf32>
      %1055 = vector.broadcast %1054 : vector<1x128xf32> to vector<8x128xf32>
      %1056 = arith.mulf %1053, %1055 : vector<8x128xf32>
      %1057 = arith.mulf %1056, %938 : vector<8x128xf32>
      %1058 = arith.addf %1050, %1057 : vector<8x128xf32>
      %1059 = arith.truncf %543 : vector<8x128xf32> to vector<8x128xbf16>
      %1060 = vector.extract_strided_slice %537 {offsets = [0, 0], sizes = [128, 128], strides = [1, 1]} : vector<1152x128xbf16> to vector<128x128xbf16>
      %cst_131 = arith.constant dense<0.000000e+00> : vector<8x128xf32>
      %1061 = tpu.matmul %1059, %1060, %cst_131 {dimension_numbers = #tpu.dot_dimension_numbers<[1], [0], [0], [1], [0, 0, 1, 1], [], []>} : vector<8x128xbf16>, vector<128x128xbf16>, vector<8x128xf32> -> vector<8x128xf32>
      %1062 = vector.extract_strided_slice %537 {offsets = [128, 0], sizes = [128, 128], strides = [1, 1]} : vector<1152x128xbf16> to vector<128x128xbf16>
      %1063 = arith.truncf %953 : vector<8x128xf32> to vector<8x128xbf16>
      %cst_132 = arith.constant dense<0.000000e+00> : vector<8x128xf32>
      %1064 = tpu.matmul %1063, %1062, %cst_132 {dimension_numbers = #tpu.dot_dimension_numbers<[1], [0], [0], [1], [0, 0, 1, 1], [], []>} : vector<8x128xbf16>, vector<128x128xbf16>, vector<8x128xf32> -> vector<8x128xf32>
      %1065 = arith.addf %1061, %1064 : vector<8x128xf32>
      %1066 = vector.extract_strided_slice %537 {offsets = [256, 0], sizes = [128, 128], strides = [1, 1]} : vector<1152x128xbf16> to vector<128x128xbf16>
      %1067 = arith.truncf %968 : vector<8x128xf32> to vector<8x128xbf16>
      %cst_133 = arith.constant dense<0.000000e+00> : vector<8x128xf32>
      %1068 = tpu.matmul %1067, %1066, %cst_133 {dimension_numbers = #tpu.dot_dimension_numbers<[1], [0], [0], [1], [0, 0, 1, 1], [], []>} : vector<8x128xbf16>, vector<128x128xbf16>, vector<8x128xf32> -> vector<8x128xf32>
      %1069 = arith.addf %1065, %1068 : vector<8x128xf32>
      %1070 = vector.extract_strided_slice %537 {offsets = [384, 0], sizes = [128, 128], strides = [1, 1]} : vector<1152x128xbf16> to vector<128x128xbf16>
      %1071 = arith.truncf %983 : vector<8x128xf32> to vector<8x128xbf16>
      %cst_134 = arith.constant dense<0.000000e+00> : vector<8x128xf32>
      %1072 = tpu.matmul %1071, %1070, %cst_134 {dimension_numbers = #tpu.dot_dimension_numbers<[1], [0], [0], [1], [0, 0, 1, 1], [], []>} : vector<8x128xbf16>, vector<128x128xbf16>, vector<8x128xf32> -> vector<8x128xf32>
      %1073 = arith.addf %1069, %1072 : vector<8x128xf32>
      %1074 = vector.extract_strided_slice %537 {offsets = [512, 0], sizes = [128, 128], strides = [1, 1]} : vector<1152x128xbf16> to vector<128x128xbf16>
      %1075 = arith.truncf %998 : vector<8x128xf32> to vector<8x128xbf16>
      %cst_135 = arith.constant dense<0.000000e+00> : vector<8x128xf32>
      %1076 = tpu.matmul %1075, %1074, %cst_135 {dimension_numbers = #tpu.dot_dimension_numbers<[1], [0], [0], [1], [0, 0, 1, 1], [], []>} : vector<8x128xbf16>, vector<128x128xbf16>, vector<8x128xf32> -> vector<8x128xf32>
      %1077 = arith.addf %1073, %1076 : vector<8x128xf32>
      %1078 = vector.extract_strided_slice %537 {offsets = [640, 0], sizes = [128, 128], strides = [1, 1]} : vector<1152x128xbf16> to vector<128x128xbf16>
      %1079 = arith.truncf %1013 : vector<8x128xf32> to vector<8x128xbf16>
      %cst_136 = arith.constant dense<0.000000e+00> : vector<8x128xf32>
      %1080 = tpu.matmul %1079, %1078, %cst_136 {dimension_numbers = #tpu.dot_dimension_numbers<[1], [0], [0], [1], [0, 0, 1, 1], [], []>} : vector<8x128xbf16>, vector<128x128xbf16>, vector<8x128xf32> -> vector<8x128xf32>
      %1081 = arith.addf %1077, %1080 : vector<8x128xf32>
      %1082 = vector.extract_strided_slice %537 {offsets = [768, 0], sizes = [128, 128], strides = [1, 1]} : vector<1152x128xbf16> to vector<128x128xbf16>
      %1083 = arith.truncf %1028 : vector<8x128xf32> to vector<8x128xbf16>
      %cst_137 = arith.constant dense<0.000000e+00> : vector<8x128xf32>
      %1084 = tpu.matmul %1083, %1082, %cst_137 {dimension_numbers = #tpu.dot_dimension_numbers<[1], [0], [0], [1], [0, 0, 1, 1], [], []>} : vector<8x128xbf16>, vector<128x128xbf16>, vector<8x128xf32> -> vector<8x128xf32>
      %1085 = arith.addf %1081, %1084 : vector<8x128xf32>
      %1086 = vector.extract_strided_slice %537 {offsets = [896, 0], sizes = [128, 128], strides = [1, 1]} : vector<1152x128xbf16> to vector<128x128xbf16>
      %1087 = arith.truncf %1043 : vector<8x128xf32> to vector<8x128xbf16>
      %cst_138 = arith.constant dense<0.000000e+00> : vector<8x128xf32>
      %1088 = tpu.matmul %1087, %1086, %cst_138 {dimension_numbers = #tpu.dot_dimension_numbers<[1], [0], [0], [1], [0, 0, 1, 1], [], []>} : vector<8x128xbf16>, vector<128x128xbf16>, vector<8x128xf32> -> vector<8x128xf32>
      %1089 = arith.addf %1085, %1088 : vector<8x128xf32>
      %1090 = vector.extract_strided_slice %537 {offsets = [1024, 0], sizes = [128, 128], strides = [1, 1]} : vector<1152x128xbf16> to vector<128x128xbf16>
      %1091 = arith.truncf %1058 : vector<8x128xf32> to vector<8x128xbf16>
      %cst_139 = arith.constant dense<0.000000e+00> : vector<8x128xf32>
      %1092 = tpu.matmul %1091, %1090, %cst_139 {dimension_numbers = #tpu.dot_dimension_numbers<[1], [0], [0], [1], [0, 0, 1, 1], [], []>} : vector<8x128xbf16>, vector<128x128xbf16>, vector<8x128xf32> -> vector<8x128xf32>
      %1093 = arith.addf %1089, %1092 : vector<8x128xf32>
      %c1_140 = arith.constant 1 : index
      %c0_141 = arith.constant 0 : index
      %c0_142 = arith.constant 0 : index
      %1094 = vector.load %arg5[%c1_140, %c0_141, %c0_142] : memref<2x72x128xf32, #tpu.memory_space<vmem>>, vector<1x72x128xf32>
      %1095 = vector.shape_cast %1094 : vector<1x72x128xf32> to vector<72x128xf32>
      %c1_143 = arith.constant 1 : index
      %c0_144 = arith.constant 0 : index
      %c0_145 = arith.constant 0 : index
      %1096 = vector.load %arg6[%c1_143, %c0_144, %c0_145] : memref<2x1152x128xbf16, #tpu.memory_space<vmem>>, vector<1x1152x128xbf16>
      %1097 = vector.shape_cast %1096 : vector<1x1152x128xbf16> to vector<1152x128xbf16>
      %1098 = arith.negf %1093 : vector<8x128xf32>
      %1099 = math.exp %1098 : vector<8x128xf32>
      %cst_146 = arith.constant 1.000000e+00 : f32
      %1100 = vector.broadcast %cst_146 : f32 to vector<8x128xf32>
      %1101 = arith.addf %1100, %1099 : vector<8x128xf32>
      %1102 = arith.divf %1100, %1101 : vector<8x128xf32>
      %1103 = arith.mulf %1093, %1102 : vector<8x128xf32>
      %1104 = vector.extract_strided_slice %1095 {offsets = [0, 0], sizes = [1, 128], strides = [1, 1]} : vector<72x128xf32> to vector<1x128xf32>
      %1105 = vector.broadcast %1104 : vector<1x128xf32> to vector<8x128xf32>
      %1106 = arith.cmpf oge, %1093, %1105 : vector<8x128xf32>
      %1107 = vector.extract_strided_slice %1095 {offsets = [1, 0], sizes = [1, 128], strides = [1, 1]} : vector<72x128xf32> to vector<1x128xf32>
      %1108 = vector.broadcast %1107 : vector<1x128xf32> to vector<8x128xf32>
      %1109 = arith.cmpf olt, %1093, %1108 : vector<8x128xf32>
      %1110 = arith.andi %1106, %1109 : vector<8x128xi1>
      %cst_147 = arith.constant 1.000000e+00 : f32
      %cst_148 = arith.constant 0.000000e+00 : f32
      %1111 = vector.broadcast %cst_147 : f32 to vector<8x128xf32>
      %1112 = vector.broadcast %cst_148 : f32 to vector<8x128xf32>
      %1113 = arith.select %1110, %1111, %1112 : vector<8x128xi1>, vector<8x128xf32>
      %1114 = vector.extract_strided_slice %1095 {offsets = [1, 0], sizes = [1, 128], strides = [1, 1]} : vector<72x128xf32> to vector<1x128xf32>
      %1115 = vector.broadcast %1114 : vector<1x128xf32> to vector<8x128xf32>
      %1116 = arith.cmpf oge, %1093, %1115 : vector<8x128xf32>
      %1117 = vector.extract_strided_slice %1095 {offsets = [2, 0], sizes = [1, 128], strides = [1, 1]} : vector<72x128xf32> to vector<1x128xf32>
      %1118 = vector.broadcast %1117 : vector<1x128xf32> to vector<8x128xf32>
      %1119 = arith.cmpf olt, %1093, %1118 : vector<8x128xf32>
      %1120 = arith.andi %1116, %1119 : vector<8x128xi1>
      %cst_149 = arith.constant 1.000000e+00 : f32
      %cst_150 = arith.constant 0.000000e+00 : f32
      %1121 = vector.broadcast %cst_149 : f32 to vector<8x128xf32>
      %1122 = vector.broadcast %cst_150 : f32 to vector<8x128xf32>
      %1123 = arith.select %1120, %1121, %1122 : vector<8x128xi1>, vector<8x128xf32>
      %1124 = vector.extract_strided_slice %1095 {offsets = [2, 0], sizes = [1, 128], strides = [1, 1]} : vector<72x128xf32> to vector<1x128xf32>
      %1125 = vector.broadcast %1124 : vector<1x128xf32> to vector<8x128xf32>
      %1126 = arith.cmpf oge, %1093, %1125 : vector<8x128xf32>
      %1127 = vector.extract_strided_slice %1095 {offsets = [3, 0], sizes = [1, 128], strides = [1, 1]} : vector<72x128xf32> to vector<1x128xf32>
      %1128 = vector.broadcast %1127 : vector<1x128xf32> to vector<8x128xf32>
      %1129 = arith.cmpf olt, %1093, %1128 : vector<8x128xf32>
      %1130 = arith.andi %1126, %1129 : vector<8x128xi1>
      %cst_151 = arith.constant 1.000000e+00 : f32
      %cst_152 = arith.constant 0.000000e+00 : f32
      %1131 = vector.broadcast %cst_151 : f32 to vector<8x128xf32>
      %1132 = vector.broadcast %cst_152 : f32 to vector<8x128xf32>
      %1133 = arith.select %1130, %1131, %1132 : vector<8x128xi1>, vector<8x128xf32>
      %1134 = vector.extract_strided_slice %1095 {offsets = [3, 0], sizes = [1, 128], strides = [1, 1]} : vector<72x128xf32> to vector<1x128xf32>
      %1135 = vector.broadcast %1134 : vector<1x128xf32> to vector<8x128xf32>
      %1136 = arith.cmpf oge, %1093, %1135 : vector<8x128xf32>
      %1137 = vector.extract_strided_slice %1095 {offsets = [4, 0], sizes = [1, 128], strides = [1, 1]} : vector<72x128xf32> to vector<1x128xf32>
      %1138 = vector.broadcast %1137 : vector<1x128xf32> to vector<8x128xf32>
      %1139 = arith.cmpf olt, %1093, %1138 : vector<8x128xf32>
      %1140 = arith.andi %1136, %1139 : vector<8x128xi1>
      %cst_153 = arith.constant 1.000000e+00 : f32
      %cst_154 = arith.constant 0.000000e+00 : f32
      %1141 = vector.broadcast %cst_153 : f32 to vector<8x128xf32>
      %1142 = vector.broadcast %cst_154 : f32 to vector<8x128xf32>
      %1143 = arith.select %1140, %1141, %1142 : vector<8x128xi1>, vector<8x128xf32>
      %1144 = vector.extract_strided_slice %1095 {offsets = [4, 0], sizes = [1, 128], strides = [1, 1]} : vector<72x128xf32> to vector<1x128xf32>
      %1145 = vector.broadcast %1144 : vector<1x128xf32> to vector<8x128xf32>
      %1146 = arith.cmpf oge, %1093, %1145 : vector<8x128xf32>
      %1147 = vector.extract_strided_slice %1095 {offsets = [5, 0], sizes = [1, 128], strides = [1, 1]} : vector<72x128xf32> to vector<1x128xf32>
      %1148 = vector.broadcast %1147 : vector<1x128xf32> to vector<8x128xf32>
      %1149 = arith.cmpf olt, %1093, %1148 : vector<8x128xf32>
      %1150 = arith.andi %1146, %1149 : vector<8x128xi1>
      %cst_155 = arith.constant 1.000000e+00 : f32
      %cst_156 = arith.constant 0.000000e+00 : f32
      %1151 = vector.broadcast %cst_155 : f32 to vector<8x128xf32>
      %1152 = vector.broadcast %cst_156 : f32 to vector<8x128xf32>
      %1153 = arith.select %1150, %1151, %1152 : vector<8x128xi1>, vector<8x128xf32>
      %1154 = vector.extract_strided_slice %1095 {offsets = [5, 0], sizes = [1, 128], strides = [1, 1]} : vector<72x128xf32> to vector<1x128xf32>
      %1155 = vector.broadcast %1154 : vector<1x128xf32> to vector<8x128xf32>
      %1156 = arith.cmpf oge, %1093, %1155 : vector<8x128xf32>
      %1157 = vector.extract_strided_slice %1095 {offsets = [6, 0], sizes = [1, 128], strides = [1, 1]} : vector<72x128xf32> to vector<1x128xf32>
      %1158 = vector.broadcast %1157 : vector<1x128xf32> to vector<8x128xf32>
      %1159 = arith.cmpf olt, %1093, %1158 : vector<8x128xf32>
      %1160 = arith.andi %1156, %1159 : vector<8x128xi1>
      %cst_157 = arith.constant 1.000000e+00 : f32
      %cst_158 = arith.constant 0.000000e+00 : f32
      %1161 = vector.broadcast %cst_157 : f32 to vector<8x128xf32>
      %1162 = vector.broadcast %cst_158 : f32 to vector<8x128xf32>
      %1163 = arith.select %1160, %1161, %1162 : vector<8x128xi1>, vector<8x128xf32>
      %1164 = vector.extract_strided_slice %1095 {offsets = [6, 0], sizes = [1, 128], strides = [1, 1]} : vector<72x128xf32> to vector<1x128xf32>
      %1165 = vector.broadcast %1164 : vector<1x128xf32> to vector<8x128xf32>
      %1166 = arith.cmpf oge, %1093, %1165 : vector<8x128xf32>
      %1167 = vector.extract_strided_slice %1095 {offsets = [7, 0], sizes = [1, 128], strides = [1, 1]} : vector<72x128xf32> to vector<1x128xf32>
      %1168 = vector.broadcast %1167 : vector<1x128xf32> to vector<8x128xf32>
      %1169 = arith.cmpf olt, %1093, %1168 : vector<8x128xf32>
      %1170 = arith.andi %1166, %1169 : vector<8x128xi1>
      %cst_159 = arith.constant 1.000000e+00 : f32
      %cst_160 = arith.constant 0.000000e+00 : f32
      %1171 = vector.broadcast %cst_159 : f32 to vector<8x128xf32>
      %1172 = vector.broadcast %cst_160 : f32 to vector<8x128xf32>
      %1173 = arith.select %1170, %1171, %1172 : vector<8x128xi1>, vector<8x128xf32>
      %1174 = vector.extract_strided_slice %1095 {offsets = [7, 0], sizes = [1, 128], strides = [1, 1]} : vector<72x128xf32> to vector<1x128xf32>
      %1175 = vector.broadcast %1174 : vector<1x128xf32> to vector<8x128xf32>
      %1176 = arith.cmpf oge, %1093, %1175 : vector<8x128xf32>
      %1177 = vector.extract_strided_slice %1095 {offsets = [8, 0], sizes = [1, 128], strides = [1, 1]} : vector<72x128xf32> to vector<1x128xf32>
      %1178 = vector.broadcast %1177 : vector<1x128xf32> to vector<8x128xf32>
      %1179 = arith.cmpf olt, %1093, %1178 : vector<8x128xf32>
      %1180 = arith.andi %1176, %1179 : vector<8x128xi1>
      %cst_161 = arith.constant 1.000000e+00 : f32
      %cst_162 = arith.constant 0.000000e+00 : f32
      %1181 = vector.broadcast %cst_161 : f32 to vector<8x128xf32>
      %1182 = vector.broadcast %cst_162 : f32 to vector<8x128xf32>
      %1183 = arith.select %1180, %1181, %1182 : vector<8x128xi1>, vector<8x128xf32>
      %1184 = vector.extract_strided_slice %1095 {offsets = [8, 0], sizes = [1, 128], strides = [1, 1]} : vector<72x128xf32> to vector<1x128xf32>
      %1185 = vector.broadcast %1184 : vector<1x128xf32> to vector<8x128xf32>
      %1186 = arith.cmpf oge, %1093, %1185 : vector<8x128xf32>
      %1187 = vector.extract_strided_slice %1095 {offsets = [9, 0], sizes = [1, 128], strides = [1, 1]} : vector<72x128xf32> to vector<1x128xf32>
      %1188 = vector.broadcast %1187 : vector<1x128xf32> to vector<8x128xf32>
      %1189 = arith.cmpf olt, %1093, %1188 : vector<8x128xf32>
      %1190 = arith.andi %1186, %1189 : vector<8x128xi1>
      %cst_163 = arith.constant 1.000000e+00 : f32
      %cst_164 = arith.constant 0.000000e+00 : f32
      %1191 = vector.broadcast %cst_163 : f32 to vector<8x128xf32>
      %1192 = vector.broadcast %cst_164 : f32 to vector<8x128xf32>
      %1193 = arith.select %1190, %1191, %1192 : vector<8x128xi1>, vector<8x128xf32>
      %1194 = vector.extract_strided_slice %1095 {offsets = [9, 0], sizes = [1, 128], strides = [1, 1]} : vector<72x128xf32> to vector<1x128xf32>
      %1195 = vector.broadcast %1194 : vector<1x128xf32> to vector<8x128xf32>
      %1196 = arith.cmpf oge, %1093, %1195 : vector<8x128xf32>
      %1197 = vector.extract_strided_slice %1095 {offsets = [10, 0], sizes = [1, 128], strides = [1, 1]} : vector<72x128xf32> to vector<1x128xf32>
      %1198 = vector.broadcast %1197 : vector<1x128xf32> to vector<8x128xf32>
      %1199 = arith.cmpf olt, %1093, %1198 : vector<8x128xf32>
      %1200 = arith.andi %1196, %1199 : vector<8x128xi1>
      %cst_165 = arith.constant 1.000000e+00 : f32
      %cst_166 = arith.constant 0.000000e+00 : f32
      %1201 = vector.broadcast %cst_165 : f32 to vector<8x128xf32>
      %1202 = vector.broadcast %cst_166 : f32 to vector<8x128xf32>
      %1203 = arith.select %1200, %1201, %1202 : vector<8x128xi1>, vector<8x128xf32>
      %1204 = vector.extract_strided_slice %1095 {offsets = [10, 0], sizes = [1, 128], strides = [1, 1]} : vector<72x128xf32> to vector<1x128xf32>
      %1205 = vector.broadcast %1204 : vector<1x128xf32> to vector<8x128xf32>
      %1206 = arith.cmpf oge, %1093, %1205 : vector<8x128xf32>
      %1207 = vector.extract_strided_slice %1095 {offsets = [11, 0], sizes = [1, 128], strides = [1, 1]} : vector<72x128xf32> to vector<1x128xf32>
      %1208 = vector.broadcast %1207 : vector<1x128xf32> to vector<8x128xf32>
      %1209 = arith.cmpf olt, %1093, %1208 : vector<8x128xf32>
      %1210 = arith.andi %1206, %1209 : vector<8x128xi1>
      %cst_167 = arith.constant 1.000000e+00 : f32
      %cst_168 = arith.constant 0.000000e+00 : f32
      %1211 = vector.broadcast %cst_167 : f32 to vector<8x128xf32>
      %1212 = vector.broadcast %cst_168 : f32 to vector<8x128xf32>
      %1213 = arith.select %1210, %1211, %1212 : vector<8x128xi1>, vector<8x128xf32>
      %1214 = vector.extract_strided_slice %1095 {offsets = [0, 0], sizes = [1, 128], strides = [1, 1]} : vector<72x128xf32> to vector<1x128xf32>
      %1215 = vector.broadcast %1214 : vector<1x128xf32> to vector<8x128xf32>
      %1216 = arith.subf %1093, %1215 : vector<8x128xf32>
      %1217 = vector.extract_strided_slice %1095 {offsets = [12, 0], sizes = [1, 128], strides = [1, 1]} : vector<72x128xf32> to vector<1x128xf32>
      %1218 = vector.broadcast %1217 : vector<1x128xf32> to vector<8x128xf32>
      %1219 = arith.mulf %1216, %1218 : vector<8x128xf32>
      %1220 = arith.mulf %1219, %1113 : vector<8x128xf32>
      %1221 = vector.extract_strided_slice %1095 {offsets = [2, 0], sizes = [1, 128], strides = [1, 1]} : vector<72x128xf32> to vector<1x128xf32>
      %1222 = vector.broadcast %1221 : vector<1x128xf32> to vector<8x128xf32>
      %1223 = arith.subf %1222, %1093 : vector<8x128xf32>
      %1224 = vector.extract_strided_slice %1095 {offsets = [42, 0], sizes = [1, 128], strides = [1, 1]} : vector<72x128xf32> to vector<1x128xf32>
      %1225 = vector.broadcast %1224 : vector<1x128xf32> to vector<8x128xf32>
      %1226 = arith.mulf %1223, %1225 : vector<8x128xf32>
      %1227 = arith.mulf %1226, %1123 : vector<8x128xf32>
      %1228 = arith.addf %1220, %1227 : vector<8x128xf32>
      %1229 = vector.extract_strided_slice %1095 {offsets = [1, 0], sizes = [1, 128], strides = [1, 1]} : vector<72x128xf32> to vector<1x128xf32>
      %1230 = vector.broadcast %1229 : vector<1x128xf32> to vector<8x128xf32>
      %1231 = arith.subf %1093, %1230 : vector<8x128xf32>
      %1232 = vector.extract_strided_slice %1095 {offsets = [13, 0], sizes = [1, 128], strides = [1, 1]} : vector<72x128xf32> to vector<1x128xf32>
      %1233 = vector.broadcast %1232 : vector<1x128xf32> to vector<8x128xf32>
      %1234 = arith.mulf %1231, %1233 : vector<8x128xf32>
      %1235 = arith.mulf %1234, %1123 : vector<8x128xf32>
      %1236 = vector.extract_strided_slice %1095 {offsets = [3, 0], sizes = [1, 128], strides = [1, 1]} : vector<72x128xf32> to vector<1x128xf32>
      %1237 = vector.broadcast %1236 : vector<1x128xf32> to vector<8x128xf32>
      %1238 = arith.subf %1237, %1093 : vector<8x128xf32>
      %1239 = vector.extract_strided_slice %1095 {offsets = [43, 0], sizes = [1, 128], strides = [1, 1]} : vector<72x128xf32> to vector<1x128xf32>
      %1240 = vector.broadcast %1239 : vector<1x128xf32> to vector<8x128xf32>
      %1241 = arith.mulf %1238, %1240 : vector<8x128xf32>
      %1242 = arith.mulf %1241, %1133 : vector<8x128xf32>
      %1243 = arith.addf %1235, %1242 : vector<8x128xf32>
      %1244 = vector.extract_strided_slice %1095 {offsets = [2, 0], sizes = [1, 128], strides = [1, 1]} : vector<72x128xf32> to vector<1x128xf32>
      %1245 = vector.broadcast %1244 : vector<1x128xf32> to vector<8x128xf32>
      %1246 = arith.subf %1093, %1245 : vector<8x128xf32>
      %1247 = vector.extract_strided_slice %1095 {offsets = [14, 0], sizes = [1, 128], strides = [1, 1]} : vector<72x128xf32> to vector<1x128xf32>
      %1248 = vector.broadcast %1247 : vector<1x128xf32> to vector<8x128xf32>
      %1249 = arith.mulf %1246, %1248 : vector<8x128xf32>
      %1250 = arith.mulf %1249, %1133 : vector<8x128xf32>
      %1251 = vector.extract_strided_slice %1095 {offsets = [4, 0], sizes = [1, 128], strides = [1, 1]} : vector<72x128xf32> to vector<1x128xf32>
      %1252 = vector.broadcast %1251 : vector<1x128xf32> to vector<8x128xf32>
      %1253 = arith.subf %1252, %1093 : vector<8x128xf32>
      %1254 = vector.extract_strided_slice %1095 {offsets = [44, 0], sizes = [1, 128], strides = [1, 1]} : vector<72x128xf32> to vector<1x128xf32>
      %1255 = vector.broadcast %1254 : vector<1x128xf32> to vector<8x128xf32>
      %1256 = arith.mulf %1253, %1255 : vector<8x128xf32>
      %1257 = arith.mulf %1256, %1143 : vector<8x128xf32>
      %1258 = arith.addf %1250, %1257 : vector<8x128xf32>
      %1259 = vector.extract_strided_slice %1095 {offsets = [3, 0], sizes = [1, 128], strides = [1, 1]} : vector<72x128xf32> to vector<1x128xf32>
      %1260 = vector.broadcast %1259 : vector<1x128xf32> to vector<8x128xf32>
      %1261 = arith.subf %1093, %1260 : vector<8x128xf32>
      %1262 = vector.extract_strided_slice %1095 {offsets = [15, 0], sizes = [1, 128], strides = [1, 1]} : vector<72x128xf32> to vector<1x128xf32>
      %1263 = vector.broadcast %1262 : vector<1x128xf32> to vector<8x128xf32>
      %1264 = arith.mulf %1261, %1263 : vector<8x128xf32>
      %1265 = arith.mulf %1264, %1143 : vector<8x128xf32>
      %1266 = vector.extract_strided_slice %1095 {offsets = [5, 0], sizes = [1, 128], strides = [1, 1]} : vector<72x128xf32> to vector<1x128xf32>
      %1267 = vector.broadcast %1266 : vector<1x128xf32> to vector<8x128xf32>
      %1268 = arith.subf %1267, %1093 : vector<8x128xf32>
      %1269 = vector.extract_strided_slice %1095 {offsets = [45, 0], sizes = [1, 128], strides = [1, 1]} : vector<72x128xf32> to vector<1x128xf32>
      %1270 = vector.broadcast %1269 : vector<1x128xf32> to vector<8x128xf32>
      %1271 = arith.mulf %1268, %1270 : vector<8x128xf32>
      %1272 = arith.mulf %1271, %1153 : vector<8x128xf32>
      %1273 = arith.addf %1265, %1272 : vector<8x128xf32>
      %1274 = vector.extract_strided_slice %1095 {offsets = [4, 0], sizes = [1, 128], strides = [1, 1]} : vector<72x128xf32> to vector<1x128xf32>
      %1275 = vector.broadcast %1274 : vector<1x128xf32> to vector<8x128xf32>
      %1276 = arith.subf %1093, %1275 : vector<8x128xf32>
      %1277 = vector.extract_strided_slice %1095 {offsets = [16, 0], sizes = [1, 128], strides = [1, 1]} : vector<72x128xf32> to vector<1x128xf32>
      %1278 = vector.broadcast %1277 : vector<1x128xf32> to vector<8x128xf32>
      %1279 = arith.mulf %1276, %1278 : vector<8x128xf32>
      %1280 = arith.mulf %1279, %1153 : vector<8x128xf32>
      %1281 = vector.extract_strided_slice %1095 {offsets = [6, 0], sizes = [1, 128], strides = [1, 1]} : vector<72x128xf32> to vector<1x128xf32>
      %1282 = vector.broadcast %1281 : vector<1x128xf32> to vector<8x128xf32>
      %1283 = arith.subf %1282, %1093 : vector<8x128xf32>
      %1284 = vector.extract_strided_slice %1095 {offsets = [46, 0], sizes = [1, 128], strides = [1, 1]} : vector<72x128xf32> to vector<1x128xf32>
      %1285 = vector.broadcast %1284 : vector<1x128xf32> to vector<8x128xf32>
      %1286 = arith.mulf %1283, %1285 : vector<8x128xf32>
      %1287 = arith.mulf %1286, %1163 : vector<8x128xf32>
      %1288 = arith.addf %1280, %1287 : vector<8x128xf32>
      %1289 = vector.extract_strided_slice %1095 {offsets = [5, 0], sizes = [1, 128], strides = [1, 1]} : vector<72x128xf32> to vector<1x128xf32>
      %1290 = vector.broadcast %1289 : vector<1x128xf32> to vector<8x128xf32>
      %1291 = arith.subf %1093, %1290 : vector<8x128xf32>
      %1292 = vector.extract_strided_slice %1095 {offsets = [17, 0], sizes = [1, 128], strides = [1, 1]} : vector<72x128xf32> to vector<1x128xf32>
      %1293 = vector.broadcast %1292 : vector<1x128xf32> to vector<8x128xf32>
      %1294 = arith.mulf %1291, %1293 : vector<8x128xf32>
      %1295 = arith.mulf %1294, %1163 : vector<8x128xf32>
      %1296 = vector.extract_strided_slice %1095 {offsets = [7, 0], sizes = [1, 128], strides = [1, 1]} : vector<72x128xf32> to vector<1x128xf32>
      %1297 = vector.broadcast %1296 : vector<1x128xf32> to vector<8x128xf32>
      %1298 = arith.subf %1297, %1093 : vector<8x128xf32>
      %1299 = vector.extract_strided_slice %1095 {offsets = [47, 0], sizes = [1, 128], strides = [1, 1]} : vector<72x128xf32> to vector<1x128xf32>
      %1300 = vector.broadcast %1299 : vector<1x128xf32> to vector<8x128xf32>
      %1301 = arith.mulf %1298, %1300 : vector<8x128xf32>
      %1302 = arith.mulf %1301, %1173 : vector<8x128xf32>
      %1303 = arith.addf %1295, %1302 : vector<8x128xf32>
      %1304 = vector.extract_strided_slice %1095 {offsets = [6, 0], sizes = [1, 128], strides = [1, 1]} : vector<72x128xf32> to vector<1x128xf32>
      %1305 = vector.broadcast %1304 : vector<1x128xf32> to vector<8x128xf32>
      %1306 = arith.subf %1093, %1305 : vector<8x128xf32>
      %1307 = vector.extract_strided_slice %1095 {offsets = [18, 0], sizes = [1, 128], strides = [1, 1]} : vector<72x128xf32> to vector<1x128xf32>
      %1308 = vector.broadcast %1307 : vector<1x128xf32> to vector<8x128xf32>
      %1309 = arith.mulf %1306, %1308 : vector<8x128xf32>
      %1310 = arith.mulf %1309, %1173 : vector<8x128xf32>
      %1311 = vector.extract_strided_slice %1095 {offsets = [8, 0], sizes = [1, 128], strides = [1, 1]} : vector<72x128xf32> to vector<1x128xf32>
      %1312 = vector.broadcast %1311 : vector<1x128xf32> to vector<8x128xf32>
      %1313 = arith.subf %1312, %1093 : vector<8x128xf32>
      %1314 = vector.extract_strided_slice %1095 {offsets = [48, 0], sizes = [1, 128], strides = [1, 1]} : vector<72x128xf32> to vector<1x128xf32>
      %1315 = vector.broadcast %1314 : vector<1x128xf32> to vector<8x128xf32>
      %1316 = arith.mulf %1313, %1315 : vector<8x128xf32>
      %1317 = arith.mulf %1316, %1183 : vector<8x128xf32>
      %1318 = arith.addf %1310, %1317 : vector<8x128xf32>
      %1319 = vector.extract_strided_slice %1095 {offsets = [7, 0], sizes = [1, 128], strides = [1, 1]} : vector<72x128xf32> to vector<1x128xf32>
      %1320 = vector.broadcast %1319 : vector<1x128xf32> to vector<8x128xf32>
      %1321 = arith.subf %1093, %1320 : vector<8x128xf32>
      %1322 = vector.extract_strided_slice %1095 {offsets = [19, 0], sizes = [1, 128], strides = [1, 1]} : vector<72x128xf32> to vector<1x128xf32>
      %1323 = vector.broadcast %1322 : vector<1x128xf32> to vector<8x128xf32>
      %1324 = arith.mulf %1321, %1323 : vector<8x128xf32>
      %1325 = arith.mulf %1324, %1183 : vector<8x128xf32>
      %1326 = vector.extract_strided_slice %1095 {offsets = [9, 0], sizes = [1, 128], strides = [1, 1]} : vector<72x128xf32> to vector<1x128xf32>
      %1327 = vector.broadcast %1326 : vector<1x128xf32> to vector<8x128xf32>
      %1328 = arith.subf %1327, %1093 : vector<8x128xf32>
      %1329 = vector.extract_strided_slice %1095 {offsets = [49, 0], sizes = [1, 128], strides = [1, 1]} : vector<72x128xf32> to vector<1x128xf32>
      %1330 = vector.broadcast %1329 : vector<1x128xf32> to vector<8x128xf32>
      %1331 = arith.mulf %1328, %1330 : vector<8x128xf32>
      %1332 = arith.mulf %1331, %1193 : vector<8x128xf32>
      %1333 = arith.addf %1325, %1332 : vector<8x128xf32>
      %1334 = vector.extract_strided_slice %1095 {offsets = [8, 0], sizes = [1, 128], strides = [1, 1]} : vector<72x128xf32> to vector<1x128xf32>
      %1335 = vector.broadcast %1334 : vector<1x128xf32> to vector<8x128xf32>
      %1336 = arith.subf %1093, %1335 : vector<8x128xf32>
      %1337 = vector.extract_strided_slice %1095 {offsets = [20, 0], sizes = [1, 128], strides = [1, 1]} : vector<72x128xf32> to vector<1x128xf32>
      %1338 = vector.broadcast %1337 : vector<1x128xf32> to vector<8x128xf32>
      %1339 = arith.mulf %1336, %1338 : vector<8x128xf32>
      %1340 = arith.mulf %1339, %1193 : vector<8x128xf32>
      %1341 = vector.extract_strided_slice %1095 {offsets = [10, 0], sizes = [1, 128], strides = [1, 1]} : vector<72x128xf32> to vector<1x128xf32>
      %1342 = vector.broadcast %1341 : vector<1x128xf32> to vector<8x128xf32>
      %1343 = arith.subf %1342, %1093 : vector<8x128xf32>
      %1344 = vector.extract_strided_slice %1095 {offsets = [50, 0], sizes = [1, 128], strides = [1, 1]} : vector<72x128xf32> to vector<1x128xf32>
      %1345 = vector.broadcast %1344 : vector<1x128xf32> to vector<8x128xf32>
      %1346 = arith.mulf %1343, %1345 : vector<8x128xf32>
      %1347 = arith.mulf %1346, %1203 : vector<8x128xf32>
      %1348 = arith.addf %1340, %1347 : vector<8x128xf32>
      %1349 = vector.extract_strided_slice %1095 {offsets = [9, 0], sizes = [1, 128], strides = [1, 1]} : vector<72x128xf32> to vector<1x128xf32>
      %1350 = vector.broadcast %1349 : vector<1x128xf32> to vector<8x128xf32>
      %1351 = arith.subf %1093, %1350 : vector<8x128xf32>
      %1352 = vector.extract_strided_slice %1095 {offsets = [21, 0], sizes = [1, 128], strides = [1, 1]} : vector<72x128xf32> to vector<1x128xf32>
      %1353 = vector.broadcast %1352 : vector<1x128xf32> to vector<8x128xf32>
      %1354 = arith.mulf %1351, %1353 : vector<8x128xf32>
      %1355 = arith.mulf %1354, %1203 : vector<8x128xf32>
      %1356 = vector.extract_strided_slice %1095 {offsets = [11, 0], sizes = [1, 128], strides = [1, 1]} : vector<72x128xf32> to vector<1x128xf32>
      %1357 = vector.broadcast %1356 : vector<1x128xf32> to vector<8x128xf32>
      %1358 = arith.subf %1357, %1093 : vector<8x128xf32>
      %1359 = vector.extract_strided_slice %1095 {offsets = [51, 0], sizes = [1, 128], strides = [1, 1]} : vector<72x128xf32> to vector<1x128xf32>
      %1360 = vector.broadcast %1359 : vector<1x128xf32> to vector<8x128xf32>
      %1361 = arith.mulf %1358, %1360 : vector<8x128xf32>
      %1362 = arith.mulf %1361, %1213 : vector<8x128xf32>
      %1363 = arith.addf %1355, %1362 : vector<8x128xf32>
      %1364 = vector.extract_strided_slice %1095 {offsets = [0, 0], sizes = [1, 128], strides = [1, 1]} : vector<72x128xf32> to vector<1x128xf32>
      %1365 = vector.broadcast %1364 : vector<1x128xf32> to vector<8x128xf32>
      %1366 = arith.subf %1093, %1365 : vector<8x128xf32>
      %1367 = vector.extract_strided_slice %1095 {offsets = [22, 0], sizes = [1, 128], strides = [1, 1]} : vector<72x128xf32> to vector<1x128xf32>
      %1368 = vector.broadcast %1367 : vector<1x128xf32> to vector<8x128xf32>
      %1369 = arith.mulf %1366, %1368 : vector<8x128xf32>
      %1370 = arith.mulf %1369, %1228 : vector<8x128xf32>
      %1371 = vector.extract_strided_slice %1095 {offsets = [3, 0], sizes = [1, 128], strides = [1, 1]} : vector<72x128xf32> to vector<1x128xf32>
      %1372 = vector.broadcast %1371 : vector<1x128xf32> to vector<8x128xf32>
      %1373 = arith.subf %1372, %1093 : vector<8x128xf32>
      %1374 = vector.extract_strided_slice %1095 {offsets = [52, 0], sizes = [1, 128], strides = [1, 1]} : vector<72x128xf32> to vector<1x128xf32>
      %1375 = vector.broadcast %1374 : vector<1x128xf32> to vector<8x128xf32>
      %1376 = arith.mulf %1373, %1375 : vector<8x128xf32>
      %1377 = arith.mulf %1376, %1243 : vector<8x128xf32>
      %1378 = arith.addf %1370, %1377 : vector<8x128xf32>
      %1379 = vector.extract_strided_slice %1095 {offsets = [1, 0], sizes = [1, 128], strides = [1, 1]} : vector<72x128xf32> to vector<1x128xf32>
      %1380 = vector.broadcast %1379 : vector<1x128xf32> to vector<8x128xf32>
      %1381 = arith.subf %1093, %1380 : vector<8x128xf32>
      %1382 = vector.extract_strided_slice %1095 {offsets = [23, 0], sizes = [1, 128], strides = [1, 1]} : vector<72x128xf32> to vector<1x128xf32>
      %1383 = vector.broadcast %1382 : vector<1x128xf32> to vector<8x128xf32>
      %1384 = arith.mulf %1381, %1383 : vector<8x128xf32>
      %1385 = arith.mulf %1384, %1243 : vector<8x128xf32>
      %1386 = vector.extract_strided_slice %1095 {offsets = [4, 0], sizes = [1, 128], strides = [1, 1]} : vector<72x128xf32> to vector<1x128xf32>
      %1387 = vector.broadcast %1386 : vector<1x128xf32> to vector<8x128xf32>
      %1388 = arith.subf %1387, %1093 : vector<8x128xf32>
      %1389 = vector.extract_strided_slice %1095 {offsets = [53, 0], sizes = [1, 128], strides = [1, 1]} : vector<72x128xf32> to vector<1x128xf32>
      %1390 = vector.broadcast %1389 : vector<1x128xf32> to vector<8x128xf32>
      %1391 = arith.mulf %1388, %1390 : vector<8x128xf32>
      %1392 = arith.mulf %1391, %1258 : vector<8x128xf32>
      %1393 = arith.addf %1385, %1392 : vector<8x128xf32>
      %1394 = vector.extract_strided_slice %1095 {offsets = [2, 0], sizes = [1, 128], strides = [1, 1]} : vector<72x128xf32> to vector<1x128xf32>
      %1395 = vector.broadcast %1394 : vector<1x128xf32> to vector<8x128xf32>
      %1396 = arith.subf %1093, %1395 : vector<8x128xf32>
      %1397 = vector.extract_strided_slice %1095 {offsets = [24, 0], sizes = [1, 128], strides = [1, 1]} : vector<72x128xf32> to vector<1x128xf32>
      %1398 = vector.broadcast %1397 : vector<1x128xf32> to vector<8x128xf32>
      %1399 = arith.mulf %1396, %1398 : vector<8x128xf32>
      %1400 = arith.mulf %1399, %1258 : vector<8x128xf32>
      %1401 = vector.extract_strided_slice %1095 {offsets = [5, 0], sizes = [1, 128], strides = [1, 1]} : vector<72x128xf32> to vector<1x128xf32>
      %1402 = vector.broadcast %1401 : vector<1x128xf32> to vector<8x128xf32>
      %1403 = arith.subf %1402, %1093 : vector<8x128xf32>
      %1404 = vector.extract_strided_slice %1095 {offsets = [54, 0], sizes = [1, 128], strides = [1, 1]} : vector<72x128xf32> to vector<1x128xf32>
      %1405 = vector.broadcast %1404 : vector<1x128xf32> to vector<8x128xf32>
      %1406 = arith.mulf %1403, %1405 : vector<8x128xf32>
      %1407 = arith.mulf %1406, %1273 : vector<8x128xf32>
      %1408 = arith.addf %1400, %1407 : vector<8x128xf32>
      %1409 = vector.extract_strided_slice %1095 {offsets = [3, 0], sizes = [1, 128], strides = [1, 1]} : vector<72x128xf32> to vector<1x128xf32>
      %1410 = vector.broadcast %1409 : vector<1x128xf32> to vector<8x128xf32>
      %1411 = arith.subf %1093, %1410 : vector<8x128xf32>
      %1412 = vector.extract_strided_slice %1095 {offsets = [25, 0], sizes = [1, 128], strides = [1, 1]} : vector<72x128xf32> to vector<1x128xf32>
      %1413 = vector.broadcast %1412 : vector<1x128xf32> to vector<8x128xf32>
      %1414 = arith.mulf %1411, %1413 : vector<8x128xf32>
      %1415 = arith.mulf %1414, %1273 : vector<8x128xf32>
      %1416 = vector.extract_strided_slice %1095 {offsets = [6, 0], sizes = [1, 128], strides = [1, 1]} : vector<72x128xf32> to vector<1x128xf32>
      %1417 = vector.broadcast %1416 : vector<1x128xf32> to vector<8x128xf32>
      %1418 = arith.subf %1417, %1093 : vector<8x128xf32>
      %1419 = vector.extract_strided_slice %1095 {offsets = [55, 0], sizes = [1, 128], strides = [1, 1]} : vector<72x128xf32> to vector<1x128xf32>
      %1420 = vector.broadcast %1419 : vector<1x128xf32> to vector<8x128xf32>
      %1421 = arith.mulf %1418, %1420 : vector<8x128xf32>
      %1422 = arith.mulf %1421, %1288 : vector<8x128xf32>
      %1423 = arith.addf %1415, %1422 : vector<8x128xf32>
      %1424 = vector.extract_strided_slice %1095 {offsets = [4, 0], sizes = [1, 128], strides = [1, 1]} : vector<72x128xf32> to vector<1x128xf32>
      %1425 = vector.broadcast %1424 : vector<1x128xf32> to vector<8x128xf32>
      %1426 = arith.subf %1093, %1425 : vector<8x128xf32>
      %1427 = vector.extract_strided_slice %1095 {offsets = [26, 0], sizes = [1, 128], strides = [1, 1]} : vector<72x128xf32> to vector<1x128xf32>
      %1428 = vector.broadcast %1427 : vector<1x128xf32> to vector<8x128xf32>
      %1429 = arith.mulf %1426, %1428 : vector<8x128xf32>
      %1430 = arith.mulf %1429, %1288 : vector<8x128xf32>
      %1431 = vector.extract_strided_slice %1095 {offsets = [7, 0], sizes = [1, 128], strides = [1, 1]} : vector<72x128xf32> to vector<1x128xf32>
      %1432 = vector.broadcast %1431 : vector<1x128xf32> to vector<8x128xf32>
      %1433 = arith.subf %1432, %1093 : vector<8x128xf32>
      %1434 = vector.extract_strided_slice %1095 {offsets = [56, 0], sizes = [1, 128], strides = [1, 1]} : vector<72x128xf32> to vector<1x128xf32>
      %1435 = vector.broadcast %1434 : vector<1x128xf32> to vector<8x128xf32>
      %1436 = arith.mulf %1433, %1435 : vector<8x128xf32>
      %1437 = arith.mulf %1436, %1303 : vector<8x128xf32>
      %1438 = arith.addf %1430, %1437 : vector<8x128xf32>
      %1439 = vector.extract_strided_slice %1095 {offsets = [5, 0], sizes = [1, 128], strides = [1, 1]} : vector<72x128xf32> to vector<1x128xf32>
      %1440 = vector.broadcast %1439 : vector<1x128xf32> to vector<8x128xf32>
      %1441 = arith.subf %1093, %1440 : vector<8x128xf32>
      %1442 = vector.extract_strided_slice %1095 {offsets = [27, 0], sizes = [1, 128], strides = [1, 1]} : vector<72x128xf32> to vector<1x128xf32>
      %1443 = vector.broadcast %1442 : vector<1x128xf32> to vector<8x128xf32>
      %1444 = arith.mulf %1441, %1443 : vector<8x128xf32>
      %1445 = arith.mulf %1444, %1303 : vector<8x128xf32>
      %1446 = vector.extract_strided_slice %1095 {offsets = [8, 0], sizes = [1, 128], strides = [1, 1]} : vector<72x128xf32> to vector<1x128xf32>
      %1447 = vector.broadcast %1446 : vector<1x128xf32> to vector<8x128xf32>
      %1448 = arith.subf %1447, %1093 : vector<8x128xf32>
      %1449 = vector.extract_strided_slice %1095 {offsets = [57, 0], sizes = [1, 128], strides = [1, 1]} : vector<72x128xf32> to vector<1x128xf32>
      %1450 = vector.broadcast %1449 : vector<1x128xf32> to vector<8x128xf32>
      %1451 = arith.mulf %1448, %1450 : vector<8x128xf32>
      %1452 = arith.mulf %1451, %1318 : vector<8x128xf32>
      %1453 = arith.addf %1445, %1452 : vector<8x128xf32>
      %1454 = vector.extract_strided_slice %1095 {offsets = [6, 0], sizes = [1, 128], strides = [1, 1]} : vector<72x128xf32> to vector<1x128xf32>
      %1455 = vector.broadcast %1454 : vector<1x128xf32> to vector<8x128xf32>
      %1456 = arith.subf %1093, %1455 : vector<8x128xf32>
      %1457 = vector.extract_strided_slice %1095 {offsets = [28, 0], sizes = [1, 128], strides = [1, 1]} : vector<72x128xf32> to vector<1x128xf32>
      %1458 = vector.broadcast %1457 : vector<1x128xf32> to vector<8x128xf32>
      %1459 = arith.mulf %1456, %1458 : vector<8x128xf32>
      %1460 = arith.mulf %1459, %1318 : vector<8x128xf32>
      %1461 = vector.extract_strided_slice %1095 {offsets = [9, 0], sizes = [1, 128], strides = [1, 1]} : vector<72x128xf32> to vector<1x128xf32>
      %1462 = vector.broadcast %1461 : vector<1x128xf32> to vector<8x128xf32>
      %1463 = arith.subf %1462, %1093 : vector<8x128xf32>
      %1464 = vector.extract_strided_slice %1095 {offsets = [58, 0], sizes = [1, 128], strides = [1, 1]} : vector<72x128xf32> to vector<1x128xf32>
      %1465 = vector.broadcast %1464 : vector<1x128xf32> to vector<8x128xf32>
      %1466 = arith.mulf %1463, %1465 : vector<8x128xf32>
      %1467 = arith.mulf %1466, %1333 : vector<8x128xf32>
      %1468 = arith.addf %1460, %1467 : vector<8x128xf32>
      %1469 = vector.extract_strided_slice %1095 {offsets = [7, 0], sizes = [1, 128], strides = [1, 1]} : vector<72x128xf32> to vector<1x128xf32>
      %1470 = vector.broadcast %1469 : vector<1x128xf32> to vector<8x128xf32>
      %1471 = arith.subf %1093, %1470 : vector<8x128xf32>
      %1472 = vector.extract_strided_slice %1095 {offsets = [29, 0], sizes = [1, 128], strides = [1, 1]} : vector<72x128xf32> to vector<1x128xf32>
      %1473 = vector.broadcast %1472 : vector<1x128xf32> to vector<8x128xf32>
      %1474 = arith.mulf %1471, %1473 : vector<8x128xf32>
      %1475 = arith.mulf %1474, %1333 : vector<8x128xf32>
      %1476 = vector.extract_strided_slice %1095 {offsets = [10, 0], sizes = [1, 128], strides = [1, 1]} : vector<72x128xf32> to vector<1x128xf32>
      %1477 = vector.broadcast %1476 : vector<1x128xf32> to vector<8x128xf32>
      %1478 = arith.subf %1477, %1093 : vector<8x128xf32>
      %1479 = vector.extract_strided_slice %1095 {offsets = [59, 0], sizes = [1, 128], strides = [1, 1]} : vector<72x128xf32> to vector<1x128xf32>
      %1480 = vector.broadcast %1479 : vector<1x128xf32> to vector<8x128xf32>
      %1481 = arith.mulf %1478, %1480 : vector<8x128xf32>
      %1482 = arith.mulf %1481, %1348 : vector<8x128xf32>
      %1483 = arith.addf %1475, %1482 : vector<8x128xf32>
      %1484 = vector.extract_strided_slice %1095 {offsets = [8, 0], sizes = [1, 128], strides = [1, 1]} : vector<72x128xf32> to vector<1x128xf32>
      %1485 = vector.broadcast %1484 : vector<1x128xf32> to vector<8x128xf32>
      %1486 = arith.subf %1093, %1485 : vector<8x128xf32>
      %1487 = vector.extract_strided_slice %1095 {offsets = [30, 0], sizes = [1, 128], strides = [1, 1]} : vector<72x128xf32> to vector<1x128xf32>
      %1488 = vector.broadcast %1487 : vector<1x128xf32> to vector<8x128xf32>
      %1489 = arith.mulf %1486, %1488 : vector<8x128xf32>
      %1490 = arith.mulf %1489, %1348 : vector<8x128xf32>
      %1491 = vector.extract_strided_slice %1095 {offsets = [11, 0], sizes = [1, 128], strides = [1, 1]} : vector<72x128xf32> to vector<1x128xf32>
      %1492 = vector.broadcast %1491 : vector<1x128xf32> to vector<8x128xf32>
      %1493 = arith.subf %1492, %1093 : vector<8x128xf32>
      %1494 = vector.extract_strided_slice %1095 {offsets = [60, 0], sizes = [1, 128], strides = [1, 1]} : vector<72x128xf32> to vector<1x128xf32>
      %1495 = vector.broadcast %1494 : vector<1x128xf32> to vector<8x128xf32>
      %1496 = arith.mulf %1493, %1495 : vector<8x128xf32>
      %1497 = arith.mulf %1496, %1363 : vector<8x128xf32>
      %1498 = arith.addf %1490, %1497 : vector<8x128xf32>
      %1499 = vector.extract_strided_slice %1095 {offsets = [0, 0], sizes = [1, 128], strides = [1, 1]} : vector<72x128xf32> to vector<1x128xf32>
      %1500 = vector.broadcast %1499 : vector<1x128xf32> to vector<8x128xf32>
      %1501 = arith.subf %1093, %1500 : vector<8x128xf32>
      %1502 = vector.extract_strided_slice %1095 {offsets = [32, 0], sizes = [1, 128], strides = [1, 1]} : vector<72x128xf32> to vector<1x128xf32>
      %1503 = vector.broadcast %1502 : vector<1x128xf32> to vector<8x128xf32>
      %1504 = arith.mulf %1501, %1503 : vector<8x128xf32>
      %1505 = arith.mulf %1504, %1378 : vector<8x128xf32>
      %1506 = vector.extract_strided_slice %1095 {offsets = [4, 0], sizes = [1, 128], strides = [1, 1]} : vector<72x128xf32> to vector<1x128xf32>
      %1507 = vector.broadcast %1506 : vector<1x128xf32> to vector<8x128xf32>
      %1508 = arith.subf %1507, %1093 : vector<8x128xf32>
      %1509 = vector.extract_strided_slice %1095 {offsets = [62, 0], sizes = [1, 128], strides = [1, 1]} : vector<72x128xf32> to vector<1x128xf32>
      %1510 = vector.broadcast %1509 : vector<1x128xf32> to vector<8x128xf32>
      %1511 = arith.mulf %1508, %1510 : vector<8x128xf32>
      %1512 = arith.mulf %1511, %1393 : vector<8x128xf32>
      %1513 = arith.addf %1505, %1512 : vector<8x128xf32>
      %1514 = vector.extract_strided_slice %1095 {offsets = [1, 0], sizes = [1, 128], strides = [1, 1]} : vector<72x128xf32> to vector<1x128xf32>
      %1515 = vector.broadcast %1514 : vector<1x128xf32> to vector<8x128xf32>
      %1516 = arith.subf %1093, %1515 : vector<8x128xf32>
      %1517 = vector.extract_strided_slice %1095 {offsets = [33, 0], sizes = [1, 128], strides = [1, 1]} : vector<72x128xf32> to vector<1x128xf32>
      %1518 = vector.broadcast %1517 : vector<1x128xf32> to vector<8x128xf32>
      %1519 = arith.mulf %1516, %1518 : vector<8x128xf32>
      %1520 = arith.mulf %1519, %1393 : vector<8x128xf32>
      %1521 = vector.extract_strided_slice %1095 {offsets = [5, 0], sizes = [1, 128], strides = [1, 1]} : vector<72x128xf32> to vector<1x128xf32>
      %1522 = vector.broadcast %1521 : vector<1x128xf32> to vector<8x128xf32>
      %1523 = arith.subf %1522, %1093 : vector<8x128xf32>
      %1524 = vector.extract_strided_slice %1095 {offsets = [63, 0], sizes = [1, 128], strides = [1, 1]} : vector<72x128xf32> to vector<1x128xf32>
      %1525 = vector.broadcast %1524 : vector<1x128xf32> to vector<8x128xf32>
      %1526 = arith.mulf %1523, %1525 : vector<8x128xf32>
      %1527 = arith.mulf %1526, %1408 : vector<8x128xf32>
      %1528 = arith.addf %1520, %1527 : vector<8x128xf32>
      %1529 = vector.extract_strided_slice %1095 {offsets = [2, 0], sizes = [1, 128], strides = [1, 1]} : vector<72x128xf32> to vector<1x128xf32>
      %1530 = vector.broadcast %1529 : vector<1x128xf32> to vector<8x128xf32>
      %1531 = arith.subf %1093, %1530 : vector<8x128xf32>
      %1532 = vector.extract_strided_slice %1095 {offsets = [34, 0], sizes = [1, 128], strides = [1, 1]} : vector<72x128xf32> to vector<1x128xf32>
      %1533 = vector.broadcast %1532 : vector<1x128xf32> to vector<8x128xf32>
      %1534 = arith.mulf %1531, %1533 : vector<8x128xf32>
      %1535 = arith.mulf %1534, %1408 : vector<8x128xf32>
      %1536 = vector.extract_strided_slice %1095 {offsets = [6, 0], sizes = [1, 128], strides = [1, 1]} : vector<72x128xf32> to vector<1x128xf32>
      %1537 = vector.broadcast %1536 : vector<1x128xf32> to vector<8x128xf32>
      %1538 = arith.subf %1537, %1093 : vector<8x128xf32>
      %1539 = vector.extract_strided_slice %1095 {offsets = [64, 0], sizes = [1, 128], strides = [1, 1]} : vector<72x128xf32> to vector<1x128xf32>
      %1540 = vector.broadcast %1539 : vector<1x128xf32> to vector<8x128xf32>
      %1541 = arith.mulf %1538, %1540 : vector<8x128xf32>
      %1542 = arith.mulf %1541, %1423 : vector<8x128xf32>
      %1543 = arith.addf %1535, %1542 : vector<8x128xf32>
      %1544 = vector.extract_strided_slice %1095 {offsets = [3, 0], sizes = [1, 128], strides = [1, 1]} : vector<72x128xf32> to vector<1x128xf32>
      %1545 = vector.broadcast %1544 : vector<1x128xf32> to vector<8x128xf32>
      %1546 = arith.subf %1093, %1545 : vector<8x128xf32>
      %1547 = vector.extract_strided_slice %1095 {offsets = [35, 0], sizes = [1, 128], strides = [1, 1]} : vector<72x128xf32> to vector<1x128xf32>
      %1548 = vector.broadcast %1547 : vector<1x128xf32> to vector<8x128xf32>
      %1549 = arith.mulf %1546, %1548 : vector<8x128xf32>
      %1550 = arith.mulf %1549, %1423 : vector<8x128xf32>
      %1551 = vector.extract_strided_slice %1095 {offsets = [7, 0], sizes = [1, 128], strides = [1, 1]} : vector<72x128xf32> to vector<1x128xf32>
      %1552 = vector.broadcast %1551 : vector<1x128xf32> to vector<8x128xf32>
      %1553 = arith.subf %1552, %1093 : vector<8x128xf32>
      %1554 = vector.extract_strided_slice %1095 {offsets = [65, 0], sizes = [1, 128], strides = [1, 1]} : vector<72x128xf32> to vector<1x128xf32>
      %1555 = vector.broadcast %1554 : vector<1x128xf32> to vector<8x128xf32>
      %1556 = arith.mulf %1553, %1555 : vector<8x128xf32>
      %1557 = arith.mulf %1556, %1438 : vector<8x128xf32>
      %1558 = arith.addf %1550, %1557 : vector<8x128xf32>
      %1559 = vector.extract_strided_slice %1095 {offsets = [4, 0], sizes = [1, 128], strides = [1, 1]} : vector<72x128xf32> to vector<1x128xf32>
      %1560 = vector.broadcast %1559 : vector<1x128xf32> to vector<8x128xf32>
      %1561 = arith.subf %1093, %1560 : vector<8x128xf32>
      %1562 = vector.extract_strided_slice %1095 {offsets = [36, 0], sizes = [1, 128], strides = [1, 1]} : vector<72x128xf32> to vector<1x128xf32>
      %1563 = vector.broadcast %1562 : vector<1x128xf32> to vector<8x128xf32>
      %1564 = arith.mulf %1561, %1563 : vector<8x128xf32>
      %1565 = arith.mulf %1564, %1438 : vector<8x128xf32>
      %1566 = vector.extract_strided_slice %1095 {offsets = [8, 0], sizes = [1, 128], strides = [1, 1]} : vector<72x128xf32> to vector<1x128xf32>
      %1567 = vector.broadcast %1566 : vector<1x128xf32> to vector<8x128xf32>
      %1568 = arith.subf %1567, %1093 : vector<8x128xf32>
      %1569 = vector.extract_strided_slice %1095 {offsets = [66, 0], sizes = [1, 128], strides = [1, 1]} : vector<72x128xf32> to vector<1x128xf32>
      %1570 = vector.broadcast %1569 : vector<1x128xf32> to vector<8x128xf32>
      %1571 = arith.mulf %1568, %1570 : vector<8x128xf32>
      %1572 = arith.mulf %1571, %1453 : vector<8x128xf32>
      %1573 = arith.addf %1565, %1572 : vector<8x128xf32>
      %1574 = vector.extract_strided_slice %1095 {offsets = [5, 0], sizes = [1, 128], strides = [1, 1]} : vector<72x128xf32> to vector<1x128xf32>
      %1575 = vector.broadcast %1574 : vector<1x128xf32> to vector<8x128xf32>
      %1576 = arith.subf %1093, %1575 : vector<8x128xf32>
      %1577 = vector.extract_strided_slice %1095 {offsets = [37, 0], sizes = [1, 128], strides = [1, 1]} : vector<72x128xf32> to vector<1x128xf32>
      %1578 = vector.broadcast %1577 : vector<1x128xf32> to vector<8x128xf32>
      %1579 = arith.mulf %1576, %1578 : vector<8x128xf32>
      %1580 = arith.mulf %1579, %1453 : vector<8x128xf32>
      %1581 = vector.extract_strided_slice %1095 {offsets = [9, 0], sizes = [1, 128], strides = [1, 1]} : vector<72x128xf32> to vector<1x128xf32>
      %1582 = vector.broadcast %1581 : vector<1x128xf32> to vector<8x128xf32>
      %1583 = arith.subf %1582, %1093 : vector<8x128xf32>
      %1584 = vector.extract_strided_slice %1095 {offsets = [67, 0], sizes = [1, 128], strides = [1, 1]} : vector<72x128xf32> to vector<1x128xf32>
      %1585 = vector.broadcast %1584 : vector<1x128xf32> to vector<8x128xf32>
      %1586 = arith.mulf %1583, %1585 : vector<8x128xf32>
      %1587 = arith.mulf %1586, %1468 : vector<8x128xf32>
      %1588 = arith.addf %1580, %1587 : vector<8x128xf32>
      %1589 = vector.extract_strided_slice %1095 {offsets = [6, 0], sizes = [1, 128], strides = [1, 1]} : vector<72x128xf32> to vector<1x128xf32>
      %1590 = vector.broadcast %1589 : vector<1x128xf32> to vector<8x128xf32>
      %1591 = arith.subf %1093, %1590 : vector<8x128xf32>
      %1592 = vector.extract_strided_slice %1095 {offsets = [38, 0], sizes = [1, 128], strides = [1, 1]} : vector<72x128xf32> to vector<1x128xf32>
      %1593 = vector.broadcast %1592 : vector<1x128xf32> to vector<8x128xf32>
      %1594 = arith.mulf %1591, %1593 : vector<8x128xf32>
      %1595 = arith.mulf %1594, %1468 : vector<8x128xf32>
      %1596 = vector.extract_strided_slice %1095 {offsets = [10, 0], sizes = [1, 128], strides = [1, 1]} : vector<72x128xf32> to vector<1x128xf32>
      %1597 = vector.broadcast %1596 : vector<1x128xf32> to vector<8x128xf32>
      %1598 = arith.subf %1597, %1093 : vector<8x128xf32>
      %1599 = vector.extract_strided_slice %1095 {offsets = [68, 0], sizes = [1, 128], strides = [1, 1]} : vector<72x128xf32> to vector<1x128xf32>
      %1600 = vector.broadcast %1599 : vector<1x128xf32> to vector<8x128xf32>
      %1601 = arith.mulf %1598, %1600 : vector<8x128xf32>
      %1602 = arith.mulf %1601, %1483 : vector<8x128xf32>
      %1603 = arith.addf %1595, %1602 : vector<8x128xf32>
      %1604 = vector.extract_strided_slice %1095 {offsets = [7, 0], sizes = [1, 128], strides = [1, 1]} : vector<72x128xf32> to vector<1x128xf32>
      %1605 = vector.broadcast %1604 : vector<1x128xf32> to vector<8x128xf32>
      %1606 = arith.subf %1093, %1605 : vector<8x128xf32>
      %1607 = vector.extract_strided_slice %1095 {offsets = [39, 0], sizes = [1, 128], strides = [1, 1]} : vector<72x128xf32> to vector<1x128xf32>
      %1608 = vector.broadcast %1607 : vector<1x128xf32> to vector<8x128xf32>
      %1609 = arith.mulf %1606, %1608 : vector<8x128xf32>
      %1610 = arith.mulf %1609, %1483 : vector<8x128xf32>
      %1611 = vector.extract_strided_slice %1095 {offsets = [11, 0], sizes = [1, 128], strides = [1, 1]} : vector<72x128xf32> to vector<1x128xf32>
      %1612 = vector.broadcast %1611 : vector<1x128xf32> to vector<8x128xf32>
      %1613 = arith.subf %1612, %1093 : vector<8x128xf32>
      %1614 = vector.extract_strided_slice %1095 {offsets = [69, 0], sizes = [1, 128], strides = [1, 1]} : vector<72x128xf32> to vector<1x128xf32>
      %1615 = vector.broadcast %1614 : vector<1x128xf32> to vector<8x128xf32>
      %1616 = arith.mulf %1613, %1615 : vector<8x128xf32>
      %1617 = arith.mulf %1616, %1498 : vector<8x128xf32>
      %1618 = arith.addf %1610, %1617 : vector<8x128xf32>
      %1619 = arith.truncf %1103 : vector<8x128xf32> to vector<8x128xbf16>
      %1620 = vector.extract_strided_slice %1097 {offsets = [0, 0], sizes = [128, 128], strides = [1, 1]} : vector<1152x128xbf16> to vector<128x128xbf16>
      %cst_169 = arith.constant dense<0.000000e+00> : vector<8x128xf32>
      %1621 = tpu.matmul %1619, %1620, %cst_169 {dimension_numbers = #tpu.dot_dimension_numbers<[1], [0], [0], [1], [0, 0, 1, 1], [], []>} : vector<8x128xbf16>, vector<128x128xbf16>, vector<8x128xf32> -> vector<8x128xf32>
      %1622 = vector.extract_strided_slice %1097 {offsets = [128, 0], sizes = [128, 128], strides = [1, 1]} : vector<1152x128xbf16> to vector<128x128xbf16>
      %1623 = arith.truncf %1513 : vector<8x128xf32> to vector<8x128xbf16>
      %cst_170 = arith.constant dense<0.000000e+00> : vector<8x128xf32>
      %1624 = tpu.matmul %1623, %1622, %cst_170 {dimension_numbers = #tpu.dot_dimension_numbers<[1], [0], [0], [1], [0, 0, 1, 1], [], []>} : vector<8x128xbf16>, vector<128x128xbf16>, vector<8x128xf32> -> vector<8x128xf32>
      %1625 = arith.addf %1621, %1624 : vector<8x128xf32>
      %1626 = vector.extract_strided_slice %1097 {offsets = [256, 0], sizes = [128, 128], strides = [1, 1]} : vector<1152x128xbf16> to vector<128x128xbf16>
      %1627 = arith.truncf %1528 : vector<8x128xf32> to vector<8x128xbf16>
      %cst_171 = arith.constant dense<0.000000e+00> : vector<8x128xf32>
      %1628 = tpu.matmul %1627, %1626, %cst_171 {dimension_numbers = #tpu.dot_dimension_numbers<[1], [0], [0], [1], [0, 0, 1, 1], [], []>} : vector<8x128xbf16>, vector<128x128xbf16>, vector<8x128xf32> -> vector<8x128xf32>
      %1629 = arith.addf %1625, %1628 : vector<8x128xf32>
      %1630 = vector.extract_strided_slice %1097 {offsets = [384, 0], sizes = [128, 128], strides = [1, 1]} : vector<1152x128xbf16> to vector<128x128xbf16>
      %1631 = arith.truncf %1543 : vector<8x128xf32> to vector<8x128xbf16>
      %cst_172 = arith.constant dense<0.000000e+00> : vector<8x128xf32>
      %1632 = tpu.matmul %1631, %1630, %cst_172 {dimension_numbers = #tpu.dot_dimension_numbers<[1], [0], [0], [1], [0, 0, 1, 1], [], []>} : vector<8x128xbf16>, vector<128x128xbf16>, vector<8x128xf32> -> vector<8x128xf32>
      %1633 = arith.addf %1629, %1632 : vector<8x128xf32>
      %1634 = vector.extract_strided_slice %1097 {offsets = [512, 0], sizes = [128, 128], strides = [1, 1]} : vector<1152x128xbf16> to vector<128x128xbf16>
      %1635 = arith.truncf %1558 : vector<8x128xf32> to vector<8x128xbf16>
      %cst_173 = arith.constant dense<0.000000e+00> : vector<8x128xf32>
      %1636 = tpu.matmul %1635, %1634, %cst_173 {dimension_numbers = #tpu.dot_dimension_numbers<[1], [0], [0], [1], [0, 0, 1, 1], [], []>} : vector<8x128xbf16>, vector<128x128xbf16>, vector<8x128xf32> -> vector<8x128xf32>
      %1637 = arith.addf %1633, %1636 : vector<8x128xf32>
      %1638 = vector.extract_strided_slice %1097 {offsets = [640, 0], sizes = [128, 128], strides = [1, 1]} : vector<1152x128xbf16> to vector<128x128xbf16>
      %1639 = arith.truncf %1573 : vector<8x128xf32> to vector<8x128xbf16>
      %cst_174 = arith.constant dense<0.000000e+00> : vector<8x128xf32>
      %1640 = tpu.matmul %1639, %1638, %cst_174 {dimension_numbers = #tpu.dot_dimension_numbers<[1], [0], [0], [1], [0, 0, 1, 1], [], []>} : vector<8x128xbf16>, vector<128x128xbf16>, vector<8x128xf32> -> vector<8x128xf32>
      %1641 = arith.addf %1637, %1640 : vector<8x128xf32>
      %1642 = vector.extract_strided_slice %1097 {offsets = [768, 0], sizes = [128, 128], strides = [1, 1]} : vector<1152x128xbf16> to vector<128x128xbf16>
      %1643 = arith.truncf %1588 : vector<8x128xf32> to vector<8x128xbf16>
      %cst_175 = arith.constant dense<0.000000e+00> : vector<8x128xf32>
      %1644 = tpu.matmul %1643, %1642, %cst_175 {dimension_numbers = #tpu.dot_dimension_numbers<[1], [0], [0], [1], [0, 0, 1, 1], [], []>} : vector<8x128xbf16>, vector<128x128xbf16>, vector<8x128xf32> -> vector<8x128xf32>
      %1645 = arith.addf %1641, %1644 : vector<8x128xf32>
      %1646 = vector.extract_strided_slice %1097 {offsets = [896, 0], sizes = [128, 128], strides = [1, 1]} : vector<1152x128xbf16> to vector<128x128xbf16>
      %1647 = arith.truncf %1603 : vector<8x128xf32> to vector<8x128xbf16>
      %cst_176 = arith.constant dense<0.000000e+00> : vector<8x128xf32>
      %1648 = tpu.matmul %1647, %1646, %cst_176 {dimension_numbers = #tpu.dot_dimension_numbers<[1], [0], [0], [1], [0, 0, 1, 1], [], []>} : vector<8x128xbf16>, vector<128x128xbf16>, vector<8x128xf32> -> vector<8x128xf32>
      %1649 = arith.addf %1645, %1648 : vector<8x128xf32>
      %1650 = vector.extract_strided_slice %1097 {offsets = [1024, 0], sizes = [128, 128], strides = [1, 1]} : vector<1152x128xbf16> to vector<128x128xbf16>
      %1651 = arith.truncf %1618 : vector<8x128xf32> to vector<8x128xbf16>
      %cst_177 = arith.constant dense<0.000000e+00> : vector<8x128xf32>
      %1652 = tpu.matmul %1651, %1650, %cst_177 {dimension_numbers = #tpu.dot_dimension_numbers<[1], [0], [0], [1], [0, 0, 1, 1], [], []>} : vector<8x128xbf16>, vector<128x128xbf16>, vector<8x128xf32> -> vector<8x128xf32>
      %1653 = arith.addf %1649, %1652 : vector<8x128xf32>
      %1654 = arith.negf %1653 : vector<8x128xf32>
      %1655 = math.exp %1654 : vector<8x128xf32>
      %cst_178 = arith.constant 1.000000e+00 : f32
      %1656 = vector.broadcast %cst_178 : f32 to vector<8x128xf32>
      %1657 = arith.addf %1656, %1655 : vector<8x128xf32>
      %1658 = arith.divf %1656, %1657 : vector<8x128xf32>
      %c0_179 = arith.constant 0 : index
      %c0_180 = arith.constant 0 : index
      %1659 = vector.load %arg7[%c0_179, %c0_180] : memref<8x128xf32, #tpu.memory_space<vmem>>, vector<8x128xf32>
      tpu.vector_store %arg7[%c0_179, %c0_180], %1658 {strides = array<i32>} : memref<8x128xf32, #tpu.memory_space<vmem>>, vector<8x128xf32>,
    } else {
    }
    return
  }
  func.func @transform_0(%arg0: i32) -> (i32, i32, i32) {
    %c0_i32 = arith.constant 0 : i32
    %c0_i32_0 = arith.constant 0 : i32
    %c0_i32_1 = arith.constant 0 : i32
    return %arg0, %c0_i32, %c0_i32_0 : i32, i32, i32
  }
  func.func @transform_1(%arg0: i32) -> (i32, i32) {
    %c0_i32 = arith.constant 0 : i32
    %c0_i32_0 = arith.constant 0 : i32
    %c0_i32_1 = arith.constant 0 : i32
    return %c0_i32, %c0_i32_0 : i32, i32
  }
  func.func @transform_2(%arg0: i32) -> (i32, i32) {
    %c0_i32 = arith.constant 0 : i32
    %c0_i32_0 = arith.constant 0 : i32
    %c0_i32_1 = arith.constant 0 : i32
    return %c0_i32, %c0_i32_0 : i32, i32
  }
  func.func @transform_3(%arg0: i32) -> (i32, i32) {
    %c0_i32 = arith.constant 0 : i32
    %c0_i32_0 = arith.constant 0 : i32
    %c0_i32_1 = arith.constant 0 : i32
    return %c0_i32, %c0_i32_0 : i32, i32
  }
  func.func @transform_4(%arg0: i32) -> (i32, i32, i32) {
    %c0_i32 = arith.constant 0 : i32
    %c0_i32_0 = arith.constant 0 : i32
    %c0_i32_1 = arith.constant 0 : i32
    %c0_i32_2 = arith.constant 0 : i32
    return %c0_i32, %c0_i32_0, %c0_i32_1 : i32, i32, i32
  }
  func.func @transform_5(%arg0: i32) -> (i32, i32, i32) {
    %c0_i32 = arith.constant 0 : i32
    %c0_i32_0 = arith.constant 0 : i32
    %c0_i32_1 = arith.constant 0 : i32
    %c0_i32_2 = arith.constant 0 : i32
    return %c0_i32, %c0_i32_0, %c0_i32_1 : i32, i32, i32
  }
  func.func @transform_6(%arg0: i32) -> (i32, i32) {
    %c0_i32 = arith.constant 0 : i32
    %c0_i32_0 = arith.constant 0 : i32
    %c0_i32_1 = arith.constant 0 : i32
    return %c0_i32, %c0_i32_0 : i32, i32
  }
}

</mosaic_0001>

<bundles_post_ra>
// kernel: tpu_custom_call.1
= control target key start
LH: loop header
LB: loop body
LE: loop exit
PB: predicated region body
PF: predicated region fallthrough
CT: control target
= control target key end

     0   :  { %11 = vsyncpa [#allocation4], 0  ;;  %s10714_s0 = inlined_call_operand.hbm [shape: f32[8,8,16], index: 0, kind: input, shape index: {}]   ;;  %s10715_s1 = inlined_call_operand.hbm [shape: bf16[144,384], index: 1, kind: input, shape index: {}]   ;;  %s10716_s2 = inlined_call_operand.hbm [shape: bf16[256,384], index: 2, kind: input, shape index: {}]   ;;  %s10717_s3 = inlined_call_operand.hbm [shape: f32[4,384], index: 3, kind: input, shape index: {}]   ;;  %s10718_s4 = inlined_call_operand.hbm [shape: f32[2,72,128], index: 4, kind: input, shape index: {}]   ;;  %s10719_s5 = inlined_call_operand.hbm [shape: bf16[2,1152,128], index: 5, kind: input, shape index: {}]   ;;  %s10720_s6 = inlined_call_operand.hbm [shape: f32[8,128], index: 6, kind: output, shape index: {}]  }
   0x1   :  { %12 = vsyncpa [#allocation7], 0 }
   0x2   :  { %13 = vsyncpa [#allocation10], 0 }
   0x3   :  { %14 = vsyncpa [#allocation13], 0 }
   0x4   :  { %15 = vsyncpa [#allocation5], 0  ;;  %s7958_s21 = smov [#allocation6]  }
   0x5   :  { %s33_s22 = sshll.u32 %s7958_s21, 4  ;;  %s34_s22 = int_to_ptr.vmem [resolvable:$true] %s33_s22 }
   0x6   :  { %s7816_s23 = scalar_lea.vmem %s34_s22, 3456  ;;  %p7821_p1 = scmp.lt.s32.totalorder %s34_s22, %s34_s22 }
   0x7   :  { %p7817_p0 = scmp.ne.s32.totalorder %s34_s22, %s7816_s23  ;;  %p7822_p2 = scmp.lt.s32.totalorder %s7816_s23, %s7816_s23 }
   0x9   :  { %p7823_p3 = por %p7822_p2, %p7821_p1 }
   0xb   :  { %p7824_p4 = pnand %p7823_p3, %p7817_p0 }
   0xd   :  { %7827 = shalt.err (!%p7824_p4)
}
   0xe   :  { %s7959_s24 = smov 192   ;;  %s7960_s25 = smov 12  }
   0xf   :  { %39 = dma.hbm_to_vmem [thread:$0]  %s10715_s1, 3456, %s34_s22, [#allocation7], %s7959_s24, %s7959_s24, %s7960_s25  }
  0x10   :  { %s7961_s28 = smov [#allocation9]   ;;  %s7962_s30 = smov [#allocation3]  }
  0x11   :  { %s58_s29 = sshll.u32 %s7961_s28, 4  ;;  %s21_s7 = sshll.u32 %s7962_s30, 4  ;;  %s59_s29 = int_to_ptr.vmem [resolvable:$true] %s58_s29  ;;  %s22_s7 = int_to_ptr.vmem [resolvable:$true] %s21_s7 }
  0x12   :  { %s7836_s8 = scalar_lea.vmem %s59_s29, 192  ;;  %p7841_p6 = scmp.lt.s32.totalorder %s59_s29, %s59_s29 }
  0x13   :  { %p7837_p5 = scmp.ne.s32.totalorder %s59_s29, %s7836_s8  ;;  %p7842_p7 = scmp.lt.s32.totalorder %s7836_s8, %s7836_s8 }
  0x15   :  { %p7843_p8 = por %p7842_p7, %p7841_p6 }
  0x17   :  { %p7844_p9 = pnand %p7843_p8, %p7837_p5 }
  0x19   :  { %7847 = shalt.err (!%p7844_p9)
}
  0x1a   :  { %61 = dma.hbm_to_vmem [thread:$0]  %s10717_s3, 192, %s59_s29, [#allocation10]  }
  0x1b   :  { %s7856_s11 = scalar_lea.vmem %s22_s7, 1024  ;;  %p7861_p11 = scmp.lt.s32.totalorder %s22_s7, %s22_s7 }
  0x1c   :  { %p7857_p10 = scmp.ne.s32.totalorder %s22_s7, %s7856_s11  ;;  %p7862_p12 = scmp.lt.s32.totalorder %s7856_s11, %s7856_s11 }
  0x1e   :  { %p7863_p13 = por %p7862_p12, %p7861_p11 }
  0x20   :  { %p7864_p0 = pnand %p7863_p13, %p7857_p10 }
  0x22   :  { %7867 = shalt.err (!%p7864_p0)
}
  0x23   :  { %s7963_s1 = smov 128   ;;  %s7964_s12 = smov 8  }
  0x24   :  { %27 = dma.hbm_to_vmem [thread:$0]  %s10714_s0, 1024, %s22_s7, [#allocation4], %s7963_s1, %s7963_s1, %s7964_s12  }
  0x25   :  { %s7965_s15 = smov [#allocation8]   ;;  %s7966_s17 = smov [#allocation11]  }
  0x26   :  { %s45_s16 = sshll.u32 %s7965_s15, 4  ;;  %s67_s18 = sshll.u32 %s7966_s17, 4  ;;  %s46_s16 = int_to_ptr.vmem [resolvable:$true] %s45_s16  ;;  %s68_s18 = int_to_ptr.vmem [resolvable:$true] %s67_s18 }
  0x27   :  { %s7876_s3 = scalar_lea.vmem %s46_s16, 6144  ;;  %p7881_p2 = scmp.lt.s32.totalorder %s46_s16, %s46_s16 }
  0x28   :  { %p7877_p1 = scmp.ne.s32.totalorder %s46_s16, %s7876_s3  ;;  %p7882_p3 = scmp.lt.s32.totalorder %s7876_s3, %s7876_s3 }
  0x2a   :  { %p7883_p4 = por %p7882_p3, %p7881_p2 }
  0x2c   :  { %p7884_p5 = pnand %p7883_p4, %p7877_p1 }
  0x2e   :  { %7887 = shalt.err (!%p7884_p5)
}
  0x2f   :  { %51 = dma.hbm_to_vmem [thread:$0]  %s10716_s2, 6144, %s46_s16, [#allocation7], %s7959_s24, %s7959_s24, %s7960_s25  }
  0x30   :  { %s7896_s0 = scalar_lea.vmem %s68_s18, 2304  ;;  %p7901_p7 = scmp.lt.s32.totalorder %s68_s18, %s68_s18 }
  0x31   :  { %p7897_p6 = scmp.ne.s32.totalorder %s68_s18, %s7896_s0  ;;  %p7902_p8 = scmp.lt.s32.totalorder %s7896_s0, %s7896_s0 }
  0x33   :  { %p7903_p9 = por %p7902_p8, %p7901_p7 }
  0x35   :  { %p7904_p10 = pnand %p7903_p9, %p7897_p6 }
  0x37   :  { %7907 = shalt.err (!%p7904_p10)
}
  0x38   :  { %73 = dma.hbm_to_vmem [thread:$0]  %s10718_s4, 2304, %s68_s18, [#allocation10], %s7963_s1, %s7963_s1, %s7964_s12  }
  0x39   :  { %s7967_s23 = smov [#allocation12]  }
  0x3a   :  { %s79_s26 = sshll.u32 %s7967_s23, 4  ;;  %s80_s26 = int_to_ptr.vmem [resolvable:$true] %s79_s26 }
  0x3b   :  { %s7916_s27 = scalar_lea.vmem %s80_s26, 18432  ;;  %p7921_p12 = scmp.lt.s32.totalorder %s80_s26, %s80_s26 }
  0x3c   :  { %p7917_p11 = scmp.ne.s32.totalorder %s80_s26, %s7916_s27  ;;  %p7922_p13 = scmp.lt.s32.totalorder %s7916_s27, %s7916_s27 }
  0x3e   :  { %p7923_p0 = por %p7922_p13, %p7921_p12 }
  0x40   :  { %p7924_p1 = pnand %p7923_p0, %p7917_p11 }
  0x42   :  { %7927 = shalt.err (!%p7924_p1)
}
  0x43   :  { %s7968_s2 = smov 64   ;;  %s7969_s24 = smov 4  }
  0x44   :  { %85 = dma.hbm_to_vmem [thread:$0]  %s10719_s5, 18432, %s80_s26, [#allocation13], %s7968_s2, %s7968_s2, %s7969_s24  }
  0x45   :  { %7948 = dma.done.wait [#allocation4], 1024  }
  0x46   :  { %7949 = vsyncadd [#allocation4], 4294966272 }
  0x47   :  { %7950 = dma.done.wait [#allocation7], 9600  }
  0x48   :  { %7951 = vsyncadd [#allocation7], 4294957696 }
  0x49   :  { %7952 = dma.done.wait [#allocation10], 2496  }
  0x4a   :  { %7953 = vsyncadd [#allocation10], 4294964800 }
  0x4b   :  { %7954 = dma.done.wait [#allocation13], 18432  }
  0x4c   :  { %7955 = vsyncadd [#allocation13], 4294948864  ;;  %v10722_v0 = vmov 0   ;;  %v7224_v1 = vld [vmem:[#allocation6 + $0xc4] ss:$12 sps:$4 sm:$0xff]   ;;  %v214_v4 = vld [vmem:[#allocation3 + $0x8] sm:$0xff] }
  0x4d   :  { %315 = vmatprep.mubr.bf16.mxu0 %v10722_v0  ;;  %v7226_v2 = vld [vmem:[#allocation6 + $0xc0] ss:$12 sps:$4 sm:$0xff]   ;;  %297 = vmatprep.subr.bf16.mxu0 %v7224_v1  ;;  %vm270_vm0 = vcmask 130048   ;;  %v7229_v7 = vld [vmem:[#allocation6 + $0xa8] ss:$12 sps:$4 sm:$0xff]   ;;  %v216_v11 = vld [vmem:[#allocation3 + $0x18] sm:$0xff] }
  0x4e   :  { %v213_v3 = vld [vmem:[#allocation3] sm:$0xff]  ;;  %v7227_v6 = vld [vmem:[#allocation6 + $0xac] ss:$12 sps:$4 sm:$0xff]   ;;  %298 = vmatpush1.bf16.msra.mxu0 %v7226_v2  ;;  %v7232_v9 = vld [vmem:[#allocation6 + $0x90] ss:$12 sps:$4 sm:$0xff]   ;;  %v10724_v23 = vmov 0.0  }
  0x4f   :  { %v221_v5 = vpack.c.bf16 %v214_v4, %v213_v3  ;;  %580 = vmatprep.subr.bf16.mxu0 %v7227_v6  ;;  %v7230_v8 = vld [vmem:[#allocation6 + $0x94] ss:$12 sps:$4 sm:$0xff]   ;;  %v7233_v12 = vld [vmem:[#allocation6 + $0x7c] ss:$12 sps:$4 sm:$0xff]   ;;  %v7235_v14 = vld [vmem:[#allocation6 + $0x78] ss:$12 sps:$4 sm:$0xff]  }
  0x50   :  { %v215_v10 = vld [vmem:[#allocation3 + $0x10] sm:$0xff]  ;;  %v7238_v17 = vld [vmem:[#allocation6 + $0x60] ss:$12 sps:$4 sm:$0xff]   ;;  %v7253_v28 = vld [vmem:[#allocation6 + $0x98] ss:$12 sps:$4 sm:$0xff]   ;;  %vm7972_vm1 = vmmov 0  }
  0x51   :  { %6359 = vmatprep.mubr.msk.bf16.mxu1 %vm270_vm0, %v221_v5  ;;  %5715 = vmatmul.mubr.msk.bf16.vlgmr.msra.gmra.mxu0 %vm270_vm0, %v221_v5  ;;  %v222_v13 = vpack.c.bf16 %v216_v11, %v215_v10  ;;  %v7236_v15 = vld [vmem:[#allocation6 + $0x64] ss:$12 sps:$4 sm:$0xff]   ;;  %v7247_v16 = vld [vmem:[#allocation6 + $0xc8] ss:$12 sps:$4 sm:$0xff]   ;;  %v7239_v20 = vld [vmem:[#allocation6 + $0x4c] ss:$12 sps:$4 sm:$0xff]  }
  0x52   :  { %581 = vmatpush1.bf16.msra.mxu0 %v7229_v7  ;;  %325 = vmatprep.mubr.bf16.mxu0 %v10722_v0  ;;  %v217_v18 = vld [vmem:[#allocation3 + $0x20] sm:$0xff]  ;;  %v218_v19 = vld [vmem:[#allocation3 + $0x28] sm:$0xff]  ;;  %v7252_v21 = vld [vmem:[#allocation6 + $0xb0] ss:$12 sps:$4 sm:$0xff]   ;;  %v10721_v39 = vmov 0.0|0.0   ;;  %s7974_s4 = smov [#allocation14]  }
  0x53   :  { %582 = vmatprep.subr.bf16.mxu0 %v7230_v8  ;;  %6357 = vmatprep.subr.bf16.mxu1 %v7247_v16  ;;  %v223_v22 = vpack.c.bf16 %v218_v19, %v217_v18  ;;  %v7241_v24 = vld [vmem:[#allocation6 + $0x48] ss:$12 sps:$4 sm:$0xff]   ;;  %v7244_v26 = vld [vmem:[#allocation6 + $0x30] ss:$12 sps:$4 sm:$0xff]   ;;  %v7254_v31 = vld [vmem:[#allocation6 + $0x80] ss:$12 sps:$4 sm:$0xff]  }
  0x54   :  { %6358 = vmatpush3.bf16.msra.mxu1 %v7247_v16  ;;  %v7242_v25 = vld [vmem:[#allocation6 + $0x34] ss:$12 sps:$4 sm:$0xff]   ;;  %v220_v29 = vld [vmem:[#allocation3 + $0x38] sm:$0xff]  ;;  %v7249_v34 = vld [vmem:[#allocation6 + $0x4] ss:$12 sps:$4 sm:$0xff]   ;;  %s5700_s5 = sshll.u32 %s7974_s4, 4  ;;  %s5701_s5 = int_to_ptr.vmem [resolvable:$true] %s5700_s5 }
  0x55   :  { %6367 = vmatprep.subr.bf16.mxu1 %v10724_v23  ;;  %v219_v27 = vld [vmem:[#allocation3 + $0x30] sm:$0xff]  ;;  %v7245_v30 = vld [vmem:[#allocation6 + $0x1c] ss:$12 sps:$4 sm:$0xff]   ;;  %v7248_v32 = vld [vmem:[#allocation6 + $0x18] ss:$12 sps:$4 sm:$0xff]   ;;  %s7928_s29 = scalar_lea.vmem %s5701_s5, 128  ;;  %p7933_p3 = scmp.lt.s32.totalorder %s5701_s5, %s5701_s5 }
  0x56   :  { %583 = vmatpush1.bf16.msra.mxu0 %v7232_v9  ;;  %v224_v33 = vpack.c.bf16 %v220_v29, %v219_v27  ;;  %v7255_v35 = vld [vmem:[#allocation6 + $0x68] ss:$12 sps:$4 sm:$0xff]   ;;  %v7251_v36 = vld [vmem:[#allocation6] ss:$12 sps:$4 sm:$0xff]   ;;  %v7256_v37 = vld [vmem:[#allocation6 + $0x50] ss:$12 sps:$4 sm:$0xff]   ;;  %p7929_p2 = scmp.ne.s32.totalorder %s5701_s5, %s7928_s29  ;;  %p7934_p4 = scmp.lt.s32.totalorder %s7928_s29, %s7928_s29 }
  0x57   :  { %584 = vmatprep.subr.bf16.mxu0 %v7233_v12  ;;  %6360 = vmatmul.mubr.msk.bf16.vlgmr.msra.gmra.mxu1 %vm270_vm0, %v222_v13  ;;  %v7257_v38 = vld [vmem:[#allocation6 + $0x38] ss:$12 sps:$4 sm:$0xff]   ;;  %v7258_v40 = vld [vmem:[#allocation6 + $0x20] ss:$12 sps:$4 sm:$0xff]   ;;  %v7259_v41 = vld [vmem:[#allocation6 + $0x8] ss:$12 sps:$4 sm:$0xff]  }
  0x58   :  { %6368 = vmatpush3.bf16.msra.mxu1 %v7252_v21  ;;  %6363 = vmatprep.mubr.msk.bf16.mxu1 %vm270_vm0, %v223_v22  ;;  %v8063_v42 = vld [vmem:[#allocation8 + $0xac] ss:$12 sps:$4 sm:$0xff]   ;;  %v8065_v43 = vld [vmem:[#allocation8 + $0xa8] ss:$12 sps:$4 sm:$0xff]   ;;  %v8071_v45 = vld [vmem:[#allocation8 + $0x90] ss:$12 sps:$4 sm:$0xff]   ;;  %p7935_p5 = por %p7934_p4, %p7933_p3 }
  0x59   :  { %5716 = vmatmul.mubr.msk.bf16.gmra.mxu0 %vm270_vm0, %v222_v13  ;;  %6369 = vmatprep.subr.bf16.mxu1 %v10724_v23  ;;  %v8069_v44 = vld [vmem:[#allocation8 + $0x94] ss:$12 sps:$4 sm:$0xff]   ;;  %v8075_v46 = vld [vmem:[#allocation8 + $0x7c] ss:$12 sps:$4 sm:$0xff]   ;;  %v8077_v47 = vld [vmem:[#allocation8 + $0x78] ss:$12 sps:$4 sm:$0xff]  }
  0x5a   :  { %585 = vmatpush1.bf16.msra.mxu0 %v7235_v14  ;;  %335 = vmatprep.mubr.bf16.mxu0 %v10722_v0  ;;  %v8081_v48 = vld [vmem:[#allocation8 + $0x64] ss:$12 sps:$4 sm:$0xff]   ;;  %v8083_v49 = vld [vmem:[#allocation8 + $0x60] ss:$12 sps:$4 sm:$0xff]   ;;  %v8089_v51 = vld [vmem:[#allocation8 + $0x48] ss:$12 sps:$4 sm:$0xff]   ;;  %p7936_p6 = pnand %p7935_p5, %p7929_p2 }
  0x5b   :  { %586 = vmatprep.subr.bf16.mxu0 %v7236_v15  ;;  %v8087_v50 = vld [vmem:[#allocation8 + $0x4c] ss:$12 sps:$4 sm:$0xff]   ;;  %v8093_v52 = vld [vmem:[#allocation8 + $0x34] ss:$12 sps:$4 sm:$0xff]   ;;  %v8095_v53 = vld [vmem:[#allocation8 + $0x30] ss:$12 sps:$4 sm:$0xff]  }
  0x5c   :  { %6370 = vmatpush3.bf16.msra.mxu1 %v7253_v28  ;;  %v8099_v54 = vld [vmem:[#allocation8 + $0x1c] ss:$12 sps:$4 sm:$0xff]   ;;  %v8101_v55 = vld [vmem:[#allocation8 + $0x18] ss:$12 sps:$4 sm:$0xff]   ;;  %v8107_v57 = vld [vmem:[#allocation8] ss:$12 sps:$4 sm:$0xff]  }
  0x5d   :  { %6371 = vmatprep.subr.bf16.mxu1 %v10724_v23  ;;  %v8105_v56 = vld [vmem:[#allocation8 + $0x4] ss:$12 sps:$4 sm:$0xff]   ;;  %v8111_v58 = vld [vmem:[#allocation8 + $0x16c] ss:$12 sps:$4 sm:$0xff]   ;;  %v8114_v59 = vld [vmem:[#allocation8 + $0x168] ss:$12 sps:$4 sm:$0xff]  }
  0x5e   :  { %587 = vmatpush1.bf16.msra.mxu0 %v7238_v17  ;;  %v8116_v60 = vld [vmem:[#allocation8 + $0xb0] ss:$12 sps:$4 sm:$0xff]   ;;  %v8120_v61 = vld [vmem:[#allocation8 + $0x154] ss:$12 sps:$4 sm:$0xff]   ;;  %v8125_v63 = vld [vmem:[#allocation8 + $0x98] ss:$12 sps:$4 sm:$0xff]  }
  0x5f   :  { %588 = vmatprep.subr.bf16.mxu0 %v7239_v20  ;;  %6364 = vmatmul.mubr.msk.bf16.gmra.mxu1 %vm270_vm0, %v224_v33  ;;  %v8123_v62 = vld [vmem:[#allocation8 + $0x150] ss:$12 sps:$4 sm:$0xff]   ;;  %v8133_v2 = vld [vmem:[#allocation8 + $0x138] ss:$12 sps:$4 sm:$0xff]   ;;  %v8135_v3 = vld [vmem:[#allocation8 + $0x80] ss:$12 sps:$4 sm:$0xff]   ;;  %v227_v20 = vlaneseq }
  0x60   :  { %6372 = vmatpush3.bf16.msra.mxu1 %v7254_v31  ;;  %6383 = vmatprep.mubr.msk.bf16.mxu1 %vm7972_vm1, %v10724_v23  ;;  %v8130_v1 = vld [vmem:[#allocation8 + $0x13c] ss:$12 sps:$4 sm:$0xff]   ;;  %v8140_v4 = vld [vmem:[#allocation8 + $0x124] ss:$12 sps:$4 sm:$0xff]   ;;  %v8143_v5 = vld [vmem:[#allocation8 + $0x120] ss:$12 sps:$4 sm:$0xff]  }
  0x61   :  { %5717 = vmatmul.mubr.msk.bf16.gmra.mxu0 %vm270_vm0, %v223_v22  ;;  %6373 = vmatprep.subr.bf16.mxu1 %v10724_v23  ;;  %10856 = vst [vmem:[#allocation20_spill] sm:$0xff] %v8140_v4  ;;  %10857 = vst [vmem:[#allocation21_spill] sm:$0xff] %v8143_v5  ;;  %v8145_v6 = vld [vmem:[#allocation8 + $0x68] ss:$12 sps:$4 sm:$0xff]   ;;  %v8150_v7 = vld [vmem:[#allocation8 + $0x10c] ss:$12 sps:$4 sm:$0xff]  }
  0x62   :  { %589 = vmatpush1.bf16.msra.mxu0 %v7241_v24  ;;  %345 = vmatprep.mubr.bf16.mxu0 %v10722_v0  ;;  %10858 = vst [vmem:[#allocation22_spill] sm:$0xff] %v8145_v6  ;;  %10859 = vst [vmem:[#allocation23_spill] sm:$0xff] %v8150_v7  ;;  %v8152_v8 = vld [vmem:[#allocation8 + $0x108] ss:$12 sps:$4 sm:$0xff]   ;;  %v8154_v9 = vld [vmem:[#allocation8 + $0x50] ss:$12 sps:$4 sm:$0xff]  }
  0x63   :  { %590 = vmatprep.subr.bf16.mxu0 %v7242_v25  ;;  %10860 = vst [vmem:[#allocation24_spill] sm:$0xff] %v8152_v8  ;;  %10861 = vst [vmem:[#allocation25_spill] sm:$0xff] %v8154_v9  ;;  %v8157_v10 = vld [vmem:[#allocation8 + $0xf4] ss:$12 sps:$4 sm:$0xff]   ;;  %v8160_v11 = vld [vmem:[#allocation8 + $0xf0] ss:$12 sps:$4 sm:$0xff]  }
  0x64   :  { %6374 = vmatpush3.bf16.msra.mxu1 %v7255_v35  ;;  %10862 = vst [vmem:[#allocation26_spill] sm:$0xff] %v8157_v10  ;;  %10863 = vst [vmem:[#allocation27_spill] sm:$0xff] %v8160_v11  ;;  %v8162_v12 = vld [vmem:[#allocation8 + $0x38] ss:$12 sps:$4 sm:$0xff]   ;;  %v8164_v13 = vld [vmem:[#allocation8 + $0xdc] ss:$12 sps:$4 sm:$0xff]  }
  0x65   :  { %6375 = vmatprep.subr.bf16.mxu1 %v10724_v23  ;;  %10864 = vst [vmem:[#allocation28_spill] sm:$0xff] %v8162_v12  ;;  %10865 = vst [vmem:[#allocation29_spill] sm:$0xff] %v8164_v13  ;;  %v8170_v14 = vld [vmem:[#allocation8 + $0xd8] ss:$12 sps:$4 sm:$0xff]   ;;  %v8172_v15 = vld [vmem:[#allocation8 + $0x20] ss:$12 sps:$4 sm:$0xff]  }
  0x66   :  { %591 = vmatpush1.bf16.msra.mxu0 %v7244_v26  ;;  %10866 = vst [vmem:[#allocation30_spill] sm:$0xff] %v8170_v14  ;;  %10867 = vst [vmem:[#allocation31_spill] sm:$0xff] %v8172_v15  ;;  %v8174_v16 = vld [vmem:[#allocation8 + $0xc4] ss:$12 sps:$4 sm:$0xff]   ;;  %v8180_v17 = vld [vmem:[#allocation8 + $0xc0] ss:$12 sps:$4 sm:$0xff]  }
  0x67   :  { %592 = vmatprep.subr.bf16.mxu0 %v7245_v30  ;;  %10868 = vst [vmem:[#allocation32_spill] sm:$0xff] %v8174_v16  ;;  %10869 = vst [vmem:[#allocation33_spill] sm:$0xff] %v8180_v17  ;;  %v8182_v18 = vld [vmem:[#allocation8 + $0x8] ss:$12 sps:$4 sm:$0xff]   ;;  %v8194_v21 = vshrl.u32 %v227_v20, 7  ;;  %v8199_v24 = vld [vmem:[#allocation9] sm:$0xff] }
  0x68   :  { %6376 = vmatpush3.bf16.msra.mxu1 %v7256_v37  ;;  %10870 = vst [vmem:[#allocation34_spill] sm:$0xff] %v8182_v18  ;;  %v8191_v19 = vld [vmem:[#allocation6 + $0xac] ss:$12 sps:$4 sm:$0xff]   ;;  %10874 = vst [vmem:[#allocation38_spill] sm:$0xff] %v8199_v24  ;;  %v8207_v31 = vld [vmem:[#allocation9 + $0x8] sm:$0xf] }
  0x69   :  { %5718 = vmatmul.mubr.msk.bf16.gmra.mxu0 %vm270_vm0, %v224_v33  ;;  %6377 = vmatprep.subr.bf16.mxu1 %v10724_v23  ;;  %10871 = vst [vmem:[#allocation35_spill] sm:$0xff] %v8191_v19  ;;  %10872 = vst [vmem:[#allocation36_spill] sm:$0xff] %v8194_v21  ;;  %v8197_v22 = vsub.s32 0, %v8194_v21  ;;  %v8204_v27 = vsub.s32 4, %v8194_v21 }
  0x6a   :  { %593 = vmatpush1.bf16.msra.mxu0 %v7248_v32  ;;  %612 = vmatprep.mubr.bf16.mxu0 %v10722_v0 }
  0x6b   :  { %594 = vmatprep.subr.bf16.mxu0 %v7249_v34  ;;  %10873 = vst [vmem:[#allocation37_spill] sm:$0xff] %v8197_v22  ;;  %v230_v25 = vrot.slane %v8199_v24, %v8197_v22  ;;  %10875 = vst [vmem:[#allocation39_spill] sm:$0xff] %v8204_v27  ;;  %v234_v32 = vrot.slane %v8199_v24, %v8204_v27  ;;  %v238_v35 = vrot.slane %v8207_v31, %v8197_v22 }
  0x6c   :  { %6378 = vmatpush3.bf16.msra.mxu1 %v7257_v38 }
  0x6d   :  { %6379 = vmatprep.subr.bf16.mxu1 %v10724_v23  ;;  %v245_v29 = vrot.slane %v230_v25, %v8197_v22  ;;  %v8218_v37 = vrot.slane %v234_v32, %v8197_v22  ;;  %v8226_v20 = vrot.slane %v238_v35, %v8197_v22 }
  0x6e   :  { %595 = vmatpush1.bf16.msra.mxu0 %v7251_v36 }
  0x6f   :  { %862 = vmatprep.subr.bf16.mxu0 %v8063_v42  ;;  %10880 = vst [vmem:[#allocation44_spill] sm:$0xff] %v8226_v20 }
  0x70   :  { %6380 = vmatpush3.bf16.msra.mxu1 %v7258_v40 }
  0x71   :  { %613 = vmatmul.mubr.bf16.vlgmr.msra.gmra.mxu0 %v10721_v39  ;;  %6381 = vmatprep.subr.bf16.mxu1 %v10724_v23 }
  0x72   :  { %894 = vmatprep.mubr.bf16.mxu0 %v10721_v39  ;;  %863 = vmatpush1.bf16.msra.mxu0 %v8065_v43 }
  0x73   :  { %864 = vmatprep.subr.bf16.mxu0 %v8069_v44 }
  0x74   :  { %6382 = vmatpush3.bf16.msra.mxu1 %v7259_v41 }
  0x75   :  { %6387 = vmatprep.subr.bf16.mxu1 %v10724_v23 }
  0x76   :  { %865 = vmatpush1.bf16.msra.mxu0 %v8071_v45 }
  0x77   :  { %6384 = vmatmul.mubr.bf16.vlgmr.msra.gmra.mxu1 %v10721_v39  ;;  %866 = vmatprep.subr.bf16.mxu0 %v8075_v46 }
  0x78   :  { %6403 = vmatprep.mubr.msk.bf16.mxu1 %vm7972_vm1, %v10724_v23  ;;  %6388 = vmatpush3.bf16.msra.mxu1 %v8116_v60 }
  0x79   :  { %6389 = vmatprep.subr.bf16.mxu1 %v10724_v23 }
  0x7a   :  { %867 = vmatpush1.bf16.msra.mxu0 %v8077_v47 }
  0x7b   :  { %868 = vmatprep.subr.bf16.mxu0 %v8081_v48 }
  0x7c   :  { %6390 = vmatpush3.bf16.msra.mxu1 %v8125_v63 }
  0x7d   :  { %6391 = vmatprep.subr.bf16.mxu1 %v10724_v23 }
  0x7e   :  { %869 = vmatpush1.bf16.msra.mxu0 %v8083_v49 }
  0x7f   :  { %870 = vmatprep.subr.bf16.mxu0 %v8087_v50 }
  0x80   :  { %6392 = vmatpush3.bf16.msra.mxu1 %v8135_v3 }
  0x81   :  { %6393 = vmatprep.subr.bf16.mxu1 %v10724_v23 }
  0x82   :  { %871 = vmatpush1.bf16.msra.mxu0 %v8089_v51 }
  0x83   :  { %872 = vmatprep.subr.bf16.mxu0 %v8093_v52 }
  0x84   :  { %6394 = vmatpush3.bf16.msra.mxu1 %v8145_v6 }
  0x85   :  { %6395 = vmatprep.subr.bf16.mxu1 %v10724_v23 }
  0x86   :  { %873 = vmatpush1.bf16.msra.mxu0 %v8095_v53 }
  0x87   :  { %874 = vmatprep.subr.bf16.mxu0 %v8099_v54 }
  0x88   :  { %6396 = vmatpush3.bf16.msra.mxu1 %v8154_v9 }
  0x89   :  { %6397 = vmatprep.subr.bf16.mxu1 %v10724_v23 }
  0x8a   :  { %875 = vmatpush1.bf16.msra.mxu0 %v8101_v55 }
  0x8b   :  { %876 = vmatprep.subr.bf16.mxu0 %v8105_v56 }
  0x8c   :  { %6398 = vmatpush3.bf16.msra.mxu1 %v8162_v12 }
  0x8d   :  { %6399 = vmatprep.subr.bf16.mxu1 %v10724_v23 }
  0x8e   :  { %877 = vmatpush1.bf16.msra.mxu0 %v8107_v57 }
  0x8f   :  { %878 = vmatprep.subr.bf16.mxu0 %v8111_v58 }
  0x90   :  { %6400 = vmatpush3.bf16.msra.mxu1 %v8172_v15 }
  0x91   :  { %6401 = vmatprep.subr.bf16.mxu1 %v10724_v23 }
  0x92   :  { %879 = vmatpush2.bf16.msra.mxu0 %v8114_v59 }
  0x93   :  { %880 = vmatprep.subr.bf16.mxu0 %v8120_v61 }
  0x94   :  { %6402 = vmatpush3.bf16.msra.mxu1 %v8182_v18 }
  0x95   :  { %6407 = vmatprep.subr.bf16.mxu1 %v10724_v23 }
  0x96   :  { %881 = vmatpush2.bf16.msra.mxu0 %v8123_v62 }
  0x97   :  { %882 = vmatprep.subr.bf16.mxu0 %v8130_v1 }
  0x9a   :  { %883 = vmatpush2.bf16.msra.mxu0 %v8133_v2 }
  0x9b   :  { %884 = vmatprep.subr.bf16.mxu0 %v8140_v4 }
  0x9e   :  { %885 = vmatpush2.bf16.msra.mxu0 %v8143_v5 }
  0x9f   :  { %886 = vmatprep.subr.bf16.mxu0 %v8150_v7 }
  0xa2   :  { %887 = vmatpush2.bf16.msra.mxu0 %v8152_v8 }
  0xa3   :  { %888 = vmatprep.subr.bf16.mxu0 %v8157_v10 }
  0xa6   :  { %889 = vmatpush2.bf16.msra.mxu0 %v8160_v11 }
  0xa7   :  { %890 = vmatprep.subr.bf16.mxu0 %v8164_v13 }
  0xaa   :  { %891 = vmatpush2.bf16.msra.mxu0 %v8170_v14 }
  0xab   :  { %892 = vmatprep.subr.bf16.mxu0 %v8174_v16 }
  0xae   :  { %893 = vmatpush2.bf16.msra.mxu0 %v8180_v17 }
  0xaf   :  { %1106 = vmatprep.subr.bf16.mxu0 %v8191_v19 }
 0x111   :  { %v317_v26 = vpop.f32.mrf.mxu0 }
 0x113   :  { %v319_v28 = vpop.f32.mrf.mxu0 }
 0x115   :  { %v321_v30 = vpop.f32.mrf.mxu0 }
 0x116   :  { %v8211_v33 = vadd.f32 %v321_v30, %v245_v29 }
 0x117   :  { %v8213_v34 = vpop.f32.mrf.mxu0  ;;  %v6361_v0 = vpop.f32.mrf.mxu1 }
 0x118   :  { %10876 = vst [vmem:[#allocation40_spill] sm:$0xff] %v8211_v33  ;;  %10877 = vst [vmem:[#allocation41_spill] sm:$0xff] %v8213_v34  ;;  %v8234_v32 = vadd.f32 %v6361_v0, %v8226_v20  ;;  %v8249_v0 = vsub.s32 1, %v8194_v21 }
 0x119   :  { %v327_v36 = vpop.f32.mrf.mxu0  ;;  %v390_v27 = vpop.f32.mrf.mxu1 }
 0x11a   :  { %v8220_v38 = vadd.f32 %v327_v36, %v245_v29  ;;  %10883 = vst [vmem:[#allocation47_spill] sm:$0xff] %v8234_v32  ;;  %10889 = vst [vmem:[#allocation53_spill] sm:$0xff] %v8249_v0 }
 0x11b   :  { %v329_v40 = vpop.f32.mrf.mxu0 }
 0x11c   :  { %10878 = vst [vmem:[#allocation42_spill] sm:$0xff] %v8220_v38  ;;  %v8223_v41 = vadd.f32 %v329_v40, %v8218_v37 }
 0x11d   :  { %v331_v25 = vpop.f32.mrf.mxu0 }
 0x11e   :  { %10879 = vst [vmem:[#allocation43_spill] sm:$0xff] %v8223_v41  ;;  %v8228_v30 = vadd.f32 %v331_v25, %v245_v29  ;;  %v6362_v41 = vpop.f32.mrf.mxu1 }
 0x11f   :  { %v333_v39 = vpop.f32.mrf.mxu0  ;;  %v8242_v25 = vadd.f32 %v6362_v41, %v8226_v20 }
 0x120   :  { %10881 = vst [vmem:[#allocation45_spill] sm:$0xff] %v8228_v30  ;;  %v8231_v23 = vadd.f32 %v333_v39, %v8218_v37  ;;  %v8244_v30 = vpop.f32.mrf.mxu1 }
 0x121   :  { %v337_v36 = vpop.f32.mrf.mxu0  ;;  %10886 = vst [vmem:[#allocation50_spill] sm:$0xff] %v8242_v25  ;;  %10887 = vst [vmem:[#allocation51_spill] sm:$0xff] %v8244_v30  ;;  %v428_v25 = vrot.slane %v8199_v24, %v8249_v0 }
 0x122   :  { %10882 = vst [vmem:[#allocation46_spill] sm:$0xff] %v8231_v23  ;;  %v8236_v38 = vadd.f32 %v337_v36, %v245_v29  ;;  %v6365_v32 = vpop.f32.mrf.mxu1 }
 0x123   :  { %v339_v40 = vpop.f32.mrf.mxu0 }
 0x124   :  { %10884 = vst [vmem:[#allocation48_spill] sm:$0xff] %v8236_v38  ;;  %v8239_v35 = vadd.f32 %v339_v40, %v8218_v37  ;;  %v8255_v38 = vadd.f32 %v6365_v32, %v8226_v20 }
 0x125   :  { %v341_v22 = vpop.f32.mrf.mxu0 }
 0x126   :  { %10885 = vst [vmem:[#allocation49_spill] sm:$0xff] %v8239_v35  ;;  %v8246_v39 = vadd.f32 %v341_v22, %v245_v29  ;;  %10891 = vst [vmem:[#allocation55_spill] sm:$0xff] %v8255_v38  ;;  %v406_v35 = vpop.f32.mrf.mxu1  ;;  %v8262_v22 = vsub.s32 5, %v8194_v21  ;;  %v318_v21 = vadd.f32 %v317_v26, %v245_v29 }
 0x127   :  { %v343_v23 = vpop.f32.mrf.mxu0 }
 0x128   :  { %10888 = vst [vmem:[#allocation52_spill] sm:$0xff] %v8246_v39  ;;  %v8252_v36 = vadd.f32 %v343_v23, %v8218_v37  ;;  %10893 = vst [vmem:[#allocation57_spill] sm:$0xff] %v8262_v22  ;;  %v8265_v39 = vadd.f32 %v406_v35, %v8226_v20  ;;  %v6366_v34 = vpop.f32.mrf.mxu1 }
 0x129   :  { %v347_v40 = vpop.f32.mrf.mxu0  ;;  %v8271_v32 = vadd.f32 %v6366_v34, %v8226_v20 }
 0x12a   :  { %10890 = vst [vmem:[#allocation54_spill] sm:$0xff] %v8252_v36  ;;  %v8257_v41 = vadd.f32 %v347_v40, %v245_v29  ;;  %10894 = vst [vmem:[#allocation58_spill] sm:$0xff] %v8265_v39  ;;  %v432_v36 = vrot.slane %v8199_v24, %v8262_v22  ;;  %v320_v22 = vadd.f32 %v319_v28, %v8218_v37 }
 0x12b   :  { %v349_v30 = vpop.f32.mrf.mxu0  ;;  %10896 = vst [vmem:[#allocation60_spill] sm:$0xff] %v8271_v32 }
 0x12c   :  { %10892 = vst [vmem:[#allocation56_spill] sm:$0xff] %v8257_v41  ;;  %v8268_v23 = vadd.f32 %v349_v30, %v8218_v37  ;;  %v8276_v41 = vrot.slane %v428_v25, %v8249_v0  ;;  %v8285_v34 = vrot.slane %v432_v36, %v8249_v0 }
 0x12d   :  { %v351_v38 = vpop.f32.mrf.mxu0 }
 0x12e   :  { %10895 = vst [vmem:[#allocation59_spill] sm:$0xff] %v8268_v23  ;;  %v8273_v40 = vadd.f32 %v351_v38, %v245_v29  ;;  %10898 = vst [vmem:[#allocation62_spill] sm:$0xff] %v8276_v41 }
 0x12f   :  { %v353_v33 = vpop.f32.mrf.mxu0 }
 0x130   :  { %10897 = vst [vmem:[#allocation61_spill] sm:$0xff] %v8273_v40  ;;  %v8281_v35 = vadd.f32 %v353_v33, %v8218_v37  ;;  %v8289_v33 = vpop.f32.mrf.mxu1 }
 0x131   :  { %v614_v39 = vpop.f32.mrf.mxu0  ;;  %10900 = vst [vmem:[#allocation64_spill] sm:$0xff] %v8289_v33  ;;  %v8358_v33 = vld [vmem:[#allocation6 + $0x34] ss:$12 sps:$4 sm:$0xff]  }
 0x132   :  { %10899 = vst [vmem:[#allocation63_spill] sm:$0xff] %v8281_v35  ;;  %v615_v30 = vadd.f32 %v614_v39, %v8276_v41  ;;  %10908 = vst [vmem:[#allocation70_spill] sm:$0xff] %v8358_v33 }
 0x133   :  { %v616_v32 = vpop.f32.mrf.mxu0 }
 0x134   :  { %v661_v38 = vadd.f32 %v615_v30, %v318_v21  ;;  %v617_v25 = vadd.f32 %v616_v32, %v8285_v34  ;;  %v436_v21 = vrot.slane %v8207_v31, %v8249_v0 }
 0x135   :  { %v618_v40 = vpop.f32.mrf.mxu0 }
 0x136   :  { %v5747_v23 = vmul.f32 -1.442695, %v661_v38  ;;  %v668_v24 = vadd.f32 %v617_v25, %v320_v22 }
 0x137   :  { %v619_v19 = vpop.f32.mrf.mxu0  ;;  %v655_v26 = vpop.f32.mrf.mxu1 }
 0x138   :  { %7468 = vpow2.f32 %v5747_v23  ;;  %v5748_v35 = vmul.f32 -1.442695, %v668_v24  ;;  %v8294_v19 = vrot.slane %v436_v21, %v8249_v0  ;;  %v391_v24 = vadd.f32 %v390_v27, %v8226_v20  ;;  %v8309_v27 = vld [vmem:[#allocation6 + $0xa8] ss:$12 sps:$4 sm:$0xff]   ;;  %v8355_v0 = vld [vmem:[#allocation8 + $0xf8] ss:$12 sps:$4 sm:$0xff]  }
 0x139   :  { %v6385_v29 = vpop.f32.mrf.mxu1  ;;  %v10901_v21 = vmov 0.0   ;;  %10907 = vst [vmem:[#allocation69_spill] sm:$0xff] %v8355_v0 }
 0x13a   :  { %7470 = vpow2.f32 %v5748_v35  ;;  %v656_v22 = vadd.f32 %v655_v26, %v8294_v19  ;;  %v8312_v26 = vld [vmem:[#allocation8 + $0x158] ss:$12 sps:$4 sm:$0xff]  }
 0x13b   :  { %v658_v39 = vpop.f32.mrf.mxu1 }
 0x13c   :  { %v8300_v39 = vld [vmem:[#allocation8 + $0x170] ss:$12 sps:$4 sm:$0xff]  }
 0x13d   :  { %v6386_v41 = vpop.f32.mrf.mxu1 }
 0x145   :  { %v7469_v36 = vpop.eup %7468 }
 0x146   :  { %v665_v17 = vadd.f32 1.0, %v7469_v36 }
 0x147   :  { %v7471_v28 = vpop.eup %7470 }
 0x148   :  { %7472 = vrcp.f32 %v665_v17  ;;  %v672_v23 = vadd.f32 1.0, %v7471_v28  ;;  %v8315_v28 = vld [vmem:[#allocation6 + $0x94] ss:$12 sps:$4 sm:$0xff]  }
 0x14a   :  { %7474 = vrcp.f32 %v672_v23  ;;  %v10902_v23 = vmov 0  }
 0x155   :  { %v7473_v32 = vpop.eup %7472 }
 0x156   :  { %v675_v40 = vmul.f32 %v7473_v32, %v656_v22  ;;  %v8322_v22 = vld [vmem:[#allocation6 + $0x90] ss:$12 sps:$4 sm:$0xff]   ;;  %v8325_v32 = vld [vmem:[#allocation8 + $0x140] ss:$12 sps:$4 sm:$0xff]  }
 0x157   :  { %v7475_v41 = vpop.eup %7474 }
 0x158   :  { %v676_v35 = vadd.f32 %v675_v40, %v391_v24  ;;  %v678_v30 = vsub.f32 1.0, %v7475_v41  ;;  %v680_v25 = vmul.f32 0.0, %v7475_v41  ;;  %v8328_v24 = vld [vmem:[#allocation6 + $0x7c] ss:$12 sps:$4 sm:$0xff]   ;;  %v8332_v40 = vld [vmem:[#allocation6 + $0x78] ss:$12 sps:$4 sm:$0xff]  }
 0x159   :  { %v8338_v41 = vld [vmem:[#allocation6 + $0x64] ss:$12 sps:$4 sm:$0xff]  }
 0x15a   :  { %7476 = vtanh.f32 %v676_v35  ;;  %v8335_v35 = vld [vmem:[#allocation8 + $0x128] ss:$12 sps:$4 sm:$0xff]  }
 0x167   :  { %v7477_v17 = vpop.eup %7476 }
 0x168   :  { %v679_v38 = vmul.f32 %v7477_v17, %v678_v30  ;;  %v8342_v30 = vld [vmem:[#allocation6 + $0x60] ss:$12 sps:$4 sm:$0xff]   ;;  %v8345_v17 = vld [vmem:[#allocation8 + $0x110] ss:$12 sps:$4 sm:$0xff]  }
 0x169   :  { %10903 = vst [vmem:[#allocation65_spill] sm:$0xff] %v8342_v30  ;;  %10904 = vst [vmem:[#allocation66_spill] sm:$0xff] %v8345_v17 }
 0x16a   :  { %v8298_v29 = vadd.f32 %v680_v25, %v679_v38  ;;  %v8348_v38 = vld [vmem:[#allocation6 + $0x4c] ss:$12 sps:$4 sm:$0xff]   ;;  %v8352_v25 = vld [vmem:[#allocation6 + $0x48] ss:$12 sps:$4 sm:$0xff]  }
 0x16b   :  { %10905 = vst [vmem:[#allocation67_spill] sm:$0xff] %v8348_v38  ;;  %10906 = vst [vmem:[#allocation68_spill] sm:$0xff] %v8352_v25 }
 0x16c   :  { %v8304_v36 = vpack.c.bf16 %v8298_v29, %v8298_v29 }
 0x16e   :  { %895 = vmatmul.mubr.bf16.vlgmr.msra.gmra.mxu0 %v8304_v36  ;;  %6404 = vmatmul.mubr.bf16.vlgmr.msra.gmra.mxu1 %v8304_v36 }
 0x16f   :  { %6408 = vmatpush3.bf16.msra.mxu1 %v8300_v39  ;;  %1107 = vmatpush1.bf16.msra.mxu0 %v8309_v27 }
 0x170   :  { %6409 = vmatprep.subr.bf16.mxu1 %v10901_v21  ;;  %1108 = vmatprep.subr.bf16.mxu0 %v8315_v28 }
 0x171   :  { %6423 = vmatprep.mubr.msk.bf16.mxu1 %vm7972_vm1, %v10901_v21  ;;  %1138 = vmatprep.mubr.bf16.mxu0 %v10902_v23 }
 0x173   :  { %6410 = vmatpush3.bf16.msra.mxu1 %v8312_v26  ;;  %1109 = vmatpush1.bf16.msra.mxu0 %v8322_v22 }
 0x174   :  { %6411 = vmatprep.subr.bf16.mxu1 %v10901_v21  ;;  %1110 = vmatprep.subr.bf16.mxu0 %v8328_v24 }
 0x177   :  { %6412 = vmatpush3.bf16.msra.mxu1 %v8325_v32  ;;  %1111 = vmatpush1.bf16.msra.mxu0 %v8332_v40 }
 0x178   :  { %6413 = vmatprep.subr.bf16.mxu1 %v10901_v21  ;;  %1112 = vmatprep.subr.bf16.mxu0 %v8338_v41 }
 0x17b   :  { %6414 = vmatpush3.bf16.msra.mxu1 %v8335_v35  ;;  %1113 = vmatpush1.bf16.msra.mxu0 %v8342_v30  ;;  %v8362_v30 = vld [vmem:[#allocation6 + $0x30] ss:$12 sps:$4 sm:$0xff]  }
 0x17c   :  { %6415 = vmatprep.subr.bf16.mxu1 %v10901_v21  ;;  %1114 = vmatprep.subr.bf16.mxu0 %v8348_v38  ;;  %10909 = vst [vmem:[#allocation71_spill] sm:$0xff] %v8362_v30  ;;  %v8365_v38 = vld [vmem:[#allocation8 + $0xe0] ss:$12 sps:$4 sm:$0xff]  }
 0x17d   :  { %10910 = vst [vmem:[#allocation72_spill] sm:$0xff] %v8365_v38 }
 0x17f   :  { %6416 = vmatpush3.bf16.msra.mxu1 %v8345_v17  ;;  %1115 = vmatpush1.bf16.msra.mxu0 %v8352_v25  ;;  %v8368_v17 = vld [vmem:[#allocation6 + $0x1c] ss:$12 sps:$4 sm:$0xff]   ;;  %v8372_v25 = vld [vmem:[#allocation6 + $0x18] ss:$12 sps:$4 sm:$0xff]  }
 0x180   :  { %6417 = vmatprep.subr.bf16.mxu1 %v10901_v21  ;;  %1116 = vmatprep.subr.bf16.mxu0 %v8358_v33  ;;  %10911 = vst [vmem:[#allocation73_spill] sm:$0xff] %v8372_v25  ;;  %v8375_v33 = vld [vmem:[#allocation8 + $0xc8] ss:$12 sps:$4 sm:$0xff]  }
 0x183   :  { %6418 = vmatpush3.bf16.msra.mxu1 %v8355_v0  ;;  %1117 = vmatpush1.bf16.msra.mxu0 %v8362_v30  ;;  %v8378_v0 = vld [vmem:[#allocation6 + $0x4] ss:$12 sps:$4 sm:$0xff]   ;;  %v8382_v30 = vld [vmem:[#allocation6] ss:$12 sps:$4 sm:$0xff]  }
 0x184   :  { %6419 = vmatprep.subr.bf16.mxu1 %v10901_v21  ;;  %1118 = vmatprep.subr.bf16.mxu0 %v8368_v17  ;;  %10912 = vst [vmem:[#allocation74_spill] sm:$0xff] %v8382_v30 }
 0x187   :  { %6420 = vmatpush3.bf16.msra.mxu1 %v8365_v38  ;;  %1119 = vmatpush1.bf16.msra.mxu0 %v8372_v25  ;;  %v10913_v38 = vmov 0.0|0.0   ;;  %v8389_v25 = vld [vmem:[#allocation6 + $0xb0] ss:$12 sps:$4 sm:$0xff]  }
 0x188   :  { %6421 = vmatprep.subr.bf16.mxu1 %v10901_v21  ;;  %1120 = vmatprep.subr.bf16.mxu0 %v8378_v0 }
 0x18b   :  { %6422 = vmatpush3.bf16.msra.mxu1 %v8375_v33  ;;  %1121 = vmatpush1.bf16.msra.mxu0 %v8382_v30  ;;  %v8397_v30 = vld [vmem:[#allocation6 + $0x98] ss:$12 sps:$4 sm:$0xff]  }
 0x18c   :  { %6427 = vmatprep.subr.bf16.mxu1 %v10901_v21  ;;  %1210 = vmatprep.subr.bf16.mxu0 %v8063_v42  ;;  %v8403_v42 = vld [vmem:[#allocation6 + $0x80] ss:$12 sps:$4 sm:$0xff]  }
 0x18e   :  { %6424 = vmatmul.mubr.bf16.vlgmr.msra.gmra.mxu1 %v10913_v38  ;;  %1139 = vmatmul.mubr.bf16.vlgmr.msra.gmra.mxu0 %v8304_v36 }
 0x18f   :  { %6428 = vmatpush3.bf16.msra.mxu1 %v8389_v25  ;;  %6443 = vmatprep.mubr.msk.bf16.mxu1 %vm7972_vm1, %v10901_v21 }
 0x190   :  { %6429 = vmatprep.subr.bf16.mxu1 %v10901_v21  ;;  %1211 = vmatpush1.bf16.msra.mxu0 %v8065_v43  ;;  %v8409_v43 = vld [vmem:[#allocation6 + $0x68] ss:$12 sps:$4 sm:$0xff]  }
 0x191   :  { %1212 = vmatprep.subr.bf16.mxu0 %v8069_v44  ;;  %v8415_v44 = vld [vmem:[#allocation6 + $0x50] ss:$12 sps:$4 sm:$0xff]  }
 0x192   :  { %10914 = vst [vmem:[#allocation75_spill] sm:$0xff] %v8415_v44 }
 0x193   :  { %6430 = vmatpush3.bf16.msra.mxu1 %v8397_v30 }
 0x194   :  { %6431 = vmatprep.subr.bf16.mxu1 %v10901_v21  ;;  %1213 = vmatpush1.bf16.msra.mxu0 %v8071_v45  ;;  %v8421_v45 = vld [vmem:[#allocation6 + $0x38] ss:$12 sps:$4 sm:$0xff]  }
 0x195   :  { %1214 = vmatprep.subr.bf16.mxu0 %v8075_v46  ;;  %10915 = vst [vmem:[#allocation76_spill] sm:$0xff] %v8421_v45  ;;  %v8427_v46 = vld [vmem:[#allocation6 + $0x20] ss:$12 sps:$4 sm:$0xff]  }
 0x196   :  { %10916 = vst [vmem:[#allocation77_spill] sm:$0xff] %v8427_v46 }
 0x197   :  { %6432 = vmatpush3.bf16.msra.mxu1 %v8403_v42 }
 0x198   :  { %6433 = vmatprep.subr.bf16.mxu1 %v10901_v21  ;;  %1215 = vmatpush1.bf16.msra.mxu0 %v8077_v47  ;;  %v8433_v47 = vld [vmem:[#allocation6 + $0x8] ss:$12 sps:$4 sm:$0xff]  }
 0x199   :  { %1216 = vmatprep.subr.bf16.mxu0 %v8081_v48  ;;  %10917 = vst [vmem:[#allocation78_spill] sm:$0xff] %v8433_v47  ;;  %v10918_v48 = vld [vmem:[#allocation33_spill] sm:$0xff] }
 0x19b   :  { %6434 = vmatpush3.bf16.msra.mxu1 %v8409_v43 }
 0x19c   :  { %6435 = vmatprep.subr.bf16.mxu1 %v10901_v21  ;;  %1217 = vmatpush1.bf16.msra.mxu0 %v8083_v49  ;;  %v10919_v49 = vld [vmem:[#allocation35_spill] sm:$0xff] }
 0x19d   :  { %1218 = vmatprep.subr.bf16.mxu0 %v8087_v50  ;;  %v10920_v50 = vld [vmem:[#allocation36_spill] sm:$0xff] }
 0x19f   :  { %6436 = vmatpush3.bf16.msra.mxu1 %v8415_v44 }
 0x1a0   :  { %6437 = vmatprep.subr.bf16.mxu1 %v10901_v21  ;;  %1219 = vmatpush1.bf16.msra.mxu0 %v8089_v51  ;;  %v8475_v51 = vsub.s32 2, %v10920_v50 }
 0x1a1   :  { %1220 = vmatprep.subr.bf16.mxu0 %v8093_v52  ;;  %v10922_v52 = vld [vmem:[#allocation38_spill] sm:$0xff] }
 0x1a2   :  { %10921 = vst [vmem:[#allocation79_spill] sm:$0xff] %v8475_v51 }
 0x1a3   :  { %6438 = vmatpush3.bf16.msra.mxu1 %v8421_v45 }
 0x1a4   :  { %6439 = vmatprep.subr.bf16.mxu1 %v10901_v21  ;;  %1221 = vmatpush1.bf16.msra.mxu0 %v8095_v53  ;;  %v687_v53 = vrot.slane %v10922_v52, %v8475_v51 }
 0x1a5   :  { %1222 = vmatprep.subr.bf16.mxu0 %v8099_v54 }
 0x1a6   :  { %v8483_v38 = vrot.slane %v687_v53, %v8475_v51 }
 0x1a7   :  { %6440 = vmatpush3.bf16.msra.mxu1 %v8427_v46 }
 0x1a8   :  { %6441 = vmatprep.subr.bf16.mxu1 %v10901_v21  ;;  %1223 = vmatpush1.bf16.msra.mxu0 %v8101_v55  ;;  %10924 = vst [vmem:[#allocation80_spill] sm:$0xff] %v8483_v38 }
 0x1a9   :  { %1224 = vmatprep.subr.bf16.mxu0 %v8105_v56 }
 0x1ab   :  { %6442 = vmatpush3.bf16.msra.mxu1 %v8433_v47 }
 0x1ac   :  { %1225 = vmatpush1.bf16.msra.mxu0 %v8107_v57  ;;  %6447 = vmatprep.subr.bf16.mxu1 %v10901_v21 }
 0x1ad   :  { %1226 = vmatprep.subr.bf16.mxu0 %v8111_v58 }
 0x1ae   :  { %6444 = vmatmul.mubr.bf16.vlgmr.msra.gmra.mxu1 %v8304_v36  ;;  %v8480_v36 = vsub.s32 6, %v10920_v50 }
 0x1af   :  { %6448 = vmatpush3.bf16.msra.mxu1 %v8116_v60  ;;  %6463 = vmatprep.mubr.msk.bf16.mxu1 %vm7972_vm1, %v10901_v21 }
 0x1b0   :  { %1227 = vmatpush2.bf16.msra.mxu0 %v8114_v59  ;;  %6449 = vmatprep.subr.bf16.mxu1 %v10901_v21  ;;  %10923 = vst [vmem:[#allocation38_spill] sm:$0xff] %v8480_v36 }
 0x1b1   :  { %1228 = vmatprep.subr.bf16.mxu0 %v8120_v61 }
 0x1b3   :  { %6450 = vmatpush3.bf16.msra.mxu1 %v8125_v63 }
 0x1b4   :  { %1229 = vmatpush2.bf16.msra.mxu0 %v8123_v62  ;;  %6451 = vmatprep.subr.bf16.mxu1 %v10901_v21 }
 0x1b5   :  { %1230 = vmatprep.subr.bf16.mxu0 %v8130_v1 }
 0x1b7   :  { %6452 = vmatpush3.bf16.msra.mxu1 %v8135_v3 }
 0x1b8   :  { %1231 = vmatpush2.bf16.msra.mxu0 %v8133_v2  ;;  %6453 = vmatprep.subr.bf16.mxu1 %v10901_v21 }
 0x1b9   :  { %1232 = vmatprep.subr.bf16.mxu0 %v8140_v4 }
 0x1bb   :  { %6454 = vmatpush3.bf16.msra.mxu1 %v8145_v6 }
 0x1bc   :  { %1233 = vmatpush2.bf16.msra.mxu0 %v8143_v5  ;;  %6455 = vmatprep.subr.bf16.mxu1 %v10901_v21 }
 0x1bd   :  { %1234 = vmatprep.subr.bf16.mxu0 %v8150_v7 }
 0x1bf   :  { %6456 = vmatpush3.bf16.msra.mxu1 %v8154_v9 }
 0x1c0   :  { %1235 = vmatpush2.bf16.msra.mxu0 %v8152_v8  ;;  %6457 = vmatprep.subr.bf16.mxu1 %v10901_v21 }
 0x1c1   :  { %1236 = vmatprep.subr.bf16.mxu0 %v8157_v10 }
 0x1c3   :  { %6458 = vmatpush3.bf16.msra.mxu1 %v8162_v12 }
 0x1c4   :  { %1237 = vmatpush2.bf16.msra.mxu0 %v8160_v11  ;;  %6459 = vmatprep.subr.bf16.mxu1 %v10901_v21 }
 0x1c5   :  { %1238 = vmatprep.subr.bf16.mxu0 %v8164_v13 }
 0x1c7   :  { %6460 = vmatpush3.bf16.msra.mxu1 %v8172_v15 }
 0x1c8   :  { %1239 = vmatpush2.bf16.msra.mxu0 %v8170_v14  ;;  %6461 = vmatprep.subr.bf16.mxu1 %v10901_v21 }
 0x1c9   :  { %1240 = vmatprep.subr.bf16.mxu0 %v8174_v16 }
 0x1cb   :  { %6462 = vmatpush3.bf16.msra.mxu1 %v8182_v18  ;;  %v691_v18 = vrot.slane %v10922_v52, %v8480_v36 }
 0x1cc   :  { %1241 = vmatpush2.bf16.msra.mxu0 %v10918_v48  ;;  %6467 = vmatprep.subr.bf16.mxu1 %v10901_v21 }
 0x1cd   :  { %1350 = vmatprep.subr.bf16.mxu0 %v10919_v49  ;;  %v8489_v11 = vrot.slane %v691_v18, %v8475_v51 }
 0x1cf   :  { %10925 = vst [vmem:[#allocation81_spill] sm:$0xff] %v8489_v11 }
 0x22e   :  { %v896_v48 = vpop.f32.mrf.mxu0  ;;  %v1001_v16 = vpop.f32.mrf.mxu1 }
 0x22f   :  { %v897_v14 = vadd.f32 %v896_v48, %v8483_v38  ;;  %v8493_v48 = vsub.s32 3, %v10920_v50 }
 0x230   :  { %v898_v49 = vpop.f32.mrf.mxu0  ;;  %v6405_v15 = vpop.f32.mrf.mxu1 }
 0x231   :  { %v5781_v13 = vmul.f32 -1.442695, %v897_v14  ;;  %v899_v53 = vadd.f32 %v898_v49, %v8489_v11  ;;  %10926 = vst [vmem:[#allocation82_spill] sm:$0xff] %v8493_v48  ;;  %v8497_v14 = vrot.slane %v8207_v31, %v8493_v48  ;;  %v10928_v48 = vld [vmem:[#allocation40_spill] sm:$0xff] }
 0x232   :  { %v900_v12 = vpop.f32.mrf.mxu0  ;;  %v1004_v10 = vpop.f32.mrf.mxu1 }
 0x233   :  { %7478 = vpow2.f32 %v5781_v13  ;;  %v5782_v7 = vmul.f32 -1.442695, %v899_v53  ;;  %v8501_v10 = vrot.slane %v8207_v31, %v8475_v51  ;;  %v10927_v13 = vld [vmem:[#allocation62_spill] sm:$0xff] }
 0x234   :  { %v901_v8 = vpop.f32.mrf.mxu0  ;;  %v6406_v9 = vpop.f32.mrf.mxu1 }
 0x235   :  { %7480 = vpow2.f32 %v5782_v7 }
 0x240   :  { %v7479_v52 = vpop.eup %7478 }
 0x241   :  { %v906_v36 = vadd.f32 1.0, %v7479_v52  ;;  %v1002_v52 = vadd.f32 %v1001_v16, %v8501_v10 }
 0x242   :  { %v7481_v15 = vpop.eup %7480 }
 0x243   :  { %7482 = vrcp.f32 %v906_v36  ;;  %v912_v8 = vadd.f32 1.0, %v7481_v15 }
 0x245   :  { %7484 = vrcp.f32 %v912_v8 }
 0x24e   :  { %v1093_v9 = vpop.f32.mrf.mxu1  ;;  %v1140_v12 = vpop.f32.mrf.mxu0 }
 0x24f   :  { %v1094_v7 = vadd.f32 %v1093_v9, %v8497_v14  ;;  %v1141_v18 = vadd.f32 %v1140_v12, %v10927_v13  ;;  %v10929_v9 = vld [vmem:[#allocation41_spill] sm:$0xff] }
 0x250   :  { %v7483_v49 = vpop.eup %7482  ;;  %v6425_v36 = vpop.f32.mrf.mxu1  ;;  %v324_v12 = vadd.f32 %v10929_v9, %v8218_v37 }
 0x251   :  { %v1142_v53 = vpop.f32.mrf.mxu0  ;;  %v1099_v50 = vmul.f32 %v7483_v49, %v1094_v7  ;;  %v1187_v11 = vadd.f32 %v1141_v18, %v10928_v48 }
 0x252   :  { %v1096_v38 = vpop.f32.mrf.mxu1  ;;  %v1143_v15 = vadd.f32 %v1142_v53, %v8285_v34  ;;  %v7485_v16 = vpop.eup %7484 }
 0x253   :  { %v1144_v5 = vpop.f32.mrf.mxu0  ;;  %v1100_v31 = vadd.f32 %v1099_v50, %v1002_v52  ;;  %v5799_v51 = vmul.f32 -1.442695, %v1187_v11  ;;  %v1102_v8 = vsub.f32 1.0, %v7485_v16  ;;  %v10930_v52 = vld [vmem:[#allocation51_spill] sm:$0xff] }
 0x254   :  { %v6426_v6 = vpop.f32.mrf.mxu1  ;;  %v1194_v36 = vadd.f32 %v1143_v15, %v324_v12  ;;  %v1104_v5 = vmul.f32 0.0, %v7485_v16 }
 0x255   :  { %v1145_v4 = vpop.f32.mrf.mxu0  ;;  %7486 = vtanh.f32 %v1100_v31  ;;  %v394_v31 = vadd.f32 %v10930_v52, %v8226_v20  ;;  %v10940_v52 = vld [vmem:[#allocation74_spill] sm:$0xff] }
 0x256   :  { %7488 = vpow2.f32 %v5799_v51  ;;  %v5800_v13 = vmul.f32 -1.442695, %v1194_v36  ;;  %v8603_v20 = vld [vmem:[#allocation8 + $0x34] ss:$12 sps:$4 sm:$0xff]  }
 0x257   :  { %10943 = vst [vmem:[#allocation51_spill] sm:$0xff] %v8603_v20 }
 0x258   :  { %7490 = vpow2.f32 %v5800_v13 }
 0x262   :  { %v7487_v7 = vpop.eup %7486 }
 0x263   :  { %v7489_v48 = vpop.eup %7488  ;;  %v1103_v38 = vmul.f32 %v7487_v7, %v1102_v8 }
 0x264   :  { %v1191_v50 = vadd.f32 1.0, %v7489_v48 }
 0x265   :  { %v8510_v11 = vadd.f32 %v1104_v5, %v1103_v38  ;;  %v7491_v6 = vpop.eup %7490 }
 0x266   :  { %7492 = vrcp.f32 %v1191_v50  ;;  %v1198_v51 = vadd.f32 1.0, %v7491_v6  ;;  %v10932_v50 = vld [vmem:[#allocation67_spill] sm:$0xff]  ;;  %v10933_v6 = vld [vmem:[#allocation66_spill] sm:$0xff] }
 0x267   :  { %v1209_v4 = vpack.c.bf16 %v8510_v11, %v8510_v11 }
 0x268   :  { %7494 = vrcp.f32 %v1198_v51  ;;  %v10935_v51 = vld [vmem:[#allocation70_spill] sm:$0xff] }
 0x269   :  { %1242 = vmatprep.mubr.bf16.mxu0 %v1209_v4 }
 0x26e   :  { %v1181_v37 = vpop.f32.mrf.mxu1 }
 0x26f   :  { %v1182_v49 = vadd.f32 %v1181_v37, %v8294_v19  ;;  %v10934_v37 = vld [vmem:[#allocation68_spill] sm:$0xff] }
 0x270   :  { %v6445_v18 = vpop.f32.mrf.mxu1 }
 0x271   :  { %v10936_v18 = vld [vmem:[#allocation69_spill] sm:$0xff] }
 0x272   :  { %v1184_v13 = vpop.f32.mrf.mxu1 }
 0x273   :  { %v7493_v53 = vpop.eup %7492  ;;  %v10938_v13 = vld [vmem:[#allocation72_spill] sm:$0xff] }
 0x274   :  { %v1201_v15 = vmul.f32 %v7493_v53, %v1182_v49  ;;  %v6446_v9 = vpop.f32.mrf.mxu1  ;;  %v10937_v49 = vld [vmem:[#allocation71_spill] sm:$0xff]  ;;  %v10939_v53 = vld [vmem:[#allocation73_spill] sm:$0xff] }
 0x275   :  { %v7495_v36 = vpop.eup %7494  ;;  %v8571_v9 = vld [vmem:[#allocation8 + $0x94] ss:$12 sps:$4 sm:$0xff]  }
 0x276   :  { %v1202_v12 = vadd.f32 %v1201_v15, %v394_v31  ;;  %v1204_v16 = vsub.f32 1.0, %v7495_v36  ;;  %v1206_v48 = vmul.f32 %v7495_v36, %v8298_v29  ;;  %v10931_v29 = vld [vmem:[#allocation65_spill] sm:$0xff]  ;;  %v8568_v15 = vld [vmem:[#allocation8 + $0xa8] ss:$12 sps:$4 sm:$0xff]   ;;  %v8584_v36 = vld [vmem:[#allocation8 + $0x78] ss:$12 sps:$4 sm:$0xff]  }
 0x277   :  { %v8560_v31 = vld [vmem:[#allocation8 + $0xac] ss:$12 sps:$4 sm:$0xff]  }
 0x278   :  { %7496 = vtanh.f32 %v1202_v12  ;;  %v8579_v12 = vld [vmem:[#allocation8 + $0x7c] ss:$12 sps:$4 sm:$0xff]  }
 0x285   :  { %v7497_v8 = vpop.eup %7496 }
 0x286   :  { %v1205_v7 = vmul.f32 %v7497_v8, %v1204_v16  ;;  %v8587_v16 = vld [vmem:[#allocation8 + $0x64] ss:$12 sps:$4 sm:$0xff]   ;;  %v8592_v8 = vld [vmem:[#allocation8 + $0x60] ss:$12 sps:$4 sm:$0xff]  }
 0x287   :  { %10941 = vst [vmem:[#allocation40_spill] sm:$0xff] %v8592_v8 }
 0x288   :  { %v8518_v38 = vadd.f32 %v1206_v48, %v1205_v7  ;;  %v8595_v7 = vld [vmem:[#allocation8 + $0x4c] ss:$12 sps:$4 sm:$0xff]   ;;  %v8600_v48 = vld [vmem:[#allocation8 + $0x48] ss:$12 sps:$4 sm:$0xff]  }
 0x289   :  { %10942 = vst [vmem:[#allocation41_spill] sm:$0xff] %v8600_v48 }
 0x28a   :  { %v8522_v5 = vpack.c.bf16 %v8518_v38, %v8518_v38 }
 0x28c   :  { %1243 = vmatmul.mubr.bf16.vlgmr.msra.gmra.mxu0 %v8522_v5  ;;  %6464 = vmatmul.mubr.bf16.vlgmr.msra.gmra.mxu1 %v8522_v5 }
 0x28d   :  { %6468 = vmatpush3.bf16.msra.mxu1 %v8300_v39  ;;  %1351 = vmatpush1.bf16.msra.mxu0 %v8309_v27 }
 0x28e   :  { %6469 = vmatprep.subr.bf16.mxu1 %v10901_v21  ;;  %1352 = vmatprep.subr.bf16.mxu0 %v8315_v28 }
 0x28f   :  { %6483 = vmatprep.mubr.msk.bf16.mxu1 %vm7972_vm1, %v10901_v21  ;;  %1382 = vmatprep.mubr.bf16.mxu0 %v10902_v23 }
 0x291   :  { %6470 = vmatpush3.bf16.msra.mxu1 %v8312_v26  ;;  %1353 = vmatpush1.bf16.msra.mxu0 %v8322_v22 }
 0x292   :  { %6471 = vmatprep.subr.bf16.mxu1 %v10901_v21  ;;  %1354 = vmatprep.subr.bf16.mxu0 %v8328_v24 }
 0x295   :  { %6472 = vmatpush3.bf16.msra.mxu1 %v8325_v32  ;;  %1355 = vmatpush1.bf16.msra.mxu0 %v8332_v40 }
 0x296   :  { %6473 = vmatprep.subr.bf16.mxu1 %v10901_v21  ;;  %1356 = vmatprep.subr.bf16.mxu0 %v8338_v41 }
 0x299   :  { %6474 = vmatpush3.bf16.msra.mxu1 %v8335_v35  ;;  %1357 = vmatpush1.bf16.msra.mxu0 %v10931_v29 }
 0x29a   :  { %6475 = vmatprep.subr.bf16.mxu1 %v10901_v21  ;;  %1358 = vmatprep.subr.bf16.mxu0 %v10932_v50 }
 0x29d   :  { %6476 = vmatpush3.bf16.msra.mxu1 %v10933_v6  ;;  %1359 = vmatpush1.bf16.msra.mxu0 %v10934_v37 }
 0x29e   :  { %6477 = vmatprep.subr.bf16.mxu1 %v10901_v21  ;;  %1360 = vmatprep.subr.bf16.mxu0 %v10935_v51 }
 0x2a1   :  { %6478 = vmatpush3.bf16.msra.mxu1 %v10936_v18  ;;  %1361 = vmatpush1.bf16.msra.mxu0 %v10937_v49 }
 0x2a2   :  { %6479 = vmatprep.subr.bf16.mxu1 %v10901_v21  ;;  %1362 = vmatprep.subr.bf16.mxu0 %v8368_v17 }
 0x2a5   :  { %6480 = vmatpush3.bf16.msra.mxu1 %v10938_v13  ;;  %1363 = vmatpush1.bf16.msra.mxu0 %v10939_v53 }
 0x2a6   :  { %6481 = vmatprep.subr.bf16.mxu1 %v10901_v21  ;;  %1364 = vmatprep.subr.bf16.mxu0 %v8378_v0 }
 0x2a9   :  { %6482 = vmatpush3.bf16.msra.mxu1 %v8375_v33  ;;  %1365 = vmatpush1.bf16.msra.mxu0 %v10940_v52 }
 0x2aa   :  { %6487 = vmatprep.subr.bf16.mxu1 %v10901_v21  ;;  %1454 = vmatprep.subr.bf16.mxu0 %v8560_v31 }
 0x2ac   :  { %6484 = vmatmul.mubr.bf16.vlgmr.msra.gmra.mxu1 %v1209_v4  ;;  %1383 = vmatmul.mubr.bf16.vlgmr.msra.gmra.mxu0 %v8522_v5  ;;  %v8576_v4 = vld [vmem:[#allocation8 + $0x90] ss:$12 sps:$4 sm:$0xff]  }
 0x2ad   :  { %6488 = vmatpush3.bf16.msra.mxu1 %v8389_v25  ;;  %6503 = vmatprep.mubr.msk.bf16.mxu1 %vm7972_vm1, %v10901_v21 }
 0x2ae   :  { %6489 = vmatprep.subr.bf16.mxu1 %v10901_v21  ;;  %1455 = vmatpush1.bf16.msra.mxu0 %v8568_v15 }
 0x2af   :  { %1456 = vmatprep.subr.bf16.mxu0 %v8571_v9 }
 0x2b1   :  { %6490 = vmatpush3.bf16.msra.mxu1 %v8397_v30 }
 0x2b2   :  { %6491 = vmatprep.subr.bf16.mxu1 %v10901_v21  ;;  %1457 = vmatpush1.bf16.msra.mxu0 %v8576_v4 }
 0x2b3   :  { %1458 = vmatprep.subr.bf16.mxu0 %v8579_v12 }
 0x2b5   :  { %6492 = vmatpush3.bf16.msra.mxu1 %v8403_v42 }
 0x2b6   :  { %6493 = vmatprep.subr.bf16.mxu1 %v10901_v21  ;;  %1459 = vmatpush1.bf16.msra.mxu0 %v8584_v36 }
 0x2b7   :  { %1460 = vmatprep.subr.bf16.mxu0 %v8587_v16 }
 0x2b9   :  { %6494 = vmatpush3.bf16.msra.mxu1 %v8409_v43 }
 0x2ba   :  { %6495 = vmatprep.subr.bf16.mxu1 %v10901_v21  ;;  %1461 = vmatpush1.bf16.msra.mxu0 %v8592_v8  ;;  %v8608_v8 = vld [vmem:[#allocation8 + $0x30] ss:$12 sps:$4 sm:$0xff]  }
 0x2bb   :  { %1462 = vmatprep.subr.bf16.mxu0 %v8595_v7  ;;  %10944 = vst [vmem:[#allocation65_spill] sm:$0xff] %v8608_v8 }
 0x2bd   :  { %6496 = vmatpush3.bf16.msra.mxu1 %v8415_v44 }
 0x2be   :  { %6497 = vmatprep.subr.bf16.mxu1 %v10901_v21  ;;  %1463 = vmatpush1.bf16.msra.mxu0 %v8600_v48 }
 0x2bf   :  { %1464 = vmatprep.subr.bf16.mxu0 %v8603_v20 }
 0x2c1   :  { %6498 = vmatpush3.bf16.msra.mxu1 %v8421_v45 }
 0x2c2   :  { %6499 = vmatprep.subr.bf16.mxu1 %v10901_v21  ;;  %1465 = vmatpush1.bf16.msra.mxu0 %v8608_v8 }
 0x2c3   :  { %1466 = vmatprep.subr.bf16.mxu0 %v8099_v54  ;;  %v10945_v54 = vld [vmem:[#allocation20_spill] sm:$0xff] }
 0x2c5   :  { %6500 = vmatpush3.bf16.msra.mxu1 %v8427_v46 }
 0x2c6   :  { %6501 = vmatprep.subr.bf16.mxu1 %v10901_v21  ;;  %1467 = vmatpush1.bf16.msra.mxu0 %v8101_v55  ;;  %v10946_v55 = vld [vmem:[#allocation22_spill] sm:$0xff] }
 0x2c7   :  { %1468 = vmatprep.subr.bf16.mxu0 %v8105_v56  ;;  %v10947_v56 = vld [vmem:[#allocation21_spill] sm:$0xff] }
 0x2c9   :  { %6502 = vmatpush3.bf16.msra.mxu1 %v8433_v47  ;;  %v10962_v47 = vld [vmem:[#allocation81_spill] sm:$0xff] }
 0x2ca   :  { %1469 = vmatpush1.bf16.msra.mxu0 %v8107_v57  ;;  %6507 = vmatprep.subr.bf16.mxu1 %v10901_v21  ;;  %v10948_v57 = vld [vmem:[#allocation23_spill] sm:$0xff] }
 0x2cb   :  { %1470 = vmatprep.subr.bf16.mxu0 %v8111_v58  ;;  %v10949_v58 = vld [vmem:[#allocation25_spill] sm:$0xff] }
 0x2cc   :  { %6504 = vmatmul.mubr.bf16.vlgmr.msra.gmra.mxu1 %v8522_v5  ;;  %v10958_v5 = vld [vmem:[#allocation34_spill] sm:$0xff] }
 0x2cd   :  { %6508 = vmatpush3.bf16.msra.mxu1 %v8116_v60  ;;  %6523 = vmatprep.mubr.msk.bf16.mxu1 %vm7972_vm1, %v10901_v21  ;;  %v10951_v60 = vld [vmem:[#allocation26_spill] sm:$0xff] }
 0x2ce   :  { %1471 = vmatpush2.bf16.msra.mxu0 %v8114_v59  ;;  %6509 = vmatprep.subr.bf16.mxu1 %v10901_v21  ;;  %v10950_v59 = vld [vmem:[#allocation24_spill] sm:$0xff] }
 0x2cf   :  { %1472 = vmatprep.subr.bf16.mxu0 %v8120_v61  ;;  %v10952_v61 = vld [vmem:[#allocation28_spill] sm:$0xff] }
 0x2d1   :  { %6510 = vmatpush3.bf16.msra.mxu1 %v8125_v63  ;;  %v10954_v63 = vld [vmem:[#allocation29_spill] sm:$0xff] }
 0x2d2   :  { %1473 = vmatpush2.bf16.msra.mxu0 %v8123_v62  ;;  %6511 = vmatprep.subr.bf16.mxu1 %v10901_v21  ;;  %v10953_v62 = vld [vmem:[#allocation27_spill] sm:$0xff] }
 0x2d3   :  { %1474 = vmatprep.subr.bf16.mxu0 %v8130_v1  ;;  %v10955_v1 = vld [vmem:[#allocation31_spill] sm:$0xff] }
 0x2d5   :  { %6512 = vmatpush3.bf16.msra.mxu1 %v8135_v3  ;;  %v10957_v3 = vld [vmem:[#allocation32_spill] sm:$0xff] }
 0x2d6   :  { %1475 = vmatpush2.bf16.msra.mxu0 %v8133_v2  ;;  %6513 = vmatprep.subr.bf16.mxu1 %v10901_v21  ;;  %v10956_v2 = vld [vmem:[#allocation30_spill] sm:$0xff] }
 0x2d7   :  { %1476 = vmatprep.subr.bf16.mxu0 %v10945_v54  ;;  %v10959_v54 = vld [vmem:[#allocation33_spill] sm:$0xff] }
 0x2d9   :  { %6514 = vmatpush3.bf16.msra.mxu1 %v10946_v55  ;;  %v10960_v55 = vld [vmem:[#allocation35_spill] sm:$0xff] }
 0x2da   :  { %1477 = vmatpush2.bf16.msra.mxu0 %v10947_v56  ;;  %6515 = vmatprep.subr.bf16.mxu1 %v10901_v21 }
 0x2db   :  { %1478 = vmatprep.subr.bf16.mxu0 %v10948_v57 }
 0x2dd   :  { %6516 = vmatpush3.bf16.msra.mxu1 %v10949_v58  ;;  %v10961_v58 = vld [vmem:[#allocation80_spill] sm:$0xff] }
 0x2de   :  { %1479 = vmatpush2.bf16.msra.mxu0 %v10950_v59  ;;  %6517 = vmatprep.subr.bf16.mxu1 %v10901_v21 }
 0x2df   :  { %1480 = vmatprep.subr.bf16.mxu0 %v10951_v60 }
 0x2e1   :  { %6518 = vmatpush3.bf16.msra.mxu1 %v10952_v61 }
 0x2e2   :  { %1481 = vmatpush2.bf16.msra.mxu0 %v10953_v62  ;;  %6519 = vmatprep.subr.bf16.mxu1 %v10901_v21 }
 0x2e3   :  { %1482 = vmatprep.subr.bf16.mxu0 %v10954_v63 }
 0x2e5   :  { %6520 = vmatpush3.bf16.msra.mxu1 %v10955_v1 }
 0x2e6   :  { %1483 = vmatpush2.bf16.msra.mxu0 %v10956_v2  ;;  %6521 = vmatprep.subr.bf16.mxu1 %v10901_v21 }
 0x2e7   :  { %1484 = vmatprep.subr.bf16.mxu0 %v10957_v3 }
 0x2e9   :  { %6522 = vmatpush3.bf16.msra.mxu1 %v10958_v5 }
 0x2ea   :  { %1485 = vmatpush2.bf16.msra.mxu0 %v10959_v54  ;;  %6527 = vmatprep.subr.bf16.mxu1 %v10901_v21 }
 0x2eb   :  { %1594 = vmatprep.subr.bf16.mxu0 %v10960_v55 }
 0x34c   :  { %v1244_v56 = vpop.f32.mrf.mxu0  ;;  %v1297_v57 = vpop.f32.mrf.mxu1 }
 0x34d   :  { %v1245_v59 = vadd.f32 %v1244_v56, %v10961_v58 }
 0x34e   :  { %v1246_v60 = vpop.f32.mrf.mxu0  ;;  %v6465_v61 = vpop.f32.mrf.mxu1 }
 0x34f   :  { %v5801_v62 = vmul.f32 -1.442695, %v1245_v59  ;;  %v1247_v5 = vadd.f32 %v1246_v60, %v10962_v47  ;;  %v10963_v61 = vld [vmem:[#allocation62_spill] sm:$0xff] }
 0x350   :  { %v1248_v63 = vpop.f32.mrf.mxu0  ;;  %v1300_v1 = vpop.f32.mrf.mxu1 }
 0x351   :  { %7498 = vpow2.f32 %v5801_v62  ;;  %v5802_v46 = vmul.f32 -1.442695, %v1247_v5 }
 0x352   :  { %v1249_v2 = vpop.f32.mrf.mxu0  ;;  %v6466_v3 = vpop.f32.mrf.mxu1 }
 0x353   :  { %7500 = vpow2.f32 %v5802_v46  ;;  %v1298_v2 = vadd.f32 %v1297_v57, %v8501_v10  ;;  %v10964_v3 = vld [vmem:[#allocation42_spill] sm:$0xff] }
 0x35e   :  { %v7499_v54 = vpop.eup %7498 }
 0x35f   :  { %v1254_v8 = vadd.f32 1.0, %v7499_v54 }
 0x360   :  { %v7501_v55 = vpop.eup %7500 }
 0x361   :  { %7502 = vrcp.f32 %v1254_v8  ;;  %v1260_v45 = vadd.f32 1.0, %v7501_v55 }
 0x363   :  { %7504 = vrcp.f32 %v1260_v45 }
 0x36c   :  { %v1337_v20 = vpop.f32.mrf.mxu1  ;;  %v1384_v48 = vpop.f32.mrf.mxu0 }
 0x36d   :  { %v1338_v56 = vadd.f32 %v1337_v20, %v8497_v14  ;;  %v1385_v59 = vadd.f32 %v1384_v48, %v10963_v61  ;;  %v10965_v20 = vld [vmem:[#allocation43_spill] sm:$0xff] }
 0x36e   :  { %v7503_v63 = vpop.eup %7502  ;;  %v6485_v1 = vpop.f32.mrf.mxu1 }
 0x36f   :  { %v1386_v62 = vpop.f32.mrf.mxu0  ;;  %v1343_v60 = vmul.f32 %v7503_v63, %v1338_v56  ;;  %v1431_v46 = vadd.f32 %v1385_v59, %v10964_v3 }
 0x370   :  { %v1340_v5 = vpop.f32.mrf.mxu1  ;;  %v1387_v55 = vadd.f32 %v1386_v62, %v8285_v34  ;;  %v7505_v61 = vpop.eup %7504 }
 0x371   :  { %v1388_v54 = vpop.f32.mrf.mxu0  ;;  %v1344_v8 = vadd.f32 %v1343_v60, %v1298_v2  ;;  %v5803_v47 = vmul.f32 -1.442695, %v1431_v46  ;;  %v1346_v57 = vsub.f32 1.0, %v7505_v61  ;;  %v1348_v59 = vmul.f32 %v7505_v61, %v8510_v11  ;;  %v10966_v11 = vld [vmem:[#allocation47_spill] sm:$0xff] }
 0x372   :  { %v6486_v58 = vpop.f32.mrf.mxu1  ;;  %v1438_v48 = vadd.f32 %v1387_v55, %v10965_v20 }
 0x373   :  { %v1389_v44 = vpop.f32.mrf.mxu0  ;;  %7506 = vtanh.f32 %v1344_v8 }
 0x374   :  { %7508 = vpow2.f32 %v5803_v47  ;;  %v5804_v1 = vmul.f32 -1.442695, %v1438_v48 }
 0x376   :  { %7510 = vpow2.f32 %v5804_v1 }
 0x380   :  { %v7507_v45 = vpop.eup %7506 }
 0x381   :  { %v7509_v56 = vpop.eup %7508  ;;  %v1347_v63 = vmul.f32 %v7507_v45, %v1346_v57 }
 0x382   :  { %v1435_v3 = vadd.f32 1.0, %v7509_v56 }
 0x383   :  { %v8664_v2 = vadd.f32 %v1348_v59, %v1347_v63  ;;  %v7511_v47 = vpop.eup %7510  ;;  %v8812_v59 = vld [vmem:[#allocation8 + $0x38] ss:$12 sps:$4 sm:$0xff]  }
 0x384   :  { %7512 = vrcp.f32 %v1435_v3  ;;  %v1442_v62 = vadd.f32 1.0, %v7511_v47  ;;  %10985 = vst [vmem:[#allocation22_spill] sm:$0xff] %v8812_v59  ;;  %v8815_v3 = vld [vmem:[#allocation8 + $0xf0] ss:$12 sps:$4 sm:$0xff]   ;;  %v8822_v47 = vld [vmem:[#allocation8 + $0x20] ss:$12 sps:$4 sm:$0xff]  }
 0x385   :  { %v1453_v44 = vpack.c.bf16 %v8664_v2, %v8664_v2  ;;  %10986 = vst [vmem:[#allocation21_spill] sm:$0xff] %v8815_v3  ;;  %10988 = vst [vmem:[#allocation25_spill] sm:$0xff] %v8822_v47 }
 0x386   :  { %7514 = vrcp.f32 %v1442_v62  ;;  %v8829_v62 = vld [vmem:[#allocation8 + $0xc4] ss:$12 sps:$4 sm:$0xff]  }
 0x387   :  { %1486 = vmatprep.mubr.bf16.mxu0 %v1453_v44  ;;  %10990 = vst [vmem:[#allocation26_spill] sm:$0xff] %v8829_v62 }
 0x38c   :  { %v1425_v58 = vpop.f32.mrf.mxu1 }
 0x38d   :  { %v1426_v46 = vadd.f32 %v1425_v58, %v8294_v19  ;;  %v8825_v58 = vld [vmem:[#allocation8 + $0xd8] ss:$12 sps:$4 sm:$0xff]  }
 0x38e   :  { %v6505_v60 = vpop.f32.mrf.mxu1  ;;  %10989 = vst [vmem:[#allocation24_spill] sm:$0xff] %v8825_v58 }
 0x38f   :  { %v8832_v60 = vld [vmem:[#allocation8 + $0x8] ss:$12 sps:$4 sm:$0xff]  }
 0x390   :  { %v1428_v5 = vpop.f32.mrf.mxu1  ;;  %10991 = vst [vmem:[#allocation28_spill] sm:$0xff] %v8832_v60 }
 0x391   :  { %v7513_v54 = vpop.eup %7512  ;;  %v8839_v5 = vld [vmem:[#allocation6 + $0xac] ss:$12 sps:$4 sm:$0xff]  }
 0x392   :  { %v1445_v8 = vmul.f32 %v7513_v54, %v1426_v46  ;;  %v6506_v55 = vpop.f32.mrf.mxu1  ;;  %v8835_v46 = vld [vmem:[#allocation8 + $0xc0] ss:$12 sps:$4 sm:$0xff]   ;;  %10993 = vst [vmem:[#allocation29_spill] sm:$0xff] %v8839_v5 }
 0x393   :  { %v7515_v20 = vpop.eup %7514  ;;  %10992 = vst [vmem:[#allocation27_spill] sm:$0xff] %v8835_v46  ;;  %v10994_v55 = vld [vmem:[#allocation80_spill] sm:$0xff] }
 0x394   :  { %v1446_v61 = vadd.f32 %v1445_v8, %v10966_v11  ;;  %v1448_v48 = vsub.f32 1.0, %v7515_v20  ;;  %v1450_v45 = vmul.f32 %v7515_v20, %v8518_v38  ;;  %v8775_v38 = vld [vmem:[#allocation8 + $0x150] ss:$12 sps:$4 sm:$0xff]  }
 0x396   :  { %7516 = vtanh.f32 %v1446_v61 }
 0x3a3   :  { %v7517_v1 = vpop.eup %7516 }
 0x3a4   :  { %v1449_v57 = vmul.f32 %v7517_v1, %v1448_v48 }
 0x3a6   :  { %v8671_v56 = vadd.f32 %v1450_v45, %v1449_v57 }
 0x3a8   :  { %v8675_v63 = vpack.c.bf16 %v8671_v56, %v8671_v56 }
 0x3aa   :  { %1487 = vmatmul.mubr.bf16.vlgmr.msra.gmra.mxu0 %v8675_v63  ;;  %6524 = vmatmul.mubr.bf16.vlgmr.msra.gmra.mxu1 %v8675_v63 }
 0x3ab   :  { %6528 = vmatpush3.bf16.msra.mxu1 %v8300_v39  ;;  %1595 = vmatpush1.bf16.msra.mxu0 %v8309_v27  ;;  %v10969_v39 = vld [vmem:[#allocation41_spill] sm:$0xff]  ;;  %v10970_v27 = vld [vmem:[#allocation51_spill] sm:$0xff] }
 0x3ac   :  { %6529 = vmatprep.subr.bf16.mxu1 %v10901_v21  ;;  %1596 = vmatprep.subr.bf16.mxu0 %v8315_v28  ;;  %v10972_v28 = vld [vmem:[#allocation65_spill] sm:$0xff] }
 0x3ad   :  { %6543 = vmatprep.mubr.msk.bf16.mxu1 %vm7972_vm1, %v10901_v21  ;;  %1626 = vmatprep.mubr.bf16.mxu0 %v10902_v23 }
 0x3af   :  { %6530 = vmatpush3.bf16.msra.mxu1 %v8312_v26  ;;  %1597 = vmatpush1.bf16.msra.mxu0 %v8322_v22  ;;  %v10971_v26 = vld [vmem:[#allocation76_spill] sm:$0xff] }
 0x3b0   :  { %6531 = vmatprep.subr.bf16.mxu1 %v10901_v21  ;;  %1598 = vmatprep.subr.bf16.mxu0 %v8328_v24  ;;  %v8740_v22 = vld [vmem:[#allocation8 + $0x1c] ss:$12 sps:$4 sm:$0xff]   ;;  %v8745_v24 = vld [vmem:[#allocation8 + $0x18] ss:$12 sps:$4 sm:$0xff]  }
 0x3b3   :  { %6532 = vmatpush3.bf16.msra.mxu1 %v8325_v32  ;;  %1599 = vmatpush1.bf16.msra.mxu0 %v8332_v40  ;;  %v10973_v32 = vld [vmem:[#allocation77_spill] sm:$0xff] }
 0x3b4   :  { %6533 = vmatprep.subr.bf16.mxu1 %v10901_v21  ;;  %1600 = vmatprep.subr.bf16.mxu0 %v8338_v41  ;;  %v8748_v40 = vld [vmem:[#allocation8 + $0x4] ss:$12 sps:$4 sm:$0xff]   ;;  %v8752_v41 = vld [vmem:[#allocation8] ss:$12 sps:$4 sm:$0xff]  }
 0x3b7   :  { %6534 = vmatpush3.bf16.msra.mxu1 %v8335_v35  ;;  %1601 = vmatpush1.bf16.msra.mxu0 %v10931_v29  ;;  %v10974_v35 = vld [vmem:[#allocation78_spill] sm:$0xff]  ;;  %v8779_v29 = vld [vmem:[#allocation8 + $0x13c] ss:$12 sps:$4 sm:$0xff]  }
 0x3b8   :  { %6535 = vmatprep.subr.bf16.mxu1 %v10901_v21  ;;  %1602 = vmatprep.subr.bf16.mxu0 %v10932_v50  ;;  %10975 = vst [vmem:[#allocation67_spill] sm:$0xff] %v8779_v29  ;;  %v8782_v50 = vld [vmem:[#allocation8 + $0x80] ss:$12 sps:$4 sm:$0xff]  }
 0x3b9   :  { %10976 = vst [vmem:[#allocation66_spill] sm:$0xff] %v8782_v50 }
 0x3bb   :  { %6536 = vmatpush3.bf16.msra.mxu1 %v10933_v6  ;;  %1603 = vmatpush1.bf16.msra.mxu0 %v10934_v37  ;;  %v8785_v6 = vld [vmem:[#allocation8 + $0x138] ss:$12 sps:$4 sm:$0xff]  }
 0x3bc   :  { %6537 = vmatprep.subr.bf16.mxu1 %v10901_v21  ;;  %1604 = vmatprep.subr.bf16.mxu0 %v10935_v51  ;;  %10977 = vst [vmem:[#allocation68_spill] sm:$0xff] %v8785_v6  ;;  %v8789_v37 = vld [vmem:[#allocation8 + $0x124] ss:$12 sps:$4 sm:$0xff]   ;;  %v8792_v51 = vld [vmem:[#allocation8 + $0x68] ss:$12 sps:$4 sm:$0xff]  }
 0x3bd   :  { %10978 = vst [vmem:[#allocation70_spill] sm:$0xff] %v8789_v37  ;;  %10979 = vst [vmem:[#allocation69_spill] sm:$0xff] %v8792_v51 }
 0x3bf   :  { %6538 = vmatpush3.bf16.msra.mxu1 %v10936_v18  ;;  %1605 = vmatpush1.bf16.msra.mxu0 %v10937_v49  ;;  %v8795_v18 = vld [vmem:[#allocation8 + $0x120] ss:$12 sps:$4 sm:$0xff]  }
 0x3c0   :  { %6539 = vmatprep.subr.bf16.mxu1 %v10901_v21  ;;  %1606 = vmatprep.subr.bf16.mxu0 %v8368_v17  ;;  %v8760_v17 = vld [vmem:[#allocation8 + $0xb0] ss:$12 sps:$4 sm:$0xff]   ;;  %10980 = vst [vmem:[#allocation71_spill] sm:$0xff] %v8795_v18  ;;  %v8799_v49 = vld [vmem:[#allocation8 + $0x10c] ss:$12 sps:$4 sm:$0xff]  }
 0x3c1   :  { %10981 = vst [vmem:[#allocation72_spill] sm:$0xff] %v8799_v49 }
 0x3c3   :  { %6540 = vmatpush3.bf16.msra.mxu1 %v10938_v13  ;;  %1607 = vmatpush1.bf16.msra.mxu0 %v10939_v53  ;;  %v8802_v13 = vld [vmem:[#allocation8 + $0x50] ss:$12 sps:$4 sm:$0xff]   ;;  %v8805_v53 = vld [vmem:[#allocation8 + $0x108] ss:$12 sps:$4 sm:$0xff]  }
 0x3c4   :  { %6541 = vmatprep.subr.bf16.mxu1 %v10901_v21  ;;  %1608 = vmatprep.subr.bf16.mxu0 %v8378_v0  ;;  %v10967_v0 = vld [vmem:[#allocation40_spill] sm:$0xff]  ;;  %10982 = vst [vmem:[#allocation73_spill] sm:$0xff] %v8802_v13  ;;  %10983 = vst [vmem:[#allocation74_spill] sm:$0xff] %v8805_v53 }
 0x3c7   :  { %6542 = vmatpush3.bf16.msra.mxu1 %v8375_v33  ;;  %1609 = vmatpush1.bf16.msra.mxu0 %v10940_v52  ;;  %v10968_v33 = vld [vmem:[#allocation75_spill] sm:$0xff] }
 0x3c8   :  { %6547 = vmatprep.subr.bf16.mxu1 %v10901_v21  ;;  %1698 = vmatprep.subr.bf16.mxu0 %v8560_v31  ;;  %v8809_v52 = vld [vmem:[#allocation8 + $0xf4] ss:$12 sps:$4 sm:$0xff]  }
 0x3c9   :  { %10984 = vst [vmem:[#allocation20_spill] sm:$0xff] %v8809_v52 }
 0x3ca   :  { %6544 = vmatmul.mubr.bf16.vlgmr.msra.gmra.mxu1 %v1453_v44  ;;  %1627 = vmatmul.mubr.bf16.vlgmr.msra.gmra.mxu0 %v8675_v63  ;;  %v8819_v44 = vld [vmem:[#allocation8 + $0xdc] ss:$12 sps:$4 sm:$0xff]  }
 0x3cb   :  { %6548 = vmatpush3.bf16.msra.mxu1 %v8389_v25  ;;  %6563 = vmatprep.mubr.msk.bf16.mxu1 %vm7972_vm1, %v10901_v21  ;;  %v8765_v25 = vld [vmem:[#allocation8 + $0x168] ss:$12 sps:$4 sm:$0xff]   ;;  %10987 = vst [vmem:[#allocation23_spill] sm:$0xff] %v8819_v44 }
 0x3cc   :  { %6549 = vmatprep.subr.bf16.mxu1 %v10901_v21  ;;  %1699 = vmatpush1.bf16.msra.mxu0 %v8568_v15 }
 0x3cd   :  { %1700 = vmatprep.subr.bf16.mxu0 %v8571_v9 }
 0x3cf   :  { %6550 = vmatpush3.bf16.msra.mxu1 %v8397_v30  ;;  %v8756_v30 = vld [vmem:[#allocation8 + $0x16c] ss:$12 sps:$4 sm:$0xff]  }
 0x3d0   :  { %6551 = vmatprep.subr.bf16.mxu1 %v10901_v21  ;;  %1701 = vmatpush1.bf16.msra.mxu0 %v8576_v4 }
 0x3d1   :  { %1702 = vmatprep.subr.bf16.mxu0 %v8579_v12 }
 0x3d3   :  { %6552 = vmatpush3.bf16.msra.mxu1 %v8403_v42  ;;  %v8769_v42 = vld [vmem:[#allocation8 + $0x154] ss:$12 sps:$4 sm:$0xff]  }
 0x3d4   :  { %6553 = vmatprep.subr.bf16.mxu1 %v10901_v21  ;;  %1703 = vmatpush1.bf16.msra.mxu0 %v8584_v36 }
 0x3d5   :  { %1704 = vmatprep.subr.bf16.mxu0 %v8587_v16 }
 0x3d7   :  { %6554 = vmatpush3.bf16.msra.mxu1 %v8409_v43  ;;  %v8772_v43 = vld [vmem:[#allocation8 + $0x98] ss:$12 sps:$4 sm:$0xff]  }
 0x3d8   :  { %6555 = vmatprep.subr.bf16.mxu1 %v10901_v21  ;;  %1705 = vmatpush1.bf16.msra.mxu0 %v10967_v0 }
 0x3d9   :  { %1706 = vmatprep.subr.bf16.mxu0 %v8595_v7 }
 0x3db   :  { %6556 = vmatpush3.bf16.msra.mxu1 %v10968_v33  ;;  %v10995_v33 = vld [vmem:[#allocation81_spill] sm:$0xff] }
 0x3dc   :  { %6557 = vmatprep.subr.bf16.mxu1 %v10901_v21  ;;  %1707 = vmatpush1.bf16.msra.mxu0 %v10969_v39 }
 0x3dd   :  { %1708 = vmatprep.subr.bf16.mxu0 %v10970_v27 }
 0x3df   :  { %6558 = vmatpush3.bf16.msra.mxu1 %v10971_v26 }
 0x3e0   :  { %6559 = vmatprep.subr.bf16.mxu1 %v10901_v21  ;;  %1709 = vmatpush1.bf16.msra.mxu0 %v10972_v28 }
 0x3e1   :  { %1710 = vmatprep.subr.bf16.mxu0 %v8740_v22 }
 0x3e3   :  { %6560 = vmatpush3.bf16.msra.mxu1 %v10973_v32 }
 0x3e4   :  { %6561 = vmatprep.subr.bf16.mxu1 %v10901_v21  ;;  %1711 = vmatpush1.bf16.msra.mxu0 %v8745_v24 }
 0x3e5   :  { %1712 = vmatprep.subr.bf16.mxu0 %v8748_v40 }
 0x3e7   :  { %6562 = vmatpush3.bf16.msra.mxu1 %v10974_v35 }
 0x3e8   :  { %1713 = vmatpush1.bf16.msra.mxu0 %v8752_v41  ;;  %6567 = vmatprep.subr.bf16.mxu1 %v10901_v21 }
 0x3e9   :  { %1714 = vmatprep.subr.bf16.mxu0 %v8756_v30 }
 0x3ea   :  { %6564 = vmatmul.mubr.bf16.vlgmr.msra.gmra.mxu1 %v8675_v63 }
 0x3eb   :  { %6568 = vmatpush3.bf16.msra.mxu1 %v8760_v17  ;;  %6583 = vmatprep.mubr.msk.bf16.mxu1 %vm7972_vm1, %v10901_v21 }
 0x3ec   :  { %1715 = vmatpush2.bf16.msra.mxu0 %v8765_v25  ;;  %6569 = vmatprep.subr.bf16.mxu1 %v10901_v21 }
 0x3ed   :  { %1716 = vmatprep.subr.bf16.mxu0 %v8769_v42 }
 0x3ef   :  { %6570 = vmatpush3.bf16.msra.mxu1 %v8772_v43 }
 0x3f0   :  { %1717 = vmatpush2.bf16.msra.mxu0 %v8775_v38  ;;  %6571 = vmatprep.subr.bf16.mxu1 %v10901_v21 }
 0x3f1   :  { %1718 = vmatprep.subr.bf16.mxu0 %v8779_v29 }
 0x3f3   :  { %6572 = vmatpush3.bf16.msra.mxu1 %v8782_v50 }
 0x3f4   :  { %1719 = vmatpush2.bf16.msra.mxu0 %v8785_v6  ;;  %6573 = vmatprep.subr.bf16.mxu1 %v10901_v21 }
 0x3f5   :  { %1720 = vmatprep.subr.bf16.mxu0 %v8789_v37 }
 0x3f7   :  { %6574 = vmatpush3.bf16.msra.mxu1 %v8792_v51 }
 0x3f8   :  { %1721 = vmatpush2.bf16.msra.mxu0 %v8795_v18  ;;  %6575 = vmatprep.subr.bf16.mxu1 %v10901_v21 }
 0x3f9   :  { %1722 = vmatprep.subr.bf16.mxu0 %v8799_v49 }
 0x3fb   :  { %6576 = vmatpush3.bf16.msra.mxu1 %v8802_v13 }
 0x3fc   :  { %1723 = vmatpush2.bf16.msra.mxu0 %v8805_v53  ;;  %6577 = vmatprep.subr.bf16.mxu1 %v10901_v21 }
 0x3fd   :  { %1724 = vmatprep.subr.bf16.mxu0 %v8809_v52 }
 0x3ff   :  { %6578 = vmatpush3.bf16.msra.mxu1 %v8812_v59 }
 0x400   :  { %1725 = vmatpush2.bf16.msra.mxu0 %v8815_v3  ;;  %6579 = vmatprep.subr.bf16.mxu1 %v10901_v21 }
 0x401   :  { %1726 = vmatprep.subr.bf16.mxu0 %v8819_v44 }
 0x403   :  { %6580 = vmatpush3.bf16.msra.mxu1 %v8822_v47 }
 0x404   :  { %1727 = vmatpush2.bf16.msra.mxu0 %v8825_v58  ;;  %6581 = vmatprep.subr.bf16.mxu1 %v10901_v21 }
 0x405   :  { %1728 = vmatprep.subr.bf16.mxu0 %v8829_v62 }
 0x407   :  { %6582 = vmatpush3.bf16.msra.mxu1 %v8832_v60 }
 0x408   :  { %1729 = vmatpush2.bf16.msra.mxu0 %v8835_v46  ;;  %6587 = vmatprep.subr.bf16.mxu1 %v10901_v21 }
 0x409   :  { %1838 = vmatprep.subr.bf16.mxu0 %v8839_v5 }
 0x46a   :  { %v1488_v54 = vpop.f32.mrf.mxu0  ;;  %v1541_v8 = vpop.f32.mrf.mxu1 }
 0x46b   :  { %v1489_v11 = vadd.f32 %v1488_v54, %v10994_v55 }
 0x46c   :  { %v1490_v61 = vpop.f32.mrf.mxu0  ;;  %v6525_v20 = vpop.f32.mrf.mxu1 }
 0x46d   :  { %v5805_v48 = vmul.f32 -1.442695, %v1489_v11  ;;  %v1491_v26 = vadd.f32 %v1490_v61, %v10995_v33  ;;  %v10996_v20 = vld [vmem:[#allocation62_spill] sm:$0xff] }
 0x46e   :  { %v1492_v1 = vpop.f32.mrf.mxu0  ;;  %v1544_v57 = vpop.f32.mrf.mxu1 }
 0x46f   :  { %7518 = vpow2.f32 %v5805_v48  ;;  %v5806_v32 = vmul.f32 -1.442695, %v1491_v26 }
 0x470   :  { %v1493_v45 = vpop.f32.mrf.mxu0  ;;  %v6526_v63 = vpop.f32.mrf.mxu1 }
 0x471   :  { %7520 = vpow2.f32 %v5806_v32  ;;  %v1542_v45 = vadd.f32 %v1541_v8, %v8501_v10  ;;  %v10997_v63 = vld [vmem:[#allocation45_spill] sm:$0xff] }
 0x47c   :  { %v7519_v35 = vpop.eup %7518 }
 0x47d   :  { %v1498_v46 = vadd.f32 1.0, %v7519_v35 }
 0x47e   :  { %v7521_v5 = vpop.eup %7520 }
 0x47f   :  { %7522 = vrcp.f32 %v1498_v46  ;;  %v1504_v60 = vadd.f32 1.0, %v7521_v5 }
 0x481   :  { %7524 = vrcp.f32 %v1504_v60 }
 0x48a   :  { %v1581_v62 = vpop.f32.mrf.mxu1  ;;  %v1628_v58 = vpop.f32.mrf.mxu0 }
 0x48b   :  { %v1582_v54 = vadd.f32 %v1581_v62, %v8497_v14  ;;  %v1629_v11 = vadd.f32 %v1628_v58, %v10996_v20  ;;  %v10998_v58 = vld [vmem:[#allocation46_spill] sm:$0xff] }
 0x48c   :  { %v7523_v1 = vpop.eup %7522  ;;  %v6545_v57 = vpop.f32.mrf.mxu1 }
 0x48d   :  { %v1630_v48 = vpop.f32.mrf.mxu0  ;;  %v1587_v61 = vmul.f32 %v7523_v1, %v1582_v54  ;;  %v1675_v26 = vadd.f32 %v1629_v11, %v10997_v63 }
 0x48e   :  { %v1584_v32 = vpop.f32.mrf.mxu1  ;;  %v1631_v5 = vadd.f32 %v1630_v48, %v8285_v34  ;;  %v7525_v20 = vpop.eup %7524 }
 0x48f   :  { %v1632_v35 = vpop.f32.mrf.mxu0  ;;  %v1588_v46 = vadd.f32 %v1587_v61, %v1542_v45  ;;  %v5807_v33 = vmul.f32 -1.442695, %v1675_v26  ;;  %v1590_v8 = vsub.f32 1.0, %v7525_v20  ;;  %v1592_v11 = vmul.f32 %v7525_v20, %v8664_v2 }
 0x490   :  { %v6546_v55 = vpop.f32.mrf.mxu1  ;;  %v1682_v62 = vadd.f32 %v1631_v5, %v10998_v58 }
 0x491   :  { %v1633_v47 = vpop.f32.mrf.mxu0  ;;  %7526 = vtanh.f32 %v1588_v46  ;;  %v10999_v46 = vld [vmem:[#allocation50_spill] sm:$0xff] }
 0x492   :  { %7528 = vpow2.f32 %v5807_v33  ;;  %v5808_v57 = vmul.f32 -1.442695, %v1682_v62 }
 0x494   :  { %7530 = vpow2.f32 %v5808_v57 }
 0x49e   :  { %v7527_v60 = vpop.eup %7526 }
 0x49f   :  { %v7529_v54 = vpop.eup %7528  ;;  %v1591_v1 = vmul.f32 %v7527_v60, %v1590_v8 }
 0x4a0   :  { %v1679_v63 = vadd.f32 1.0, %v7529_v54 }
 0x4a1   :  { %v8851_v45 = vadd.f32 %v1592_v11, %v1591_v1  ;;  %v7531_v55 = vpop.eup %7530  ;;  %v8869_v11 = vld [vmem:[#allocation8 + $0x170] ss:$12 sps:$4 sm:$0xff]  }
 0x4a2   :  { %7532 = vrcp.f32 %v1679_v63  ;;  %v1686_v48 = vadd.f32 1.0, %v7531_v55  ;;  %v8872_v63 = vld [vmem:[#allocation6 + $0xa8] ss:$12 sps:$4 sm:$0xff]   ;;  %v8882_v55 = vld [vmem:[#allocation8 + $0x158] ss:$12 sps:$4 sm:$0xff]  }
 0x4a3   :  { %v8855_v47 = vpack.c.bf16 %v8851_v45, %v8851_v45 }
 0x4a4   :  { %7534 = vrcp.f32 %v1686_v48  ;;  %v8889_v48 = vld [vmem:[#allocation6 + $0x7c] ss:$12 sps:$4 sm:$0xff]  }
 0x4a5   :  { %1730 = vmatprep.mubr.bf16.mxu0 %v8855_v47 }
 0x4aa   :  { %v1669_v33 = vpop.f32.mrf.mxu1 }
 0x4ab   :  { %v1670_v26 = vadd.f32 %v1669_v33, %v8294_v19  ;;  %v8885_v33 = vld [vmem:[#allocation6 + $0x90] ss:$12 sps:$4 sm:$0xff]  }
 0x4ac   :  { %v6565_v61 = vpop.f32.mrf.mxu1 }
 0x4ad   :  { %v8892_v61 = vld [vmem:[#allocation8 + $0x140] ss:$12 sps:$4 sm:$0xff]  }
 0x4ae   :  { %v1672_v32 = vpop.f32.mrf.mxu1 }
 0x4af   :  { %v7533_v35 = vpop.eup %7532  ;;  %v8899_v32 = vld [vmem:[#allocation6 + $0x64] ss:$12 sps:$4 sm:$0xff]  }
 0x4b0   :  { %v1689_v2 = vmul.f32 %v7533_v35, %v1670_v26  ;;  %v6566_v20 = vpop.f32.mrf.mxu1  ;;  %v8895_v26 = vld [vmem:[#allocation6 + $0x78] ss:$12 sps:$4 sm:$0xff]   ;;  %v8902_v35 = vld [vmem:[#allocation8 + $0x128] ss:$12 sps:$4 sm:$0xff]  }
 0x4b1   :  { %v7535_v58 = vpop.eup %7534  ;;  %v8909_v20 = vld [vmem:[#allocation6 + $0x4c] ss:$12 sps:$4 sm:$0xff]  }
 0x4b2   :  { %v1690_v5 = vadd.f32 %v1689_v2, %v10999_v46  ;;  %v1692_v62 = vsub.f32 1.0, %v7535_v58  ;;  %v1694_v60 = vmul.f32 %v7535_v58, %v8671_v56  ;;  %v8876_v56 = vld [vmem:[#allocation6 + $0x94] ss:$12 sps:$4 sm:$0xff]  }
 0x4b3   :  { %v8905_v2 = vld [vmem:[#allocation6 + $0x60] ss:$12 sps:$4 sm:$0xff]   ;;  %v8912_v46 = vld [vmem:[#allocation8 + $0x110] ss:$12 sps:$4 sm:$0xff]  }
 0x4b4   :  { %7536 = vtanh.f32 %v1690_v5  ;;  %v8915_v5 = vld [vmem:[#allocation6 + $0x48] ss:$12 sps:$4 sm:$0xff]  }
 0x4b5   :  { %11000 = vst [vmem:[#allocation31_spill] sm:$0xff] %v8915_v5  ;;  %v8919_v58 = vld [vmem:[#allocation6 + $0x34] ss:$12 sps:$4 sm:$0xff]  }
 0x4b6   :  { %11001 = vst [vmem:[#allocation30_spill] sm:$0xff] %v8919_v58 }
 0x4c1   :  { %v7537_v57 = vpop.eup %7536 }
 0x4c2   :  { %v1693_v8 = vmul.f32 %v7537_v57, %v1692_v62  ;;  %v8922_v62 = vld [vmem:[#allocation8 + $0xf8] ss:$12 sps:$4 sm:$0xff]  }
 0x4c3   :  { %11002 = vst [vmem:[#allocation32_spill] sm:$0xff] %v8922_v62  ;;  %v8925_v57 = vld [vmem:[#allocation6 + $0x30] ss:$12 sps:$4 sm:$0xff]  }
 0x4c4   :  { %v8861_v54 = vadd.f32 %v1694_v60, %v1693_v8  ;;  %11003 = vst [vmem:[#allocation34_spill] sm:$0xff] %v8925_v57  ;;  %v8929_v8 = vld [vmem:[#allocation6 + $0x1c] ss:$12 sps:$4 sm:$0xff]   ;;  %v8932_v60 = vld [vmem:[#allocation8 + $0xe0] ss:$12 sps:$4 sm:$0xff]  }
 0x4c6   :  { %v8865_v1 = vpack.c.bf16 %v8861_v54, %v8861_v54 }
 0x4c8   :  { %1731 = vmatmul.mubr.bf16.vlgmr.msra.gmra.mxu0 %v8865_v1  ;;  %6584 = vmatmul.mubr.bf16.vlgmr.msra.gmra.mxu1 %v8865_v1 }
 0x4c9   :  { %6588 = vmatpush3.bf16.msra.mxu1 %v8869_v11  ;;  %1839 = vmatpush1.bf16.msra.mxu0 %v8872_v63 }
 0x4ca   :  { %6589 = vmatprep.subr.bf16.mxu1 %v10901_v21  ;;  %1840 = vmatprep.subr.bf16.mxu0 %v8876_v56 }
 0x4cb   :  { %6603 = vmatprep.mubr.msk.bf16.mxu1 %vm7972_vm1, %v10901_v21  ;;  %1870 = vmatprep.mubr.bf16.mxu0 %v10902_v23 }
 0x4cd   :  { %6590 = vmatpush3.bf16.msra.mxu1 %v8882_v55  ;;  %1841 = vmatpush1.bf16.msra.mxu0 %v8885_v33 }
 0x4ce   :  { %6591 = vmatprep.subr.bf16.mxu1 %v10901_v21  ;;  %1842 = vmatprep.subr.bf16.mxu0 %v8889_v48 }
 0x4d1   :  { %6592 = vmatpush3.bf16.msra.mxu1 %v8892_v61  ;;  %1843 = vmatpush1.bf16.msra.mxu0 %v8895_v26 }
 0x4d2   :  { %6593 = vmatprep.subr.bf16.mxu1 %v10901_v21  ;;  %1844 = vmatprep.subr.bf16.mxu0 %v8899_v32 }
 0x4d5   :  { %6594 = vmatpush3.bf16.msra.mxu1 %v8902_v35  ;;  %1845 = vmatpush1.bf16.msra.mxu0 %v8905_v2 }
 0x4d6   :  { %6595 = vmatprep.subr.bf16.mxu1 %v10901_v21  ;;  %1846 = vmatprep.subr.bf16.mxu0 %v8909_v20 }
 0x4d9   :  { %6596 = vmatpush3.bf16.msra.mxu1 %v8912_v46  ;;  %1847 = vmatpush1.bf16.msra.mxu0 %v8915_v5  ;;  %v8935_v5 = vld [vmem:[#allocation6 + $0x18] ss:$12 sps:$4 sm:$0xff]  }
 0x4da   :  { %6597 = vmatprep.subr.bf16.mxu1 %v10901_v21  ;;  %1848 = vmatprep.subr.bf16.mxu0 %v8919_v58  ;;  %11004 = vst [vmem:[#allocation33_spill] sm:$0xff] %v8935_v5  ;;  %v8945_v58 = vld [vmem:[#allocation6] ss:$12 sps:$4 sm:$0xff]  }
 0x4db   :  { %11005 = vst [vmem:[#allocation35_spill] sm:$0xff] %v8945_v58 }
 0x4dd   :  { %6598 = vmatpush3.bf16.msra.mxu1 %v8922_v62  ;;  %1849 = vmatpush1.bf16.msra.mxu0 %v8925_v57  ;;  %v8939_v62 = vld [vmem:[#allocation6 + $0x4] ss:$12 sps:$4 sm:$0xff]   ;;  %v8942_v57 = vld [vmem:[#allocation8 + $0xc8] ss:$12 sps:$4 sm:$0xff]  }
 0x4de   :  { %6599 = vmatprep.subr.bf16.mxu1 %v10901_v21  ;;  %1850 = vmatprep.subr.bf16.mxu0 %v8929_v8 }
 0x4e1   :  { %6600 = vmatpush3.bf16.msra.mxu1 %v8932_v60  ;;  %1851 = vmatpush1.bf16.msra.mxu0 %v8935_v5  ;;  %v8952_v5 = vld [vmem:[#allocation6 + $0xb0] ss:$12 sps:$4 sm:$0xff]  }
 0x4e2   :  { %6601 = vmatprep.subr.bf16.mxu1 %v10901_v21  ;;  %1852 = vmatprep.subr.bf16.mxu0 %v8939_v62 }
 0x4e5   :  { %6602 = vmatpush3.bf16.msra.mxu1 %v8942_v57  ;;  %1853 = vmatpush1.bf16.msra.mxu0 %v8945_v58  ;;  %v8960_v58 = vld [vmem:[#allocation6 + $0x98] ss:$12 sps:$4 sm:$0xff]  }
 0x4e6   :  { %6607 = vmatprep.subr.bf16.mxu1 %v10901_v21  ;;  %1942 = vmatprep.subr.bf16.mxu0 %v8560_v31  ;;  %v8966_v31 = vld [vmem:[#allocation6 + $0x80] ss:$12 sps:$4 sm:$0xff]  }
 0x4e8   :  { %6604 = vmatmul.mubr.bf16.vlgmr.msra.gmra.mxu1 %v8855_v47  ;;  %1871 = vmatmul.mubr.bf16.vlgmr.msra.gmra.mxu0 %v8865_v1 }
 0x4e9   :  { %6608 = vmatpush3.bf16.msra.mxu1 %v8952_v5  ;;  %6623 = vmatprep.mubr.msk.bf16.mxu1 %vm7972_vm1, %v10901_v21 }
 0x4ea   :  { %6609 = vmatprep.subr.bf16.mxu1 %v10901_v21  ;;  %1943 = vmatpush1.bf16.msra.mxu0 %v8568_v15  ;;  %v8972_v15 = vld [vmem:[#allocation6 + $0x68] ss:$12 sps:$4 sm:$0xff]  }
 0x4eb   :  { %1944 = vmatprep.subr.bf16.mxu0 %v8571_v9  ;;  %v8978_v9 = vld [vmem:[#allocation6 + $0x50] ss:$12 sps:$4 sm:$0xff]  }
 0x4ec   :  { %11006 = vst [vmem:[#allocation42_spill] sm:$0xff] %v8978_v9 }
 0x4ed   :  { %6610 = vmatpush3.bf16.msra.mxu1 %v8960_v58 }
 0x4ee   :  { %6611 = vmatprep.subr.bf16.mxu1 %v10901_v21  ;;  %1945 = vmatpush1.bf16.msra.mxu0 %v8576_v4  ;;  %v8984_v4 = vld [vmem:[#allocation6 + $0x38] ss:$12 sps:$4 sm:$0xff]  }
 0x4ef   :  { %1946 = vmatprep.subr.bf16.mxu0 %v8579_v12  ;;  %11007 = vst [vmem:[#allocation43_spill] sm:$0xff] %v8984_v4  ;;  %v8990_v12 = vld [vmem:[#allocation6 + $0x20] ss:$12 sps:$4 sm:$0xff]  }
 0x4f0   :  { %11008 = vst [vmem:[#allocation47_spill] sm:$0xff] %v8990_v12 }
 0x4f1   :  { %6612 = vmatpush3.bf16.msra.mxu1 %v8966_v31 }
 0x4f2   :  { %6613 = vmatprep.subr.bf16.mxu1 %v10901_v21  ;;  %1947 = vmatpush1.bf16.msra.mxu0 %v8584_v36  ;;  %v8996_v36 = vld [vmem:[#allocation6 + $0x8] ss:$12 sps:$4 sm:$0xff]  }
 0x4f3   :  { %1948 = vmatprep.subr.bf16.mxu0 %v8587_v16  ;;  %11009 = vst [vmem:[#allocation40_spill] sm:$0xff] %v8996_v36  ;;  %v11010_v16 = vld [vmem:[#allocation25_spill] sm:$0xff] }
 0x4f5   :  { %6614 = vmatpush3.bf16.msra.mxu1 %v8972_v15 }
 0x4f6   :  { %6615 = vmatprep.subr.bf16.mxu1 %v10901_v21  ;;  %1949 = vmatpush1.bf16.msra.mxu0 %v10967_v0  ;;  %v11012_v0 = vld [vmem:[#allocation26_spill] sm:$0xff] }
 0x4f7   :  { %1950 = vmatprep.subr.bf16.mxu0 %v8595_v7  ;;  %v11011_v7 = vld [vmem:[#allocation24_spill] sm:$0xff] }
 0x4f9   :  { %6616 = vmatpush3.bf16.msra.mxu1 %v8978_v9 }
 0x4fa   :  { %6617 = vmatprep.subr.bf16.mxu1 %v10901_v21  ;;  %1951 = vmatpush1.bf16.msra.mxu0 %v10969_v39  ;;  %v11013_v39 = vld [vmem:[#allocation28_spill] sm:$0xff] }
 0x4fb   :  { %1952 = vmatprep.subr.bf16.mxu0 %v10970_v27  ;;  %v11014_v27 = vld [vmem:[#allocation27_spill] sm:$0xff] }
 0x4fd   :  { %6618 = vmatpush3.bf16.msra.mxu1 %v8984_v4 }
 0x4fe   :  { %6619 = vmatprep.subr.bf16.mxu1 %v10901_v21  ;;  %1953 = vmatpush1.bf16.msra.mxu0 %v10972_v28  ;;  %v11015_v28 = vld [vmem:[#allocation29_spill] sm:$0xff] }
 0x4ff   :  { %1954 = vmatprep.subr.bf16.mxu0 %v8740_v22 }
 0x501   :  { %6620 = vmatpush3.bf16.msra.mxu1 %v8990_v12 }
 0x502   :  { %6621 = vmatprep.subr.bf16.mxu1 %v10901_v21  ;;  %1955 = vmatpush1.bf16.msra.mxu0 %v8745_v24 }
 0x503   :  { %1956 = vmatprep.subr.bf16.mxu0 %v8748_v40 }
 0x505   :  { %6622 = vmatpush3.bf16.msra.mxu1 %v8996_v36 }
 0x506   :  { %1957 = vmatpush1.bf16.msra.mxu0 %v8752_v41  ;;  %6627 = vmatprep.subr.bf16.mxu1 %v10901_v21 }
 0x507   :  { %1958 = vmatprep.subr.bf16.mxu0 %v8756_v30 }
 0x508   :  { %6624 = vmatmul.mubr.bf16.vlgmr.msra.gmra.mxu1 %v8865_v1 }
 0x509   :  { %6628 = vmatpush3.bf16.msra.mxu1 %v8760_v17  ;;  %6643 = vmatprep.mubr.msk.bf16.mxu1 %vm7972_vm1, %v10901_v21 }
 0x50a   :  { %1959 = vmatpush2.bf16.msra.mxu0 %v8765_v25  ;;  %6629 = vmatprep.subr.bf16.mxu1 %v10901_v21 }
 0x50b   :  { %1960 = vmatprep.subr.bf16.mxu0 %v8769_v42 }
 0x50d   :  { %6630 = vmatpush3.bf16.msra.mxu1 %v8772_v43 }
 0x50e   :  { %1961 = vmatpush2.bf16.msra.mxu0 %v8775_v38  ;;  %6631 = vmatprep.subr.bf16.mxu1 %v10901_v21 }
 0x50f   :  { %1962 = vmatprep.subr.bf16.mxu0 %v8779_v29 }
 0x511   :  { %6632 = vmatpush3.bf16.msra.mxu1 %v8782_v50 }
 0x512   :  { %1963 = vmatpush2.bf16.msra.mxu0 %v8785_v6  ;;  %6633 = vmatprep.subr.bf16.mxu1 %v10901_v21 }
 0x513   :  { %1964 = vmatprep.subr.bf16.mxu0 %v8789_v37 }
 0x515   :  { %6634 = vmatpush3.bf16.msra.mxu1 %v8792_v51 }
 0x516   :  { %1965 = vmatpush2.bf16.msra.mxu0 %v8795_v18  ;;  %6635 = vmatprep.subr.bf16.mxu1 %v10901_v21 }
 0x517   :  { %1966 = vmatprep.subr.bf16.mxu0 %v8799_v49  ;;  %v11017_v49 = vld [vmem:[#allocation81_spill] sm:$0xff] }
 0x519   :  { %6636 = vmatpush3.bf16.msra.mxu1 %v8802_v13 }
 0x51a   :  { %1967 = vmatpush2.bf16.msra.mxu0 %v8805_v53  ;;  %6637 = vmatprep.subr.bf16.mxu1 %v10901_v21 }
 0x51b   :  { %1968 = vmatprep.subr.bf16.mxu0 %v8809_v52 }
 0x51d   :  { %6638 = vmatpush3.bf16.msra.mxu1 %v8812_v59 }
 0x51e   :  { %1969 = vmatpush2.bf16.msra.mxu0 %v8815_v3  ;;  %6639 = vmatprep.subr.bf16.mxu1 %v10901_v21  ;;  %v11016_v3 = vld [vmem:[#allocation80_spill] sm:$0xff] }
 0x51f   :  { %1970 = vmatprep.subr.bf16.mxu0 %v8819_v44 }
 0x521   :  { %6640 = vmatpush3.bf16.msra.mxu1 %v11010_v16 }
 0x522   :  { %1971 = vmatpush2.bf16.msra.mxu0 %v11011_v7  ;;  %6641 = vmatprep.subr.bf16.mxu1 %v10901_v21 }
 0x523   :  { %1972 = vmatprep.subr.bf16.mxu0 %v11012_v0 }
 0x525   :  { %6642 = vmatpush3.bf16.msra.mxu1 %v11013_v39 }
 0x526   :  { %1973 = vmatpush2.bf16.msra.mxu0 %v11014_v27  ;;  %6647 = vmatprep.subr.bf16.mxu1 %v10901_v21 }
 0x527   :  { %2082 = vmatprep.subr.bf16.mxu0 %v11015_v28 }
 0x588   :  { %v1732_v47 = vpop.f32.mrf.mxu0  ;;  %v1785_v1 = vpop.f32.mrf.mxu1 }
 0x589   :  { %v1733_v44 = vadd.f32 %v1732_v47, %v11016_v3 }
 0x58a   :  { %v1734_v59 = vpop.f32.mrf.mxu0  ;;  %v6585_v16 = vpop.f32.mrf.mxu1 }
 0x58b   :  { %v5809_v52 = vmul.f32 -1.442695, %v1733_v44  ;;  %v1735_v39 = vadd.f32 %v1734_v59, %v11017_v49  ;;  %v11018_v16 = vld [vmem:[#allocation62_spill] sm:$0xff] }
 0x58c   :  { %v1736_v7 = vpop.f32.mrf.mxu0  ;;  %v1788_v53 = vpop.f32.mrf.mxu1 }
 0x58d   :  { %7538 = vpow2.f32 %v5809_v52  ;;  %v5810_v18 = vmul.f32 -1.442695, %v1735_v39 }
 0x58e   :  { %v1737_v13 = vpop.f32.mrf.mxu0  ;;  %v6586_v0 = vpop.f32.mrf.mxu1 }
 0x58f   :  { %7540 = vpow2.f32 %v5810_v18  ;;  %v1786_v13 = vadd.f32 %v1785_v1, %v8501_v10  ;;  %v11019_v0 = vld [vmem:[#allocation48_spill] sm:$0xff] }
 0x59a   :  { %v7539_v27 = vpop.eup %7538 }
 0x59b   :  { %v1742_v51 = vadd.f32 1.0, %v7539_v27 }
 0x59c   :  { %v7541_v28 = vpop.eup %7540 }
 0x59d   :  { %7542 = vrcp.f32 %v1742_v51  ;;  %v1748_v37 = vadd.f32 1.0, %v7541_v28 }
 0x59f   :  { %7544 = vrcp.f32 %v1748_v37 }
 0x5a8   :  { %v1825_v6 = vpop.f32.mrf.mxu1  ;;  %v1872_v50 = vpop.f32.mrf.mxu0 }
 0x5a9   :  { %v1826_v47 = vadd.f32 %v1825_v6, %v8497_v14  ;;  %v1873_v44 = vadd.f32 %v1872_v50, %v11018_v16  ;;  %v11020_v50 = vld [vmem:[#allocation49_spill] sm:$0xff] }
 0x5aa   :  { %v7543_v7 = vpop.eup %7542  ;;  %v6605_v53 = vpop.f32.mrf.mxu1 }
 0x5ab   :  { %v1874_v52 = vpop.f32.mrf.mxu0  ;;  %v1831_v59 = vmul.f32 %v7543_v7, %v1826_v47  ;;  %v1919_v18 = vadd.f32 %v1873_v44, %v11019_v0 }
 0x5ac   :  { %v1828_v39 = vpop.f32.mrf.mxu1  ;;  %v1875_v28 = vadd.f32 %v1874_v52, %v8285_v34  ;;  %v7545_v16 = vpop.eup %7544 }
 0x5ad   :  { %v1876_v27 = vpop.f32.mrf.mxu0  ;;  %v1832_v51 = vadd.f32 %v1831_v59, %v1786_v13  ;;  %v5811_v49 = vmul.f32 -1.442695, %v1919_v18  ;;  %v1834_v1 = vsub.f32 1.0, %v7545_v16  ;;  %v1836_v44 = vmul.f32 %v7545_v16, %v8851_v45  ;;  %v11021_v45 = vld [vmem:[#allocation58_spill] sm:$0xff] }
 0x5ae   :  { %v6606_v3 = vpop.f32.mrf.mxu1  ;;  %v1926_v6 = vadd.f32 %v1875_v28, %v11020_v50 }
 0x5af   :  { %v1877_v29 = vpop.f32.mrf.mxu0  ;;  %7546 = vtanh.f32 %v1832_v51 }
 0x5b0   :  { %7548 = vpow2.f32 %v5811_v49  ;;  %v5812_v53 = vmul.f32 -1.442695, %v1926_v6 }
 0x5b2   :  { %7550 = vpow2.f32 %v5812_v53 }
 0x5bc   :  { %v7547_v37 = vpop.eup %7546 }
 0x5bd   :  { %v7549_v47 = vpop.eup %7548  ;;  %v1835_v7 = vmul.f32 %v7547_v37, %v1834_v1 }
 0x5be   :  { %v1923_v0 = vadd.f32 1.0, %v7549_v47 }
 0x5bf   :  { %v9046_v13 = vadd.f32 %v1836_v44, %v1835_v7  ;;  %v7551_v49 = vpop.eup %7550  ;;  %v11023_v44 = vld [vmem:[#allocation30_spill] sm:$0xff] }
 0x5c0   :  { %7552 = vrcp.f32 %v1923_v0  ;;  %v1930_v52 = vadd.f32 1.0, %v7551_v49  ;;  %v11024_v0 = vld [vmem:[#allocation32_spill] sm:$0xff]  ;;  %v11025_v49 = vld [vmem:[#allocation34_spill] sm:$0xff] }
 0x5c1   :  { %v1941_v29 = vpack.c.bf16 %v9046_v13, %v9046_v13 }
 0x5c2   :  { %7554 = vrcp.f32 %v1930_v52  ;;  %v11027_v52 = vld [vmem:[#allocation35_spill] sm:$0xff] }
 0x5c3   :  { %1974 = vmatprep.mubr.bf16.mxu0 %v1941_v29 }
 0x5c8   :  { %v1913_v3 = vpop.f32.mrf.mxu1 }
 0x5c9   :  { %v1914_v18 = vadd.f32 %v1913_v3, %v8294_v19  ;;  %v11026_v3 = vld [vmem:[#allocation33_spill] sm:$0xff] }
 0x5ca   :  { %v6625_v59 = vpop.f32.mrf.mxu1 }
 0x5cb   :  { %v9095_v59 = vld [vmem:[#allocation8 + $0xac] ss:$12 sps:$4 sm:$0xff]  }
 0x5cc   :  { %v1916_v39 = vpop.f32.mrf.mxu1 }
 0x5cd   :  { %v7553_v27 = vpop.eup %7552  ;;  %v9106_v39 = vld [vmem:[#allocation8 + $0x94] ss:$12 sps:$4 sm:$0xff]  }
 0x5ce   :  { %v1933_v51 = vmul.f32 %v7553_v27, %v1914_v18  ;;  %v6626_v28 = vpop.f32.mrf.mxu1  ;;  %v9103_v18 = vld [vmem:[#allocation8 + $0xa8] ss:$12 sps:$4 sm:$0xff]  }
 0x5cf   :  { %v7555_v50 = vpop.eup %7554  ;;  %v9114_v27 = vld [vmem:[#allocation8 + $0x7c] ss:$12 sps:$4 sm:$0xff]   ;;  %v9122_v28 = vld [vmem:[#allocation8 + $0x64] ss:$12 sps:$4 sm:$0xff]  }
 0x5d0   :  { %v1934_v16 = vadd.f32 %v1933_v51, %v11021_v45  ;;  %v1936_v6 = vsub.f32 1.0, %v7555_v50  ;;  %v1938_v37 = vmul.f32 %v7555_v50, %v8861_v54  ;;  %v11022_v54 = vld [vmem:[#allocation31_spill] sm:$0xff]  ;;  %v9119_v51 = vld [vmem:[#allocation8 + $0x78] ss:$12 sps:$4 sm:$0xff]   ;;  %v9135_v50 = vld [vmem:[#allocation8 + $0x48] ss:$12 sps:$4 sm:$0xff]  }
 0x5d1   :  { %v9127_v45 = vld [vmem:[#allocation8 + $0x60] ss:$12 sps:$4 sm:$0xff]   ;;  %11029 = vst [vmem:[#allocation41_spill] sm:$0xff] %v9135_v50 }
 0x5d2   :  { %7556 = vtanh.f32 %v1934_v16  ;;  %v9130_v16 = vld [vmem:[#allocation8 + $0x4c] ss:$12 sps:$4 sm:$0xff]  }
 0x5d3   :  { %11028 = vst [vmem:[#allocation75_spill] sm:$0xff] %v9130_v16 }
 0x5df   :  { %v7557_v53 = vpop.eup %7556 }
 0x5e0   :  { %v1937_v1 = vmul.f32 %v7557_v53, %v1936_v6  ;;  %v9138_v6 = vld [vmem:[#allocation8 + $0x34] ss:$12 sps:$4 sm:$0xff]   ;;  %v9143_v53 = vld [vmem:[#allocation8 + $0x30] ss:$12 sps:$4 sm:$0xff]  }
 0x5e1   :  { %11030 = vst [vmem:[#allocation51_spill] sm:$0xff] %v9138_v6  ;;  %11031 = vst [vmem:[#allocation76_spill] sm:$0xff] %v9143_v53 }
 0x5e2   :  { %v9053_v47 = vadd.f32 %v1938_v37, %v1937_v1  ;;  %v11042_v1 = vld [vmem:[#allocation22_spill] sm:$0xff]  ;;  %v11043_v37 = vld [vmem:[#allocation21_spill] sm:$0xff] }
 0x5e4   :  { %v9057_v7 = vpack.c.bf16 %v9053_v47, %v9053_v47 }
 0x5e6   :  { %1975 = vmatmul.mubr.bf16.vlgmr.msra.gmra.mxu0 %v9057_v7  ;;  %6644 = vmatmul.mubr.bf16.vlgmr.msra.gmra.mxu1 %v9057_v7 }
 0x5e7   :  { %6648 = vmatpush3.bf16.msra.mxu1 %v8869_v11  ;;  %2083 = vmatpush1.bf16.msra.mxu0 %v8872_v63 }
 0x5e8   :  { %6649 = vmatprep.subr.bf16.mxu1 %v10901_v21  ;;  %2084 = vmatprep.subr.bf16.mxu0 %v8876_v56 }
 0x5e9   :  { %6663 = vmatprep.mubr.msk.bf16.mxu1 %vm7972_vm1, %v10901_v21  ;;  %2114 = vmatprep.mubr.bf16.mxu0 %v10902_v23 }
 0x5eb   :  { %6650 = vmatpush3.bf16.msra.mxu1 %v8882_v55  ;;  %2085 = vmatpush1.bf16.msra.mxu0 %v8885_v33 }
 0x5ec   :  { %6651 = vmatprep.subr.bf16.mxu1 %v10901_v21  ;;  %2086 = vmatprep.subr.bf16.mxu0 %v8889_v48 }
 0x5ef   :  { %6652 = vmatpush3.bf16.msra.mxu1 %v8892_v61  ;;  %2087 = vmatpush1.bf16.msra.mxu0 %v8895_v26 }
 0x5f0   :  { %6653 = vmatprep.subr.bf16.mxu1 %v10901_v21  ;;  %2088 = vmatprep.subr.bf16.mxu0 %v8899_v32 }
 0x5f3   :  { %6654 = vmatpush3.bf16.msra.mxu1 %v8902_v35  ;;  %2089 = vmatpush1.bf16.msra.mxu0 %v8905_v2 }
 0x5f4   :  { %6655 = vmatprep.subr.bf16.mxu1 %v10901_v21  ;;  %2090 = vmatprep.subr.bf16.mxu0 %v8909_v20 }
 0x5f7   :  { %6656 = vmatpush3.bf16.msra.mxu1 %v8912_v46  ;;  %2091 = vmatpush1.bf16.msra.mxu0 %v11022_v54 }
 0x5f8   :  { %6657 = vmatprep.subr.bf16.mxu1 %v10901_v21  ;;  %2092 = vmatprep.subr.bf16.mxu0 %v11023_v44 }
 0x5fb   :  { %6658 = vmatpush3.bf16.msra.mxu1 %v11024_v0  ;;  %2093 = vmatpush1.bf16.msra.mxu0 %v11025_v49 }
 0x5fc   :  { %6659 = vmatprep.subr.bf16.mxu1 %v10901_v21  ;;  %2094 = vmatprep.subr.bf16.mxu0 %v8929_v8 }
 0x5ff   :  { %6660 = vmatpush3.bf16.msra.mxu1 %v8932_v60  ;;  %2095 = vmatpush1.bf16.msra.mxu0 %v11026_v3 }
 0x600   :  { %6661 = vmatprep.subr.bf16.mxu1 %v10901_v21  ;;  %2096 = vmatprep.subr.bf16.mxu0 %v8939_v62 }
 0x603   :  { %6662 = vmatpush3.bf16.msra.mxu1 %v8942_v57  ;;  %2097 = vmatpush1.bf16.msra.mxu0 %v11027_v52 }
 0x604   :  { %6667 = vmatprep.subr.bf16.mxu1 %v10901_v21  ;;  %2186 = vmatprep.subr.bf16.mxu0 %v9095_v59 }
 0x606   :  { %6664 = vmatmul.mubr.bf16.vlgmr.msra.gmra.mxu1 %v1941_v29  ;;  %2115 = vmatmul.mubr.bf16.vlgmr.msra.gmra.mxu0 %v9057_v7  ;;  %v9111_v29 = vld [vmem:[#allocation8 + $0x90] ss:$12 sps:$4 sm:$0xff]  }
 0x607   :  { %6668 = vmatpush3.bf16.msra.mxu1 %v8952_v5  ;;  %6683 = vmatprep.mubr.msk.bf16.mxu1 %vm7972_vm1, %v10901_v21 }
 0x608   :  { %6669 = vmatprep.subr.bf16.mxu1 %v10901_v21  ;;  %2187 = vmatpush1.bf16.msra.mxu0 %v9103_v18 }
 0x609   :  { %2188 = vmatprep.subr.bf16.mxu0 %v9106_v39 }
 0x60b   :  { %6670 = vmatpush3.bf16.msra.mxu1 %v8960_v58 }
 0x60c   :  { %6671 = vmatprep.subr.bf16.mxu1 %v10901_v21  ;;  %2189 = vmatpush1.bf16.msra.mxu0 %v9111_v29 }
 0x60d   :  { %2190 = vmatprep.subr.bf16.mxu0 %v9114_v27 }
 0x60f   :  { %6672 = vmatpush3.bf16.msra.mxu1 %v8966_v31 }
 0x610   :  { %6673 = vmatprep.subr.bf16.mxu1 %v10901_v21  ;;  %2191 = vmatpush1.bf16.msra.mxu0 %v9119_v51 }
 0x611   :  { %2192 = vmatprep.subr.bf16.mxu0 %v9122_v28 }
 0x613   :  { %6674 = vmatpush3.bf16.msra.mxu1 %v8972_v15 }
 0x614   :  { %6675 = vmatprep.subr.bf16.mxu1 %v10901_v21  ;;  %2193 = vmatpush1.bf16.msra.mxu0 %v9127_v45 }
 0x615   :  { %2194 = vmatprep.subr.bf16.mxu0 %v9130_v16 }
 0x617   :  { %6676 = vmatpush3.bf16.msra.mxu1 %v8978_v9 }
 0x618   :  { %6677 = vmatprep.subr.bf16.mxu1 %v10901_v21  ;;  %2195 = vmatpush1.bf16.msra.mxu0 %v9135_v50 }
 0x619   :  { %2196 = vmatprep.subr.bf16.mxu0 %v9138_v6 }
 0x61b   :  { %6678 = vmatpush3.bf16.msra.mxu1 %v8984_v4 }
 0x61c   :  { %6679 = vmatprep.subr.bf16.mxu1 %v10901_v21  ;;  %2197 = vmatpush1.bf16.msra.mxu0 %v9143_v53 }
 0x61d   :  { %2198 = vmatprep.subr.bf16.mxu0 %v8740_v22  ;;  %v11032_v22 = vld [vmem:[#allocation67_spill] sm:$0xff] }
 0x61f   :  { %6680 = vmatpush3.bf16.msra.mxu1 %v8990_v12  ;;  %v11052_v12 = vld [vmem:[#allocation81_spill] sm:$0xff] }
 0x620   :  { %6681 = vmatprep.subr.bf16.mxu1 %v10901_v21  ;;  %2199 = vmatpush1.bf16.msra.mxu0 %v8745_v24  ;;  %v11033_v24 = vld [vmem:[#allocation66_spill] sm:$0xff] }
 0x621   :  { %2200 = vmatprep.subr.bf16.mxu0 %v8748_v40  ;;  %v11034_v40 = vld [vmem:[#allocation68_spill] sm:$0xff] }
 0x623   :  { %6682 = vmatpush3.bf16.msra.mxu1 %v8996_v36 }
 0x624   :  { %2201 = vmatpush1.bf16.msra.mxu0 %v8752_v41  ;;  %6687 = vmatprep.subr.bf16.mxu1 %v10901_v21  ;;  %v11035_v41 = vld [vmem:[#allocation70_spill] sm:$0xff] }
 0x625   :  { %2202 = vmatprep.subr.bf16.mxu0 %v8756_v30  ;;  %v11036_v30 = vld [vmem:[#allocation69_spill] sm:$0xff] }
 0x626   :  { %6684 = vmatmul.mubr.bf16.vlgmr.msra.gmra.mxu1 %v9057_v7  ;;  %v11044_v7 = vld [vmem:[#allocation23_spill] sm:$0xff] }
 0x627   :  { %6688 = vmatpush3.bf16.msra.mxu1 %v8760_v17  ;;  %6703 = vmatprep.mubr.msk.bf16.mxu1 %vm7972_vm1, %v10901_v21  ;;  %v11037_v17 = vld [vmem:[#allocation71_spill] sm:$0xff] }
 0x628   :  { %2203 = vmatpush2.bf16.msra.mxu0 %v8765_v25  ;;  %6689 = vmatprep.subr.bf16.mxu1 %v10901_v21  ;;  %v11038_v25 = vld [vmem:[#allocation72_spill] sm:$0xff] }
 0x629   :  { %2204 = vmatprep.subr.bf16.mxu0 %v8769_v42  ;;  %v11039_v42 = vld [vmem:[#allocation73_spill] sm:$0xff] }
 0x62b   :  { %6690 = vmatpush3.bf16.msra.mxu1 %v8772_v43  ;;  %v11040_v43 = vld [vmem:[#allocation74_spill] sm:$0xff] }
 0x62c   :  { %2205 = vmatpush2.bf16.msra.mxu0 %v8775_v38  ;;  %6691 = vmatprep.subr.bf16.mxu1 %v10901_v21  ;;  %v11041_v38 = vld [vmem:[#allocation20_spill] sm:$0xff] }
 0x62d   :  { %2206 = vmatprep.subr.bf16.mxu0 %v11032_v22  ;;  %v11045_v22 = vld [vmem:[#allocation25_spill] sm:$0xff] }
 0x62f   :  { %6692 = vmatpush3.bf16.msra.mxu1 %v11033_v24  ;;  %v11046_v24 = vld [vmem:[#allocation24_spill] sm:$0xff] }
 0x630   :  { %2207 = vmatpush2.bf16.msra.mxu0 %v11034_v40  ;;  %6693 = vmatprep.subr.bf16.mxu1 %v10901_v21  ;;  %v11047_v40 = vld [vmem:[#allocation26_spill] sm:$0xff] }
 0x631   :  { %2208 = vmatprep.subr.bf16.mxu0 %v11035_v41  ;;  %v11048_v41 = vld [vmem:[#allocation28_spill] sm:$0xff] }
 0x633   :  { %6694 = vmatpush3.bf16.msra.mxu1 %v11036_v30  ;;  %v11049_v30 = vld [vmem:[#allocation27_spill] sm:$0xff] }
 0x634   :  { %2209 = vmatpush2.bf16.msra.mxu0 %v11037_v17  ;;  %6695 = vmatprep.subr.bf16.mxu1 %v10901_v21  ;;  %v11050_v17 = vld [vmem:[#allocation29_spill] sm:$0xff] }
 0x635   :  { %2210 = vmatprep.subr.bf16.mxu0 %v11038_v25 }
 0x637   :  { %6696 = vmatpush3.bf16.msra.mxu1 %v11039_v42 }
 0x638   :  { %2211 = vmatpush2.bf16.msra.mxu0 %v11040_v43  ;;  %6697 = vmatprep.subr.bf16.mxu1 %v10901_v21  ;;  %v11051_v43 = vld [vmem:[#allocation80_spill] sm:$0xff] }
 0x639   :  { %2212 = vmatprep.subr.bf16.mxu0 %v11041_v38 }
 0x63b   :  { %6698 = vmatpush3.bf16.msra.mxu1 %v11042_v1 }
 0x63c   :  { %2213 = vmatpush2.bf16.msra.mxu0 %v11043_v37  ;;  %6699 = vmatprep.subr.bf16.mxu1 %v10901_v21 }
 0x63d   :  { %2214 = vmatprep.subr.bf16.mxu0 %v11044_v7 }
 0x63f   :  { %6700 = vmatpush3.bf16.msra.mxu1 %v11045_v22 }
 0x640   :  { %2215 = vmatpush2.bf16.msra.mxu0 %v11046_v24  ;;  %6701 = vmatprep.subr.bf16.mxu1 %v10901_v21 }
 0x641   :  { %2216 = vmatprep.subr.bf16.mxu0 %v11047_v40 }
 0x643   :  { %6702 = vmatpush3.bf16.msra.mxu1 %v11048_v41 }
 0x644   :  { %2217 = vmatpush2.bf16.msra.mxu0 %v11049_v30  ;;  %6707 = vmatprep.subr.bf16.mxu1 %v10901_v21 }
 0x645   :  { %2326 = vmatprep.subr.bf16.mxu0 %v11050_v17 }
 0x6a6   :  { %v1976_v25 = vpop.f32.mrf.mxu0  ;;  %v2029_v42 = vpop.f32.mrf.mxu1 }
 0x6a7   :  { %v1977_v38 = vadd.f32 %v1976_v25, %v11051_v43 }
 0x6a8   :  { %v1978_v1 = vpop.f32.mrf.mxu0  ;;  %v6645_v37 = vpop.f32.mrf.mxu1 }
 0x6a9   :  { %v5813_v7 = vmul.f32 -1.442695, %v1977_v38  ;;  %v1979_v41 = vadd.f32 %v1978_v1, %v11052_v12  ;;  %v11053_v37 = vld [vmem:[#allocation62_spill] sm:$0xff] }
 0x6aa   :  { %v1980_v22 = vpop.f32.mrf.mxu0  ;;  %v2032_v24 = vpop.f32.mrf.mxu1 }
 0x6ab   :  { %7558 = vpow2.f32 %v5813_v7  ;;  %v5814_v53 = vmul.f32 -1.442695, %v1979_v41 }
 0x6ac   :  { %v1981_v36 = vpop.f32.mrf.mxu0  ;;  %v6646_v40 = vpop.f32.mrf.mxu1 }
 0x6ad   :  { %7560 = vpow2.f32 %v5814_v53  ;;  %v2030_v36 = vadd.f32 %v2029_v42, %v8501_v10  ;;  %v11054_v40 = vld [vmem:[#allocation52_spill] sm:$0xff] }
 0x6b8   :  { %v7559_v30 = vpop.eup %7558 }
 0x6b9   :  { %v1986_v4 = vadd.f32 1.0, %v7559_v30 }
 0x6ba   :  { %v7561_v17 = vpop.eup %7560 }
 0x6bb   :  { %7562 = vrcp.f32 %v1986_v4  ;;  %v1992_v6 = vadd.f32 1.0, %v7561_v17 }
 0x6bd   :  { %7564 = vrcp.f32 %v1992_v6 }
 0x6c6   :  { %v2069_v50 = vpop.f32.mrf.mxu1  ;;  %v2116_v9 = vpop.f32.mrf.mxu0 }
 0x6c7   :  { %v2070_v25 = vadd.f32 %v2069_v50, %v8497_v14  ;;  %v2117_v38 = vadd.f32 %v2116_v9, %v11053_v37  ;;  %v11055_v9 = vld [vmem:[#allocation54_spill] sm:$0xff] }
 0x6c8   :  { %v7563_v22 = vpop.eup %7562  ;;  %v6665_v24 = vpop.f32.mrf.mxu1 }
 0x6c9   :  { %v2118_v7 = vpop.f32.mrf.mxu0  ;;  %v2075_v1 = vmul.f32 %v7563_v22, %v2070_v25  ;;  %v2163_v53 = vadd.f32 %v2117_v38, %v11054_v40 }
 0x6ca   :  { %v2072_v41 = vpop.f32.mrf.mxu1  ;;  %v2119_v17 = vadd.f32 %v2118_v7, %v8285_v34  ;;  %v7565_v37 = vpop.eup %7564 }
 0x6cb   :  { %v2120_v30 = vpop.f32.mrf.mxu0  ;;  %v2076_v4 = vadd.f32 %v2075_v1, %v2030_v36  ;;  %v5815_v12 = vmul.f32 -1.442695, %v2163_v53  ;;  %v2078_v42 = vsub.f32 1.0, %v7565_v37  ;;  %v2080_v38 = vmul.f32 %v7565_v37, %v9046_v13 }
 0x6cc   :  { %v6666_v43 = vpop.f32.mrf.mxu1  ;;  %v2170_v50 = vadd.f32 %v2119_v17, %v11055_v9  ;;  %v11057_v17 = vld [vmem:[#allocation64_spill] sm:$0xff] }
 0x6cd   :  { %v2121_v16 = vpop.f32.mrf.mxu0  ;;  %7566 = vtanh.f32 %v2076_v4  ;;  %v11056_v4 = vld [vmem:[#allocation44_spill] sm:$0xff] }
 0x6ce   :  { %7568 = vpow2.f32 %v5815_v12  ;;  %v5816_v24 = vmul.f32 -1.442695, %v2170_v50  ;;  %v410_v9 = vadd.f32 %v11057_v17, %v11056_v4  ;;  %v7776_v4 = vld [vmem:[#allocation6 + $0xac] ss:$12 sps:$4 sm:$0xff]  }
 0x6d0   :  { %7570 = vpow2.f32 %v5816_v24 }
 0x6da   :  { %v7567_v6 = vpop.eup %7566 }
 0x6db   :  { %v7569_v25 = vpop.eup %7568  ;;  %v2079_v22 = vmul.f32 %v7567_v6, %v2078_v42 }
 0x6dc   :  { %v2167_v40 = vadd.f32 1.0, %v7569_v25 }
 0x6dd   :  { %v9199_v36 = vadd.f32 %v2080_v38, %v2079_v22  ;;  %v7571_v12 = vpop.eup %7570 }
 0x6de   :  { %7572 = vrcp.f32 %v2167_v40  ;;  %v2174_v7 = vadd.f32 1.0, %v7571_v12  ;;  %v9351_v12 = vld [vmem:[#allocation8 + $0xf0] ss:$12 sps:$4 sm:$0xff]  }
 0x6df   :  { %v2185_v16 = vpack.c.bf16 %v9199_v36, %v9199_v36 }
 0x6e0   :  { %7574 = vrcp.f32 %v2174_v7  ;;  %v9358_v7 = vld [vmem:[#allocation8 + $0x20] ss:$12 sps:$4 sm:$0xff]  }
 0x6e1   :  { %2218 = vmatprep.mubr.bf16.mxu0 %v2185_v16  ;;  %11066 = vst [vmem:[#allocation65_spill] sm:$0xff] %v9358_v7 }
 0x6e6   :  { %v2157_v43 = vpop.f32.mrf.mxu1 }
 0x6e7   :  { %v2158_v53 = vadd.f32 %v2157_v43, %v8294_v19  ;;  %v9355_v43 = vld [vmem:[#allocation8 + $0xdc] ss:$12 sps:$4 sm:$0xff]  }
 0x6e8   :  { %v6685_v1 = vpop.f32.mrf.mxu1 }
 0x6e9   :  { %v9361_v1 = vld [vmem:[#allocation8 + $0xd8] ss:$12 sps:$4 sm:$0xff]  }
 0x6ea   :  { %v2160_v41 = vpop.f32.mrf.mxu1  ;;  %11067 = vst [vmem:[#allocation77_spill] sm:$0xff] %v9361_v1 }
 0x6eb   :  { %v7573_v30 = vpop.eup %7572  ;;  %v9368_v41 = vld [vmem:[#allocation8 + $0x8] ss:$12 sps:$4 sm:$0xff]  }
 0x6ec   :  { %v2177_v13 = vmul.f32 %v7573_v30, %v2158_v53  ;;  %v6686_v37 = vpop.f32.mrf.mxu1  ;;  %v9365_v53 = vld [vmem:[#allocation8 + $0xc4] ss:$12 sps:$4 sm:$0xff]   ;;  %11069 = vst [vmem:[#allocation45_spill] sm:$0xff] %v9368_v41  ;;  %v9371_v30 = vld [vmem:[#allocation8 + $0xc0] ss:$12 sps:$4 sm:$0xff]  }
 0x6ed   :  { %v7575_v24 = vpop.eup %7574  ;;  %11068 = vst [vmem:[#allocation78_spill] sm:$0xff] %v9365_v53  ;;  %11070 = vst [vmem:[#allocation46_spill] sm:$0xff] %v9371_v30 }
 0x6ee   :  { %v2178_v50 = vadd.f32 %v2177_v13, %v410_v9  ;;  %v2180_v42 = vsub.f32 1.0, %v7575_v24  ;;  %v2182_v22 = vmul.f32 %v7575_v24, %v9053_v47  ;;  %v9325_v47 = vld [vmem:[#allocation8 + $0x124] ss:$12 sps:$4 sm:$0xff]  }
 0x6ef   :  { %v11071_v13 = vld [vmem:[#allocation80_spill] sm:$0xff] }
 0x6f0   :  { %7576 = vtanh.f32 %v2178_v50 }
 0x6fd   :  { %v7577_v6 = vpop.eup %7576 }
 0x6fe   :  { %v2181_v25 = vmul.f32 %v7577_v6, %v2180_v42 }
 0x700   :  { %v9207_v38 = vadd.f32 %v2182_v22, %v2181_v25 }
 0x702   :  { %v9211_v40 = vpack.c.bf16 %v9207_v38, %v9207_v38 }
 0x704   :  { %2219 = vmatmul.mubr.bf16.vlgmr.msra.gmra.mxu0 %v9211_v40  ;;  %6704 = vmatmul.mubr.bf16.vlgmr.msra.gmra.mxu1 %v9211_v40 }
 0x705   :  { %6708 = vmatpush3.bf16.msra.mxu1 %v8869_v11  ;;  %2327 = vmatpush1.bf16.msra.mxu0 %v8872_v63  ;;  %v11058_v11 = vld [vmem:[#allocation75_spill] sm:$0xff]  ;;  %v11059_v63 = vld [vmem:[#allocation42_spill] sm:$0xff] }
 0x706   :  { %6709 = vmatprep.subr.bf16.mxu1 %v10901_v21  ;;  %2328 = vmatprep.subr.bf16.mxu0 %v8876_v56  ;;  %v11060_v56 = vld [vmem:[#allocation41_spill] sm:$0xff] }
 0x707   :  { %6723 = vmatprep.mubr.msk.bf16.mxu1 %vm7972_vm1, %v10901_v21  ;;  %2358 = vmatprep.mubr.bf16.mxu0 %v10902_v23 }
 0x709   :  { %6710 = vmatpush3.bf16.msra.mxu1 %v8882_v55  ;;  %2329 = vmatpush1.bf16.msra.mxu0 %v8885_v33  ;;  %v11061_v55 = vld [vmem:[#allocation51_spill] sm:$0xff] }
 0x70a   :  { %6711 = vmatprep.subr.bf16.mxu1 %v10901_v21  ;;  %2330 = vmatprep.subr.bf16.mxu0 %v8889_v48  ;;  %v11062_v33 = vld [vmem:[#allocation43_spill] sm:$0xff]  ;;  %v11063_v48 = vld [vmem:[#allocation76_spill] sm:$0xff] }
 0x70d   :  { %6712 = vmatpush3.bf16.msra.mxu1 %v8892_v61  ;;  %2331 = vmatpush1.bf16.msra.mxu0 %v8895_v26  ;;  %v9276_v61 = vld [vmem:[#allocation8 + $0x1c] ss:$12 sps:$4 sm:$0xff]  }
 0x70e   :  { %6713 = vmatprep.subr.bf16.mxu1 %v10901_v21  ;;  %2332 = vmatprep.subr.bf16.mxu0 %v8899_v32  ;;  %v11064_v26 = vld [vmem:[#allocation47_spill] sm:$0xff]  ;;  %v9281_v32 = vld [vmem:[#allocation8 + $0x18] ss:$12 sps:$4 sm:$0xff]  }
 0x711   :  { %6714 = vmatpush3.bf16.msra.mxu1 %v8902_v35  ;;  %2333 = vmatpush1.bf16.msra.mxu0 %v8905_v2  ;;  %v9284_v35 = vld [vmem:[#allocation8 + $0x4] ss:$12 sps:$4 sm:$0xff]  }
 0x712   :  { %6715 = vmatprep.subr.bf16.mxu1 %v10901_v21  ;;  %2334 = vmatprep.subr.bf16.mxu0 %v8909_v20  ;;  %v11065_v2 = vld [vmem:[#allocation40_spill] sm:$0xff]  ;;  %v9288_v20 = vld [vmem:[#allocation8] ss:$12 sps:$4 sm:$0xff]  }
 0x715   :  { %6716 = vmatpush3.bf16.msra.mxu1 %v8912_v46  ;;  %2335 = vmatpush1.bf16.msra.mxu0 %v11022_v54  ;;  %v9292_v46 = vld [vmem:[#allocation8 + $0x16c] ss:$12 sps:$4 sm:$0xff]   ;;  %v9328_v54 = vld [vmem:[#allocation8 + $0x68] ss:$12 sps:$4 sm:$0xff]  }
 0x716   :  { %6717 = vmatprep.subr.bf16.mxu1 %v10901_v21  ;;  %2336 = vmatprep.subr.bf16.mxu0 %v11023_v44  ;;  %v9331_v44 = vld [vmem:[#allocation8 + $0x120] ss:$12 sps:$4 sm:$0xff]  }
 0x719   :  { %6718 = vmatpush3.bf16.msra.mxu1 %v11024_v0  ;;  %2337 = vmatpush1.bf16.msra.mxu0 %v11025_v49  ;;  %v9335_v0 = vld [vmem:[#allocation8 + $0x10c] ss:$12 sps:$4 sm:$0xff]   ;;  %v9338_v49 = vld [vmem:[#allocation8 + $0x50] ss:$12 sps:$4 sm:$0xff]  }
 0x71a   :  { %6719 = vmatprep.subr.bf16.mxu1 %v10901_v21  ;;  %2338 = vmatprep.subr.bf16.mxu0 %v8929_v8  ;;  %v9311_v8 = vld [vmem:[#allocation8 + $0x150] ss:$12 sps:$4 sm:$0xff]  }
 0x71d   :  { %6720 = vmatpush3.bf16.msra.mxu1 %v8932_v60  ;;  %2339 = vmatpush1.bf16.msra.mxu0 %v11026_v3  ;;  %v9315_v60 = vld [vmem:[#allocation8 + $0x13c] ss:$12 sps:$4 sm:$0xff]  }
 0x71e   :  { %6721 = vmatprep.subr.bf16.mxu1 %v10901_v21  ;;  %2340 = vmatprep.subr.bf16.mxu0 %v8939_v62  ;;  %v9305_v62 = vld [vmem:[#allocation8 + $0x154] ss:$12 sps:$4 sm:$0xff]  }
 0x71f   :  { %v9341_v3 = vld [vmem:[#allocation8 + $0x108] ss:$12 sps:$4 sm:$0xff]  }
 0x721   :  { %6722 = vmatpush3.bf16.msra.mxu1 %v8942_v57  ;;  %2341 = vmatpush1.bf16.msra.mxu0 %v11027_v52  ;;  %v9308_v57 = vld [vmem:[#allocation8 + $0x98] ss:$12 sps:$4 sm:$0xff]   ;;  %v9345_v52 = vld [vmem:[#allocation8 + $0xf4] ss:$12 sps:$4 sm:$0xff]  }
 0x722   :  { %6727 = vmatprep.subr.bf16.mxu1 %v10901_v21  ;;  %2430 = vmatprep.subr.bf16.mxu0 %v9095_v59 }
 0x724   :  { %6724 = vmatmul.mubr.bf16.vlgmr.msra.gmra.mxu1 %v2185_v16  ;;  %2359 = vmatmul.mubr.bf16.vlgmr.msra.gmra.mxu0 %v9211_v40  ;;  %v9348_v16 = vld [vmem:[#allocation8 + $0x38] ss:$12 sps:$4 sm:$0xff]  }
 0x725   :  { %6728 = vmatpush3.bf16.msra.mxu1 %v8952_v5  ;;  %6743 = vmatprep.mubr.msk.bf16.mxu1 %vm7972_vm1, %v10901_v21  ;;  %v9296_v5 = vld [vmem:[#allocation8 + $0xb0] ss:$12 sps:$4 sm:$0xff]  }
 0x726   :  { %6729 = vmatprep.subr.bf16.mxu1 %v10901_v21  ;;  %2431 = vmatpush1.bf16.msra.mxu0 %v9103_v18 }
 0x727   :  { %2432 = vmatprep.subr.bf16.mxu0 %v9106_v39 }
 0x729   :  { %6730 = vmatpush3.bf16.msra.mxu1 %v8960_v58  ;;  %v9301_v58 = vld [vmem:[#allocation8 + $0x168] ss:$12 sps:$4 sm:$0xff]  }
 0x72a   :  { %6731 = vmatprep.subr.bf16.mxu1 %v10901_v21  ;;  %2433 = vmatpush1.bf16.msra.mxu0 %v9111_v29 }
 0x72b   :  { %2434 = vmatprep.subr.bf16.mxu0 %v9114_v27 }
 0x72d   :  { %6732 = vmatpush3.bf16.msra.mxu1 %v8966_v31  ;;  %v9318_v31 = vld [vmem:[#allocation8 + $0x80] ss:$12 sps:$4 sm:$0xff]  }
 0x72e   :  { %6733 = vmatprep.subr.bf16.mxu1 %v10901_v21  ;;  %2435 = vmatpush1.bf16.msra.mxu0 %v9119_v51 }
 0x72f   :  { %2436 = vmatprep.subr.bf16.mxu0 %v9122_v28 }
 0x731   :  { %6734 = vmatpush3.bf16.msra.mxu1 %v8972_v15  ;;  %v9321_v15 = vld [vmem:[#allocation8 + $0x138] ss:$12 sps:$4 sm:$0xff]  }
 0x732   :  { %6735 = vmatprep.subr.bf16.mxu1 %v10901_v21  ;;  %2437 = vmatpush1.bf16.msra.mxu0 %v9127_v45 }
 0x733   :  { %2438 = vmatprep.subr.bf16.mxu0 %v11058_v11 }
 0x735   :  { %6736 = vmatpush3.bf16.msra.mxu1 %v11059_v63  ;;  %v11072_v63 = vld [vmem:[#allocation81_spill] sm:$0xff] }
 0x736   :  { %6737 = vmatprep.subr.bf16.mxu1 %v10901_v21  ;;  %2439 = vmatpush1.bf16.msra.mxu0 %v11060_v56 }
 0x737   :  { %2440 = vmatprep.subr.bf16.mxu0 %v11061_v55 }
 0x739   :  { %6738 = vmatpush3.bf16.msra.mxu1 %v11062_v33 }
 0x73a   :  { %6739 = vmatprep.subr.bf16.mxu1 %v10901_v21  ;;  %2441 = vmatpush1.bf16.msra.mxu0 %v11063_v48 }
 0x73b   :  { %2442 = vmatprep.subr.bf16.mxu0 %v9276_v61 }
 0x73d   :  { %6740 = vmatpush3.bf16.msra.mxu1 %v11064_v26 }
 0x73e   :  { %6741 = vmatprep.subr.bf16.mxu1 %v10901_v21  ;;  %2443 = vmatpush1.bf16.msra.mxu0 %v9281_v32 }
 0x73f   :  { %2444 = vmatprep.subr.bf16.mxu0 %v9284_v35 }
 0x741   :  { %6742 = vmatpush3.bf16.msra.mxu1 %v11065_v2 }
 0x742   :  { %2445 = vmatpush1.bf16.msra.mxu0 %v9288_v20  ;;  %6747 = vmatprep.subr.bf16.mxu1 %v10901_v21 }
 0x743   :  { %2446 = vmatprep.subr.bf16.mxu0 %v9292_v46 }
 0x744   :  { %6744 = vmatmul.mubr.bf16.vlgmr.msra.gmra.mxu1 %v9211_v40 }
 0x745   :  { %6748 = vmatpush3.bf16.msra.mxu1 %v9296_v5  ;;  %6763 = vmatprep.mubr.msk.bf16.mxu1 %vm7972_vm1, %v10901_v21 }
 0x746   :  { %2447 = vmatpush2.bf16.msra.mxu0 %v9301_v58  ;;  %6749 = vmatprep.subr.bf16.mxu1 %v10901_v21 }
 0x747   :  { %2448 = vmatprep.subr.bf16.mxu0 %v9305_v62 }
 0x749   :  { %6750 = vmatpush3.bf16.msra.mxu1 %v9308_v57 }
 0x74a   :  { %2449 = vmatpush2.bf16.msra.mxu0 %v9311_v8  ;;  %6751 = vmatprep.subr.bf16.mxu1 %v10901_v21 }
 0x74b   :  { %2450 = vmatprep.subr.bf16.mxu0 %v9315_v60 }
 0x74d   :  { %6752 = vmatpush3.bf16.msra.mxu1 %v9318_v31 }
 0x74e   :  { %2451 = vmatpush2.bf16.msra.mxu0 %v9321_v15  ;;  %6753 = vmatprep.subr.bf16.mxu1 %v10901_v21 }
 0x74f   :  { %2452 = vmatprep.subr.bf16.mxu0 %v9325_v47 }
 0x751   :  { %6754 = vmatpush3.bf16.msra.mxu1 %v9328_v54 }
 0x752   :  { %2453 = vmatpush2.bf16.msra.mxu0 %v9331_v44  ;;  %6755 = vmatprep.subr.bf16.mxu1 %v10901_v21 }
 0x753   :  { %2454 = vmatprep.subr.bf16.mxu0 %v9335_v0 }
 0x755   :  { %6756 = vmatpush3.bf16.msra.mxu1 %v9338_v49 }
 0x756   :  { %2455 = vmatpush2.bf16.msra.mxu0 %v9341_v3  ;;  %6757 = vmatprep.subr.bf16.mxu1 %v10901_v21 }
 0x757   :  { %2456 = vmatprep.subr.bf16.mxu0 %v9345_v52 }
 0x759   :  { %6758 = vmatpush3.bf16.msra.mxu1 %v9348_v16 }
 0x75a   :  { %2457 = vmatpush2.bf16.msra.mxu0 %v9351_v12  ;;  %6759 = vmatprep.subr.bf16.mxu1 %v10901_v21 }
 0x75b   :  { %2458 = vmatprep.subr.bf16.mxu0 %v9355_v43 }
 0x75d   :  { %6760 = vmatpush3.bf16.msra.mxu1 %v9358_v7 }
 0x75e   :  { %2459 = vmatpush2.bf16.msra.mxu0 %v9361_v1  ;;  %6761 = vmatprep.subr.bf16.mxu1 %v10901_v21 }
 0x75f   :  { %2460 = vmatprep.subr.bf16.mxu0 %v9365_v53 }
 0x761   :  { %6762 = vmatpush3.bf16.msra.mxu1 %v9368_v41 }
 0x762   :  { %2461 = vmatpush2.bf16.msra.mxu0 %v9371_v30  ;;  %6767 = vmatprep.subr.bf16.mxu1 %v10901_v21 }
 0x763   :  { %2570 = vmatprep.subr.bf16.mxu0 %v7776_v4 }
 0x7c4   :  { %v2220_v17 = vpop.f32.mrf.mxu0  ;;  %v2273_v9 = vpop.f32.mrf.mxu1 }
 0x7c5   :  { %v2221_v37 = vadd.f32 %v2220_v17, %v11071_v13 }
 0x7c6   :  { %v2222_v50 = vpop.f32.mrf.mxu0  ;;  %v6705_v24 = vpop.f32.mrf.mxu1 }
 0x7c7   :  { %v5817_v42 = vmul.f32 -1.442695, %v2221_v37  ;;  %v2223_v33 = vadd.f32 %v2222_v50, %v11072_v63  ;;  %v11073_v24 = vld [vmem:[#allocation62_spill] sm:$0xff] }
 0x7c8   :  { %v2224_v6 = vpop.f32.mrf.mxu0  ;;  %v2276_v25 = vpop.f32.mrf.mxu1 }
 0x7c9   :  { %7578 = vpow2.f32 %v5817_v42  ;;  %v5818_v26 = vmul.f32 -1.442695, %v2223_v33 }
 0x7ca   :  { %v2225_v22 = vpop.f32.mrf.mxu0  ;;  %v6706_v40 = vpop.f32.mrf.mxu1 }
 0x7cb   :  { %7580 = vpow2.f32 %v5818_v26  ;;  %v2274_v22 = vadd.f32 %v2273_v9, %v8501_v10  ;;  %v11074_v40 = vld [vmem:[#allocation56_spill] sm:$0xff] }
 0x7d6   :  { %v7579_v2 = vpop.eup %7578 }
 0x7d7   :  { %v2230_v30 = vadd.f32 1.0, %v7579_v2 }
 0x7d8   :  { %v7581_v4 = vpop.eup %7580 }
 0x7d9   :  { %7582 = vrcp.f32 %v2230_v30  ;;  %v2236_v41 = vadd.f32 1.0, %v7581_v4 }
 0x7db   :  { %7584 = vrcp.f32 %v2236_v41 }
 0x7e4   :  { %v2313_v53 = vpop.f32.mrf.mxu1  ;;  %v2360_v1 = vpop.f32.mrf.mxu0 }
 0x7e5   :  { %v2314_v17 = vadd.f32 %v2313_v53, %v8497_v14  ;;  %v2361_v37 = vadd.f32 %v2360_v1, %v11073_v24  ;;  %v11075_v1 = vld [vmem:[#allocation59_spill] sm:$0xff] }
 0x7e6   :  { %v7583_v6 = vpop.eup %7582  ;;  %v6725_v25 = vpop.f32.mrf.mxu1 }
 0x7e7   :  { %v2362_v42 = vpop.f32.mrf.mxu0  ;;  %v2319_v50 = vmul.f32 %v7583_v6, %v2314_v17  ;;  %v2407_v33 = vadd.f32 %v2361_v37, %v11074_v40 }
 0x7e8   :  { %v2316_v26 = vpop.f32.mrf.mxu1  ;;  %v2363_v4 = vadd.f32 %v2362_v42, %v8285_v34  ;;  %v7585_v24 = vpop.eup %7584 }
 0x7e9   :  { %v2364_v2 = vpop.f32.mrf.mxu0  ;;  %v2320_v30 = vadd.f32 %v2319_v50, %v2274_v22  ;;  %v5819_v63 = vmul.f32 -1.442695, %v2407_v33  ;;  %v2322_v9 = vsub.f32 1.0, %v7585_v24  ;;  %v2324_v37 = vmul.f32 %v7585_v24, %v9199_v36 }
 0x7ea   :  { %v6726_v13 = vpop.f32.mrf.mxu1  ;;  %v2414_v53 = vadd.f32 %v2363_v4, %v11075_v1 }
 0x7eb   :  { %v2365_v7 = vpop.f32.mrf.mxu0  ;;  %7586 = vtanh.f32 %v2320_v30  ;;  %v11076_v30 = vld [vmem:[#allocation55_spill] sm:$0xff] }
 0x7ec   :  { %7588 = vpow2.f32 %v5819_v63  ;;  %v5820_v25 = vmul.f32 -1.442695, %v2414_v53 }
 0x7ee   :  { %7590 = vpow2.f32 %v5820_v25 }
 0x7f8   :  { %v7587_v41 = vpop.eup %7586 }
 0x7f9   :  { %v7589_v17 = vpop.eup %7588  ;;  %v2323_v6 = vmul.f32 %v7587_v41, %v2322_v9 }
 0x7fa   :  { %v2411_v40 = vadd.f32 1.0, %v7589_v17 }
 0x7fb   :  { %v9384_v22 = vadd.f32 %v2324_v37, %v2323_v6  ;;  %v7591_v13 = vpop.eup %7590  ;;  %v9402_v37 = vld [vmem:[#allocation8 + $0x170] ss:$12 sps:$4 sm:$0xff]  }
 0x7fc   :  { %7592 = vrcp.f32 %v2411_v40  ;;  %v2418_v42 = vadd.f32 1.0, %v7591_v13  ;;  %v7778_v40 = vld [vmem:[#allocation6 + $0xa8] ss:$12 sps:$4 sm:$0xff]  }
 0x7fd   :  { %v9388_v7 = vpack.c.bf16 %v9384_v22, %v9384_v22  ;;  %v7779_v13 = vld [vmem:[#allocation6 + $0x94] ss:$12 sps:$4 sm:$0xff]  }
 0x7fe   :  { %7594 = vrcp.f32 %v2418_v42  ;;  %v7782_v42 = vld [vmem:[#allocation6 + $0x7c] ss:$12 sps:$4 sm:$0xff]  }
 0x7ff   :  { %2462 = vmatprep.mubr.bf16.mxu0 %v9388_v7 }
 0x804   :  { %v2401_v63 = vpop.f32.mrf.mxu1 }
 0x805   :  { %v2402_v33 = vadd.f32 %v2401_v63, %v8294_v19  ;;  %v7781_v63 = vld [vmem:[#allocation6 + $0x90] ss:$12 sps:$4 sm:$0xff]  }
 0x806   :  { %v6745_v50 = vpop.f32.mrf.mxu1 }
 0x807   :  { %v9413_v50 = vld [vmem:[#allocation8 + $0x140] ss:$12 sps:$4 sm:$0xff]  }
 0x808   :  { %v2404_v26 = vpop.f32.mrf.mxu1 }
 0x809   :  { %v7593_v2 = vpop.eup %7592  ;;  %v7785_v26 = vld [vmem:[#allocation6 + $0x64] ss:$12 sps:$4 sm:$0xff]  }
 0x80a   :  { %v2421_v36 = vmul.f32 %v7593_v2, %v2402_v33  ;;  %v6746_v24 = vpop.f32.mrf.mxu1  ;;  %v7784_v33 = vld [vmem:[#allocation6 + $0x78] ss:$12 sps:$4 sm:$0xff]   ;;  %v7787_v2 = vld [vmem:[#allocation6 + $0x60] ss:$12 sps:$4 sm:$0xff]  }
 0x80b   :  { %v7595_v1 = vpop.eup %7594  ;;  %v9421_v24 = vld [vmem:[#allocation8 + $0x110] ss:$12 sps:$4 sm:$0xff]  }
 0x80c   :  { %v2422_v4 = vadd.f32 %v2421_v36, %v11076_v30  ;;  %v2424_v53 = vsub.f32 1.0, %v7595_v1  ;;  %v2426_v41 = vmul.f32 %v7595_v1, %v9207_v38  ;;  %v9409_v38 = vld [vmem:[#allocation8 + $0x158] ss:$12 sps:$4 sm:$0xff]   ;;  %v7788_v36 = vld [vmem:[#allocation6 + $0x4c] ss:$12 sps:$4 sm:$0xff]  }
 0x80d   :  { %v7790_v30 = vld [vmem:[#allocation6 + $0x48] ss:$12 sps:$4 sm:$0xff]   ;;  %v9425_v1 = vld [vmem:[#allocation8 + $0xf8] ss:$12 sps:$4 sm:$0xff]  }
 0x80e   :  { %7596 = vtanh.f32 %v2422_v4  ;;  %v7791_v4 = vld [vmem:[#allocation6 + $0x34] ss:$12 sps:$4 sm:$0xff]  }
 0x81b   :  { %v7597_v25 = vpop.eup %7596 }
 0x81c   :  { %v2425_v9 = vmul.f32 %v7597_v25, %v2424_v53  ;;  %v7793_v53 = vld [vmem:[#allocation6 + $0x30] ss:$12 sps:$4 sm:$0xff]  }
 0x81d   :  { %v7794_v25 = vld [vmem:[#allocation6 + $0x1c] ss:$12 sps:$4 sm:$0xff]  }
 0x81e   :  { %v9394_v17 = vadd.f32 %v2426_v41, %v2425_v9  ;;  %v9429_v9 = vld [vmem:[#allocation8 + $0xe0] ss:$12 sps:$4 sm:$0xff]  }
 0x81f   :  { %v7796_v41 = vld [vmem:[#allocation6 + $0x18] ss:$12 sps:$4 sm:$0xff]  }
 0x820   :  { %v9398_v6 = vpack.c.bf16 %v9394_v17, %v9394_v17 }
 0x822   :  { %2463 = vmatmul.mubr.bf16.vlgmr.msra.gmra.mxu0 %v9398_v6  ;;  %6764 = vmatmul.mubr.bf16.vlgmr.msra.gmra.mxu1 %v9398_v6 }
 0x823   :  { %6768 = vmatpush3.bf16.msra.mxu1 %v9402_v37  ;;  %2571 = vmatpush1.bf16.msra.mxu0 %v7778_v40  ;;  %v7797_v40 = vld [vmem:[#allocation6 + $0x4] ss:$12 sps:$4 sm:$0xff]  }
 0x824   :  { %6769 = vmatprep.subr.bf16.mxu1 %v10901_v21  ;;  %2572 = vmatprep.subr.bf16.mxu0 %v7779_v13  ;;  %v9433_v13 = vld [vmem:[#allocation8 + $0xc8] ss:$12 sps:$4 sm:$0xff]  }
 0x825   :  { %6783 = vmatprep.mubr.msk.bf16.mxu1 %vm7972_vm1, %v10901_v21  ;;  %2602 = vmatprep.mubr.bf16.mxu0 %v10902_v23  ;;  %v9417_v23 = vld [vmem:[#allocation8 + $0x128] ss:$12 sps:$4 sm:$0xff]  }
 0x827   :  { %6770 = vmatpush3.bf16.msra.mxu1 %v9409_v38  ;;  %2573 = vmatpush1.bf16.msra.mxu0 %v7781_v63  ;;  %v7799_v63 = vld [vmem:[#allocation6] ss:$12 sps:$4 sm:$0xff]  }
 0x828   :  { %6771 = vmatprep.subr.bf16.mxu1 %v10901_v21  ;;  %2574 = vmatprep.subr.bf16.mxu0 %v7782_v42  ;;  %v7800_v42 = vld [vmem:[#allocation6 + $0xb0] ss:$12 sps:$4 sm:$0xff]  }
 0x82b   :  { %6772 = vmatpush3.bf16.msra.mxu1 %v9413_v50  ;;  %2575 = vmatpush1.bf16.msra.mxu0 %v7784_v33  ;;  %v7801_v33 = vld [vmem:[#allocation6 + $0x98] ss:$12 sps:$4 sm:$0xff]  }
 0x82c   :  { %6773 = vmatprep.subr.bf16.mxu1 %v10901_v21  ;;  %2576 = vmatprep.subr.bf16.mxu0 %v7785_v26 }
 0x82f   :  { %6774 = vmatpush3.bf16.msra.mxu1 %v9417_v23  ;;  %2577 = vmatpush1.bf16.msra.mxu0 %v7787_v2 }
 0x830   :  { %6775 = vmatprep.subr.bf16.mxu1 %v10901_v21  ;;  %2578 = vmatprep.subr.bf16.mxu0 %v7788_v36  ;;  %v11085_v36 = vld [vmem:[#allocation61_spill] sm:$0xff] }
 0x833   :  { %6776 = vmatpush3.bf16.msra.mxu1 %v9421_v24  ;;  %2579 = vmatpush1.bf16.msra.mxu0 %v7790_v30 }
 0x834   :  { %6777 = vmatprep.subr.bf16.mxu1 %v10901_v21  ;;  %2580 = vmatprep.subr.bf16.mxu0 %v7791_v4 }
 0x837   :  { %6778 = vmatpush3.bf16.msra.mxu1 %v9425_v1  ;;  %2581 = vmatpush1.bf16.msra.mxu0 %v7793_v53 }
 0x838   :  { %6779 = vmatprep.subr.bf16.mxu1 %v10901_v21  ;;  %2582 = vmatprep.subr.bf16.mxu0 %v7794_v25 }
 0x83b   :  { %6780 = vmatpush3.bf16.msra.mxu1 %v9429_v9  ;;  %2583 = vmatpush1.bf16.msra.mxu0 %v7796_v41 }
 0x83c   :  { %6781 = vmatprep.subr.bf16.mxu1 %v10901_v21  ;;  %2584 = vmatprep.subr.bf16.mxu0 %v7797_v40 }
 0x83f   :  { %6782 = vmatpush3.bf16.msra.mxu1 %v9433_v13  ;;  %2585 = vmatpush1.bf16.msra.mxu0 %v7799_v63 }
 0x840   :  { %6787 = vmatprep.subr.bf16.mxu1 %v10901_v21  ;;  %2674 = vmatprep.subr.bf16.mxu0 %v9095_v59  ;;  %v7802_v59 = vld [vmem:[#allocation6 + $0x80] ss:$12 sps:$4 sm:$0xff]  }
 0x842   :  { %6784 = vmatmul.mubr.bf16.vlgmr.msra.gmra.mxu1 %v9388_v7  ;;  %2603 = vmatmul.mubr.bf16.vlgmr.msra.gmra.mxu0 %v9398_v6  ;;  %v7803_v7 = vld [vmem:[#allocation6 + $0x68] ss:$12 sps:$4 sm:$0xff]  }
 0x843   :  { %6788 = vmatpush3.bf16.msra.mxu1 %v7800_v42  ;;  %6803 = vmatprep.mubr.msk.bf16.mxu1 %vm7972_vm1, %v10901_v21 }
 0x844   :  { %6789 = vmatprep.subr.bf16.mxu1 %v10901_v21  ;;  %2675 = vmatpush1.bf16.msra.mxu0 %v9103_v18  ;;  %v7804_v18 = vld [vmem:[#allocation6 + $0x50] ss:$12 sps:$4 sm:$0xff]  }
 0x845   :  { %2676 = vmatprep.subr.bf16.mxu0 %v9106_v39  ;;  %v7805_v39 = vld [vmem:[#allocation6 + $0x38] ss:$12 sps:$4 sm:$0xff]  }
 0x847   :  { %6790 = vmatpush3.bf16.msra.mxu1 %v7801_v33  ;;  %v11086_v33 = vld [vmem:[#allocation63_spill] sm:$0xff] }
 0x848   :  { %6791 = vmatprep.subr.bf16.mxu1 %v10901_v21  ;;  %2677 = vmatpush1.bf16.msra.mxu0 %v9111_v29  ;;  %v7806_v29 = vld [vmem:[#allocation6 + $0x20] ss:$12 sps:$4 sm:$0xff]  }
 0x849   :  { %2678 = vmatprep.subr.bf16.mxu0 %v9114_v27  ;;  %v7807_v27 = vld [vmem:[#allocation6 + $0x8] ss:$12 sps:$4 sm:$0xff]  }
 0x84b   :  { %6792 = vmatpush3.bf16.msra.mxu1 %v7802_v59 }
 0x84c   :  { %6793 = vmatprep.subr.bf16.mxu1 %v10901_v21  ;;  %2679 = vmatpush1.bf16.msra.mxu0 %v9119_v51  ;;  %v11077_v51 = vld [vmem:[#allocation65_spill] sm:$0xff] }
 0x84d   :  { %2680 = vmatprep.subr.bf16.mxu0 %v9122_v28  ;;  %v11078_v28 = vld [vmem:[#allocation77_spill] sm:$0xff] }
 0x84f   :  { %6794 = vmatpush3.bf16.msra.mxu1 %v7803_v7 }
 0x850   :  { %6795 = vmatprep.subr.bf16.mxu1 %v10901_v21  ;;  %2681 = vmatpush1.bf16.msra.mxu0 %v9127_v45  ;;  %v11079_v45 = vld [vmem:[#allocation78_spill] sm:$0xff] }
 0x851   :  { %2682 = vmatprep.subr.bf16.mxu0 %v11058_v11  ;;  %v11080_v11 = vld [vmem:[#allocation45_spill] sm:$0xff] }
 0x853   :  { %6796 = vmatpush3.bf16.msra.mxu1 %v7804_v18 }
 0x854   :  { %6797 = vmatprep.subr.bf16.mxu1 %v10901_v21  ;;  %2683 = vmatpush1.bf16.msra.mxu0 %v11060_v56  ;;  %v11081_v56 = vld [vmem:[#allocation46_spill] sm:$0xff] }
 0x855   :  { %2684 = vmatprep.subr.bf16.mxu0 %v11061_v55 }
 0x857   :  { %6798 = vmatpush3.bf16.msra.mxu1 %v7805_v39 }
 0x858   :  { %6799 = vmatprep.subr.bf16.mxu1 %v10901_v21  ;;  %2685 = vmatpush1.bf16.msra.mxu0 %v11063_v48 }
 0x859   :  { %2686 = vmatprep.subr.bf16.mxu0 %v9276_v61  ;;  %v11082_v61 = vld [vmem:[#allocation80_spill] sm:$0xff] }
 0x85b   :  { %6800 = vmatpush3.bf16.msra.mxu1 %v7806_v29 }
 0x85c   :  { %6801 = vmatprep.subr.bf16.mxu1 %v10901_v21  ;;  %2687 = vmatpush1.bf16.msra.mxu0 %v9281_v32 }
 0x85d   :  { %2688 = vmatprep.subr.bf16.mxu0 %v9284_v35 }
 0x85f   :  { %6802 = vmatpush3.bf16.msra.mxu1 %v7807_v27 }
 0x860   :  { %2689 = vmatpush1.bf16.msra.mxu0 %v9288_v20  ;;  %6807 = vmatprep.subr.bf16.mxu1 %v10901_v21 }
 0x861   :  { %2690 = vmatprep.subr.bf16.mxu0 %v9292_v46 }
 0x862   :  { %6804 = vmatmul.mubr.bf16.vlgmr.msra.gmra.mxu1 %v9398_v6 }
 0x863   :  { %6808 = vmatpush3.bf16.msra.mxu1 %v9296_v5  ;;  %6823 = vmatprep.mubr.msk.bf16.mxu1 %vm7972_vm1, %v10901_v21 }
 0x864   :  { %2691 = vmatpush2.bf16.msra.mxu0 %v9301_v58  ;;  %6809 = vmatprep.subr.bf16.mxu1 %v10901_v21 }
 0x865   :  { %2692 = vmatprep.subr.bf16.mxu0 %v9305_v62 }
 0x867   :  { %6810 = vmatpush3.bf16.msra.mxu1 %v9308_v57 }
 0x868   :  { %2693 = vmatpush2.bf16.msra.mxu0 %v9311_v8  ;;  %6811 = vmatprep.subr.bf16.mxu1 %v10901_v21  ;;  %v11083_v8 = vld [vmem:[#allocation81_spill] sm:$0xff] }
 0x869   :  { %2694 = vmatprep.subr.bf16.mxu0 %v9315_v60 }
 0x86b   :  { %6812 = vmatpush3.bf16.msra.mxu1 %v9318_v31 }
 0x86c   :  { %2695 = vmatpush2.bf16.msra.mxu0 %v9321_v15  ;;  %6813 = vmatprep.subr.bf16.mxu1 %v10901_v21 }
 0x86d   :  { %2696 = vmatprep.subr.bf16.mxu0 %v9325_v47 }
 0x86f   :  { %6814 = vmatpush3.bf16.msra.mxu1 %v9328_v54 }
 0x870   :  { %2697 = vmatpush2.bf16.msra.mxu0 %v9331_v44  ;;  %6815 = vmatprep.subr.bf16.mxu1 %v10901_v21 }
 0x871   :  { %2698 = vmatprep.subr.bf16.mxu0 %v9335_v0 }
 0x873   :  { %6816 = vmatpush3.bf16.msra.mxu1 %v9338_v49 }
 0x874   :  { %2699 = vmatpush2.bf16.msra.mxu0 %v9341_v3  ;;  %6817 = vmatprep.subr.bf16.mxu1 %v10901_v21 }
 0x875   :  { %2700 = vmatprep.subr.bf16.mxu0 %v9345_v52  ;;  %v11084_v52 = vld [vmem:[#allocation62_spill] sm:$0xff] }
 0x877   :  { %6818 = vmatpush3.bf16.msra.mxu1 %v9348_v16 }
 0x878   :  { %2701 = vmatpush2.bf16.msra.mxu0 %v9351_v12  ;;  %6819 = vmatprep.subr.bf16.mxu1 %v10901_v21 }
 0x879   :  { %2702 = vmatprep.subr.bf16.mxu0 %v9355_v43 }
 0x87b   :  { %6820 = vmatpush3.bf16.msra.mxu1 %v11077_v51 }
 0x87c   :  { %2703 = vmatpush2.bf16.msra.mxu0 %v11078_v28  ;;  %6821 = vmatprep.subr.bf16.mxu1 %v10901_v21 }
 0x87d   :  { %2704 = vmatprep.subr.bf16.mxu0 %v11079_v45 }
 0x87f   :  { %6822 = vmatpush3.bf16.msra.mxu1 %v11080_v11 }
 0x880   :  { %2705 = vmatpush2.bf16.msra.mxu0 %v11081_v56  ;;  %6827 = vmatprep.subr.bf16.mxu1 %v10901_v21 }
 0x881   :  { %6847 = vmatprep.subr.bf16.mxu0 %v10901_v21 }
 0x8e2   :  { %v2464_v55 = vpop.f32.mrf.mxu0  ;;  %v2517_v48 = vpop.f32.mrf.mxu1 }
 0x8e3   :  { %v2465_v32 = vadd.f32 %v2464_v55, %v11082_v61  ;;  %v2518_v26 = vadd.f32 %v2517_v48, %v8501_v10 }
 0x8e4   :  { %v2466_v35 = vpop.f32.mrf.mxu0  ;;  %v6765_v20 = vpop.f32.mrf.mxu1 }
 0x8e5   :  { %v5821_v46 = vmul.f32 -1.442695, %v2465_v32  ;;  %v2467_v60 = vadd.f32 %v2466_v35, %v11083_v8 }
 0x8e6   :  { %v2468_v5 = vpop.f32.mrf.mxu0  ;;  %v2520_v58 = vpop.f32.mrf.mxu1 }
 0x8e7   :  { %7598 = vpow2.f32 %v5821_v46  ;;  %v5822_v31 = vmul.f32 -1.442695, %v2467_v60 }
 0x8e8   :  { %v2469_v62 = vpop.f32.mrf.mxu0  ;;  %v6766_v57 = vpop.f32.mrf.mxu1 }
 0x8e9   :  { %7600 = vpow2.f32 %v5822_v31 }
 0x8f4   :  { %v7599_v15 = vpop.eup %7598 }
 0x8f5   :  { %v2474_v47 = vadd.f32 1.0, %v7599_v15 }
 0x8f6   :  { %v7601_v54 = vpop.eup %7600 }
 0x8f7   :  { %7602 = vrcp.f32 %v2474_v47  ;;  %v2480_v44 = vadd.f32 1.0, %v7601_v54 }
 0x8f9   :  { %7604 = vrcp.f32 %v2480_v44 }
 0x902   :  { %v2557_v0 = vpop.f32.mrf.mxu1  ;;  %v2604_v49 = vpop.f32.mrf.mxu0 }
 0x903   :  { %v2558_v3 = vadd.f32 %v2557_v0, %v8497_v14  ;;  %v2605_v16 = vadd.f32 %v2604_v49, %v11084_v52  ;;  %v7335_v0 = vld [vmem:[#allocation12 + $0x20] sm:$0xff]   ;;  %v7339_v52 = vld [vmem:[#allocation12 + $0x10] sm:$0xff]  }
 0x904   :  { %v7603_v12 = vpop.eup %7602  ;;  %v6785_v43 = vpop.f32.mrf.mxu1  ;;  %v7334_v49 = vld [vmem:[#allocation12 + $0x40] sm:$0xff]  }
 0x905   :  { %v2606_v6 = vpop.f32.mrf.mxu0  ;;  %v2563_v2 = vmul.f32 %v7603_v12, %v2558_v3  ;;  %v2651_v30 = vadd.f32 %v2605_v16, %v11085_v36  ;;  %v7337_v3 = vld [vmem:[#allocation12 + $0x18] sm:$0xff]   ;;  %v7341_v16 = vld [vmem:[#allocation12 + $0x8] sm:$0xff]   ;;  %v7343_v12 = vld [vmem:[#allocation12] sm:$0xff]  }
 0x906   :  { %v2560_v4 = vpop.f32.mrf.mxu1  ;;  %v2607_v40 = vadd.f32 %v2606_v6, %v8285_v34  ;;  %v7605_v18 = vpop.eup %7604 }
 0x907   :  { %v2608_v53 = vpop.f32.mrf.mxu0  ;;  %v2564_v25 = vadd.f32 %v2563_v2, %v2518_v26  ;;  %v5823_v41 = vmul.f32 -1.442695, %v2651_v30  ;;  %v2566_v39 = vsub.f32 1.0, %v7605_v18  ;;  %v2568_v28 = vmul.f32 %v7605_v18, %v9384_v22  ;;  %v11087_v22 = vld [vmem:[#allocation60_spill] sm:$0xff] }
 0x908   :  { %v6786_v63 = vpop.f32.mrf.mxu1  ;;  %v2658_v59 = vadd.f32 %v2607_v40, %v11086_v33 }
 0x909   :  { %v2609_v42 = vpop.f32.mrf.mxu0  ;;  %7606 = vtanh.f32 %v2564_v25 }
 0x90a   :  { %7608 = vpow2.f32 %v5823_v41  ;;  %v5824_v7 = vmul.f32 -1.442695, %v2658_v59 }
 0x90c   :  { %7610 = vpow2.f32 %v5824_v7 }
 0x916   :  { %v7607_v29 = vpop.eup %7606 }
 0x917   :  { %v7609_v27 = vpop.eup %7608  ;;  %v2567_v51 = vmul.f32 %v7607_v29, %v2566_v39 }
 0x918   :  { %v2655_v45 = vadd.f32 1.0, %v7609_v27 }
 0x919   :  { %v9510_v11 = vadd.f32 %v2568_v28, %v2567_v51  ;;  %v7611_v56 = vpop.eup %7610 }
 0x91a   :  { %7612 = vrcp.f32 %v2655_v45  ;;  %v2662_v48 = vadd.f32 1.0, %v7611_v56  ;;  %v9559_v56 = vld [vmem:[#allocation11 + $0x28] sm:$0xff] }
 0x91b   :  { %v2673_v34 = vpack.c.bf16 %v9510_v11, %v9510_v11 }
 0x91c   :  { %7614 = vrcp.f32 %v2662_v48  ;;  %v9563_v48 = vld [vmem:[#allocation11 + $0x10] sm:$0xff] }
 0x91d   :  { %2706 = vmatprep.mubr.bf16.mxu0 %v2673_v34 }
 0x922   :  { %v2645_v55 = vpop.f32.mrf.mxu1 }
 0x923   :  { %v2646_v35 = vadd.f32 %v2645_v55, %v8294_v19  ;;  %v7324_v19 = vld [vmem:[#allocation12 + $0x78] sm:$0xff]  }
 0x924   :  { %v6805_v32 = vpop.f32.mrf.mxu1  ;;  %v9561_v55 = vld [vmem:[#allocation11 + $0x8] sm:$0xff] }
 0x925   :  { %v9565_v32 = vld [vmem:[#allocation11 + $0x30] sm:$0xff] }
 0x926   :  { %v2648_v20 = vpop.f32.mrf.mxu1 }
 0x927   :  { %v7613_v46 = vpop.eup %7612  ;;  %v11089_v20 = vld [vmem:[#allocation53_spill] sm:$0xff] }
 0x928   :  { %v2665_v5 = vmul.f32 %v7613_v46, %v2646_v35  ;;  %v6806_v58 = vpop.f32.mrf.mxu1  ;;  %v11090_v46 = vld [vmem:[#allocation36_spill] sm:$0xff] }
 0x929   :  { %v7615_v57 = vpop.eup %7614  ;;  %v9576_v58 = vld [vmem:[#allocation11 + $0x20] sm:$0xff] }
 0x92a   :  { %v2666_v62 = vadd.f32 %v2665_v5, %v11087_v22  ;;  %v2668_v60 = vsub.f32 1.0, %v7615_v57  ;;  %v2670_v47 = vmul.f32 %v7615_v57, %v9394_v17  ;;  %v7325_v17 = vld [vmem:[#allocation12 + $0x70] sm:$0xff]   ;;  %v9574_v5 = vsub.s32 7, %v11090_v46  ;;  %v9578_v22 = vld [vmem:[#allocation11 + $0x38] sm:$0xff] }
 0x92c   :  { %7616 = vtanh.f32 %v2666_v62  ;;  %v11091_v62 = vld [vmem:[#allocation79_spill] sm:$0xff] }
 0x939   :  { %v7617_v31 = vpop.eup %7616 }
 0x93a   :  { %v2669_v15 = vmul.f32 %v7617_v31, %v2668_v60  ;;  %v11092_v60 = vld [vmem:[#allocation82_spill] sm:$0xff] }
 0x93c   :  { %v2671_v54 = vadd.f32 %v2670_v47, %v2669_v15  ;;  %v11093_v15 = vld [vmem:[#allocation39_spill] sm:$0xff] }
 0x93e   :  { %v2672_v44 = vpack.c.bf16 %v2671_v54, %v2671_v54  ;;  %v3079_v54 = vrot.slane %v9561_v55, %v11093_v15 }
 0x940   :  { %2707 = vmatmul.mubr.bf16.vlgmr.msra.gmra.mxu0 %v2672_v44  ;;  %6824 = vmatmul.mubr.bf16.vlgmr.msra.gmra.mxu1 %v2672_v44  ;;  %v3086_v44 = vrot.slane %v9559_v56, %v11091_v62 }
 0x941   :  { %6828 = vmatpush3.bf16.msra.mxu1 %v9402_v37  ;;  %6843 = vmatprep.mubr.msk.bf16.mxu1 %vm7972_vm1, %v10901_v21  ;;  %v7326_v37 = vld [vmem:[#allocation12 + $0x68] sm:$0xff]  }
 0x942   :  { %6829 = vmatprep.subr.bf16.mxu1 %v10901_v21  ;;  %6863 = vmatprep.mubr.msk.bf16.mxu0 %vm7972_vm1, %v10901_v21 }
 0x943   :  { %6848 = vmatpush3.bf16.msra.mxu0 %v7324_v19  ;;  %v11094_v19 = vld [vmem:[#allocation57_spill] sm:$0xff] }
 0x944   :  { %6849 = vmatprep.subr.bf16.mxu0 %v10901_v21 }
 0x945   :  { %6830 = vmatpush3.bf16.msra.mxu1 %v9409_v38  ;;  %v7327_v38 = vld [vmem:[#allocation12 + $0x60] sm:$0xff]  }
 0x946   :  { %6831 = vmatprep.subr.bf16.mxu1 %v10901_v21 }
 0x947   :  { %6850 = vmatpush3.bf16.msra.mxu0 %v7325_v17  ;;  %v3094_v17 = vrot.slane %v9561_v55, %v11094_v19 }
 0x948   :  { %6851 = vmatprep.subr.bf16.mxu0 %v10901_v21 }
 0x949   :  { %6832 = vmatpush3.bf16.msra.mxu1 %v9413_v50  ;;  %v7329_v50 = vld [vmem:[#allocation12 + $0x38] sm:$0xff]  }
 0x94a   :  { %6833 = vmatprep.subr.bf16.mxu1 %v10901_v21 }
 0x94b   :  { %6852 = vmatpush3.bf16.msra.mxu0 %v7326_v37  ;;  %v3101_v37 = vrot.slane %v9559_v56, %v11092_v60 }
 0x94c   :  { %6853 = vmatprep.subr.bf16.mxu0 %v10901_v21 }
 0x94d   :  { %6834 = vmatpush3.bf16.msra.mxu1 %v9417_v23  ;;  %v7328_v23 = vld [vmem:[#allocation12 + $0x58] sm:$0xff]  }
 0x94e   :  { %6835 = vmatprep.subr.bf16.mxu1 %v10901_v21 }
 0x94f   :  { %6854 = vmatpush3.bf16.msra.mxu0 %v7327_v38  ;;  %v11095_v38 = vld [vmem:[#allocation38_spill] sm:$0xff] }
 0x950   :  { %6855 = vmatprep.subr.bf16.mxu0 %v10901_v21 }
 0x951   :  { %6836 = vmatpush3.bf16.msra.mxu1 %v9421_v24  ;;  %v7331_v24 = vld [vmem:[#allocation12 + $0x30] sm:$0xff]  }
 0x952   :  { %6837 = vmatprep.subr.bf16.mxu1 %v10901_v21 }
 0x953   :  { %6856 = vmatpush3.bf16.msra.mxu0 %v7328_v23  ;;  %v9599_v23 = vld [vmem:[#allocation11 + $0x18] sm:$0xff] }
 0x954   :  { %6857 = vmatprep.subr.bf16.mxu0 %v10901_v21 }
 0x955   :  { %6838 = vmatpush3.bf16.msra.mxu1 %v9425_v1  ;;  %v7330_v1 = vld [vmem:[#allocation12 + $0x50] sm:$0xff]  }
 0x956   :  { %6839 = vmatprep.subr.bf16.mxu1 %v10901_v21 }
 0x957   :  { %6858 = vmatpush3.bf16.msra.mxu0 %v7330_v1  ;;  %v3228_v1 = vrot.slane %v9563_v48, %v11095_v38 }
 0x958   :  { %6859 = vmatprep.subr.bf16.mxu0 %v10901_v21 }
 0x959   :  { %6840 = vmatpush3.bf16.msra.mxu1 %v9429_v9  ;;  %v7333_v9 = vld [vmem:[#allocation12 + $0x28] sm:$0xff]  }
 0x95a   :  { %6841 = vmatprep.subr.bf16.mxu1 %v10901_v21 }
 0x95d   :  { %6842 = vmatpush3.bf16.msra.mxu1 %v9433_v13  ;;  %v7332_v13 = vld [vmem:[#allocation12 + $0x48] sm:$0xff]  }
 0x95e   :  { %6867 = vmatprep.subr.bf16.mxu1 %v10901_v21  ;;  %6860 = vmatpush3.bf16.msra.mxu0 %v7332_v13  ;;  %v3241_v13 = vrot.slane %v9563_v48, %v9574_v5 }
 0x95f   :  { %6861 = vmatprep.subr.bf16.mxu0 %v10901_v21 }
 0x960   :  { %6844 = vmatmul.mubr.bf16.vlgmr.msra.gmra.mxu1 %v2673_v34 }
 0x961   :  { %6883 = vmatprep.mubr.msk.bf16.mxu1 %vm7972_vm1, %v10901_v21  ;;  %6868 = vmatpush3.bf16.msra.mxu1 %v7329_v50  ;;  %v3109_v50 = vrot.slane %v9561_v55, %v11095_v38 }
 0x962   :  { %6869 = vmatprep.subr.bf16.mxu1 %v10901_v21  ;;  %6862 = vmatpush3.bf16.msra.mxu0 %v7334_v49 }
 0x963   :  { %6887 = vmatprep.subr.bf16.mxu0 %v10901_v21 }
 0x965   :  { %6870 = vmatpush3.bf16.msra.mxu1 %v7331_v24  ;;  %v3116_v24 = vrot.slane %v9559_v56, %v11093_v15 }
 0x966   :  { %6871 = vmatprep.subr.bf16.mxu1 %v10901_v21 }
 0x969   :  { %6872 = vmatpush3.bf16.msra.mxu1 %v7333_v9  ;;  %v3234_v9 = vrot.slane %v9565_v32, %v11093_v15 }
 0x96a   :  { %6873 = vmatprep.subr.bf16.mxu1 %v10901_v21 }
 0x96d   :  { %6874 = vmatpush3.bf16.msra.mxu1 %v7335_v0  ;;  %v3247_v0 = vrot.slane %v9565_v32, %v11094_v19 }
 0x96e   :  { %6875 = vmatprep.subr.bf16.mxu1 %v10901_v21 }
 0x971   :  { %6876 = vmatpush3.bf16.msra.mxu1 %v7337_v3  ;;  %v3351_v3 = vrot.slane %v9578_v22, %v11095_v38 }
 0x972   :  { %6877 = vmatprep.subr.bf16.mxu1 %v10901_v21 }
 0x975   :  { %6878 = vmatpush3.bf16.msra.mxu1 %v7339_v52 }
 0x976   :  { %6879 = vmatprep.subr.bf16.mxu1 %v10901_v21 }
 0x979   :  { %6880 = vmatpush3.bf16.msra.mxu1 %v7341_v16  ;;  %v3124_v16 = vrot.slane %v9561_v55, %v9574_v5 }
 0x97a   :  { %6881 = vmatprep.subr.bf16.mxu1 %v10901_v21 }
 0x97d   :  { %6882 = vmatpush3.bf16.msra.mxu1 %v7343_v12  ;;  %v3131_v12 = vrot.slane %v9559_v56, %v11094_v19 }
 0x97e   :  { %6907 = vmatprep.subr.bf16.mxu1 %v10901_v21 }
 0xa00   :  { %v2708_v43 = vpop.f32.mrf.mxu0  ;;  %v2761_v6 = vpop.f32.mrf.mxu1 }
 0xa01   :  { %v2709_v26 = vadd.f32 %v2708_v43, %v11082_v61  ;;  %v2762_v27 = vadd.f32 %v2761_v6, %v8501_v10 }
 0xa02   :  { %v2710_v2 = vpop.f32.mrf.mxu0  ;;  %v6825_v36 = vpop.f32.mrf.mxu1 }
 0xa03   :  { %v5825_v30 = vmul.f32 -1.442695, %v2709_v26  ;;  %v2711_v40 = vadd.f32 %v2710_v2, %v11083_v8  ;;  %v2823_v8 = vld [vmem:[#allocation11] sm:$0xff]  ;;  %v3260_v2 = vrot.slane %v9565_v32, %v11095_v38 }
 0xa04   :  { %v2712_v4 = vpop.f32.mrf.mxu0  ;;  %v2764_v53 = vpop.f32.mrf.mxu1  ;;  %v9571_v10 = vrot.slane %v2823_v8, %v11089_v20  ;;  %v9581_v57 = vrot.slane %v2823_v8, %v11091_v62  ;;  %v9584_v31 = vrot.slane %v2823_v8, %v11092_v60  ;;  %v9587_v47 = vrot.slane %v2823_v8, %v11093_v15 }
 0xa05   :  { %7618 = vpow2.f32 %v5825_v30  ;;  %v5826_v63 = vmul.f32 -1.442695, %v2711_v40  ;;  %v9616_v52 = vrot.slane %v2823_v8, %v11094_v19  ;;  %v9625_v6 = vrot.slane %v2823_v8, %v11095_v38  ;;  %v9636_v53 = vld [vmem:[#allocation11 + $0x40] sm:$0xff] }
 0xa06   :  { %v2713_v25 = vpop.f32.mrf.mxu0  ;;  %v6826_v41 = vpop.f32.mrf.mxu1  ;;  %v9634_v4 = vrot.slane %v2823_v8, %v9574_v5 }
 0xa07   :  { %7620 = vpow2.f32 %v5826_v63  ;;  %v3146_v41 = vrot.slane %v9559_v56, %v11095_v38 }
 0xa12   :  { %v7619_v42 = vpop.eup %7618 }
 0xa13   :  { %v2718_v33 = vadd.f32 1.0, %v7619_v42 }
 0xa14   :  { %v7621_v59 = vpop.eup %7620 }
 0xa15   :  { %7622 = vrcp.f32 %v2718_v33  ;;  %v2724_v7 = vadd.f32 1.0, %v7621_v59 }
 0xa17   :  { %7624 = vrcp.f32 %v2724_v7 }
 0xa20   :  { %v2801_v18 = vpop.f32.mrf.mxu1 }
 0xa21   :  { %v2802_v61 = vadd.f32 %v2801_v18, %v8497_v14  ;;  %v11088_v14 = vld [vmem:[#allocation37_spill] sm:$0xff] }
 0xa22   :  { %v7623_v39 = vpop.eup %7622  ;;  %v6845_v29 = vpop.f32.mrf.mxu1  ;;  %v9568_v35 = vrot.slane %v2823_v8, %v11088_v14  ;;  %v3345_v49 = vrot.slane %v9576_v58, %v11088_v14  ;;  %v3254_v43 = vrot.slane %v9599_v23, %v11088_v14  ;;  %v3139_v25 = vrot.slane %v9563_v48, %v11088_v14 }
 0xa23   :  { %v2807_v51 = vmul.f32 %v7623_v39, %v2802_v61 }
 0xa24   :  { %v2804_v28 = vpop.f32.mrf.mxu1  ;;  %v7625_v26 = vpop.eup %7624 }
 0xa25   :  { %v2808_v45 = vadd.f32 %v2807_v51, %v2762_v27  ;;  %v2810_v18 = vsub.f32 1.0, %v7625_v26  ;;  %v2812_v8 = vmul.f32 %v7625_v26, %v9510_v11 }
 0xa26   :  { %v6846_v34 = vpop.f32.mrf.mxu1 }
 0xa27   :  { %7626 = vtanh.f32 %v2808_v45  ;;  %v9666_v45 = vrot.slane %v9561_v55, %v11088_v14  ;;  %v9670_v34 = vrot.slane %v9561_v55, %v11089_v20 }
 0xa34   :  { %v7627_v27 = vpop.eup %7626 }
 0xa35   :  { %v2811_v46 = vmul.f32 %v7627_v27, %v2810_v18 }
 0xa37   :  { %v9685_v11 = vadd.f32 %v2812_v8, %v2811_v46  ;;  %v9701_v8 = vrot.slane %v9561_v55, %v11091_v62 }
 0xa39   :  { %vm2987_vm2 = vcmp.ge.f32.partialorder %v9685_v11, %v9568_v35  ;;  %vm2992_vm3 = vcmp.lt.f32.partialorder %v9685_v11, %v9571_v10  ;;  %vm2995_vm4 = vcmp.ge.f32.partialorder %v9685_v11, %v9571_v10  ;;  %vm3000_vm5 = vcmp.lt.f32.partialorder %v9685_v11, %v9581_v57 }
 0xa3a   :  { %vm2993_vm6 = vmand %vm2987_vm2, %vm2992_vm3  ;;  %vm3003_vm7 = vcmp.ge.f32.partialorder %v9685_v11, %v9581_v57  ;;  %vm3008_vm8 = vcmp.lt.f32.partialorder %v9685_v11, %v9584_v31  ;;  %vm3011_vm9 = vcmp.ge.f32.partialorder %v9685_v11, %v9584_v31  ;;  %vm3016_vm10 = vcmp.lt.f32.partialorder %v9685_v11, %v9587_v47 }
 0xa3b   :  { %v2994_v46 = vsel %vm2993_vm6, 1.0, %v10901_v21  ;;  %vm3001_vm11 = vmand %vm2995_vm4, %vm3000_vm5  ;;  %v3075_v61 = vsub.f32 %v9685_v11, %v9568_v35  ;;  %v3082_v30 = vsub.f32 %v9581_v57, %v9685_v11  ;;  %v9726_v28 = vsub.f32 %v9685_v11, %v9571_v10 }
 0xa3c   :  { %v3002_v18 = vsel %vm3001_vm11, 1.0, %v10901_v21  ;;  %vm3009_vm12 = vmand %vm3003_vm7, %vm3008_vm8  ;;  %v3097_v27 = vsub.f32 %v9584_v31, %v9685_v11  ;;  %v9733_v26 = vsub.f32 %v9685_v11, %v9581_v57  ;;  %v3112_v35 = vsub.f32 %v9587_v47, %v9685_v11 }
 0xa3d   :  { %v3010_v39 = vsel %vm3009_vm12, 1.0, %v10901_v21  ;;  %vm3017_vm13 = vmand %vm3011_vm9, %vm3016_vm10  ;;  %v3080_v10 = vmul.f32 %v3079_v54, %v3075_v61  ;;  %v3087_v51 = vmul.f32 %v3086_v44, %v3082_v30  ;;  %v3095_v57 = vmul.f32 %v3094_v17, %v9726_v28 }
 0xa3e   :  { %v3018_v29 = vsel %vm3017_vm13, 1.0, %v10901_v21  ;;  %v3102_v7 = vmul.f32 %v3101_v37, %v3097_v27  ;;  %v3110_v54 = vmul.f32 %v3109_v50, %v9733_v26  ;;  %v3117_v44 = vmul.f32 %v3116_v24, %v3112_v35 }
 0xa3f   :  { %v3081_v30 = vmul.f32 %v3080_v10, %v2994_v46  ;;  %v3088_v36 = vmul.f32 %v3087_v51, %v3002_v18  ;;  %v3096_v59 = vmul.f32 %v3095_v57, %v3002_v18  ;;  %v9761_v17 = vrot.slane %v9561_v55, %v11092_v60 }
 0xa40   :  { %v3103_v33 = vmul.f32 %v3102_v7, %v3010_v39  ;;  %v3111_v42 = vmul.f32 %v3110_v54, %v3010_v39  ;;  %v3118_v63 = vmul.f32 %v3117_v44, %v3018_v29  ;;  %v3206_v37 = vrot.slane %v9565_v32, %v11091_v62 }
 0xa41   :  { %v3089_v40 = vadd.f32 %v3088_v36, %v3081_v30  ;;  %v3229_v50 = vmul.f32 %v3228_v1, %v3075_v61  ;;  %v3235_v24 = vmul.f32 %v3234_v9, %v3097_v27  ;;  %v3242_v51 = vmul.f32 %v3241_v13, %v9726_v28 }
 0xa42   :  { %v3104_v7 = vadd.f32 %v3103_v33, %v3096_v59  ;;  %v3119_v39 = vadd.f32 %v3118_v63, %v3111_v42  ;;  %v3248_v18 = vmul.f32 %v3247_v0, %v3112_v35  ;;  %v5827_v36 = vmul.f32 -1.442695, %v9685_v11 }
 0xa43   :  { %v3230_v46 = vmul.f32 %v3229_v50, %v3089_v40  ;;  %vm3019_vm14 = vcmp.ge.f32.partialorder %v9685_v11, %v9587_v47  ;;  %vm3024_vm15 = vcmp.lt.f32.partialorder %v9685_v11, %v9616_v52  ;;  %v9785_v1 = vsub.f32 %v9685_v11, %v9584_v31 }
 0xa44   :  { %v3236_v9 = vmul.f32 %v3235_v24, %v3104_v7  ;;  %v3243_v13 = vmul.f32 %v3242_v51, %v3104_v7  ;;  %v3249_v63 = vmul.f32 %v3248_v18, %v3119_v39  ;;  %7628 = vpow2.f32 %v5827_v36  ;;  %vm3025_vm0 = vmand %vm3019_vm14, %vm3024_vm15  ;;  %v7336_v24 = vld [vmem:[#allocation12 + $0xb8] sm:$0xff]  }
 0xa45   :  { %v3346_v0 = vmul.f32 %v3345_v49, %v3075_v61  ;;  %v3125_v40 = vmul.f32 %v3124_v16, %v9785_v1  ;;  %v9796_v42 = vsub.f32 %v9616_v52, %v9685_v11  ;;  %v3325_v31 = vrot.slane %v9578_v22, %v11092_v60 }
 0xa46   :  { %v3237_v33 = vadd.f32 %v3236_v9, %v3230_v46  ;;  %v9800_v59 = vadd.f32 %v3249_v63, %v3243_v13  ;;  %v3352_v27 = vmul.f32 %v3351_v3, %v3112_v35  ;;  %v3026_v49 = vsel %vm3025_vm0, 1.0, %v10901_v21 }
 0xa47   :  { %v3126_v61 = vmul.f32 %v3125_v40, %v3018_v29  ;;  %v3132_v55 = vmul.f32 %v3131_v12, %v9796_v42  ;;  %vm3027_vm2 = vcmp.ge.f32.partialorder %v9685_v11, %v9616_v52  ;;  %v3429_v16 = vrot.slane %v9636_v53, %v11093_v15 }
 0xa48   :  { %v3347_v10 = vmul.f32 %v3346_v0, %v3237_v33  ;;  %v3353_v57 = vmul.f32 %v3352_v27, %v9800_v59  ;;  %v3214_v3 = vrot.slane %v9563_v48, %v11094_v19  ;;  %v3221_v29 = vrot.slane %v9565_v32, %v11092_v60  ;;  %v7338_v27 = vld [vmem:[#allocation12 + $0xb0] sm:$0xff]  }
 0xa49   :  { %v3133_v35 = vmul.f32 %v3132_v55, %v3026_v49  ;;  %vm3032_vm3 = vcmp.lt.f32.partialorder %v9685_v11, %v9625_v6  ;;  %v3135_v12 = vsub.f32 %v9685_v11, %v9587_v47  ;;  %v9825_v54 = vsub.f32 %v9625_v6, %v9685_v11 }
 0xa4a   :  { %v3354_v44 = vadd.f32 %v3353_v57, %v3347_v10  ;;  %v3255_v30 = vmul.f32 %v3254_v43, %v9733_v26  ;;  %vm3033_vm4 = vmand %vm3027_vm2, %vm3032_vm3  ;;  %vm3035_vm5 = vcmp.ge.f32.partialorder %v9685_v11, %v9625_v6  ;;  %v3332_v50 = vrot.slane %v9599_v23, %v11095_v38 }
 0xa4b   :  { %v3134_v51 = vadd.f32 %v3133_v35, %v3126_v61  ;;  %v3034_v47 = vsel %vm3033_vm4, 1.0, %v10901_v21  ;;  %v3140_v7 = vmul.f32 %v3139_v25, %v3135_v12  ;;  %v3147_v43 = vmul.f32 %v3146_v41, %v9825_v54 }
 0xa4c   :  { %v3447_v18 = vpack.c.bf16 %v3354_v44, %v3354_v44  ;;  %v3256_v36 = vmul.f32 %v3255_v30, %v3119_v39  ;;  %vm3040_vm6 = vcmp.lt.f32.partialorder %v9685_v11, %v9634_v4  ;;  %v3338_v46 = vrot.slane %v9578_v22, %v11093_v15 }
 0xa4d   :  { %v3261_v9 = vmul.f32 %v3260_v2, %v9796_v42  ;;  %v3141_v13 = vmul.f32 %v3140_v7, %v3026_v49  ;;  %v3148_v25 = vmul.f32 %v3147_v43, %v3034_v47  ;;  %v11096_v63 = vrot.slane %v9599_v23, %v11089_v20  ;;  %vm3041_vm7 = vmand %vm3035_vm5, %vm3040_vm6 }
 0xa4e   :  { %6864 = vmatmul.mubr.bf16.vlgmr.msra.gmra.mxu0 %v3447_v18  ;;  %v11097_v39 = vrot.slane %v9565_v32, %v9574_v5  ;;  %v9864_v2 = vsub.f32 %v9685_v11, %v9616_v52  ;;  %v3157_v40 = vsub.f32 %v9634_v4, %v9685_v11  ;;  %v9870_v33 = vsub.f32 %v9685_v11, %v9625_v6 }
 0xa4f   :  { %v3268_v41 = vmul.f32 %v11096_v63, %v9785_v1  ;;  %6888 = vmatpush3.bf16.msra.mxu0 %v7336_v24  ;;  %6903 = vmatprep.mubr.msk.bf16.mxu0 %vm7972_vm1, %v10901_v21  ;;  %v3262_v49 = vmul.f32 %v3261_v9, %v3134_v51  ;;  %v3149_v61 = vadd.f32 %v3148_v25, %v3141_v13  ;;  %v3042_v10 = vsel %vm3041_vm7, 1.0, %v10901_v21 }
 0xa50   :  { %v3274_v0 = vmul.f32 %v11097_v39, %v9825_v54  ;;  %6889 = vmatprep.subr.bf16.mxu0 %v10901_v21  ;;  %v11098_v52 = vrot.slane %v9563_v48, %v11089_v20  ;;  %v11099_v6 = vrot.slane %v9559_v56, %v9574_v5  ;;  %v11100_v44 = vrot.slane %v9563_v48, %v11091_v62 }
 0xa51   :  { %v3269_v55 = vmul.f32 %v3268_v41, %v3134_v51  ;;  %v3436_v24 = vrot.slane %v9576_v58, %v9574_v5  ;;  %v7629_v51 = vpop.eup %7628  ;;  %v11101_v7 = vrot.slane %v9576_v58, %v11089_v20  ;;  %v11102_v9 = vrot.slane %v9599_v23, %v11091_v62 }
 0xa52   :  { %v3155_v57 = vmul.f32 %v11098_v52, %v9864_v2  ;;  %v3162_v35 = vmul.f32 %v11099_v6, %v3157_v40  ;;  %v3170_v30 = vmul.f32 %v11100_v44, %v9870_v33  ;;  %v3275_v18 = vmul.f32 %v3274_v0, %v3149_v61  ;;  %v7340_v52 = vld [vmem:[#allocation12 + $0xa8] sm:$0xff]  }
 0xa53   :  { %v3359_v43 = vmul.f32 %v11101_v7, %v9726_v28  ;;  %v3281_v56 = vmul.f32 %v11102_v9, %v3135_v12  ;;  %v3442_v13 = vrot.slane %v9636_v53, %v11094_v19  ;;  %v2979_v25 = vadd.f32 1.0, %v7629_v51  ;;  %6890 = vmatpush3.bf16.msra.mxu0 %v7338_v27 }
 0xa54   :  { %v3156_v63 = vmul.f32 %v3155_v57, %v3034_v47  ;;  %v3163_v41 = vmul.f32 %v3162_v35, %v3042_v10  ;;  %v3171_v39 = vmul.f32 %v3170_v30, %v3042_v10  ;;  %v9898_v6 = vadd.f32 %v3262_v49, %v3256_v36  ;;  %6891 = vmatprep.subr.bf16.mxu0 %v10901_v21 }
 0xa55   :  { %v11103_v28 = vrot.slane %v9578_v22, %v9574_v5  ;;  %v9904_v44 = vadd.f32 %v3275_v18, %v3269_v55  ;;  %v11104_v7 = vrot.slane %v9578_v22, %v11088_v14  ;;  %7630 = vrcp.f32 %v2979_v25 }
 0xa56   :  { %v3164_v47 = vadd.f32 %v3163_v41, %v3156_v63  ;;  %v3282_v10 = vmul.f32 %v3281_v56, %v3149_v61  ;;  %v11105_v36 = vrot.slane %v9599_v23, %v11092_v60  ;;  %v11107_v55 = vrot.slane %v9636_v53, %v11089_v20 }
 0xa57   :  { %v3365_v0 = vmul.f32 %v11103_v28, %v9796_v42  ;;  %v3287_v9 = vmul.f32 %v11104_v7, %v3157_v40  ;;  %v11106_v42 = vrot.slane %v9576_v58, %v11092_v60  ;;  %v11108_v35 = vrot.slane %v9576_v58, %v11093_v15  ;;  %6892 = vmatpush3.bf16.msra.mxu0 %v7340_v52 }
 0xa58   :  { %v3294_v27 = vmul.f32 %v11105_v36, %v9864_v2  ;;  %v3391_v57 = vmul.f32 %v11107_v55, %v3157_v40  ;;  %vm3043_vm8 = vcmp.ge.f32.partialorder %v9685_v11, %v9634_v4  ;;  %vm3048_vm9 = vcmp.lt.f32.partialorder %v9685_v11, %v9666_v45  ;;  %6893 = vmatprep.subr.bf16.mxu0 %v10901_v21  ;;  %v7344_v55 = vld [vmem:[#allocation12 + $0x98] sm:$0xff]  }
 0xa59   :  { %v3385_v49 = vmul.f32 %v11106_v42, %v9785_v1  ;;  %v3398_v30 = vmul.f32 %v11108_v35, %v3135_v12  ;;  %v3288_v61 = vmul.f32 %v3287_v9, %v3164_v47  ;;  %v3172_v18 = vsub.f32 %v9666_v45, %v9685_v11  ;;  %v7342_v1 = vld [vmem:[#allocation12 + $0xa0] sm:$0xff]   ;;  %vm3049_vm10 = vmand %vm3043_vm8, %vm3048_vm9 }
 0xa5a   :  { %v3295_v51 = vmul.f32 %v3294_v27, %v3164_v47  ;;  %vm3051_vm11 = vcmp.ge.f32.partialorder %v9685_v11, %v9666_v45  ;;  %vm3056_vm12 = vcmp.lt.f32.partialorder %v9685_v11, %v9670_v34  ;;  %v9937_v12 = vsub.f32 %v9685_v11, %v9634_v4 }
 0xa5b   :  { %v3386_v56 = vmul.f32 %v3385_v49, %v9904_v44  ;;  %v3289_v40 = vadd.f32 %v3288_v61, %v3282_v10  ;;  %v3050_v25 = vsel %vm3049_vm10, 1.0, %v10901_v21  ;;  %v11109_v63 = vrot.slane %v9565_v32, %v11088_v14  ;;  %vm3057_vm13 = vmand %vm3051_vm11, %vm3056_vm12  ;;  %6894 = vmatpush3.bf16.msra.mxu0 %v7342_v1 }
 0xa5c   :  { %v11110_v52 = vrot.slane %v9578_v22, %v11089_v20  ;;  %v9948_v7 = vmul.f32 %v3359_v43, %v9800_v59  ;;  %v9951_v4 = vmul.f32 %v3365_v0, %v9898_v6  ;;  %v3058_v9 = vsel %vm3057_vm13, 1.0, %v10901_v21  ;;  %6895 = vmatprep.subr.bf16.mxu0 %v10901_v21 }
 0xa5d   :  { %v3177_v41 = vmul.f32 %v11109_v63, %v3172_v18  ;;  %v11111_v47 = vrot.slane %v9563_v48, %v11092_v60  ;;  %v3392_v36 = vmul.f32 %v3391_v57, %v3289_v40  ;;  %v3399_v27 = vmul.f32 %v3398_v30, %v3289_v40 }
 0xa5e   :  { %v3300_v28 = vmul.f32 %v11110_v52, %v3172_v18  ;;  %v3187_v49 = vsub.f32 %v9670_v34, %v9685_v11  ;;  %v3195_v43 = vsub.f32 %v9685_v11, %v9666_v45  ;;  %v11112_v0 = vrot.slane %v9599_v23, %v11093_v15 }
 0xa5f   :  { %v3185_v10 = vmul.f32 %v11111_v47, %v9937_v12  ;;  %v3178_v42 = vmul.f32 %v3177_v41, %v3050_v25  ;;  %v11113_v57 = vrot.slane %v9599_v23, %v11094_v19  ;;  %v9971_v61 = vadd.f32 %v3392_v36, %v3386_v56  ;;  %6896 = vmatpush3.bf16.msra.mxu0 %v7344_v55  ;;  %v7350_v23 = vld [vmem:[#allocation12 + $0x80] sm:$0xff]  }
 0xa60   :  { %v3307_v35 = vmul.f32 %v11112_v0, %v9870_v33  ;;  %v11114_v40 = vrot.slane %v9565_v32, %v11089_v20  ;;  %v11115_v45 = vrot.slane %v9578_v22, %v11091_v62  ;;  %v11116_v41 = vrot.slane %v9636_v53, %v11091_v62  ;;  %6897 = vmatprep.subr.bf16.mxu0 %v10901_v21 }
 0xa61   :  { %v3186_v59 = vmul.f32 %v3185_v10, %v3050_v25  ;;  %v3320_v30 = vmul.f32 %v11113_v57, %v9937_v12  ;;  %v3179_v1 = vadd.f32 %v3178_v42, %v3171_v39  ;;  %v11117_v47 = vrot.slane %v9563_v48, %v11093_v15 }
 0xa62   :  { %v3192_v25 = vmul.f32 %v11114_v40, %v3187_v49  ;;  %v3313_v63 = vmul.f32 %v11115_v45, %v3187_v49  ;;  %v3404_v52 = vmul.f32 %v11116_v41, %v3172_v18  ;;  %v11118_v39 = vrot.slane %v9576_v58, %v11094_v19  ;;  %v7346_v41 = vld [vmem:[#allocation12 + $0x90] sm:$0xff]  }
 0xa63   :  { %v3200_v10 = vmul.f32 %v11117_v47, %v3195_v43  ;;  %v11119_v36 = vrot.slane %v9576_v58, %v11095_v38  ;;  %v3301_v0 = vmul.f32 %v3300_v28, %v3179_v1  ;;  %v3308_v40 = vmul.f32 %v3307_v35, %v3179_v1  ;;  %6898 = vmatpush3.bf16.msra.mxu0 %v7346_v41 }
 0xa64   :  { %v3411_v56 = vmul.f32 %v11118_v39, %v9864_v2  ;;  %v3193_v57 = vmul.f32 %v3192_v25, %v3058_v9  ;;  %v11120_v18 = vrot.slane %v9636_v53, %v11092_v60  ;;  %vm3059_vm14 = vcmp.ge.f32.partialorder %v9685_v11, %v9670_v34  ;;  %v7348_v39 = vld [vmem:[#allocation12 + $0x88] sm:$0xff]   ;;  %6899 = vmatprep.subr.bf16.mxu0 %v10901_v21 }
 0xa65   :  { %v3424_v42 = vmul.f32 %v11119_v36, %v9870_v33  ;;  %v3201_v47 = vmul.f32 %v3200_v10, %v3058_v9  ;;  %vm3064_vm15 = vcmp.lt.f32.partialorder %v9685_v11, %v9701_v8  ;;  %v3202_v2 = vsub.f32 %v9701_v8, %v9685_v11  ;;  %v7631_v9 = vpop.eup %7630  ;;  %v7345_v10 = vld [vmem:[#allocation12 + $0xf8] sm:$0xff]  }
 0xa66   :  { %v3417_v45 = vmul.f32 %v11120_v18, %v3187_v49  ;;  %v3302_v33 = vadd.f32 %v3301_v0, %v3295_v51  ;;  %v3194_v28 = vadd.f32 %v3193_v57, %v3186_v59  ;;  %vm3065_vm0 = vmand %vm3059_vm14, %vm3064_vm15  ;;  %vm3067_vm2 = vcmp.ge.f32.partialorder %v9685_v11, %v9701_v8 }
 0xa67   :  { %vm3072_vm3 = vcmp.lt.f32.partialorder %v9685_v11, %v9761_v17  ;;  %v3066_v49 = vsel %vm3065_vm0, 1.0, %v10901_v21  ;;  %v3207_v55 = vmul.f32 %v3206_v37, %v3202_v2  ;;  %v3326_v35 = vmul.f32 %v3325_v31, %v3202_v2  ;;  %6900 = vmatpush3.bf16.msra.mxu0 %v7348_v39  ;;  %v7357_v39 = vld [vmem:[#allocation12 + $0xc8] sm:$0xff]  }
 0xa68   :  { %v3430_v51 = vmul.f32 %v3429_v16, %v3202_v2  ;;  %vm3073_vm4 = vmand %vm3067_vm2, %vm3072_vm3  ;;  %v2982_v8 = vmul.f32 %v7631_v9, %v9685_v11  ;;  %v3405_v59 = vmul.f32 %v3404_v52, %v3302_v33  ;;  %v3314_v1 = vmul.f32 %v3313_v63, %v3194_v28  ;;  %6901 = vmatprep.subr.bf16.mxu0 %v10901_v21 }
 0xa69   :  { %v3321_v25 = vmul.f32 %v3320_v30, %v3194_v28  ;;  %v3412_v36 = vmul.f32 %v3411_v56, %v3302_v33  ;;  %v3208_v0 = vmul.f32 %v3207_v55, %v3066_v49  ;;  %v3074_v37 = vsel %vm3073_vm4, 1.0, %v10901_v21  ;;  %v7351_v28 = vld [vmem:[#allocation12 + $0xe0] sm:$0xff]   ;;  %v7353_v55 = vld [vmem:[#allocation12 + $0xd8] sm:$0xff]  }
 0xa6a   :  { %v3210_v31 = vsub.f32 %v9685_v11, %v9670_v34  ;;  %v3446_v57 = vpack.c.bf16 %v2982_v8, %v2982_v8  ;;  %v10022_v16 = vadd.f32 %v3405_v59, %v3399_v27  ;;  %v3315_v18 = vadd.f32 %v3314_v1, %v3308_v40  ;;  %v7355_v59 = vld [vmem:[#allocation12 + $0xd0] sm:$0xff]   ;;  %v7358_v1 = vld [vmem:[#allocation12 + $0x120] sm:$0xff]  }
 0xa6b   :  { %v3217_v63 = vsub.f32 %v9761_v17, %v9685_v11  ;;  %v3209_v30 = vadd.f32 %v3208_v0, %v3201_v47  ;;  %v3333_v56 = vmul.f32 %v3332_v50, %v3195_v43  ;;  %v3437_v34 = vmul.f32 %v3436_v24, %v9937_v12  ;;  %v7347_v17 = vld [vmem:[#allocation12 + $0xf0] sm:$0xff]   ;;  %6902 = vmatpush3.bf16.msra.mxu0 %v7350_v23  ;;  %v7359_v0 = vld [vmem:[#allocation12 + $0xc0] sm:$0xff]  }
 0xa6c   :  { %v3215_v52 = vmul.f32 %v3214_v3, %v3210_v31  ;;  %6884 = vmatmul.mubr.bf16.vlgmr.msra.gmra.mxu1 %v3446_v57  ;;  %v3367_v27 = vadd.f32 %v9951_v4, %v9948_v7  ;;  %v3418_v40 = vmul.f32 %v3417_v45, %v3315_v18  ;;  %v3425_v11 = vmul.f32 %v3424_v42, %v3315_v18  ;;  %v7349_v42 = vld [vmem:[#allocation12 + $0xe8] sm:$0xff]   ;;  %v7352_v45 = vld [vmem:[#allocation12 + $0x138] sm:$0xff]   ;;  %v7378_v23 = vld [vmem:[#allocation12 + $0x190] sm:$0xff]  }
 0xa6d   :  { %v3222_v48 = vmul.f32 %v3221_v29, %v3217_v63  ;;  %6908 = vmatpush3.bf16.msra.mxu1 %v7345_v10  ;;  %v3327_v3 = vmul.f32 %v3326_v35, %v3209_v30  ;;  %v3334_v43 = vmul.f32 %v3333_v56, %v3209_v30  ;;  %v3339_v7 = vmul.f32 %v3338_v46, %v3217_v63  ;;  %v7356_v35 = vld [vmem:[#allocation12 + $0x128] sm:$0xff]   ;;  %v7370_v56 = vld [vmem:[#allocation12 + $0x1b0] sm:$0xff]  }
 0xa6e   :  { %v3216_v50 = vmul.f32 %v3215_v52, %v3066_v49  ;;  %6909 = vmatprep.subr.bf16.mxu1 %v10901_v21  ;;  %v10043_v24 = vadd.f32 %v3418_v40, %v3412_v36  ;;  %6923 = vmatprep.mubr.msk.bf16.mxu1 %vm7972_vm1, %v10901_v21  ;;  %v3443_v29 = vmul.f32 %v3442_v13, %v3217_v63  ;;  %v7354_v13 = vld [vmem:[#allocation12 + $0x130] sm:$0xff]   ;;  %v7360_v36 = vld [vmem:[#allocation12 + $0x118] sm:$0xff]   ;;  %v7364_v31 = vld [vmem:[#allocation12 + $0x108] sm:$0xff]  }
 0xa6f   :  { %v3223_v12 = vmul.f32 %v3222_v48, %v3074_v37  ;;  %v3328_v32 = vadd.f32 %v3327_v3, %v3321_v25  ;;  %v3624_v2 = vpack.c.bf16 %v3367_v27, %v3367_v27  ;;  %6927 = vmatprep.subr.bf16.mxu0 %v10901_v21  ;;  %v3377_v8 = vrot.slane %v9636_v53, %v11088_v14  ;;  %v7362_v37 = vld [vmem:[#allocation12 + $0x110] sm:$0xff]   ;;  %v7365_v18 = vld [vmem:[#allocation12 + $0x168] sm:$0xff]   ;;  %v7368_v63 = vld [vmem:[#allocation12 + $0x1b8] sm:$0xff]  }
 0xa70   :  { %v3804_v30 = vpack.c.bf16 %v9971_v61, %v9971_v61  ;;  %v7367_v52 = vld [vmem:[#allocation12 + $0x160] sm:$0xff]   ;;  %v7372_v27 = vld [vmem:[#allocation12 + $0x1a8] sm:$0xff]   ;;  %v7371_v61 = vld [vmem:[#allocation12 + $0x150] sm:$0xff]  }
 0xa71   :  { %v3224_v4 = vadd.f32 %v3223_v12, %v3216_v50  ;;  %6910 = vmatpush3.bf16.msra.mxu1 %v7347_v17  ;;  %v3431_v41 = vmul.f32 %v3430_v51, %v3328_v32  ;;  %v3438_v47 = vmul.f32 %v3437_v34, %v3328_v32  ;;  %6904 = vmatmul.mubr.bf16.vlgmr.msra.gmra.mxu0 %v3624_v2  ;;  %v7369_v34 = vld [vmem:[#allocation12 + $0x158] sm:$0xff]   ;;  %v7374_v40 = vld [vmem:[#allocation12 + $0x1a0] sm:$0xff]   ;;  %v7380_v50 = vld [vmem:[#allocation12 + $0x188] sm:$0xff]  }
 0xa72   :  { %6911 = vmatprep.subr.bf16.mxu1 %v10901_v21  ;;  %6928 = vmatpush3.bf16.msra.mxu0 %v7352_v45  ;;  %v3371_v51 = vrot.slane %v9576_v58, %v11091_v62  ;;  %v3378_v10 = vmul.f32 %v3377_v8, %v9825_v54  ;;  %v7361_v54 = vld [vmem:[#allocation12 + $0x178] sm:$0xff]   ;;  %v7375_v17 = vld [vmem:[#allocation12 + $0x140] sm:$0xff]   ;;  %v7379_v12 = vld [vmem:[#allocation12 + $0x1f0] sm:$0xff]  }
 0xa73   :  { %v3340_v22 = vmul.f32 %v3339_v7, %v3224_v4  ;;  %v10055_v46 = vadd.f32 %v3431_v41, %v3425_v11  ;;  %6929 = vmatprep.subr.bf16.mxu0 %v10901_v21  ;;  %6943 = vmatprep.mubr.msk.bf16.mxu0 %vm7972_vm1, %v10901_v21  ;;  %v7373_v11 = vld [vmem:[#allocation12 + $0x148] sm:$0xff]   ;;  %v7376_v48 = vld [vmem:[#allocation12 + $0x198] sm:$0xff]   ;;  %v7382_v7 = vld [vmem:[#allocation12 + $0x180] sm:$0xff]  }
 0xa74   :  { %v3372_v25 = vmul.f32 %v3371_v51, %v9733_v26  ;;  %v3379_v53 = vmul.f32 %v3378_v10, %v9904_v44  ;;  %v7366_v44 = vld [vmem:[#allocation12 + $0x100] sm:$0xff]   ;;  %v7377_v3 = vld [vmem:[#allocation12 + $0x1f8] sm:$0xff]   ;;  %v7381_v32 = vld [vmem:[#allocation12 + $0x1e8] sm:$0xff]  }
 0xa75   :  { %v3341_v33 = vadd.f32 %v3340_v22, %v3334_v43  ;;  %6912 = vmatpush3.bf16.msra.mxu1 %v7349_v42  ;;  %v3894_v43 = vpack.c.bf16 %v10022_v16, %v10022_v16  ;;  %v7384_v16 = vld [vmem:[#allocation12 + $0x238] sm:$0xff]   ;;  %v7383_v4 = vld [vmem:[#allocation12 + $0x1e0] sm:$0xff]   ;;  %v7386_v42 = vld [vmem:[#allocation12 + $0x230] sm:$0xff]  }
 0xa76   :  { %6913 = vmatprep.subr.bf16.mxu1 %v10901_v21  ;;  %6930 = vmatpush3.bf16.msra.mxu0 %v7354_v13  ;;  %v3373_v58 = vmul.f32 %v3372_v25, %v9898_v6  ;;  %v7363_v6 = vld [vmem:[#allocation12 + $0x170] sm:$0xff]   ;;  %v7385_v45 = vld [vmem:[#allocation12 + $0x1d8] sm:$0xff]   ;;  %v7388_v41 = vld [vmem:[#allocation12 + $0x228] sm:$0xff]  }
 0xa77   :  { %v3444_v9 = vmul.f32 %v3443_v29, %v3341_v33  ;;  %6931 = vmatprep.subr.bf16.mxu0 %v10901_v21  ;;  %v3984_v29 = vpack.c.bf16 %v10043_v24, %v10043_v24  ;;  %v7387_v24 = vld [vmem:[#allocation12 + $0x1d0] sm:$0xff]   ;;  %v7389_v2 = vld [vmem:[#allocation12 + $0x1c8] sm:$0xff]   ;;  %v7392_v22 = vld [vmem:[#allocation12 + $0x218] sm:$0xff]  }
 0xa78   :  { %v3380_v26 = vadd.f32 %v3379_v53, %v3373_v58  ;;  %v7391_v33 = vld [vmem:[#allocation12 + $0x1c0] sm:$0xff]   ;;  %v7394_v13 = vld [vmem:[#allocation12 + $0x208] sm:$0xff]   ;;  %v7397_v51 = vld [vmem:[#allocation12 + $0x2b0] sm:$0xff]  }
 0xa79   :  { %v10061_v49 = vadd.f32 %v3444_v9, %v3438_v47  ;;  %6914 = vmatpush3.bf16.msra.mxu1 %v7351_v28  ;;  %v7390_v47 = vld [vmem:[#allocation12 + $0x220] sm:$0xff]   ;;  %v7393_v28 = vld [vmem:[#allocation12 + $0x210] sm:$0xff]   ;;  %v4074_v9 = vpack.c.bf16 %v10055_v46, %v10055_v46  ;;  %v7396_v46 = vld [vmem:[#allocation12 + $0x2b8] sm:$0xff]  }
 0xa7a   :  { %6915 = vmatprep.subr.bf16.mxu1 %v10901_v21  ;;  %6932 = vmatpush3.bf16.msra.mxu0 %v7356_v35  ;;  %v3714_v57 = vpack.c.bf16 %v3380_v26, %v3380_v26  ;;  %v7403_v58 = vld [vmem:[#allocation12 + $0x270] sm:$0xff]   ;;  %v7407_v26 = vld [vmem:[#allocation12 + $0x260] sm:$0xff]  }
 0xa7b   :  { %6933 = vmatprep.subr.bf16.mxu0 %v10901_v21  ;;  %v4164_v35 = vpack.c.bf16 %v10061_v49, %v10061_v49  ;;  %v7399_v49 = vld [vmem:[#allocation12 + $0x2a0] sm:$0xff]   ;;  %v7402_v53 = vld [vmem:[#allocation12 + $0x290] sm:$0xff]  }
 0xa7d   :  { %6916 = vmatpush3.bf16.msra.mxu1 %v7353_v55  ;;  %v7395_v55 = vld [vmem:[#allocation12 + $0x200] sm:$0xff]  }
 0xa7e   :  { %6917 = vmatprep.subr.bf16.mxu1 %v10901_v21  ;;  %6934 = vmatpush3.bf16.msra.mxu0 %v7358_v1 }
 0xa7f   :  { %6935 = vmatprep.subr.bf16.mxu0 %v10901_v21 }
 0xa81   :  { %6918 = vmatpush3.bf16.msra.mxu1 %v7355_v59  ;;  %v7398_v59 = vld [vmem:[#allocation12 + $0x2a8] sm:$0xff]  }
 0xa82   :  { %6919 = vmatprep.subr.bf16.mxu1 %v10901_v21  ;;  %6936 = vmatpush3.bf16.msra.mxu0 %v7360_v36  ;;  %v7400_v36 = vld [vmem:[#allocation12 + $0x298] sm:$0xff]  }
 0xa83   :  { %6937 = vmatprep.subr.bf16.mxu0 %v10901_v21 }
 0xa85   :  { %6920 = vmatpush3.bf16.msra.mxu1 %v7357_v39  ;;  %v7401_v39 = vld [vmem:[#allocation12 + $0x278] sm:$0xff]  }
 0xa86   :  { %6921 = vmatprep.subr.bf16.mxu1 %v10901_v21  ;;  %6938 = vmatpush3.bf16.msra.mxu0 %v7362_v37  ;;  %v7404_v37 = vld [vmem:[#allocation12 + $0x288] sm:$0xff]  }
 0xa87   :  { %6939 = vmatprep.subr.bf16.mxu0 %v10901_v21 }
 0xa89   :  { %6922 = vmatpush3.bf16.msra.mxu1 %v7359_v0  ;;  %v7405_v0 = vld [vmem:[#allocation12 + $0x268] sm:$0xff]  }
 0xa8a   :  { %6947 = vmatprep.subr.bf16.mxu1 %v10901_v21  ;;  %6940 = vmatpush3.bf16.msra.mxu0 %v7364_v31 }
 0xa8b   :  { %6941 = vmatprep.subr.bf16.mxu0 %v10901_v21 }
 0xa8c   :  { %6924 = vmatmul.mubr.bf16.vlgmr.msra.gmra.mxu1 %v3714_v57 }
 0xa8d   :  { %6948 = vmatpush3.bf16.msra.mxu1 %v7361_v54  ;;  %6963 = vmatprep.mubr.msk.bf16.mxu1 %vm7972_vm1, %v10901_v21  ;;  %v7406_v54 = vld [vmem:[#allocation12 + $0x280] sm:$0xff]  }
 0xa8e   :  { %6949 = vmatprep.subr.bf16.mxu1 %v10901_v21  ;;  %6942 = vmatpush3.bf16.msra.mxu0 %v7366_v44 }
 0xa8f   :  { %6967 = vmatprep.subr.bf16.mxu0 %v10901_v21 }
 0xa91   :  { %6950 = vmatpush3.bf16.msra.mxu1 %v7363_v6  ;;  %6944 = vmatmul.mubr.bf16.vlgmr.msra.gmra.mxu0 %v3804_v30  ;;  %v7409_v6 = vld [vmem:[#allocation12 + $0x258] sm:$0xff]  }
 0xa92   :  { %6951 = vmatprep.subr.bf16.mxu1 %v10901_v21  ;;  %6968 = vmatpush3.bf16.msra.mxu0 %v7368_v63  ;;  %v7411_v63 = vld [vmem:[#allocation12 + $0x250] sm:$0xff]  }
 0xa93   :  { %6969 = vmatprep.subr.bf16.mxu0 %v10901_v21  ;;  %6983 = vmatprep.mubr.msk.bf16.mxu0 %vm7972_vm1, %v10901_v21 }
 0xa95   :  { %6952 = vmatpush3.bf16.msra.mxu1 %v7365_v18 }
 0xa96   :  { %6953 = vmatprep.subr.bf16.mxu1 %v10901_v21  ;;  %6970 = vmatpush3.bf16.msra.mxu0 %v7370_v56 }
 0xa97   :  { %6971 = vmatprep.subr.bf16.mxu0 %v10901_v21 }
 0xa99   :  { %6954 = vmatpush3.bf16.msra.mxu1 %v7367_v52 }
 0xa9a   :  { %6955 = vmatprep.subr.bf16.mxu1 %v10901_v21  ;;  %6972 = vmatpush3.bf16.msra.mxu0 %v7372_v27 }
 0xa9b   :  { %6973 = vmatprep.subr.bf16.mxu0 %v10901_v21 }
 0xa9d   :  { %6956 = vmatpush3.bf16.msra.mxu1 %v7369_v34  ;;  %v7413_v34 = vld [vmem:[#allocation12 + $0x248] sm:$0xff]  }
 0xa9e   :  { %6957 = vmatprep.subr.bf16.mxu1 %v10901_v21  ;;  %6974 = vmatpush3.bf16.msra.mxu0 %v7374_v40  ;;  %v7415_v40 = vld [vmem:[#allocation12 + $0x240] sm:$0xff]  }
 0xa9f   :  { %6975 = vmatprep.subr.bf16.mxu0 %v10901_v21 }
 0xaa1   :  { %6958 = vmatpush3.bf16.msra.mxu1 %v7371_v61 }
 0xaa2   :  { %6959 = vmatprep.subr.bf16.mxu1 %v10901_v21  ;;  %6976 = vmatpush3.bf16.msra.mxu0 %v7376_v48 }
 0xaa3   :  { %6977 = vmatprep.subr.bf16.mxu0 %v10901_v21 }
 0xaa5   :  { %6960 = vmatpush3.bf16.msra.mxu1 %v7373_v11 }
 0xaa6   :  { %6961 = vmatprep.subr.bf16.mxu1 %v10901_v21  ;;  %6978 = vmatpush3.bf16.msra.mxu0 %v7378_v23 }
 0xaa7   :  { %6979 = vmatprep.subr.bf16.mxu0 %v10901_v21 }
 0xaa9   :  { %6962 = vmatpush3.bf16.msra.mxu1 %v7375_v17 }
 0xaaa   :  { %6987 = vmatprep.subr.bf16.mxu1 %v10901_v21  ;;  %6980 = vmatpush3.bf16.msra.mxu0 %v7380_v50 }
 0xaab   :  { %6981 = vmatprep.subr.bf16.mxu0 %v10901_v21 }
 0xaac   :  { %6964 = vmatmul.mubr.bf16.vlgmr.msra.gmra.mxu1 %v3894_v43 }
 0xaad   :  { %6988 = vmatpush3.bf16.msra.mxu1 %v7377_v3  ;;  %7003 = vmatprep.mubr.msk.bf16.mxu1 %vm7972_vm1, %v10901_v21 }
 0xaae   :  { %6989 = vmatprep.subr.bf16.mxu1 %v10901_v21  ;;  %6982 = vmatpush3.bf16.msra.mxu0 %v7382_v7 }
 0xaaf   :  { %7007 = vmatprep.subr.bf16.mxu0 %v10901_v21 }
 0xab1   :  { %6990 = vmatpush3.bf16.msra.mxu1 %v7379_v12  ;;  %6984 = vmatmul.mubr.bf16.vlgmr.msra.gmra.mxu0 %v3984_v29 }
 0xab2   :  { %6991 = vmatprep.subr.bf16.mxu1 %v10901_v21  ;;  %7008 = vmatpush3.bf16.msra.mxu0 %v7384_v16 }
 0xab3   :  { %7009 = vmatprep.subr.bf16.mxu0 %v10901_v21  ;;  %7023 = vmatprep.mubr.msk.bf16.mxu0 %vm7972_vm1, %v10901_v21 }
 0xab5   :  { %6992 = vmatpush3.bf16.msra.mxu1 %v7381_v32 }
 0xab6   :  { %6993 = vmatprep.subr.bf16.mxu1 %v10901_v21  ;;  %7010 = vmatpush3.bf16.msra.mxu0 %v7386_v42 }
 0xab7   :  { %7011 = vmatprep.subr.bf16.mxu0 %v10901_v21 }
 0xab9   :  { %6994 = vmatpush3.bf16.msra.mxu1 %v7383_v4 }
 0xaba   :  { %6995 = vmatprep.subr.bf16.mxu1 %v10901_v21  ;;  %7012 = vmatpush3.bf16.msra.mxu0 %v7388_v41 }
 0xabb   :  { %7013 = vmatprep.subr.bf16.mxu0 %v10901_v21 }
 0xabd   :  { %6996 = vmatpush3.bf16.msra.mxu1 %v7385_v45 }
 0xabe   :  { %6997 = vmatprep.subr.bf16.mxu1 %v10901_v21  ;;  %7014 = vmatpush3.bf16.msra.mxu0 %v7390_v47 }
 0xabf   :  { %7015 = vmatprep.subr.bf16.mxu0 %v10901_v21 }
 0xac1   :  { %6998 = vmatpush3.bf16.msra.mxu1 %v7387_v24 }
 0xac2   :  { %6999 = vmatprep.subr.bf16.mxu1 %v10901_v21  ;;  %7016 = vmatpush3.bf16.msra.mxu0 %v7392_v22  ;;  %v10153_v22 = vld [vmem:[#allocation11 + $0x70] sm:$0xff] }
 0xac3   :  { %7017 = vmatprep.subr.bf16.mxu0 %v10901_v21 }
 0xac5   :  { %7000 = vmatpush3.bf16.msra.mxu1 %v7389_v2  ;;  %v4255_v2 = vld [vmem:[#allocation11 + $0x48] sm:$0xff] }
 0xac6   :  { %7001 = vmatprep.subr.bf16.mxu1 %v10901_v21  ;;  %7018 = vmatpush3.bf16.msra.mxu0 %v7393_v28  ;;  %v10157_v28 = vld [vmem:[#allocation11 + $0x58] sm:$0xff] }
 0xac7   :  { %7019 = vmatprep.subr.bf16.mxu0 %v10901_v21 }
 0xac9   :  { %7002 = vmatpush3.bf16.msra.mxu1 %v7391_v33  ;;  %v10155_v33 = vld [vmem:[#allocation11 + $0x50] sm:$0xff] }
 0xaca   :  { %7027 = vmatprep.subr.bf16.mxu1 %v10901_v21  ;;  %7020 = vmatpush3.bf16.msra.mxu0 %v7394_v13  ;;  %v10159_v13 = vld [vmem:[#allocation11 + $0x78] sm:$0xff] }
 0xacb   :  { %7021 = vmatprep.subr.bf16.mxu0 %v10901_v21 }
 0xacc   :  { %7004 = vmatmul.mubr.bf16.vlgmr.msra.gmra.mxu1 %v4074_v9  ;;  %v10162_v9 = vrot.slane %v4255_v2, %v11088_v14 }
 0xacd   :  { %7043 = vmatprep.mubr.msk.bf16.mxu1 %vm7972_vm1, %v10901_v21  ;;  %7028 = vmatpush3.bf16.msra.mxu1 %v7396_v46  ;;  %v10170_v46 = vld [vmem:[#allocation11 + $0x68] sm:$0xff] }
 0xace   :  { %7022 = vmatpush3.bf16.msra.mxu0 %v7395_v55  ;;  %7029 = vmatprep.subr.bf16.mxu1 %v10901_v21  ;;  %v10165_v55 = vrot.slane %v4255_v2, %v11089_v20 }
 0xacf   :  { %7047 = vmatprep.subr.bf16.mxu0 %v10901_v21 }
 0xad1   :  { %7024 = vmatmul.mubr.bf16.vlgmr.msra.gmra.mxu0 %v4164_v35  ;;  %7030 = vmatpush3.bf16.msra.mxu1 %v7397_v51  ;;  %v10168_v35 = vrot.slane %v4255_v2, %v11091_v62  ;;  %v10172_v51 = vld [vmem:[#allocation11 + $0x80] sm:$0xff] }
 0xad2   :  { %7063 = vmatprep.mubr.msk.bf16.mxu0 %vm7972_vm1, %v10901_v21  ;;  %7031 = vmatprep.subr.bf16.mxu1 %v10901_v21 }
 0xad3   :  { %7048 = vmatpush3.bf16.msra.mxu0 %v7401_v39  ;;  %v4542_v39 = vrot.slane %v10155_v33, %v11095_v38 }
 0xad4   :  { %7049 = vmatprep.subr.bf16.mxu0 %v10901_v21 }
 0xad5   :  { %7032 = vmatpush3.bf16.msra.mxu1 %v7398_v59  ;;  %v10178_v59 = vrot.slane %v4255_v2, %v11093_v15 }
 0xad6   :  { %7033 = vmatprep.subr.bf16.mxu1 %v10901_v21 }
 0xad7   :  { %7050 = vmatpush3.bf16.msra.mxu0 %v7403_v58  ;;  %v4661_v58 = vrot.slane %v10157_v28, %v11095_v38 }
 0xad8   :  { %7051 = vmatprep.subr.bf16.mxu0 %v10901_v21 }
 0xad9   :  { %7034 = vmatpush3.bf16.msra.mxu1 %v7399_v49  ;;  %v4527_v49 = vrot.slane %v10155_v33, %v11094_v19 }
 0xada   :  { %7035 = vmatprep.subr.bf16.mxu1 %v10901_v21 }
 0xadb   :  { %7052 = vmatpush3.bf16.msra.mxu0 %v7405_v0  ;;  %v4674_v0 = vrot.slane %v10157_v28, %v9574_v5 }
 0xadc   :  { %7053 = vmatprep.subr.bf16.mxu0 %v10901_v21 }
 0xadd   :  { %7036 = vmatpush3.bf16.msra.mxu1 %v7400_v36  ;;  %v4549_v36 = vrot.slane %v10153_v22, %v11093_v15 }
 0xade   :  { %7037 = vmatprep.subr.bf16.mxu1 %v10901_v21 }
 0xadf   :  { %7054 = vmatpush3.bf16.msra.mxu0 %v7407_v26  ;;  %v10200_v26 = vld [vmem:[#allocation11 + $0x60] sm:$0xff] }
 0xae0   :  { %7055 = vmatprep.subr.bf16.mxu0 %v10901_v21 }
 0xae1   :  { %7038 = vmatpush3.bf16.msra.mxu1 %v7402_v53  ;;  %v4667_v53 = vrot.slane %v10159_v13, %v11093_v15 }
 0xae2   :  { %7039 = vmatprep.subr.bf16.mxu1 %v10901_v21 }
 0xae3   :  { %7056 = vmatpush3.bf16.msra.mxu0 %v7409_v6  ;;  %v10210_v6 = vrot.slane %v4255_v2, %v11095_v38 }
 0xae4   :  { %7057 = vmatprep.subr.bf16.mxu0 %v10901_v21 }
 0xae5   :  { %7040 = vmatpush3.bf16.msra.mxu1 %v7404_v37  ;;  %v4680_v37 = vrot.slane %v10159_v13, %v11094_v19 }
 0xae6   :  { %7041 = vmatprep.subr.bf16.mxu1 %v10901_v21 }
 0xae7   :  { %7058 = vmatpush3.bf16.msra.mxu0 %v7411_v63  ;;  %v10221_v63 = vrot.slane %v10155_v33, %v11089_v20 }
 0xae8   :  { %7059 = vmatprep.subr.bf16.mxu0 %v10901_v21 }
 0xae9   :  { %7042 = vmatpush3.bf16.msra.mxu1 %v7406_v54  ;;  %v4778_v54 = vrot.slane %v10170_v46, %v11088_v14 }
 0xaea   :  { %7067 = vmatprep.subr.bf16.mxu1 %v10901_v21 }
 0xaeb   :  { %7060 = vmatpush3.bf16.msra.mxu0 %v7413_v34  ;;  %v4564_v34 = vrot.slane %v10153_v22, %v11094_v19 }
 0xaec   :  { %7061 = vmatprep.subr.bf16.mxu0 %v10901_v21 }
 0xaef   :  { %7062 = vmatpush3.bf16.msra.mxu0 %v7415_v40 }
 0xaf0   :  { %7087 = vmatprep.subr.bf16.mxu0 %v10901_v21 }
 0xb0e   :  { %v3530_v8 = vpop.f32.mrf.mxu0 }
 0xb10   :  { %v6865_v1 = vpop.f32.mrf.mxu0 }
 0xb11   :  { %v4512_v1 = vrot.slane %v10155_v33, %v11093_v15 }
 0xb12   :  { %v3533_v25 = vpop.f32.mrf.mxu0 }
 0xb13   :  { %v4519_v25 = vrot.slane %v10153_v22, %v11091_v62 }
 0xb14   :  { %v6866_v10 = vpop.f32.mrf.mxu0 }
 0xb15   :  { %v4534_v10 = vrot.slane %v10153_v22, %v11092_v60 }
 0xb2c   :  { %v3618_v31 = vpop.f32.mrf.mxu1 }
 0xb2d   :  { %v3619_v57 = vadd.f32 %v3618_v31, %v3530_v8  ;;  %v10175_v8 = vrot.slane %v4255_v2, %v11092_v60  ;;  %v4784_v31 = vrot.slane %v10172_v51, %v11095_v38 }
 0xb2e   :  { %v6885_v44 = vpop.f32.mrf.mxu1 }
 0xb2f   :  { %v10213_v44 = vrot.slane %v4255_v2, %v9574_v5 }
 0xb30   :  { %v3621_v18 = vpop.f32.mrf.mxu1 }
 0xb31   :  { %v3707_v52 = vpop.f32.mrf.mxu0  ;;  %v10217_v18 = vrot.slane %v10155_v33, %v11088_v14 }
 0xb32   :  { %v6886_v30 = vpop.f32.mrf.mxu1  ;;  %v3713_v56 = vadd.f32 %v3707_v52, %v3619_v57  ;;  %v10207_v57 = vrot.slane %v4255_v2, %v11094_v19 }
 0xb33   :  { %v6905_v27 = vpop.f32.mrf.mxu0  ;;  %v10225_v30 = vrot.slane %v10155_v33, %v11091_v62 }
 0xb34   :  { %v4687_v27 = vrot.slane %v10200_v26, %v11088_v14 }
 0xb35   :  { %v3710_v61 = vpop.f32.mrf.mxu0 }
 0xb36   :  { %v10235_v61 = vrot.slane %v10155_v33, %v11092_v60 }
 0xb37   :  { %v6906_v11 = vpop.f32.mrf.mxu0 }
 0xb38   :  { %v4693_v11 = vrot.slane %v10159_v13, %v11095_v38 }
 0xb4c   :  { %v3797_v48 = vpop.f32.mrf.mxu1 }
 0xb4d   :  { %v3803_v17 = vadd.f32 %v3797_v48, %v3713_v56  ;;  %v4557_v56 = vrot.slane %v10155_v33, %v9574_v5  ;;  %v4791_v48 = vrot.slane %v10170_v46, %v11089_v20 }
 0xb4e   :  { %v6925_v23 = vpop.f32.mrf.mxu1 }
 0xb50   :  { %v3800_v3 = vpop.f32.mrf.mxu1 }
 0xb51   :  { %v3887_v43 = vpop.f32.mrf.mxu0  ;;  %v10243_v3 = vld [vmem:[#allocation11 + $0x88] sm:$0xff] }
 0xb52   :  { %v6926_v50 = vpop.f32.mrf.mxu1  ;;  %v3893_v40 = vadd.f32 %v3887_v43, %v3803_v17 }
 0xb53   :  { %v6945_v12 = vpop.f32.mrf.mxu0 }
 0xb55   :  { %v3890_v7 = vpop.f32.mrf.mxu0 }
 0xb57   :  { %v6946_v32 = vpop.f32.mrf.mxu0 }
 0xb6c   :  { %v3977_v16 = vpop.f32.mrf.mxu1 }
 0xb6d   :  { %v3983_v32 = vadd.f32 %v3977_v16, %v3893_v40 }
 0xb6e   :  { %v6965_v29 = vpop.f32.mrf.mxu1 }
 0xb70   :  { %v3980_v4 = vpop.f32.mrf.mxu1 }
 0xb71   :  { %v4067_v45 = vpop.f32.mrf.mxu0 }
 0xb72   :  { %v6966_v42 = vpop.f32.mrf.mxu1  ;;  %v4073_v40 = vadd.f32 %v4067_v45, %v3983_v32 }
 0xb73   :  { %v6985_v41 = vpop.f32.mrf.mxu0 }
 0xb75   :  { %v4070_v24 = vpop.f32.mrf.mxu0 }
 0xb77   :  { %v6986_v47 = vpop.f32.mrf.mxu0 }
 0xb8c   :  { %v4157_v52 = vpop.f32.mrf.mxu1 }
 0xb8d   :  { %v4163_v32 = vadd.f32 %v4157_v52, %v4073_v40 }
 0xb8e   :  { %v7005_v50 = vpop.f32.mrf.mxu1 }
 0xb90   :  { %v4160_v41 = vpop.f32.mrf.mxu1 }
 0xb91   :  { %v4247_v4 = vpop.f32.mrf.mxu0 }
 0xb92   :  { %v7006_v24 = vpop.f32.mrf.mxu1  ;;  %v10295_v40 = vadd.f32 %v4247_v4, %v4163_v32 }
 0xb93   :  { %v7025_v50 = vpop.f32.mrf.mxu0 }
 0xb94   :  { %vm4420_vm5 = vcmp.ge.f32.partialorder %v10295_v40, %v10162_v9  ;;  %vm4425_vm6 = vcmp.lt.f32.partialorder %v10295_v40, %v10165_v55  ;;  %vm4428_vm7 = vcmp.ge.f32.partialorder %v10295_v40, %v10165_v55  ;;  %vm4433_vm8 = vcmp.lt.f32.partialorder %v10295_v40, %v10168_v35 }
 0xb95   :  { %v4250_v50 = vpop.f32.mrf.mxu0  ;;  %vm4426_vm9 = vmand %vm4420_vm5, %vm4425_vm6  ;;  %vm4436_vm10 = vcmp.ge.f32.partialorder %v10295_v40, %v10168_v35  ;;  %vm4441_vm11 = vcmp.lt.f32.partialorder %v10295_v40, %v10175_v8  ;;  %vm4444_vm12 = vcmp.ge.f32.partialorder %v10295_v40, %v10175_v8  ;;  %vm4449_vm13 = vcmp.lt.f32.partialorder %v10295_v40, %v10178_v59 }
 0xb96   :  { %v4427_v32 = vsel %vm4426_vm9, 1.0, %v10901_v21  ;;  %vm4434_vm14 = vmand %vm4428_vm7, %vm4433_vm8  ;;  %v4508_v4 = vsub.f32 %v10295_v40, %v10162_v9  ;;  %v4515_v50 = vsub.f32 %v10168_v35, %v10295_v40  ;;  %v4523_v45 = vsub.f32 %v10295_v40, %v10165_v55 }
 0xb97   :  { %v7026_v2 = vpop.f32.mrf.mxu0  ;;  %v4435_v41 = vsel %vm4434_vm14, 1.0, %v10901_v21  ;;  %vm4442_vm15 = vmand %vm4436_vm10, %vm4441_vm11  ;;  %v4530_v16 = vsub.f32 %v10175_v8, %v10295_v40  ;;  %v10339_v24 = vsub.f32 %v10295_v40, %v10168_v35  ;;  %v4545_v9 = vsub.f32 %v10178_v59, %v10295_v40 }
 0xb98   :  { %v4443_v52 = vsel %vm4442_vm15, 1.0, %v10901_v21  ;;  %vm4450_vm0 = vmand %vm4444_vm12, %vm4449_vm13  ;;  %v4513_v55 = vmul.f32 %v4512_v1, %v4508_v4  ;;  %v4520_v2 = vmul.f32 %v4519_v25, %v4515_v50  ;;  %v4528_v23 = vmul.f32 %v4527_v49, %v4523_v45 }
 0xb99   :  { %v4451_v35 = vsel %vm4450_vm0, 1.0, %v10901_v21  ;;  %v4535_v47 = vmul.f32 %v4534_v10, %v4530_v16  ;;  %v4543_v29 = vmul.f32 %v4542_v39, %v10339_v24  ;;  %v4550_v1 = vmul.f32 %v4549_v36, %v4545_v9 }
 0xb9a   :  { %v4514_v25 = vmul.f32 %v4513_v55, %v4427_v32  ;;  %v4521_v50 = vmul.f32 %v4520_v2, %v4435_v41  ;;  %v4529_v42 = vmul.f32 %v4528_v23, %v4435_v41  ;;  %v4765_v49 = vrot.slane %v10200_v26, %v11095_v38 }
 0xb9b   :  { %v4536_v43 = vmul.f32 %v4535_v47, %v4443_v52  ;;  %v4544_v17 = vmul.f32 %v4543_v29, %v4443_v52  ;;  %v4551_v7 = vmul.f32 %v4550_v1, %v4451_v35  ;;  %v4771_v10 = vrot.slane %v10172_v51, %v11093_v15 }
 0xb9c   :  { %v4522_v12 = vadd.f32 %v4521_v50, %v4514_v25  ;;  %v4662_v39 = vmul.f32 %v4661_v58, %v4508_v4  ;;  %v4668_v36 = vmul.f32 %v4667_v53, %v4530_v16  ;;  %v4675_v23 = vmul.f32 %v4674_v0, %v4523_v45 }
 0xb9d   :  { %v4537_v41 = vadd.f32 %v4536_v43, %v4529_v42  ;;  %v4552_v47 = vadd.f32 %v4551_v7, %v4544_v17  ;;  %v4681_v29 = vmul.f32 %v4680_v37, %v4545_v9  ;;  %v5900_v52 = vmul.f32 -1.442695, %v10295_v40 }
 0xb9e   :  { %v4663_v32 = vmul.f32 %v4662_v39, %v4522_v12  ;;  %vm4452_vm2 = vcmp.ge.f32.partialorder %v10295_v40, %v10178_v59  ;;  %vm4457_vm3 = vcmp.lt.f32.partialorder %v10295_v40, %v10207_v57  ;;  %v4553_v58 = vsub.f32 %v10295_v40, %v10175_v8 }
 0xb9f   :  { %v4669_v53 = vmul.f32 %v4668_v36, %v4537_v41  ;;  %v4676_v0 = vmul.f32 %v4675_v23, %v4537_v41  ;;  %v4682_v43 = vmul.f32 %v4681_v29, %v4552_v47  ;;  %7632 = vpow2.f32 %v5900_v52  ;;  %vm4458_vm4 = vmand %vm4452_vm2, %vm4457_vm3 }
 0xba0   :  { %v4779_v37 = vmul.f32 %v4778_v54, %v4508_v4  ;;  %v4558_v12 = vmul.f32 %v4557_v56, %v4553_v58  ;;  %v4560_v7 = vsub.f32 %v10207_v57, %v10295_v40  ;;  %v4869_v17 = vrot.slane %v10170_v46, %v9574_v5 }
 0xba1   :  { %v4670_v8 = vadd.f32 %v4669_v53, %v4663_v32  ;;  %v4683_v42 = vadd.f32 %v4682_v43, %v4676_v0  ;;  %v4785_v16 = vmul.f32 %v4784_v31, %v4545_v9  ;;  %v4459_v55 = vsel %vm4458_vm4, 1.0, %v10901_v21 }
 0xba2   :  { %v4559_v2 = vmul.f32 %v4558_v12, %v4451_v35  ;;  %v4565_v33 = vmul.f32 %v4564_v34, %v4560_v7  ;;  %vm4460_vm5 = vcmp.ge.f32.partialorder %v10295_v40, %v10207_v57  ;;  %v4875_v54 = vrot.slane %v10243_v3, %v11094_v19 }
 0xba3   :  { %v4780_v56 = vmul.f32 %v4779_v37, %v4670_v8  ;;  %v4786_v4 = vmul.f32 %v4785_v16, %v4683_v42  ;;  %v4688_v31 = vmul.f32 %v4687_v27, %v10339_v24  ;;  %v4792_v9 = vmul.f32 %v4791_v48, %v4523_v45  ;;  %v7408_v45 = vld [vmem:[#allocation12 + $0x2f8] sm:$0xff]  }
 0xba4   :  { %v4566_v35 = vmul.f32 %v4565_v33, %v4459_v55  ;;  %vm4465_vm6 = vcmp.lt.f32.partialorder %v10295_v40, %v10210_v6  ;;  %v10419_v34 = vsub.f32 %v10295_v40, %v10178_v59  ;;  %v4575_v1 = vsub.f32 %v10210_v6, %v10295_v40 }
 0xba5   :  { %v4787_v25 = vadd.f32 %v4786_v4, %v4780_v56  ;;  %v4689_v50 = vmul.f32 %v4688_v31, %v4552_v47  ;;  %v4694_v27 = vmul.f32 %v4693_v11, %v4560_v7  ;;  %vm4466_vm7 = vmand %vm4460_vm5, %vm4465_vm6  ;;  %v10428_v48 = vsub.f32 %v10295_v40, %v10207_v57  ;;  %v7410_v31 = vld [vmem:[#allocation12 + $0x2f0] sm:$0xff]  }
 0xba6   :  { %v4567_v39 = vadd.f32 %v4566_v35, %v4559_v2  ;;  %v4467_v36 = vsel %vm4466_vm7, 1.0, %v10901_v21  ;;  %v11121_v59 = vrot.slane %v10157_v28, %v11088_v14  ;;  %v11122_v41 = vrot.slane %v10153_v22, %v11095_v38 }
 0xba7   :  { %v4880_v29 = vpack.c.bf16 %v4787_v25, %v4787_v25  ;;  %v11123_v11 = vrot.slane %v10157_v28, %v11089_v20  ;;  %v11124_v52 = vrot.slane %v10200_v26, %v11089_v20  ;;  %v11125_v53 = vrot.slane %v10170_v46, %v11091_v62 }
 0xba8   :  { %v4573_v23 = vmul.f32 %v11121_v59, %v10419_v34  ;;  %v4580_v47 = vmul.f32 %v11122_v41, %v4575_v1  ;;  %v4695_v43 = vmul.f32 %v4694_v27, %v4567_v39  ;;  %v11126_v8 = vrot.slane %v10159_v13, %v9574_v5 }
 0xba9   :  { %v4588_v57 = vmul.f32 %v11123_v11, %v10428_v48  ;;  %v4701_v32 = vmul.f32 %v11124_v52, %v4553_v58  ;;  %v4805_v0 = vmul.f32 %v11125_v53, %v10339_v24  ;;  %7044 = vmatmul.mubr.bf16.vlgmr.msra.gmra.mxu1 %v4880_v29  ;;  %v11127_v56 = vrot.slane %v10170_v46, %v11092_v60  ;;  %v7412_v29 = vld [vmem:[#allocation12 + $0x2e8] sm:$0xff]  }
 0xbaa   :  { %v4574_v37 = vmul.f32 %v4573_v23, %v4459_v55  ;;  %v4581_v12 = vmul.f32 %v4580_v47, %v4467_v36  ;;  %v4707_v16 = vmul.f32 %v11126_v8, %v4575_v1  ;;  %vm4468_vm8 = vcmp.ge.f32.partialorder %v10295_v40, %v10210_v6  ;;  %7068 = vmatpush3.bf16.msra.mxu1 %v7408_v45 }
 0xbab   :  { %v4589_v2 = vmul.f32 %v4588_v57, %v4467_v36  ;;  %v4702_v33 = vmul.f32 %v4701_v32, %v4567_v39  ;;  %v4818_v4 = vmul.f32 %v11127_v56, %v4553_v58  ;;  %7083 = vmatprep.mubr.msk.bf16.mxu1 %vm7972_vm1, %v10901_v21  ;;  %v4696_v24 = vadd.f32 %v4695_v43, %v4689_v50 }
 0xbac   :  { %v4582_v55 = vadd.f32 %v4581_v12, %v4574_v37  ;;  %vm4473_vm9 = vcmp.lt.f32.partialorder %v10295_v40, %v10213_v44  ;;  %7069 = vmatprep.subr.bf16.mxu1 %v10901_v21  ;;  %v4590_v35 = vsub.f32 %v10213_v44, %v10295_v40  ;;  %vm4476_vm11 = vcmp.ge.f32.partialorder %v10295_v40, %v10213_v44  ;;  %v7633_v25 = vpop.eup %7632 }
 0xbad   :  { %vm4474_vm10 = vmand %vm4468_vm8, %vm4473_vm9  ;;  %vm4481_vm12 = vcmp.lt.f32.partialorder %v10295_v40, %v10217_v18  ;;  %v10470_v58 = vsub.f32 %v10295_v40, %v10210_v6  ;;  %v4793_v50 = vmul.f32 %v4792_v9, %v4683_v42  ;;  %v11128_v45 = vrot.slane %v10200_v26, %v11091_v62 }
 0xbae   :  { %v4708_v27 = vmul.f32 %v4707_v16, %v4582_v55  ;;  %v4806_v36 = vmul.f32 %v4805_v0, %v4696_v24  ;;  %vm10476_vm13 = vmand %vm4476_vm11, %vm4481_vm12  ;;  %v4412_v23 = vadd.f32 1.0, %v7633_v25  ;;  %v11131_v41 = vrot.slane %v10172_v51, %v9574_v5  ;;  %7070 = vmatpush3.bf16.msra.mxu1 %v7410_v31 }
 0xbaf   :  { %v4714_v39 = vmul.f32 %v11128_v45, %v10419_v34  ;;  %v4475_v6 = vsel %vm4474_vm10, 1.0, %v10901_v21  ;;  %v11132_v42 = vrot.slane %v10153_v22, %v9574_v5  ;;  %v11133_v52 = vrot.slane %v10243_v3, %v11088_v14  ;;  %7071 = vmatprep.subr.bf16.mxu1 %v10901_v21 }
 0xbb0   :  { %v4798_v47 = vmul.f32 %v11131_v41, %v4560_v7  ;;  %v4709_v11 = vadd.f32 %v4708_v27, %v4702_v33  ;;  %v11134_v53 = vrot.slane %v10172_v51, %v11088_v14  ;;  %7634 = vrcp.f32 %v4412_v23 }
 0xbb1   :  { %v4595_v9 = vmul.f32 %v11132_v42, %v4590_v35  ;;  %v4715_v57 = vmul.f32 %v4714_v39, %v4582_v55  ;;  %v4811_v32 = vmul.f32 %v11133_v52, %v4575_v1  ;;  %v11135_v22 = vrot.slane %v10157_v28, %v11091_v62 }
 0xbb2   :  { %v4720_v0 = vmul.f32 %v11134_v53, %v4590_v35  ;;  %v4605_v37 = vsub.f32 %v10217_v18, %v10295_v40  ;;  %v4819_v8 = vmul.f32 %v4818_v4, %v4709_v11  ;;  %v4483_v1 = vsel %vm10476_vm13, 1.0, %v10901_v21  ;;  %7072 = vmatpush3.bf16.msra.mxu1 %v7412_v29  ;;  %v7414_v4 = vld [vmem:[#allocation12 + $0x2e0] sm:$0xff]  }
 0xbb3   :  { %v4596_v7 = vmul.f32 %v4595_v9, %v4475_v6  ;;  %v4603_v43 = vmul.f32 %v11135_v22, %v10470_v58  ;;  %v4812_v12 = vmul.f32 %v4811_v32, %v4709_v11  ;;  %v10505_v16 = vsub.f32 %v10295_v40, %v10213_v44  ;;  %7073 = vmatprep.subr.bf16.mxu1 %v10901_v21 }
 0xbb4   :  { %v11136_v31 = vrot.slane %v10159_v13, %v11088_v14  ;;  %v11137_v25 = vrot.slane %v10200_v26, %v11092_v60  ;;  %v11138_v44 = vrot.slane %v10157_v28, %v11092_v60  ;;  %v11140_v14 = vrot.slane %v10200_v26, %v11093_v15 }
 0xbb5   :  { %v4597_v33 = vadd.f32 %v4596_v7, %v4589_v2  ;;  %v4604_v56 = vmul.f32 %v4603_v43, %v4475_v6  ;;  %v10514_v45 = vadd.f32 %v4812_v12, %v4806_v36  ;;  %v11139_v2 = vrot.slane %v10172_v51, %v11089_v20 }
 0xbb6   :  { %v4610_v55 = vmul.f32 %v11136_v31, %v4605_v37  ;;  %v4727_v27 = vmul.f32 %v11137_v25, %v10428_v48  ;;  %v4618_v39 = vmul.f32 %v11138_v44, %v10505_v16  ;;  %v4740_v23 = vmul.f32 %v11140_v14, %v10470_v58  ;;  %7074 = vmatpush3.bf16.msra.mxu1 %v7414_v4 }
 0xbb7   :  { %v4733_v59 = vmul.f32 %v11139_v2, %v4605_v37  ;;  %v4721_v41 = vmul.f32 %v4720_v0, %v4597_v33  ;;  %v11141_v42 = vrot.slane %v10170_v46, %v11093_v15  ;;  %v4799_v29 = vmul.f32 %v4798_v47, %v4696_v24  ;;  %7075 = vmatprep.subr.bf16.mxu1 %v10901_v21  ;;  %v7418_v2 = vld [vmem:[#allocation12 + $0x2d0] sm:$0xff]  }
 0xbb8   :  { %v4611_v6 = vmul.f32 %v4610_v55, %v4483_v1  ;;  %v4728_v36 = vmul.f32 %v4727_v27, %v4597_v33  ;;  %v11142_v11 = vrot.slane %v10243_v3, %v11089_v20  ;;  %v4619_v32 = vmul.f32 %v4618_v39, %v4483_v1 }
 0xbb9   :  { %v4831_v9 = vmul.f32 %v11141_v42, %v10419_v34  ;;  %v11143_v53 = vrot.slane %v10170_v46, %v11094_v19  ;;  %v4722_v22 = vadd.f32 %v4721_v41, %v4715_v57  ;;  %vm4484_vm14 = vcmp.ge.f32.partialorder %v10295_v40, %v10217_v18  ;;  %v7416_v34 = vld [vmem:[#allocation12 + $0x2d8] sm:$0xff]  }
 0xbba   :  { %v4824_v52 = vmul.f32 %v11142_v11, %v4590_v35  ;;  %v4612_v0 = vadd.f32 %v4611_v6, %v4604_v56  ;;  %vm4489_vm15 = vcmp.lt.f32.partialorder %v10295_v40, %v10221_v63  ;;  %v4620_v24 = vsub.f32 %v10221_v63, %v10295_v40  ;;  %7076 = vmatpush3.bf16.msra.mxu1 %v7416_v34 }
 0xbbb   :  { %v4844_v7 = vmul.f32 %v11143_v53, %v10428_v48  ;;  %vm4490_vm0 = vmand %vm4484_vm14, %vm4489_vm15  ;;  %vm4492_vm2 = vcmp.ge.f32.partialorder %v10295_v40, %v10221_v63  ;;  %vm4497_vm3 = vcmp.lt.f32.partialorder %v10295_v40, %v10225_v30  ;;  %v4628_v48 = vsub.f32 %v10295_v40, %v10217_v18  ;;  %7077 = vmatprep.subr.bf16.mxu1 %v10901_v21 }
 0xbbc   :  { %v4825_v35 = vmul.f32 %v4824_v52, %v4722_v22  ;;  %v4734_v47 = vmul.f32 %v4733_v59, %v4612_v0  ;;  %v4741_v57 = vmul.f32 %v4740_v23, %v4612_v0  ;;  %v4832_v43 = vmul.f32 %v4831_v9, %v4722_v22  ;;  %vm10552_vm4 = vmand %vm4492_vm2, %vm4497_vm3 }
 0xbbd   :  { %v10556_v1 = vadd.f32 %v4799_v29, %v4793_v50  ;;  %v4491_v33 = vsel %vm4490_vm0, 1.0, %v10901_v21  ;;  %v11146_v56 = vrot.slane %v10159_v13, %v11089_v20  ;;  %v11147_v18 = vrot.slane %v10172_v51, %v11091_v62  ;;  %v7635_v9 = vpop.eup %7634 }
 0xbbe   :  { %v10565_v25 = vadd.f32 %v4825_v35, %v4819_v8  ;;  %v4735_v27 = vadd.f32 %v4734_v47, %v4728_v36  ;;  %v11148_v4 = vrot.slane %v10243_v3, %v11091_v62  ;;  %v11149_v50 = vrot.slane %v10157_v28, %v11093_v15  ;;  %7078 = vmatpush3.bf16.msra.mxu1 %v7418_v2 }
 0xbbf   :  { %v4625_v31 = vmul.f32 %v11146_v56, %v4620_v24  ;;  %v4746_v55 = vmul.f32 %v11147_v18, %v4620_v24  ;;  %v4635_v20 = vsub.f32 %v10225_v30, %v10295_v40  ;;  %v11150_v8 = vrot.slane %v10200_v26, %v11094_v19  ;;  %7079 = vmatprep.subr.bf16.mxu1 %v10901_v21  ;;  %v7422_v26 = vld [vmem:[#allocation12 + $0x2c0] sm:$0xff]  }
 0xbc0   :  { %v4837_v44 = vmul.f32 %v11148_v4, %v4605_v37  ;;  %v4633_v39 = vmul.f32 %v11149_v50, %v4628_v48  ;;  %v11151_v23 = vrot.slane %v10170_v46, %v11095_v38  ;;  %v4845_v6 = vmul.f32 %v4844_v7, %v4735_v27  ;;  %v7419_v38 = vld [vmem:[#allocation12 + $0x330] sm:$0xff]  }
 0xbc1   :  { %v4626_v59 = vmul.f32 %v4625_v31, %v4491_v33  ;;  %v4753_v14 = vmul.f32 %v11150_v8, %v10505_v16  ;;  %v4499_v36 = vsel %vm10552_vm4, 1.0, %v10901_v21  ;;  %v11152_v11 = vrot.slane %v10159_v13, %v11091_v62  ;;  %v7417_v62 = vld [vmem:[#allocation12 + $0x338] sm:$0xff]  }
 0xbc2   :  { %v4857_v37 = vmul.f32 %v11151_v23, %v10470_v58  ;;  %v4838_v41 = vmul.f32 %v4837_v44, %v4735_v27  ;;  %v4634_v42 = vmul.f32 %v4633_v39, %v4491_v33  ;;  %v11153_v53 = vrot.slane %v10172_v51, %v11092_v60  ;;  %v7428_v23 = vld [vmem:[#allocation12 + $0x368] sm:$0xff]  }
 0xbc3   :  { %v4627_v29 = vadd.f32 %v4626_v59, %v4619_v32  ;;  %v4640_v52 = vmul.f32 %v11152_v11, %v4635_v20  ;;  %v11154_v58 = vrot.slane %v10243_v3, %v11093_v15  ;;  %v4415_v7 = vmul.f32 %v7635_v9, %v10295_v40  ;;  %v7420_v32 = vld [vmem:[#allocation12 + $0x2c8] sm:$0xff]   ;;  %v7423_v59 = vld [vmem:[#allocation12 + $0x320] sm:$0xff]   ;;  %v7434_v9 = vld [vmem:[#allocation12 + $0x350] sm:$0xff]  }
 0xbc4   :  { %v4759_v22 = vmul.f32 %v11153_v53, %v4635_v20  ;;  %v10597_v34 = vadd.f32 %v4838_v41, %v4832_v43  ;;  %vm4500_vm5 = vcmp.ge.f32.partialorder %v10295_v40, %v10225_v30  ;;  %vm4505_vm6 = vcmp.lt.f32.partialorder %v10295_v40, %v10235_v61  ;;  %7080 = vmatpush3.bf16.msra.mxu1 %v7420_v32  ;;  %v7430_v41 = vld [vmem:[#allocation12 + $0x360] sm:$0xff]   ;;  %v7436_v11 = vld [vmem:[#allocation12 + $0x348] sm:$0xff]   ;;  %v7435_v53 = vld [vmem:[#allocation12 + $0x3b0] sm:$0xff]  }
 0xbc5   :  { %v4863_v0 = vmul.f32 %v11154_v58, %v4635_v20  ;;  %v4747_v35 = vmul.f32 %v4746_v55, %v4627_v29  ;;  %v4641_v47 = vmul.f32 %v4640_v52, %v4499_v36  ;;  %v4754_v12 = vmul.f32 %v4753_v14, %v4627_v29  ;;  %vm4506_vm7 = vmand %vm4500_vm5, %vm4505_vm6  ;;  %7081 = vmatprep.subr.bf16.mxu1 %v10901_v21  ;;  %v7426_v20 = vld [vmem:[#allocation12 + $0x370] sm:$0xff]   ;;  %v7425_v14 = vld [vmem:[#allocation12 + $0x318] sm:$0xff]  }
 0xbc6   :  { %v4643_v33 = vsub.f32 %v10295_v40, %v10221_v63  ;;  %v4879_v56 = vpack.c.bf16 %v4415_v7, %v4415_v7  ;;  %v11155_v43 = vrot.slane %v10243_v3, %v11092_v60  ;;  %v4507_v31 = vsel %vm4506_vm7, 1.0, %v10901_v21  ;;  %v7421_v3 = vld [vmem:[#allocation12 + $0x328] sm:$0xff]   ;;  %v7433_v29 = vld [vmem:[#allocation12 + $0x3b8] sm:$0xff]   ;;  %v7439_v7 = vld [vmem:[#allocation12 + $0x3a0] sm:$0xff]  }
 0xbc7   :  { %v4650_v18 = vsub.f32 %v10235_v61, %v10295_v40  ;;  %v4748_v27 = vadd.f32 %v4747_v35, %v4741_v57  ;;  %v4642_v55 = vadd.f32 %v4641_v47, %v4634_v42  ;;  %v11156_v4 = vrot.slane %v10157_v28, %v11094_v19  ;;  %v7431_v42 = vld [vmem:[#allocation12 + $0x300] sm:$0xff]   ;;  %v7437_v58 = vld [vmem:[#allocation12 + $0x3a8] sm:$0xff]   ;;  %v7441_v32 = vld [vmem:[#allocation12 + $0x398] sm:$0xff]  }
 0xbc8   :  { %v4850_v30 = vmul.f32 %v11155_v43, %v4620_v24  ;;  %v4766_v63 = vmul.f32 %v4765_v49, %v4628_v48  ;;  %7064 = vmatmul.mubr.bf16.vlgmr.msra.gmra.mxu0 %v4879_v56  ;;  %v11157_v50 = vrot.slane %v10159_v13, %v11092_v60  ;;  %v4870_v61 = vmul.f32 %v4869_v17, %v10505_v16  ;;  %v7444_v35 = vld [vmem:[#allocation12 + $0x3e8] sm:$0xff]   ;;  %v7446_v47 = vld [vmem:[#allocation12 + $0x3e0] sm:$0xff]   ;;  %v7450_v43 = vld [vmem:[#allocation12 + $0x3d0] sm:$0xff]  }
 0xbc9   :  { %v4648_v44 = vmul.f32 %v11156_v4, %v4643_v33  ;;  %v4772_v39 = vmul.f32 %v4771_v10, %v4650_v18  ;;  %v4876_v28 = vmul.f32 %v4875_v54, %v4650_v18  ;;  %7088 = vmatpush3.bf16.msra.mxu0 %v7417_v62  ;;  %v4760_v60 = vmul.f32 %v4759_v22, %v4642_v55  ;;  %v7424_v10 = vld [vmem:[#allocation12 + $0x378] sm:$0xff]   ;;  %v7438_v22 = vld [vmem:[#allocation12 + $0x340] sm:$0xff]   ;;  %v7442_v62 = vld [vmem:[#allocation12 + $0x3f0] sm:$0xff]  }
 0xbca   :  { %v4655_v24 = vmul.f32 %v11157_v50, %v4650_v18  ;;  %v4851_v40 = vmul.f32 %v4850_v30, %v4748_v27  ;;  %v4858_v13 = vmul.f32 %v4857_v37, %v4748_v27  ;;  %7089 = vmatprep.subr.bf16.mxu0 %v10901_v21  ;;  %v4767_v49 = vmul.f32 %v4766_v63, %v4642_v55  ;;  %v7427_v37 = vld [vmem:[#allocation12 + $0x310] sm:$0xff]   ;;  %v7448_v33 = vld [vmem:[#allocation12 + $0x3d8] sm:$0xff]   ;;  %v7447_v56 = vld [vmem:[#allocation12 + $0x380] sm:$0xff]  }
 0xbcb   :  { %v4649_v15 = vmul.f32 %v4648_v44, %v4499_v36  ;;  %7103 = vmatprep.mubr.msk.bf16.mxu0 %vm7972_vm1, %v10901_v21  ;;  %v4761_v19 = vadd.f32 %v4760_v60, %v4754_v12  ;;  %7082 = vmatpush3.bf16.msra.mxu1 %v7422_v26  ;;  %v5057_v16 = vpack.c.bf16 %v10556_v1, %v10556_v1  ;;  %v7432_v36 = vld [vmem:[#allocation12 + $0x358] sm:$0xff]   ;;  %v7445_v12 = vld [vmem:[#allocation12 + $0x388] sm:$0xff]   ;;  %v7451_v27 = vld [vmem:[#allocation12 + $0x430] sm:$0xff]  }
 0xbcc   :  { %v4656_v51 = vmul.f32 %v4655_v24, %v4507_v31  ;;  %v10635_v5 = vadd.f32 %v4851_v40, %v4845_v6  ;;  %7107 = vmatprep.subr.bf16.mxu1 %v10901_v21  ;;  %v7429_v6 = vld [vmem:[#allocation12 + $0x308] sm:$0xff]   ;;  %v5147_v52 = vpack.c.bf16 %v10514_v45, %v10514_v45  ;;  %v7440_v45 = vld [vmem:[#allocation12 + $0x3f8] sm:$0xff]   ;;  %v5327_v18 = vpack.c.bf16 %v10597_v34, %v10597_v34  ;;  %v7454_v55 = vld [vmem:[#allocation12 + $0x3c0] sm:$0xff]  }
 0xbcd   :  { %7090 = vmatpush3.bf16.msra.mxu0 %v7419_v38  ;;  %v4864_v17 = vmul.f32 %v4863_v0, %v4761_v19  ;;  %v4871_v54 = vmul.f32 %v4870_v61, %v4761_v19  ;;  %v5237_v0 = vpack.c.bf16 %v10565_v25, %v10565_v25  ;;  %v7443_v25 = vld [vmem:[#allocation12 + $0x390] sm:$0xff]   ;;  %v7449_v30 = vld [vmem:[#allocation12 + $0x438] sm:$0xff]   ;;  %v7452_v31 = vld [vmem:[#allocation12 + $0x3c8] sm:$0xff]  }
 0xbce   :  { %v4657_v46 = vadd.f32 %v4656_v51, %v4649_v15  ;;  %7091 = vmatprep.subr.bf16.mxu0 %v10901_v21  ;;  %7084 = vmatmul.mubr.bf16.vlgmr.msra.gmra.mxu1 %v5057_v16  ;;  %v7453_v4 = vld [vmem:[#allocation12 + $0x428] sm:$0xff]   ;;  %v7456_v34 = vld [vmem:[#allocation12 + $0x478] sm:$0xff]   ;;  %v5417_v44 = vpack.c.bf16 %v10635_v5, %v10635_v5  ;;  %v7455_v63 = vld [vmem:[#allocation12 + $0x420] sm:$0xff]  }
 0xbcf   :  { %v10641_v57 = vadd.f32 %v4864_v17, %v4858_v13  ;;  %7108 = vmatpush3.bf16.msra.mxu1 %v7424_v10  ;;  %7123 = vmatprep.mubr.msk.bf16.mxu1 %vm7972_vm1, %v10901_v21  ;;  %v7458_v50 = vld [vmem:[#allocation12 + $0x470] sm:$0xff]   ;;  %v7457_v24 = vld [vmem:[#allocation12 + $0x418] sm:$0xff]   ;;  %v7461_v38 = vld [vmem:[#allocation12 + $0x408] sm:$0xff]  }
 0xbd0   :  { %v4773_v48 = vmul.f32 %v4772_v39, %v4657_v46  ;;  %7109 = vmatprep.subr.bf16.mxu1 %v10901_v21  ;;  %v7460_v39 = vld [vmem:[#allocation12 + $0x468] sm:$0xff]   ;;  %v7459_v61 = vld [vmem:[#allocation12 + $0x410] sm:$0xff]   ;;  %v7464_v26 = vld [vmem:[#allocation12 + $0x458] sm:$0xff]  }
 0xbd1   :  { %7092 = vmatpush3.bf16.msra.mxu0 %v7421_v3  ;;  %v7463_v40 = vld [vmem:[#allocation12 + $0x400] sm:$0xff]   ;;  %v7465_v60 = vld [vmem:[#allocation12 + $0x450] sm:$0xff]   ;;  %v7466_v13 = vld [vmem:[#allocation12 + $0x448] sm:$0xff]   ;;  %v5507_v15 = vpack.c.bf16 %v10641_v57, %v10641_v57 }
 0xbd2   :  { %v4774_v2 = vadd.f32 %v4773_v48, %v4767_v49  ;;  %7093 = vmatprep.subr.bf16.mxu0 %v10901_v21  ;;  %v7467_v51 = vld [vmem:[#allocation12 + $0x440] sm:$0xff]  }
 0xbd3   :  { %7110 = vmatpush3.bf16.msra.mxu1 %v7426_v20 }
 0xbd4   :  { %v4877_v8 = vmul.f32 %v4876_v28, %v4774_v2  ;;  %7111 = vmatprep.subr.bf16.mxu1 %v10901_v21  ;;  %v7462_v28 = vld [vmem:[#allocation12 + $0x460] sm:$0xff]  }
 0xbd5   :  { %7094 = vmatpush3.bf16.msra.mxu0 %v7423_v59 }
 0xbd6   :  { %v10647_v1 = vadd.f32 %v4877_v8, %v4871_v54  ;;  %7095 = vmatprep.subr.bf16.mxu0 %v10901_v21 }
 0xbd7   :  { %7112 = vmatpush3.bf16.msra.mxu1 %v7428_v23 }
 0xbd8   :  { %7113 = vmatprep.subr.bf16.mxu1 %v10901_v21  ;;  %v5597_v49 = vpack.c.bf16 %v10647_v1, %v10647_v1 }
 0xbd9   :  { %7096 = vmatpush3.bf16.msra.mxu0 %v7425_v14 }
 0xbda   :  { %7097 = vmatprep.subr.bf16.mxu0 %v10901_v21 }
 0xbdb   :  { %7114 = vmatpush3.bf16.msra.mxu1 %v7430_v41 }
 0xbdc   :  { %7115 = vmatprep.subr.bf16.mxu1 %v10901_v21 }
 0xbdd   :  { %7098 = vmatpush3.bf16.msra.mxu0 %v7427_v37 }
 0xbde   :  { %7099 = vmatprep.subr.bf16.mxu0 %v10901_v21 }
 0xbdf   :  { %7116 = vmatpush3.bf16.msra.mxu1 %v7432_v36 }
 0xbe0   :  { %7117 = vmatprep.subr.bf16.mxu1 %v10901_v21 }
 0xbe1   :  { %7100 = vmatpush3.bf16.msra.mxu0 %v7429_v6 }
 0xbe2   :  { %7101 = vmatprep.subr.bf16.mxu0 %v10901_v21 }
 0xbe3   :  { %7118 = vmatpush3.bf16.msra.mxu1 %v7434_v9 }
 0xbe4   :  { %7119 = vmatprep.subr.bf16.mxu1 %v10901_v21 }
 0xbe5   :  { %7102 = vmatpush3.bf16.msra.mxu0 %v7431_v42 }
 0xbe6   :  { %7127 = vmatprep.subr.bf16.mxu0 %v10901_v21 }
 0xbe7   :  { %7120 = vmatpush3.bf16.msra.mxu1 %v7436_v11 }
 0xbe8   :  { %7104 = vmatmul.mubr.bf16.vlgmr.msra.gmra.mxu0 %v5147_v52  ;;  %7121 = vmatprep.subr.bf16.mxu1 %v10901_v21 }
 0xbe9   :  { %7128 = vmatpush3.bf16.msra.mxu0 %v7433_v29  ;;  %7143 = vmatprep.mubr.msk.bf16.mxu0 %vm7972_vm1, %v10901_v21 }
 0xbea   :  { %7129 = vmatprep.subr.bf16.mxu0 %v10901_v21 }
 0xbeb   :  { %7122 = vmatpush3.bf16.msra.mxu1 %v7438_v22 }
 0xbec   :  { %7147 = vmatprep.subr.bf16.mxu1 %v10901_v21 }
 0xbed   :  { %7130 = vmatpush3.bf16.msra.mxu0 %v7435_v53 }
 0xbee   :  { %7131 = vmatprep.subr.bf16.mxu0 %v10901_v21  ;;  %7124 = vmatmul.mubr.bf16.vlgmr.msra.gmra.mxu1 %v5237_v0 }
 0xbef   :  { %7148 = vmatpush3.bf16.msra.mxu1 %v7440_v45  ;;  %7163 = vmatprep.mubr.msk.bf16.mxu1 %vm7972_vm1, %v10901_v21 }
 0xbf0   :  { %7149 = vmatprep.subr.bf16.mxu1 %v10901_v21 }
 0xbf1   :  { %7132 = vmatpush3.bf16.msra.mxu0 %v7437_v58 }
 0xbf2   :  { %7133 = vmatprep.subr.bf16.mxu0 %v10901_v21 }
 0xbf3   :  { %7150 = vmatpush3.bf16.msra.mxu1 %v7442_v62 }
 0xbf4   :  { %7151 = vmatprep.subr.bf16.mxu1 %v10901_v21 }
 0xbf5   :  { %7134 = vmatpush3.bf16.msra.mxu0 %v7439_v7 }
 0xbf6   :  { %7135 = vmatprep.subr.bf16.mxu0 %v10901_v21 }
 0xbf7   :  { %7152 = vmatpush3.bf16.msra.mxu1 %v7444_v35 }
 0xbf8   :  { %7153 = vmatprep.subr.bf16.mxu1 %v10901_v21 }
 0xbf9   :  { %7136 = vmatpush3.bf16.msra.mxu0 %v7441_v32 }
 0xbfa   :  { %7137 = vmatprep.subr.bf16.mxu0 %v10901_v21 }
 0xbfb   :  { %7154 = vmatpush3.bf16.msra.mxu1 %v7446_v47 }
 0xbfc   :  { %7155 = vmatprep.subr.bf16.mxu1 %v10901_v21 }
 0xbfd   :  { %7138 = vmatpush3.bf16.msra.mxu0 %v7443_v25 }
 0xbfe   :  { %7139 = vmatprep.subr.bf16.mxu0 %v10901_v21 }
 0xbff   :  { %7156 = vmatpush3.bf16.msra.mxu1 %v7448_v33 }
 0xc00   :  { %7157 = vmatprep.subr.bf16.mxu1 %v10901_v21 }
 0xc01   :  { %7140 = vmatpush3.bf16.msra.mxu0 %v7445_v12 }
 0xc02   :  { %7141 = vmatprep.subr.bf16.mxu0 %v10901_v21 }
 0xc03   :  { %7158 = vmatpush3.bf16.msra.mxu1 %v7450_v43 }
 0xc04   :  { %7159 = vmatprep.subr.bf16.mxu1 %v10901_v21 }
 0xc05   :  { %7142 = vmatpush3.bf16.msra.mxu0 %v7447_v56 }
 0xc06   :  { %7167 = vmatprep.subr.bf16.mxu0 %v10901_v21 }
 0xc07   :  { %7160 = vmatpush3.bf16.msra.mxu1 %v7452_v31 }
 0xc08   :  { %7144 = vmatmul.mubr.bf16.vlgmr.msra.gmra.mxu0 %v5327_v18  ;;  %7161 = vmatprep.subr.bf16.mxu1 %v10901_v21 }
 0xc09   :  { %7168 = vmatpush3.bf16.msra.mxu0 %v7449_v30  ;;  %7183 = vmatprep.mubr.msk.bf16.mxu0 %vm7972_vm1, %v10901_v21 }
 0xc0a   :  { %7169 = vmatprep.subr.bf16.mxu0 %v10901_v21 }
 0xc0b   :  { %7162 = vmatpush3.bf16.msra.mxu1 %v7454_v55 }
 0xc0c   :  { %7187 = vmatprep.subr.bf16.mxu1 %v10901_v21 }
 0xc0d   :  { %7170 = vmatpush3.bf16.msra.mxu0 %v7451_v27 }
 0xc0e   :  { %7171 = vmatprep.subr.bf16.mxu0 %v10901_v21  ;;  %7164 = vmatmul.mubr.bf16.vlgmr.msra.gmra.mxu1 %v5417_v44 }
 0xc0f   :  { %7188 = vmatpush3.bf16.msra.mxu1 %v7456_v34  ;;  %7203 = vmatprep.mubr.msk.bf16.mxu1 %vm7972_vm1, %v10901_v21 }
 0xc10   :  { %7189 = vmatprep.subr.bf16.mxu1 %v10901_v21 }
 0xc11   :  { %7172 = vmatpush3.bf16.msra.mxu0 %v7453_v4 }
 0xc12   :  { %7173 = vmatprep.subr.bf16.mxu0 %v10901_v21 }
 0xc13   :  { %7190 = vmatpush3.bf16.msra.mxu1 %v7458_v50 }
 0xc14   :  { %7191 = vmatprep.subr.bf16.mxu1 %v10901_v21 }
 0xc15   :  { %7174 = vmatpush3.bf16.msra.mxu0 %v7455_v63 }
 0xc16   :  { %7175 = vmatprep.subr.bf16.mxu0 %v10901_v21 }
 0xc17   :  { %7192 = vmatpush3.bf16.msra.mxu1 %v7460_v39 }
 0xc18   :  { %7193 = vmatprep.subr.bf16.mxu1 %v10901_v21 }
 0xc19   :  { %7176 = vmatpush3.bf16.msra.mxu0 %v7457_v24 }
 0xc1a   :  { %7177 = vmatprep.subr.bf16.mxu0 %v10901_v21 }
 0xc1b   :  { %7194 = vmatpush3.bf16.msra.mxu1 %v7462_v28 }
 0xc1c   :  { %7195 = vmatprep.subr.bf16.mxu1 %v10901_v21 }
 0xc1d   :  { %7178 = vmatpush3.bf16.msra.mxu0 %v7459_v61 }
 0xc1e   :  { %7179 = vmatprep.subr.bf16.mxu0 %v10901_v21 }
 0xc1f   :  { %7196 = vmatpush3.bf16.msra.mxu1 %v7464_v26 }
 0xc20   :  { %7197 = vmatprep.subr.bf16.mxu1 %v10901_v21 }
 0xc21   :  { %7180 = vmatpush3.bf16.msra.mxu0 %v7461_v38 }
 0xc22   :  { %7181 = vmatprep.subr.bf16.mxu0 %v10901_v21 }
 0xc23   :  { %7198 = vmatpush3.bf16.msra.mxu1 %v7465_v60 }
 0xc24   :  { %7199 = vmatprep.subr.bf16.mxu1 %v10901_v21 }
 0xc25   :  { %7182 = vmatpush3.bf16.msra.mxu0 %v7463_v40 }
 0xc27   :  { %7200 = vmatpush3.bf16.msra.mxu1 %v7466_v13 }
 0xc28   :  { %7184 = vmatmul.mubr.bf16.vlgmr.msra.gmra.mxu0 %v5507_v15  ;;  %7201 = vmatprep.subr.bf16.mxu1 %v10901_v21 }
 0xc2b   :  { %7202 = vmatpush3.bf16.msra.mxu1 %v7467_v51 }
 0xc2e   :  { %7204 = vmatmul.mubr.bf16.vlgmr.msra.gmra.mxu1 %v5597_v49 }
 0xc69   :  { %v4963_v5 = vpop.f32.mrf.mxu1 }
 0xc6b   :  { %v7045_v19 = vpop.f32.mrf.mxu1 }
 0xc6d   :  { %v4966_v46 = vpop.f32.mrf.mxu1 }
 0xc6f   :  { %v7046_v3 = vpop.f32.mrf.mxu1 }
 0xc88   :  { %v5051_v10 = vpop.f32.mrf.mxu0 }
 0xc89   :  { %v5052_v17 = vadd.f32 %v5051_v10, %v4963_v5 }
 0xc8a   :  { %v7065_v54 = vpop.f32.mrf.mxu0 }
 0xc8c   :  { %v5054_v16 = vpop.f32.mrf.mxu0 }
 0xc8e   :  { %v7066_v48 = vpop.f32.mrf.mxu0  ;;  %v5140_v57 = vpop.f32.mrf.mxu1 }
 0xc8f   :  { %v5146_v2 = vadd.f32 %v5140_v57, %v5052_v17 }
 0xc90   :  { %v7085_v59 = vpop.f32.mrf.mxu1 }
 0xc92   :  { %v5143_v20 = vpop.f32.mrf.mxu1 }
 0xc94   :  { %v7086_v8 = vpop.f32.mrf.mxu1 }
 0xca8   :  { %v5230_v21 = vpop.f32.mrf.mxu0 }
 0xca9   :  { %v5236_v45 = vadd.f32 %v5230_v21, %v5146_v2 }
 0xcaa   :  { %v7105_v14 = vpop.f32.mrf.mxu0 }
 0xcac   :  { %v5233_v23 = vpop.f32.mrf.mxu0 }
 0xcae   :  { %v7106_v37 = vpop.f32.mrf.mxu0  ;;  %v5320_v1 = vpop.f32.mrf.mxu1 }
 0xcaf   :  { %v5326_v7 = vadd.f32 %v5320_v1, %v5236_v45 }
 0xcb0   :  { %v7125_v41 = vpop.f32.mrf.mxu1 }
 0xcb2   :  { %v5323_v6 = vpop.f32.mrf.mxu1 }
 0xcb4   :  { %v7126_v36 = vpop.f32.mrf.mxu1 }
 0xcc8   :  { %v5410_v42 = vpop.f32.mrf.mxu0 }
 0xcc9   :  { %v5416_v32 = vadd.f32 %v5410_v42, %v5326_v7 }
 0xcca   :  { %v7145_v9 = vpop.f32.mrf.mxu0 }
 0xccc   :  { %v5413_v29 = vpop.f32.mrf.mxu0 }
 0xcce   :  { %v7146_v11 = vpop.f32.mrf.mxu0  ;;  %v5500_v52 = vpop.f32.mrf.mxu1 }
 0xccf   :  { %v5506_v25 = vadd.f32 %v5500_v52, %v5416_v32 }
 0xcd0   :  { %v7165_v53 = vpop.f32.mrf.mxu1 }
 0xcd2   :  { %v5503_v22 = vpop.f32.mrf.mxu1 }
 0xcd4   :  { %v7166_v58 = vpop.f32.mrf.mxu1 }
 0xce8   :  { %v5590_v0 = vpop.f32.mrf.mxu0 }
 0xce9   :  { %v5596_v12 = vadd.f32 %v5590_v0, %v5506_v25 }
 0xcea   :  { %v7185_v62 = vpop.f32.mrf.mxu0 }
 0xcec   :  { %v5593_v35 = vpop.f32.mrf.mxu0 }
 0xcee   :  { %v7186_v47 = vpop.f32.mrf.mxu0  ;;  %v5680_v33 = vpop.f32.mrf.mxu1 }
 0xcef   :  { %v5686_v56 = vadd.f32 %v5680_v33, %v5596_v12 }
 0xcf0   :  { %v7205_v43 = vpop.f32.mrf.mxu1 }
 0xcf1   :  { %v5973_v30 = vmul.f32 -1.442695, %v5686_v56 }
 0xcf2   :  { %v5683_v31 = vpop.f32.mrf.mxu1 }
 0xcf3   :  { %7636 = vpow2.f32 %v5973_v30 }
 0xcf4   :  { %v7206_v18 = vpop.f32.mrf.mxu1 }
 0xd00   :  { %v7637_v27 = vpop.eup %7636 }
 0xd01   :  { %v5690_v55 = vadd.f32 1.0, %v7637_v27 }
 0xd03   :  { %7638 = vrcp.f32 %v5690_v55 }
 0xd10   :  { %v7639_v4 = vpop.eup %7638 }
 0xd11   :  { %5693 = vst [vmem:[#allocation14] sm:$0xff] %v7639_v4 }
 0xd12   :  { %7939 = shalt.err (!%p7936_p6)
}
 0xd13   :  { %5703 = dma.vmem_to_hbm [thread:$0]  %s5701_s5, 128, %s10720_s6, [#allocation5]  }
 0xd14   :  { %7956 = dma.done.wait [#allocation5], 128  }
 0xd15   :  { %7957 = vsyncadd [#allocation5], 4294967168 }
 0xd16   :  { %5707 = vsyncpa [#allocation4], 1 }
 0xd17   :  { %5708 = vsyncpa [#allocation7], 1 }
 0xd18   :  { %5709 = vsyncpa [#allocation10], 1 }
 0xd19   :  { %5710 = vsyncpa [#allocation13], 1 }
 0xd1a   :  { %5711 = vsyncpa [#allocation5], 1 }

</bundles_post_ra>
